<compile_context>
chip_gen: v7x
topology: tpu7x:2x2x1
jax: 0.10.0
libtpu: 0.0.40
codegen_flags: <defaults>
</compile_context>

<pallas_src>
import functools

import jax
import jax.numpy as jnp
from jax import lax
from jax.experimental import pallas as pl
from jax.experimental.pallas import tpu as pltpu

BLOCK_SIZE = 256                      # positional-embedding table size
EMBED_SIZE = 384                      # C
NUM_HEADS = 6
NUM_LAYERS = 6
HEAD_SIZE = EMBED_SIZE // NUM_HEADS   # 64
VOCAB_SIZE = 65                       # tinyshakespeare char vocab (hardcoded; no network)
VOCAB_PAD = 128                       # lane-dense lm_head output width
LN_EPS = 1e-5
MXU_DTYPE = jnp.bfloat16              # MXU input dtype; accumulation is always f32
NEG_INF = -1e30                       # large finite negative (safe causal mask fill)


# ---------------------------------------------------------------------------
# Shared math helpers (pure jnp/lax: used inside the Pallas kernel AND in the
# pure-JAX reference, so the only numerical delta is the approx reciprocal and
# Mosaic-vs-XLA codegen).
# ---------------------------------------------------------------------------
def _mxu_matmul(a, b):
    """bf16-input MXU matmul with f32 accumulation. a: (M, K), b: (K, N)."""
    return lax.dot_general(
        a.astype(MXU_DTYPE), b.astype(MXU_DTYPE),
        dimension_numbers=(((a.ndim - 1,), (0,)), ((), ())),
        preferred_element_type=jnp.float32)


def _layernorm(x, gamma, beta):
    mu = jnp.mean(x, axis=-1, keepdims=True)
    var = jnp.mean(jnp.square(x - mu), axis=-1, keepdims=True)
    return (x - mu) * lax.rsqrt(var + LN_EPS) * gamma + beta


def _causal_attention(xn, w_qkv, w_proj, B, T, recip):
    """xn: (B*T, C) normed activations.  w_qkv: (C, 3C) with columns [Q | K | V],
    head h at [h*HS, (h+1)*HS) of each third; 1/sqrt(C) already folded into Q cols.
    Returns the projected attention output (B*T, C) WITHOUT the projection bias."""
    C = EMBED_SIZE
    qkv = _mxu_matmul(xn, w_qkv)                               # (B*T, 3C) f32
    row = lax.broadcasted_iota(jnp.int32, (T, T), 0)
    col = lax.broadcasted_iota(jnp.int32, (T, T), 1)
    causal = col <= row
    out_rows = []
    for b in range(B):                                         # only softmax loops over B
        r0 = b * T
        q_b = qkv[r0:r0 + T, 0:C]
        k_b = qkv[r0:r0 + T, C:2 * C]
        v_b = qkv[r0:r0 + T, 2 * C:3 * C]
        acc = jnp.zeros((T, C), jnp.float32)
        # TODO(synk): tile query rows (128-row blocks) to bound (T,T) f32 score live
        # ranges / vreg pressure at T=BLOCK_SIZE; unnecessary at the demo sizes.
        for h in range(NUM_HEADS):
            lo, hi = h * HEAD_SIZE, (h + 1) * HEAD_SIZE
            # scores = q @ k^T via contraction of the last axes (no explicit transpose).
            s = lax.dot_general(q_b[:, lo:hi].astype(MXU_DTYPE),
                                k_b[:, lo:hi].astype(MXU_DTYPE),
                                dimension_numbers=(((1,), (1,)), ((), ())),
                                preferred_element_type=jnp.float32)    # (T, T)
            s = jnp.where(causal, s, NEG_INF)
            m = jnp.max(s, axis=-1, keepdims=True)
            p = jnp.exp(s - m)
            wei = p * recip(jnp.sum(p, axis=-1, keepdims=True))
            # Dropout(0.2) on wei: eval mode -> identity.
            y_h = _mxu_matmul(wei, v_b[:, lo:hi])                      # (T, HS)
            # Fold the output projection per head: sum of lane-dense (T, C) tiles
            # instead of a 6-way 64-lane concat + one (C,C) matmul (same FLOPs).
            acc = acc + _mxu_matmul(y_h, w_proj[lo:hi, :])             # (T, C)
        out_rows.append(acc)
    return jnp.concatenate(out_rows, axis=0) if B > 1 else out_rows[0]


def _feed_forward(xn, w1, b1, w2, b2):
    h = jnp.maximum(_mxu_matmul(xn, w1) + b1, 0.0)             # Linear(C,4C) + ReLU
    return _mxu_matmul(h, w2) + b2                             # Linear(4C,C); Dropout = identity


# ---------------------------------------------------------------------------
# The fused kernel: one grid step per transformer layer, residual in VMEM scratch.
# ---------------------------------------------------------------------------
def _gpt_fused_kernel(B, T,
                      x_ref,
                      ln1_g_ref, ln1_b_ref, w_qkv_ref, w_proj_ref, b_proj_ref,
                      ln2_g_ref, ln2_b_ref, w_ff1_ref, b_ff1_ref, w_ff2_ref, b_ff2_ref,
                      lnf_g_ref, lnf_b_ref, w_f1_ref, b_f1_ref, w_f2_ref, b_f2_ref,
                      wlm_ref, blm_ref,
                      o_ref, resid_ref):
    l = pl.program_id(0)

    @pl.when(l == 0)
    def _():
        resid_ref[...] = x_ref[...]                            # load embeddings once

    x = resid_ref[...]                                         # (B*T, C) f32 residual

    # --- x = x + Proj(MHA(LN1(x))) ---
    xn1 = _layernorm(x, ln1_g_ref[...], ln1_b_ref[...])
    attn = _causal_attention(xn1, w_qkv_ref[...], w_proj_ref[...], B, T,
                             lambda s: pl.reciprocal(s, approx=True))
    x = x + attn + b_proj_ref[...]

    # --- x = x + FFN(LN2(x)) ---
    xn2 = _layernorm(x, ln2_g_ref[...], ln2_b_ref[...])
    x = x + _feed_forward(xn2, w_ff1_ref[...], b_ff1_ref[...],
                          w_ff2_ref[...], b_ff2_ref[...])

    resid_ref[...] = x                                         # carry to next layer step

    # --- final LN_f -> GPTModel.ffwd -> lm_head, fused into the last layer step ---
    @pl.when(l == pl.num_programs(0) - 1)
    def _():
        xf = _layernorm(x, lnf_g_ref[...], lnf_b_ref[...])
        y = _feed_forward(xf, w_f1_ref[...], b_f1_ref[...],
                          w_f2_ref[...], b_f2_ref[...])
        o_ref[...] = (_mxu_matmul(y, wlm_ref[...]) + blm_ref[...]).astype(o_ref.dtype)


# ---------------------------------------------------------------------------
# pallas_call wrapper
# ---------------------------------------------------------------------------
def fused_transformer(x2d, params, B, T):
    BT, C = x2d.shape

    def layer_spec(arr):
        # Stacked (L, ...) per-layer weight: stream layer l, trailing dims whole.
        ndim = arr.ndim
        return pl.BlockSpec((None,) + arr.shape[1:],
                            lambda l, _n=ndim: (l,) + (0,) * (_n - 1))

    def resident_spec(arr):
        zeros = (0,) * arr.ndim
        return pl.BlockSpec(arr.shape, lambda l, _z=zeros: _z)  # constant -> loaded once

    layer_args = (params["ln1_g"], params["ln1_b"], params["w_qkv"],
                  params["w_proj"], params["b_proj"],
                  params["ln2_g"], params["ln2_b"],
                  params["w_ff1"], params["b_ff1"], params["w_ff2"], params["b_ff2"])
    head_args = (params["lnf_g"], params["lnf_b"], params["w_f1"], params["b_f1"],
                 params["w_f2"], params["b_f2"], params["w_lm"], params["b_lm"])

    kernel = functools.partial(_gpt_fused_kernel, B, T)

    return pl.pallas_call(
        kernel,
        out_shape=jax.ShapeDtypeStruct((BT, VOCAB_PAD), jnp.float32),
        grid_spec=pltpu.PrefetchScalarGridSpec(
            num_scalar_prefetch=0,
            grid=(NUM_LAYERS,),
            in_specs=[resident_spec(x2d)] +
                     [layer_spec(a) for a in layer_args] +
                     [resident_spec(a) for a in head_args],
            out_specs=pl.BlockSpec((BT, VOCAB_PAD), lambda l: (0, 0)),
            scratch_shapes=[pltpu.VMEM((BT, C), jnp.float32)],   # residual stream
        ),
        compiler_params=pltpu.CompilerParams(
            dimension_semantics=("arbitrary",),   # layer axis carries the residual
            vmem_limit_bytes=48 * 1024 * 1024,    # safe on v5e/v6e/v7x; streamed weights ~7 MiB
        ),
    )(x2d, *layer_args, *head_args)


def gpt_forward(params, tokens):
    """tokens: (B, T) int32 -> logits (B, T, VOCAB_SIZE) f32 (loss path not computed)."""
    B, T = tokens.shape
    # TODO(synk): embedding row-gather is data-dependent; done with plain JAX indexing
    # here (a Pallas scalar-prefetch DMA gather would also work).
    x = params["tok_emb"][tokens] + params["pos_emb"][:T][None, :, :]
    x2d = x.reshape(B * T, EMBED_SIZE)
    logits2d = fused_transformer(x2d, params, B, T)
    return logits2d.reshape(B, T, VOCAB_PAD)[:, :, :VOCAB_SIZE]


# ---------------------------------------------------------------------------
# Deterministic parameter init (nn.Linear-style U(+-1/sqrt(fan_in)), stored as
# x @ W i.e. (in, out)); per-layer tensors stacked along a leading L axis; big
# matmul weights stored bf16 for the MXU.
# ---------------------------------------------------------------------------
def _uniform(key, shape, fan_in):
    bound = 1.0 / (fan_in ** 0.5)
    return jax.random.uniform(key, shape, jnp.float32, -bound, bound)


def init_params(key):
    C, L = EMBED_SIZE, NUM_LAYERS
    kit = iter(jax.random.split(key, 64))
    nk = lambda: next(kit)

    # fused QKV: cols [0:C]=Q, [C:2C]=K, [2C:3C]=V; head h at [h*HS,(h+1)*HS).
    # PyTorch Head scales scores by 1/sqrt(C of x.shape) = 1/sqrt(EMBED_SIZE);
    # fold that scale into the Q columns here (zero in-kernel multiplies).
    scale = 1.0 / (C ** 0.5)
    w_qkv = _uniform(nk(), (L, C, 3 * C), C)
    w_qkv = w_qkv.at[:, :, :C].multiply(scale)

    params = {
        "tok_emb": jax.random.normal(nk(), (VOCAB_SIZE, C), jnp.float32),
        "pos_emb": jax.random.normal(nk(), (BLOCK_SIZE, C), jnp.float32),
        "ln1_g": jnp.ones((L, 1, C), jnp.float32),
        "ln1_b": jnp.zeros((L, 1, C), jnp.float32),
        "w_qkv": w_qkv.astype(MXU_DTYPE),
        "w_proj": _uniform(nk(), (L, C, C), C).astype(MXU_DTYPE),
        "b_proj": _uniform(nk(), (L, 1, C), C),
        "ln2_g": jnp.ones((L, 1, C), jnp.float32),
        "ln2_b": jnp.zeros((L, 1, C), jnp.float32),
        "w_ff1": _uniform(nk(), (L, C, 4 * C), C).astype(MXU_DTYPE),
        "b_ff1": _uniform(nk(), (L, 1, 4 * C), C),
        "w_ff2": _uniform(nk(), (L, 4 * C, C), 4 * C).astype(MXU_DTYPE),
        "b_ff2": _uniform(nk(), (L, 1, C), 4 * C),
        "lnf_g": jnp.ones((1, C), jnp.float32),
        "lnf_b": jnp.zeros((1, C), jnp.float32),
        "w_f1": _uniform(nk(), (C, 4 * C), C).astype(MXU_DTYPE),
        "b_f1": _uniform(nk(), (1, 4 * C), C),
        "w_f2": _uniform(nk(), (4 * C, C), 4 * C).astype(MXU_DTYPE),
        "b_f2": _uniform(nk(), (1, C), 4 * C),
    }
    w_lm = _uniform(nk(), (C, VOCAB_SIZE), C)
    b_lm = _uniform(nk(), (1, VOCAB_SIZE), C)
    pad = VOCAB_PAD - VOCAB_SIZE
    params["w_lm"] = jnp.pad(w_lm, ((0, 0), (0, pad))).astype(MXU_DTYPE)
    params["b_lm"] = jnp.pad(b_lm, ((0, 0), (0, pad)))
    return params


# ---------------------------------------------------------------------------
# Pure-JAX reference (same shared math, exact reciprocal) for correctness check
# ---------------------------------------------------------------------------
def gpt_forward_reference(params, tokens):
    B, T = tokens.shape
    C = EMBED_SIZE
    x = params["tok_emb"][tokens] + params["pos_emb"][:T][None, :, :]
    x2d = x.reshape(B * T, C)
    recip = lambda s: 1.0 / s
    for l in range(NUM_LAYERS):
        xn1 = _layernorm(x2d, params["ln1_g"][l], params["ln1_b"][l])
        attn = _causal_attention(xn1, params["w_qkv"][l], params["w_proj"][l], B, T, recip)
        x2d = x2d + attn + params["b_proj"][l]
        xn2 = _layernorm(x2d, params["ln2_g"][l], params["ln2_b"][l])
        x2d = x2d + _feed_forward(xn2, params["w_ff1"][l], params["b_ff1"][l],
                                  params["w_ff2"][l], params["b_ff2"][l])
    xf = _layernorm(x2d, params["lnf_g"], params["lnf_b"])
    y = _feed_forward(xf, params["w_f1"], params["b_f1"], params["w_f2"], params["b_f2"])
    logits2d = _mxu_matmul(y, params["w_lm"]) + params["b_lm"]
    return logits2d.reshape(B, T, VOCAB_PAD)[:, :, :VOCAB_SIZE]


if __name__ == "__main__":
    B, T = 2, 8                                   # small shapes; T <= BLOCK_SIZE
    key = jax.random.PRNGKey(0)
    k_params, k_tokens = jax.random.split(key)
    params = init_params(k_params)
    tokens = jax.random.randint(k_tokens, (B, T), 0, VOCAB_SIZE, dtype=jnp.int32)

    logits = jax.jit(gpt_forward)(params, tokens)
    jax.block_until_ready(logits)
    assert logits.shape == (B, T, VOCAB_SIZE)
    assert bool(jnp.all(jnp.isfinite(logits)))

    ref = gpt_forward_reference(params, tokens)
    err = float(jnp.max(jnp.abs(logits - ref)))
    assert err < 3e-2, f"mismatch vs pure-JAX reference: max abs err = {err}"

    print("KERNEL_OK")
</pallas_src>

<mosaic_0001>
module attributes {stable_mosaic.version = 11 : i64} {
  func.func @_gpt_fused_kernel(%arg0: i32, %arg1: memref<16x384xf32, #tpu.memory_space<vmem>>, %arg2: memref<1x1x384xf32, #tpu.memory_space<vmem>>, %arg3: memref<1x1x384xf32, #tpu.memory_space<vmem>>, %arg4: memref<1x384x1152xbf16, #tpu.memory_space<vmem>>, %arg5: memref<1x384x384xbf16, #tpu.memory_space<vmem>>, %arg6: memref<1x1x384xf32, #tpu.memory_space<vmem>>, %arg7: memref<1x1x384xf32, #tpu.memory_space<vmem>>, %arg8: memref<1x1x384xf32, #tpu.memory_space<vmem>>, %arg9: memref<1x384x1536xbf16, #tpu.memory_space<vmem>>, %arg10: memref<1x1x1536xf32, #tpu.memory_space<vmem>>, %arg11: memref<1x1536x384xbf16, #tpu.memory_space<vmem>>, %arg12: memref<1x1x384xf32, #tpu.memory_space<vmem>>, %arg13: memref<1x384xf32, #tpu.memory_space<vmem>>, %arg14: memref<1x384xf32, #tpu.memory_space<vmem>>, %arg15: memref<384x1536xbf16, #tpu.memory_space<vmem>>, %arg16: memref<1x1536xf32, #tpu.memory_space<vmem>>, %arg17: memref<1536x384xbf16, #tpu.memory_space<vmem>>, %arg18: memref<1x384xf32, #tpu.memory_space<vmem>>, %arg19: memref<384x128xbf16, #tpu.memory_space<vmem>>, %arg20: memref<1x128xf32, #tpu.memory_space<vmem>>, %arg21: memref<16x128xf32, #tpu.memory_space<vmem>>, %arg22: memref<16x384xf32, #tpu.memory_space<vmem>>) attributes {dimension_semantics = [#tpu.dimension_semantics<arbitrary>], iteration_bounds = array<i64: 6>, scalar_prefetch = 0 : i64, scratch_operands = 1 : i64, tpu.core_type = #tpu.core_type<tc>, window_params = [{pipeline_mode = #tpu.pipeline_mode<synchronous>, transform_indices = @transform_0, window_bounds = array<i64: 16, 384>}, {transform_indices = @transform_1, window_bounds = array<i64: 1, 1, 384>}, {transform_indices = @transform_2, window_bounds = array<i64: 1, 1, 384>}, {transform_indices = @transform_3, window_bounds = array<i64: 1, 384, 1152>}, {transform_indices = @transform_4, window_bounds = array<i64: 1, 384, 384>}, {transform_indices = @transform_5, window_bounds = array<i64: 1, 1, 384>}, {transform_indices = @transform_6, window_bounds = array<i64: 1, 1, 384>}, {transform_indices = @transform_7, window_bounds = array<i64: 1, 1, 384>}, {transform_indices = @transform_8, window_bounds = array<i64: 1, 384, 1536>}, {transform_indices = @transform_9, window_bounds = array<i64: 1, 1, 1536>}, {transform_indices = @transform_10, window_bounds = array<i64: 1, 1536, 384>}, {transform_indices = @transform_11, window_bounds = array<i64: 1, 1, 384>}, {pipeline_mode = #tpu.pipeline_mode<synchronous>, transform_indices = @transform_12, window_bounds = array<i64: 1, 384>}, {pipeline_mode = #tpu.pipeline_mode<synchronous>, transform_indices = @transform_13, window_bounds = array<i64: 1, 384>}, {pipeline_mode = #tpu.pipeline_mode<synchronous>, transform_indices = @transform_14, window_bounds = array<i64: 384, 1536>}, {pipeline_mode = #tpu.pipeline_mode<synchronous>, transform_indices = @transform_15, window_bounds = array<i64: 1, 1536>}, {pipeline_mode = #tpu.pipeline_mode<synchronous>, transform_indices = @transform_16, window_bounds = array<i64: 1536, 384>}, {pipeline_mode = #tpu.pipeline_mode<synchronous>, transform_indices = @transform_17, window_bounds = array<i64: 1, 384>}, {pipeline_mode = #tpu.pipeline_mode<synchronous>, transform_indices = @transform_18, window_bounds = array<i64: 384, 128>}, {pipeline_mode = #tpu.pipeline_mode<synchronous>, transform_indices = @transform_19, window_bounds = array<i64: 1, 128>}, {pipeline_mode = #tpu.pipeline_mode<synchronous>, transform_indices = @transform_20, window_bounds = array<i64: 16, 128>}]} {
    %c0_i32 = arith.constant 0 : i32
    %0 = arith.cmpi eq, %arg0, %c0_i32 : i32
    %1 = arith.extui %0 : i1 to i32
    %c0_i32_0 = arith.constant 0 : i32
    %2 = arith.cmpi ne, %1, %c0_i32_0 : i32
    scf.if %2 {
      %c0_125 = arith.constant 0 : index
      %c0_126 = arith.constant 0 : index
      %402 = vector.load %arg1[%c0_125, %c0_126] : memref<16x384xf32, #tpu.memory_space<vmem>>, vector<16x384xf32>
      %c0_127 = arith.constant 0 : index
      %c0_128 = arith.constant 0 : index
      %403 = vector.load %arg22[%c0_127, %c0_128] : memref<16x384xf32, #tpu.memory_space<vmem>>, vector<16x384xf32>
      tpu.vector_store %arg22[%c0_127, %c0_128], %402 {strides = array<i32>} : memref<16x384xf32, #tpu.memory_space<vmem>>, vector<16x384xf32>,
    } else {
    }
    %c0 = arith.constant 0 : index
    %c0_1 = arith.constant 0 : index
    %3 = vector.load %arg22[%c0, %c0_1] : memref<16x384xf32, #tpu.memory_space<vmem>>, vector<16x384xf32>
    %c0_2 = arith.constant 0 : index
    %c0_3 = arith.constant 0 : index
    %c0_4 = arith.constant 0 : index
    %4 = vector.load %arg2[%c0_2, %c0_3, %c0_4] : memref<1x1x384xf32, #tpu.memory_space<vmem>>, vector<1x1x384xf32>
    %5 = vector.shape_cast %4 : vector<1x1x384xf32> to vector<1x384xf32>
    %c0_5 = arith.constant 0 : index
    %c0_6 = arith.constant 0 : index
    %c0_7 = arith.constant 0 : index
    %6 = vector.load %arg3[%c0_5, %c0_6, %c0_7] : memref<1x1x384xf32, #tpu.memory_space<vmem>>, vector<1x1x384xf32>
    %7 = vector.shape_cast %6 : vector<1x1x384xf32> to vector<1x384xf32>
    %cst = arith.constant dense<0.000000e+00> : vector<16xf32>
    %8 = vector.multi_reduction <add>, %3, %cst [1] : vector<16x384xf32> to vector<16xf32>
    %9 = vector.shape_cast %8 : vector<16xf32> to vector<16x1xf32>
    %cst_8 = arith.constant 3.840000e+02 : f32
    %10 = vector.broadcast %cst_8 : f32 to vector<16x1xf32>
    %11 = arith.divf %9, %10 : vector<16x1xf32>
    %12 = vector.broadcast %11 : vector<16x1xf32> to vector<16x384xf32>
    %13 = arith.subf %3, %12 : vector<16x384xf32>
    %14 = arith.mulf %13, %13 : vector<16x384xf32>
    %cst_9 = arith.constant dense<0.000000e+00> : vector<16xf32>
    %15 = vector.multi_reduction <add>, %14, %cst_9 [1] : vector<16x384xf32> to vector<16xf32>
    %16 = vector.shape_cast %15 : vector<16xf32> to vector<16x1xf32>
    %cst_10 = arith.constant 3.840000e+02 : f32
    %17 = vector.broadcast %cst_10 : f32 to vector<16x1xf32>
    %18 = arith.divf %16, %17 : vector<16x1xf32>
    %19 = vector.broadcast %11 : vector<16x1xf32> to vector<16x384xf32>
    %20 = arith.subf %3, %19 : vector<16x384xf32>
    %cst_11 = arith.constant 9.99999974E-6 : f32
    %21 = vector.broadcast %cst_11 : f32 to vector<16x1xf32>
    %22 = arith.addf %18, %21 : vector<16x1xf32>
    %23 = math.rsqrt %22 : vector<16x1xf32>
    %24 = vector.broadcast %23 : vector<16x1xf32> to vector<16x384xf32>
    %25 = arith.mulf %20, %24 : vector<16x384xf32>
    %26 = vector.broadcast %5 : vector<1x384xf32> to vector<16x384xf32>
    %27 = arith.mulf %25, %26 : vector<16x384xf32>
    %28 = vector.broadcast %7 : vector<1x384xf32> to vector<16x384xf32>
    %29 = arith.addf %27, %28 : vector<16x384xf32>
    %c0_12 = arith.constant 0 : index
    %c0_13 = arith.constant 0 : index
    %c0_14 = arith.constant 0 : index
    %30 = vector.load %arg4[%c0_12, %c0_13, %c0_14] : memref<1x384x1152xbf16, #tpu.memory_space<vmem>>, vector<1x384x1152xbf16>
    %31 = vector.shape_cast %30 : vector<1x384x1152xbf16> to vector<384x1152xbf16>
    %c0_15 = arith.constant 0 : index
    %c0_16 = arith.constant 0 : index
    %c0_17 = arith.constant 0 : index
    %32 = vector.load %arg5[%c0_15, %c0_16, %c0_17] : memref<1x384x384xbf16, #tpu.memory_space<vmem>>, vector<1x384x384xbf16>
    %33 = vector.shape_cast %32 : vector<1x384x384xbf16> to vector<384x384xbf16>
    %34 = arith.truncf %29 : vector<16x384xf32> to vector<16x384xbf16>
    %cst_18 = arith.constant dense<0.000000e+00> : vector<16x1152xf32>
    %35 = tpu.matmul %34, %31, %cst_18 {dimension_numbers = #tpu.dot_dimension_numbers<[1], [0], [0], [1], [0, 0, 1, 1], [], []>} : vector<16x384xbf16>, vector<384x1152xbf16>, vector<16x1152xf32> -> vector<16x1152xf32>
    %36 = tpu.iota {dimensions = array<i32: 0>} : vector<8x8xi32>
    %37 = tpu.iota {dimensions = array<i32: 1>} : vector<8x8xi32>
    %38 = arith.cmpi sle, %37, %36 : vector<8x8xi32>
    %39 = vector.extract_strided_slice %35 {offsets = [0, 0], sizes = [8, 384], strides = [1, 1]} : vector<16x1152xf32> to vector<8x384xf32>
    %40 = vector.extract_strided_slice %35 {offsets = [0, 384], sizes = [8, 384], strides = [1, 1]} : vector<16x1152xf32> to vector<8x384xf32>
    %41 = vector.extract_strided_slice %35 {offsets = [0, 768], sizes = [8, 384], strides = [1, 1]} : vector<16x1152xf32> to vector<8x384xf32>
    %cst_19 = arith.constant 0.000000e+00 : f32
    %42 = vector.broadcast %cst_19 : f32 to vector<8x384xf32>
    %43 = vector.extract_strided_slice %39 {offsets = [0, 0], sizes = [8, 64], strides = [1, 1]} : vector<8x384xf32> to vector<8x64xf32>
    %44 = arith.truncf %43 : vector<8x64xf32> to vector<8x64xbf16>
    %45 = vector.extract_strided_slice %40 {offsets = [0, 0], sizes = [8, 64], strides = [1, 1]} : vector<8x384xf32> to vector<8x64xf32>
    %46 = arith.truncf %45 : vector<8x64xf32> to vector<8x64xbf16>
    %cst_20 = arith.constant dense<0.000000e+00> : vector<8x8xf32>
    %47 = tpu.matmul %44, %46, %cst_20 {dimension_numbers = #tpu.dot_dimension_numbers<[1], [1], [0], [0], [0, 0, 1, 0], [], []>} : vector<8x64xbf16>, vector<8x64xbf16>, vector<8x8xf32> -> vector<8x8xf32>
    %cst_21 = arith.constant -1.000000e+30 : f32
    %48 = vector.broadcast %cst_21 : f32 to vector<8x8xf32>
    %49 = arith.select %38, %47, %48 : vector<8x8xi1>, vector<8x8xf32>
    %cst_22 = arith.constant dense<0xFF800000> : vector<8xf32>
    %50 = vector.multi_reduction <maximumf>, %49, %cst_22 [1] : vector<8x8xf32> to vector<8xf32>
    %51 = vector.shape_cast %50 : vector<8xf32> to vector<8x1xf32>
    %52 = vector.broadcast %51 : vector<8x1xf32> to vector<8x8xf32>
    %53 = arith.subf %49, %52 : vector<8x8xf32>
    %54 = math.exp %53 : vector<8x8xf32>
    %cst_23 = arith.constant dense<0.000000e+00> : vector<8xf32>
    %55 = vector.multi_reduction <add>, %54, %cst_23 [1] : vector<8x8xf32> to vector<8xf32>
    %56 = vector.shape_cast %55 : vector<8xf32> to vector<8x1xf32>
    %57 = tpu.reciprocal %56 {approx = true} : vector<8x1xf32> -> vector<8x1xf32>
    %58 = vector.broadcast %57 : vector<8x1xf32> to vector<8x8xf32>
    %59 = arith.mulf %54, %58 : vector<8x8xf32>
    %60 = vector.extract_strided_slice %41 {offsets = [0, 0], sizes = [8, 64], strides = [1, 1]} : vector<8x384xf32> to vector<8x64xf32>
    %61 = arith.truncf %59 : vector<8x8xf32> to vector<8x8xbf16>
    %62 = arith.truncf %60 : vector<8x64xf32> to vector<8x64xbf16>
    %cst_24 = arith.constant dense<0.000000e+00> : vector<8x64xf32>
    %63 = tpu.matmul %61, %62, %cst_24 {dimension_numbers = #tpu.dot_dimension_numbers<[1], [0], [0], [1], [0, 0, 1, 1], [], []>} : vector<8x8xbf16>, vector<8x64xbf16>, vector<8x64xf32> -> vector<8x64xf32>
    %64 = vector.extract_strided_slice %33 {offsets = [0, 0], sizes = [64, 384], strides = [1, 1]} : vector<384x384xbf16> to vector<64x384xbf16>
    %65 = arith.truncf %63 : vector<8x64xf32> to vector<8x64xbf16>
    %cst_25 = arith.constant dense<0.000000e+00> : vector<8x384xf32>
    %66 = tpu.matmul %65, %64, %cst_25 {dimension_numbers = #tpu.dot_dimension_numbers<[1], [0], [0], [1], [0, 0, 1, 1], [], []>} : vector<8x64xbf16>, vector<64x384xbf16>, vector<8x384xf32> -> vector<8x384xf32>
    %67 = arith.addf %42, %66 : vector<8x384xf32>
    %68 = vector.extract_strided_slice %39 {offsets = [0, 64], sizes = [8, 64], strides = [1, 1]} : vector<8x384xf32> to vector<8x64xf32>
    %69 = arith.truncf %68 : vector<8x64xf32> to vector<8x64xbf16>
    %70 = vector.extract_strided_slice %40 {offsets = [0, 64], sizes = [8, 64], strides = [1, 1]} : vector<8x384xf32> to vector<8x64xf32>
    %71 = arith.truncf %70 : vector<8x64xf32> to vector<8x64xbf16>
    %cst_26 = arith.constant dense<0.000000e+00> : vector<8x8xf32>
    %72 = tpu.matmul %69, %71, %cst_26 {dimension_numbers = #tpu.dot_dimension_numbers<[1], [1], [0], [0], [0, 0, 1, 0], [], []>} : vector<8x64xbf16>, vector<8x64xbf16>, vector<8x8xf32> -> vector<8x8xf32>
    %cst_27 = arith.constant -1.000000e+30 : f32
    %73 = vector.broadcast %cst_27 : f32 to vector<8x8xf32>
    %74 = arith.select %38, %72, %73 : vector<8x8xi1>, vector<8x8xf32>
    %cst_28 = arith.constant dense<0xFF800000> : vector<8xf32>
    %75 = vector.multi_reduction <maximumf>, %74, %cst_28 [1] : vector<8x8xf32> to vector<8xf32>
    %76 = vector.shape_cast %75 : vector<8xf32> to vector<8x1xf32>
    %77 = vector.broadcast %76 : vector<8x1xf32> to vector<8x8xf32>
    %78 = arith.subf %74, %77 : vector<8x8xf32>
    %79 = math.exp %78 : vector<8x8xf32>
    %cst_29 = arith.constant dense<0.000000e+00> : vector<8xf32>
    %80 = vector.multi_reduction <add>, %79, %cst_29 [1] : vector<8x8xf32> to vector<8xf32>
    %81 = vector.shape_cast %80 : vector<8xf32> to vector<8x1xf32>
    %82 = tpu.reciprocal %81 {approx = true} : vector<8x1xf32> -> vector<8x1xf32>
    %83 = vector.broadcast %82 : vector<8x1xf32> to vector<8x8xf32>
    %84 = arith.mulf %79, %83 : vector<8x8xf32>
    %85 = vector.extract_strided_slice %41 {offsets = [0, 64], sizes = [8, 64], strides = [1, 1]} : vector<8x384xf32> to vector<8x64xf32>
    %86 = arith.truncf %84 : vector<8x8xf32> to vector<8x8xbf16>
    %87 = arith.truncf %85 : vector<8x64xf32> to vector<8x64xbf16>
    %cst_30 = arith.constant dense<0.000000e+00> : vector<8x64xf32>
    %88 = tpu.matmul %86, %87, %cst_30 {dimension_numbers = #tpu.dot_dimension_numbers<[1], [0], [0], [1], [0, 0, 1, 1], [], []>} : vector<8x8xbf16>, vector<8x64xbf16>, vector<8x64xf32> -> vector<8x64xf32>
    %89 = vector.extract_strided_slice %33 {offsets = [64, 0], sizes = [64, 384], strides = [1, 1]} : vector<384x384xbf16> to vector<64x384xbf16>
    %90 = arith.truncf %88 : vector<8x64xf32> to vector<8x64xbf16>
    %cst_31 = arith.constant dense<0.000000e+00> : vector<8x384xf32>
    %91 = tpu.matmul %90, %89, %cst_31 {dimension_numbers = #tpu.dot_dimension_numbers<[1], [0], [0], [1], [0, 0, 1, 1], [], []>} : vector<8x64xbf16>, vector<64x384xbf16>, vector<8x384xf32> -> vector<8x384xf32>
    %92 = arith.addf %67, %91 : vector<8x384xf32>
    %93 = vector.extract_strided_slice %39 {offsets = [0, 128], sizes = [8, 64], strides = [1, 1]} : vector<8x384xf32> to vector<8x64xf32>
    %94 = arith.truncf %93 : vector<8x64xf32> to vector<8x64xbf16>
    %95 = vector.extract_strided_slice %40 {offsets = [0, 128], sizes = [8, 64], strides = [1, 1]} : vector<8x384xf32> to vector<8x64xf32>
    %96 = arith.truncf %95 : vector<8x64xf32> to vector<8x64xbf16>
    %cst_32 = arith.constant dense<0.000000e+00> : vector<8x8xf32>
    %97 = tpu.matmul %94, %96, %cst_32 {dimension_numbers = #tpu.dot_dimension_numbers<[1], [1], [0], [0], [0, 0, 1, 0], [], []>} : vector<8x64xbf16>, vector<8x64xbf16>, vector<8x8xf32> -> vector<8x8xf32>
    %cst_33 = arith.constant -1.000000e+30 : f32
    %98 = vector.broadcast %cst_33 : f32 to vector<8x8xf32>
    %99 = arith.select %38, %97, %98 : vector<8x8xi1>, vector<8x8xf32>
    %cst_34 = arith.constant dense<0xFF800000> : vector<8xf32>
    %100 = vector.multi_reduction <maximumf>, %99, %cst_34 [1] : vector<8x8xf32> to vector<8xf32>
    %101 = vector.shape_cast %100 : vector<8xf32> to vector<8x1xf32>
    %102 = vector.broadcast %101 : vector<8x1xf32> to vector<8x8xf32>
    %103 = arith.subf %99, %102 : vector<8x8xf32>
    %104 = math.exp %103 : vector<8x8xf32>
    %cst_35 = arith.constant dense<0.000000e+00> : vector<8xf32>
    %105 = vector.multi_reduction <add>, %104, %cst_35 [1] : vector<8x8xf32> to vector<8xf32>
    %106 = vector.shape_cast %105 : vector<8xf32> to vector<8x1xf32>
    %107 = tpu.reciprocal %106 {approx = true} : vector<8x1xf32> -> vector<8x1xf32>
    %108 = vector.broadcast %107 : vector<8x1xf32> to vector<8x8xf32>
    %109 = arith.mulf %104, %108 : vector<8x8xf32>
    %110 = vector.extract_strided_slice %41 {offsets = [0, 128], sizes = [8, 64], strides = [1, 1]} : vector<8x384xf32> to vector<8x64xf32>
    %111 = arith.truncf %109 : vector<8x8xf32> to vector<8x8xbf16>
    %112 = arith.truncf %110 : vector<8x64xf32> to vector<8x64xbf16>
    %cst_36 = arith.constant dense<0.000000e+00> : vector<8x64xf32>
    %113 = tpu.matmul %111, %112, %cst_36 {dimension_numbers = #tpu.dot_dimension_numbers<[1], [0], [0], [1], [0, 0, 1, 1], [], []>} : vector<8x8xbf16>, vector<8x64xbf16>, vector<8x64xf32> -> vector<8x64xf32>
    %114 = vector.extract_strided_slice %33 {offsets = [128, 0], sizes = [64, 384], strides = [1, 1]} : vector<384x384xbf16> to vector<64x384xbf16>
    %115 = arith.truncf %113 : vector<8x64xf32> to vector<8x64xbf16>
    %cst_37 = arith.constant dense<0.000000e+00> : vector<8x384xf32>
    %116 = tpu.matmul %115, %114, %cst_37 {dimension_numbers = #tpu.dot_dimension_numbers<[1], [0], [0], [1], [0, 0, 1, 1], [], []>} : vector<8x64xbf16>, vector<64x384xbf16>, vector<8x384xf32> -> vector<8x384xf32>
    %117 = arith.addf %92, %116 : vector<8x384xf32>
    %118 = vector.extract_strided_slice %39 {offsets = [0, 192], sizes = [8, 64], strides = [1, 1]} : vector<8x384xf32> to vector<8x64xf32>
    %119 = arith.truncf %118 : vector<8x64xf32> to vector<8x64xbf16>
    %120 = vector.extract_strided_slice %40 {offsets = [0, 192], sizes = [8, 64], strides = [1, 1]} : vector<8x384xf32> to vector<8x64xf32>
    %121 = arith.truncf %120 : vector<8x64xf32> to vector<8x64xbf16>
    %cst_38 = arith.constant dense<0.000000e+00> : vector<8x8xf32>
    %122 = tpu.matmul %119, %121, %cst_38 {dimension_numbers = #tpu.dot_dimension_numbers<[1], [1], [0], [0], [0, 0, 1, 0], [], []>} : vector<8x64xbf16>, vector<8x64xbf16>, vector<8x8xf32> -> vector<8x8xf32>
    %cst_39 = arith.constant -1.000000e+30 : f32
    %123 = vector.broadcast %cst_39 : f32 to vector<8x8xf32>
    %124 = arith.select %38, %122, %123 : vector<8x8xi1>, vector<8x8xf32>
    %cst_40 = arith.constant dense<0xFF800000> : vector<8xf32>
    %125 = vector.multi_reduction <maximumf>, %124, %cst_40 [1] : vector<8x8xf32> to vector<8xf32>
    %126 = vector.shape_cast %125 : vector<8xf32> to vector<8x1xf32>
    %127 = vector.broadcast %126 : vector<8x1xf32> to vector<8x8xf32>
    %128 = arith.subf %124, %127 : vector<8x8xf32>
    %129 = math.exp %128 : vector<8x8xf32>
    %cst_41 = arith.constant dense<0.000000e+00> : vector<8xf32>
    %130 = vector.multi_reduction <add>, %129, %cst_41 [1] : vector<8x8xf32> to vector<8xf32>
    %131 = vector.shape_cast %130 : vector<8xf32> to vector<8x1xf32>
    %132 = tpu.reciprocal %131 {approx = true} : vector<8x1xf32> -> vector<8x1xf32>
    %133 = vector.broadcast %132 : vector<8x1xf32> to vector<8x8xf32>
    %134 = arith.mulf %129, %133 : vector<8x8xf32>
    %135 = vector.extract_strided_slice %41 {offsets = [0, 192], sizes = [8, 64], strides = [1, 1]} : vector<8x384xf32> to vector<8x64xf32>
    %136 = arith.truncf %134 : vector<8x8xf32> to vector<8x8xbf16>
    %137 = arith.truncf %135 : vector<8x64xf32> to vector<8x64xbf16>
    %cst_42 = arith.constant dense<0.000000e+00> : vector<8x64xf32>
    %138 = tpu.matmul %136, %137, %cst_42 {dimension_numbers = #tpu.dot_dimension_numbers<[1], [0], [0], [1], [0, 0, 1, 1], [], []>} : vector<8x8xbf16>, vector<8x64xbf16>, vector<8x64xf32> -> vector<8x64xf32>
    %139 = vector.extract_strided_slice %33 {offsets = [192, 0], sizes = [64, 384], strides = [1, 1]} : vector<384x384xbf16> to vector<64x384xbf16>
    %140 = arith.truncf %138 : vector<8x64xf32> to vector<8x64xbf16>
    %cst_43 = arith.constant dense<0.000000e+00> : vector<8x384xf32>
    %141 = tpu.matmul %140, %139, %cst_43 {dimension_numbers = #tpu.dot_dimension_numbers<[1], [0], [0], [1], [0, 0, 1, 1], [], []>} : vector<8x64xbf16>, vector<64x384xbf16>, vector<8x384xf32> -> vector<8x384xf32>
    %142 = arith.addf %117, %141 : vector<8x384xf32>
    %143 = vector.extract_strided_slice %39 {offsets = [0, 256], sizes = [8, 64], strides = [1, 1]} : vector<8x384xf32> to vector<8x64xf32>
    %144 = arith.truncf %143 : vector<8x64xf32> to vector<8x64xbf16>
    %145 = vector.extract_strided_slice %40 {offsets = [0, 256], sizes = [8, 64], strides = [1, 1]} : vector<8x384xf32> to vector<8x64xf32>
    %146 = arith.truncf %145 : vector<8x64xf32> to vector<8x64xbf16>
    %cst_44 = arith.constant dense<0.000000e+00> : vector<8x8xf32>
    %147 = tpu.matmul %144, %146, %cst_44 {dimension_numbers = #tpu.dot_dimension_numbers<[1], [1], [0], [0], [0, 0, 1, 0], [], []>} : vector<8x64xbf16>, vector<8x64xbf16>, vector<8x8xf32> -> vector<8x8xf32>
    %cst_45 = arith.constant -1.000000e+30 : f32
    %148 = vector.broadcast %cst_45 : f32 to vector<8x8xf32>
    %149 = arith.select %38, %147, %148 : vector<8x8xi1>, vector<8x8xf32>
    %cst_46 = arith.constant dense<0xFF800000> : vector<8xf32>
    %150 = vector.multi_reduction <maximumf>, %149, %cst_46 [1] : vector<8x8xf32> to vector<8xf32>
    %151 = vector.shape_cast %150 : vector<8xf32> to vector<8x1xf32>
    %152 = vector.broadcast %151 : vector<8x1xf32> to vector<8x8xf32>
    %153 = arith.subf %149, %152 : vector<8x8xf32>
    %154 = math.exp %153 : vector<8x8xf32>
    %cst_47 = arith.constant dense<0.000000e+00> : vector<8xf32>
    %155 = vector.multi_reduction <add>, %154, %cst_47 [1] : vector<8x8xf32> to vector<8xf32>
    %156 = vector.shape_cast %155 : vector<8xf32> to vector<8x1xf32>
    %157 = tpu.reciprocal %156 {approx = true} : vector<8x1xf32> -> vector<8x1xf32>
    %158 = vector.broadcast %157 : vector<8x1xf32> to vector<8x8xf32>
    %159 = arith.mulf %154, %158 : vector<8x8xf32>
    %160 = vector.extract_strided_slice %41 {offsets = [0, 256], sizes = [8, 64], strides = [1, 1]} : vector<8x384xf32> to vector<8x64xf32>
    %161 = arith.truncf %159 : vector<8x8xf32> to vector<8x8xbf16>
    %162 = arith.truncf %160 : vector<8x64xf32> to vector<8x64xbf16>
    %cst_48 = arith.constant dense<0.000000e+00> : vector<8x64xf32>
    %163 = tpu.matmul %161, %162, %cst_48 {dimension_numbers = #tpu.dot_dimension_numbers<[1], [0], [0], [1], [0, 0, 1, 1], [], []>} : vector<8x8xbf16>, vector<8x64xbf16>, vector<8x64xf32> -> vector<8x64xf32>
    %164 = vector.extract_strided_slice %33 {offsets = [256, 0], sizes = [64, 384], strides = [1, 1]} : vector<384x384xbf16> to vector<64x384xbf16>
    %165 = arith.truncf %163 : vector<8x64xf32> to vector<8x64xbf16>
    %cst_49 = arith.constant dense<0.000000e+00> : vector<8x384xf32>
    %166 = tpu.matmul %165, %164, %cst_49 {dimension_numbers = #tpu.dot_dimension_numbers<[1], [0], [0], [1], [0, 0, 1, 1], [], []>} : vector<8x64xbf16>, vector<64x384xbf16>, vector<8x384xf32> -> vector<8x384xf32>
    %167 = arith.addf %142, %166 : vector<8x384xf32>
    %168 = vector.extract_strided_slice %39 {offsets = [0, 320], sizes = [8, 64], strides = [1, 1]} : vector<8x384xf32> to vector<8x64xf32>
    %169 = arith.truncf %168 : vector<8x64xf32> to vector<8x64xbf16>
    %170 = vector.extract_strided_slice %40 {offsets = [0, 320], sizes = [8, 64], strides = [1, 1]} : vector<8x384xf32> to vector<8x64xf32>
    %171 = arith.truncf %170 : vector<8x64xf32> to vector<8x64xbf16>
    %cst_50 = arith.constant dense<0.000000e+00> : vector<8x8xf32>
    %172 = tpu.matmul %169, %171, %cst_50 {dimension_numbers = #tpu.dot_dimension_numbers<[1], [1], [0], [0], [0, 0, 1, 0], [], []>} : vector<8x64xbf16>, vector<8x64xbf16>, vector<8x8xf32> -> vector<8x8xf32>
    %cst_51 = arith.constant -1.000000e+30 : f32
    %173 = vector.broadcast %cst_51 : f32 to vector<8x8xf32>
    %174 = arith.select %38, %172, %173 : vector<8x8xi1>, vector<8x8xf32>
    %cst_52 = arith.constant dense<0xFF800000> : vector<8xf32>
    %175 = vector.multi_reduction <maximumf>, %174, %cst_52 [1] : vector<8x8xf32> to vector<8xf32>
    %176 = vector.shape_cast %175 : vector<8xf32> to vector<8x1xf32>
    %177 = vector.broadcast %176 : vector<8x1xf32> to vector<8x8xf32>
    %178 = arith.subf %174, %177 : vector<8x8xf32>
    %179 = math.exp %178 : vector<8x8xf32>
    %cst_53 = arith.constant dense<0.000000e+00> : vector<8xf32>
    %180 = vector.multi_reduction <add>, %179, %cst_53 [1] : vector<8x8xf32> to vector<8xf32>
    %181 = vector.shape_cast %180 : vector<8xf32> to vector<8x1xf32>
    %182 = tpu.reciprocal %181 {approx = true} : vector<8x1xf32> -> vector<8x1xf32>
    %183 = vector.broadcast %182 : vector<8x1xf32> to vector<8x8xf32>
    %184 = arith.mulf %179, %183 : vector<8x8xf32>
    %185 = vector.extract_strided_slice %41 {offsets = [0, 320], sizes = [8, 64], strides = [1, 1]} : vector<8x384xf32> to vector<8x64xf32>
    %186 = arith.truncf %184 : vector<8x8xf32> to vector<8x8xbf16>
    %187 = arith.truncf %185 : vector<8x64xf32> to vector<8x64xbf16>
    %cst_54 = arith.constant dense<0.000000e+00> : vector<8x64xf32>
    %188 = tpu.matmul %186, %187, %cst_54 {dimension_numbers = #tpu.dot_dimension_numbers<[1], [0], [0], [1], [0, 0, 1, 1], [], []>} : vector<8x8xbf16>, vector<8x64xbf16>, vector<8x64xf32> -> vector<8x64xf32>
    %189 = vector.extract_strided_slice %33 {offsets = [320, 0], sizes = [64, 384], strides = [1, 1]} : vector<384x384xbf16> to vector<64x384xbf16>
    %190 = arith.truncf %188 : vector<8x64xf32> to vector<8x64xbf16>
    %cst_55 = arith.constant dense<0.000000e+00> : vector<8x384xf32>
    %191 = tpu.matmul %190, %189, %cst_55 {dimension_numbers = #tpu.dot_dimension_numbers<[1], [0], [0], [1], [0, 0, 1, 1], [], []>} : vector<8x64xbf16>, vector<64x384xbf16>, vector<8x384xf32> -> vector<8x384xf32>
    %192 = arith.addf %167, %191 : vector<8x384xf32>
    %193 = vector.extract_strided_slice %35 {offsets = [8, 0], sizes = [8, 384], strides = [1, 1]} : vector<16x1152xf32> to vector<8x384xf32>
    %194 = vector.extract_strided_slice %35 {offsets = [8, 384], sizes = [8, 384], strides = [1, 1]} : vector<16x1152xf32> to vector<8x384xf32>
    %195 = vector.extract_strided_slice %35 {offsets = [8, 768], sizes = [8, 384], strides = [1, 1]} : vector<16x1152xf32> to vector<8x384xf32>
    %cst_56 = arith.constant 0.000000e+00 : f32
    %196 = vector.broadcast %cst_56 : f32 to vector<8x384xf32>
    %197 = vector.extract_strided_slice %193 {offsets = [0, 0], sizes = [8, 64], strides = [1, 1]} : vector<8x384xf32> to vector<8x64xf32>
    %198 = arith.truncf %197 : vector<8x64xf32> to vector<8x64xbf16>
    %199 = vector.extract_strided_slice %194 {offsets = [0, 0], sizes = [8, 64], strides = [1, 1]} : vector<8x384xf32> to vector<8x64xf32>
    %200 = arith.truncf %199 : vector<8x64xf32> to vector<8x64xbf16>
    %cst_57 = arith.constant dense<0.000000e+00> : vector<8x8xf32>
    %201 = tpu.matmul %198, %200, %cst_57 {dimension_numbers = #tpu.dot_dimension_numbers<[1], [1], [0], [0], [0, 0, 1, 0], [], []>} : vector<8x64xbf16>, vector<8x64xbf16>, vector<8x8xf32> -> vector<8x8xf32>
    %cst_58 = arith.constant -1.000000e+30 : f32
    %202 = vector.broadcast %cst_58 : f32 to vector<8x8xf32>
    %203 = arith.select %38, %201, %202 : vector<8x8xi1>, vector<8x8xf32>
    %cst_59 = arith.constant dense<0xFF800000> : vector<8xf32>
    %204 = vector.multi_reduction <maximumf>, %203, %cst_59 [1] : vector<8x8xf32> to vector<8xf32>
    %205 = vector.shape_cast %204 : vector<8xf32> to vector<8x1xf32>
    %206 = vector.broadcast %205 : vector<8x1xf32> to vector<8x8xf32>
    %207 = arith.subf %203, %206 : vector<8x8xf32>
    %208 = math.exp %207 : vector<8x8xf32>
    %cst_60 = arith.constant dense<0.000000e+00> : vector<8xf32>
    %209 = vector.multi_reduction <add>, %208, %cst_60 [1] : vector<8x8xf32> to vector<8xf32>
    %210 = vector.shape_cast %209 : vector<8xf32> to vector<8x1xf32>
    %211 = tpu.reciprocal %210 {approx = true} : vector<8x1xf32> -> vector<8x1xf32>
    %212 = vector.broadcast %211 : vector<8x1xf32> to vector<8x8xf32>
    %213 = arith.mulf %208, %212 : vector<8x8xf32>
    %214 = vector.extract_strided_slice %195 {offsets = [0, 0], sizes = [8, 64], strides = [1, 1]} : vector<8x384xf32> to vector<8x64xf32>
    %215 = arith.truncf %213 : vector<8x8xf32> to vector<8x8xbf16>
    %216 = arith.truncf %214 : vector<8x64xf32> to vector<8x64xbf16>
    %cst_61 = arith.constant dense<0.000000e+00> : vector<8x64xf32>
    %217 = tpu.matmul %215, %216, %cst_61 {dimension_numbers = #tpu.dot_dimension_numbers<[1], [0], [0], [1], [0, 0, 1, 1], [], []>} : vector<8x8xbf16>, vector<8x64xbf16>, vector<8x64xf32> -> vector<8x64xf32>
    %218 = vector.extract_strided_slice %33 {offsets = [0, 0], sizes = [64, 384], strides = [1, 1]} : vector<384x384xbf16> to vector<64x384xbf16>
    %219 = arith.truncf %217 : vector<8x64xf32> to vector<8x64xbf16>
    %cst_62 = arith.constant dense<0.000000e+00> : vector<8x384xf32>
    %220 = tpu.matmul %219, %218, %cst_62 {dimension_numbers = #tpu.dot_dimension_numbers<[1], [0], [0], [1], [0, 0, 1, 1], [], []>} : vector<8x64xbf16>, vector<64x384xbf16>, vector<8x384xf32> -> vector<8x384xf32>
    %221 = arith.addf %196, %220 : vector<8x384xf32>
    %222 = vector.extract_strided_slice %193 {offsets = [0, 64], sizes = [8, 64], strides = [1, 1]} : vector<8x384xf32> to vector<8x64xf32>
    %223 = arith.truncf %222 : vector<8x64xf32> to vector<8x64xbf16>
    %224 = vector.extract_strided_slice %194 {offsets = [0, 64], sizes = [8, 64], strides = [1, 1]} : vector<8x384xf32> to vector<8x64xf32>
    %225 = arith.truncf %224 : vector<8x64xf32> to vector<8x64xbf16>
    %cst_63 = arith.constant dense<0.000000e+00> : vector<8x8xf32>
    %226 = tpu.matmul %223, %225, %cst_63 {dimension_numbers = #tpu.dot_dimension_numbers<[1], [1], [0], [0], [0, 0, 1, 0], [], []>} : vector<8x64xbf16>, vector<8x64xbf16>, vector<8x8xf32> -> vector<8x8xf32>
    %cst_64 = arith.constant -1.000000e+30 : f32
    %227 = vector.broadcast %cst_64 : f32 to vector<8x8xf32>
    %228 = arith.select %38, %226, %227 : vector<8x8xi1>, vector<8x8xf32>
    %cst_65 = arith.constant dense<0xFF800000> : vector<8xf32>
    %229 = vector.multi_reduction <maximumf>, %228, %cst_65 [1] : vector<8x8xf32> to vector<8xf32>
    %230 = vector.shape_cast %229 : vector<8xf32> to vector<8x1xf32>
    %231 = vector.broadcast %230 : vector<8x1xf32> to vector<8x8xf32>
    %232 = arith.subf %228, %231 : vector<8x8xf32>
    %233 = math.exp %232 : vector<8x8xf32>
    %cst_66 = arith.constant dense<0.000000e+00> : vector<8xf32>
    %234 = vector.multi_reduction <add>, %233, %cst_66 [1] : vector<8x8xf32> to vector<8xf32>
    %235 = vector.shape_cast %234 : vector<8xf32> to vector<8x1xf32>
    %236 = tpu.reciprocal %235 {approx = true} : vector<8x1xf32> -> vector<8x1xf32>
    %237 = vector.broadcast %236 : vector<8x1xf32> to vector<8x8xf32>
    %238 = arith.mulf %233, %237 : vector<8x8xf32>
    %239 = vector.extract_strided_slice %195 {offsets = [0, 64], sizes = [8, 64], strides = [1, 1]} : vector<8x384xf32> to vector<8x64xf32>
    %240 = arith.truncf %238 : vector<8x8xf32> to vector<8x8xbf16>
    %241 = arith.truncf %239 : vector<8x64xf32> to vector<8x64xbf16>
    %cst_67 = arith.constant dense<0.000000e+00> : vector<8x64xf32>
    %242 = tpu.matmul %240, %241, %cst_67 {dimension_numbers = #tpu.dot_dimension_numbers<[1], [0], [0], [1], [0, 0, 1, 1], [], []>} : vector<8x8xbf16>, vector<8x64xbf16>, vector<8x64xf32> -> vector<8x64xf32>
    %243 = vector.extract_strided_slice %33 {offsets = [64, 0], sizes = [64, 384], strides = [1, 1]} : vector<384x384xbf16> to vector<64x384xbf16>
    %244 = arith.truncf %242 : vector<8x64xf32> to vector<8x64xbf16>
    %cst_68 = arith.constant dense<0.000000e+00> : vector<8x384xf32>
    %245 = tpu.matmul %244, %243, %cst_68 {dimension_numbers = #tpu.dot_dimension_numbers<[1], [0], [0], [1], [0, 0, 1, 1], [], []>} : vector<8x64xbf16>, vector<64x384xbf16>, vector<8x384xf32> -> vector<8x384xf32>
    %246 = arith.addf %221, %245 : vector<8x384xf32>
    %247 = vector.extract_strided_slice %193 {offsets = [0, 128], sizes = [8, 64], strides = [1, 1]} : vector<8x384xf32> to vector<8x64xf32>
    %248 = arith.truncf %247 : vector<8x64xf32> to vector<8x64xbf16>
    %249 = vector.extract_strided_slice %194 {offsets = [0, 128], sizes = [8, 64], strides = [1, 1]} : vector<8x384xf32> to vector<8x64xf32>
    %250 = arith.truncf %249 : vector<8x64xf32> to vector<8x64xbf16>
    %cst_69 = arith.constant dense<0.000000e+00> : vector<8x8xf32>
    %251 = tpu.matmul %248, %250, %cst_69 {dimension_numbers = #tpu.dot_dimension_numbers<[1], [1], [0], [0], [0, 0, 1, 0], [], []>} : vector<8x64xbf16>, vector<8x64xbf16>, vector<8x8xf32> -> vector<8x8xf32>
    %cst_70 = arith.constant -1.000000e+30 : f32
    %252 = vector.broadcast %cst_70 : f32 to vector<8x8xf32>
    %253 = arith.select %38, %251, %252 : vector<8x8xi1>, vector<8x8xf32>
    %cst_71 = arith.constant dense<0xFF800000> : vector<8xf32>
    %254 = vector.multi_reduction <maximumf>, %253, %cst_71 [1] : vector<8x8xf32> to vector<8xf32>
    %255 = vector.shape_cast %254 : vector<8xf32> to vector<8x1xf32>
    %256 = vector.broadcast %255 : vector<8x1xf32> to vector<8x8xf32>
    %257 = arith.subf %253, %256 : vector<8x8xf32>
    %258 = math.exp %257 : vector<8x8xf32>
    %cst_72 = arith.constant dense<0.000000e+00> : vector<8xf32>
    %259 = vector.multi_reduction <add>, %258, %cst_72 [1] : vector<8x8xf32> to vector<8xf32>
    %260 = vector.shape_cast %259 : vector<8xf32> to vector<8x1xf32>
    %261 = tpu.reciprocal %260 {approx = true} : vector<8x1xf32> -> vector<8x1xf32>
    %262 = vector.broadcast %261 : vector<8x1xf32> to vector<8x8xf32>
    %263 = arith.mulf %258, %262 : vector<8x8xf32>
    %264 = vector.extract_strided_slice %195 {offsets = [0, 128], sizes = [8, 64], strides = [1, 1]} : vector<8x384xf32> to vector<8x64xf32>
    %265 = arith.truncf %263 : vector<8x8xf32> to vector<8x8xbf16>
    %266 = arith.truncf %264 : vector<8x64xf32> to vector<8x64xbf16>
    %cst_73 = arith.constant dense<0.000000e+00> : vector<8x64xf32>
    %267 = tpu.matmul %265, %266, %cst_73 {dimension_numbers = #tpu.dot_dimension_numbers<[1], [0], [0], [1], [0, 0, 1, 1], [], []>} : vector<8x8xbf16>, vector<8x64xbf16>, vector<8x64xf32> -> vector<8x64xf32>
    %268 = vector.extract_strided_slice %33 {offsets = [128, 0], sizes = [64, 384], strides = [1, 1]} : vector<384x384xbf16> to vector<64x384xbf16>
    %269 = arith.truncf %267 : vector<8x64xf32> to vector<8x64xbf16>
    %cst_74 = arith.constant dense<0.000000e+00> : vector<8x384xf32>
    %270 = tpu.matmul %269, %268, %cst_74 {dimension_numbers = #tpu.dot_dimension_numbers<[1], [0], [0], [1], [0, 0, 1, 1], [], []>} : vector<8x64xbf16>, vector<64x384xbf16>, vector<8x384xf32> -> vector<8x384xf32>
    %271 = arith.addf %246, %270 : vector<8x384xf32>
    %272 = vector.extract_strided_slice %193 {offsets = [0, 192], sizes = [8, 64], strides = [1, 1]} : vector<8x384xf32> to vector<8x64xf32>
    %273 = arith.truncf %272 : vector<8x64xf32> to vector<8x64xbf16>
    %274 = vector.extract_strided_slice %194 {offsets = [0, 192], sizes = [8, 64], strides = [1, 1]} : vector<8x384xf32> to vector<8x64xf32>
    %275 = arith.truncf %274 : vector<8x64xf32> to vector<8x64xbf16>
    %cst_75 = arith.constant dense<0.000000e+00> : vector<8x8xf32>
    %276 = tpu.matmul %273, %275, %cst_75 {dimension_numbers = #tpu.dot_dimension_numbers<[1], [1], [0], [0], [0, 0, 1, 0], [], []>} : vector<8x64xbf16>, vector<8x64xbf16>, vector<8x8xf32> -> vector<8x8xf32>
    %cst_76 = arith.constant -1.000000e+30 : f32
    %277 = vector.broadcast %cst_76 : f32 to vector<8x8xf32>
    %278 = arith.select %38, %276, %277 : vector<8x8xi1>, vector<8x8xf32>
    %cst_77 = arith.constant dense<0xFF800000> : vector<8xf32>
    %279 = vector.multi_reduction <maximumf>, %278, %cst_77 [1] : vector<8x8xf32> to vector<8xf32>
    %280 = vector.shape_cast %279 : vector<8xf32> to vector<8x1xf32>
    %281 = vector.broadcast %280 : vector<8x1xf32> to vector<8x8xf32>
    %282 = arith.subf %278, %281 : vector<8x8xf32>
    %283 = math.exp %282 : vector<8x8xf32>
    %cst_78 = arith.constant dense<0.000000e+00> : vector<8xf32>
    %284 = vector.multi_reduction <add>, %283, %cst_78 [1] : vector<8x8xf32> to vector<8xf32>
    %285 = vector.shape_cast %284 : vector<8xf32> to vector<8x1xf32>
    %286 = tpu.reciprocal %285 {approx = true} : vector<8x1xf32> -> vector<8x1xf32>
    %287 = vector.broadcast %286 : vector<8x1xf32> to vector<8x8xf32>
    %288 = arith.mulf %283, %287 : vector<8x8xf32>
    %289 = vector.extract_strided_slice %195 {offsets = [0, 192], sizes = [8, 64], strides = [1, 1]} : vector<8x384xf32> to vector<8x64xf32>
    %290 = arith.truncf %288 : vector<8x8xf32> to vector<8x8xbf16>
    %291 = arith.truncf %289 : vector<8x64xf32> to vector<8x64xbf16>
    %cst_79 = arith.constant dense<0.000000e+00> : vector<8x64xf32>
    %292 = tpu.matmul %290, %291, %cst_79 {dimension_numbers = #tpu.dot_dimension_numbers<[1], [0], [0], [1], [0, 0, 1, 1], [], []>} : vector<8x8xbf16>, vector<8x64xbf16>, vector<8x64xf32> -> vector<8x64xf32>
    %293 = vector.extract_strided_slice %33 {offsets = [192, 0], sizes = [64, 384], strides = [1, 1]} : vector<384x384xbf16> to vector<64x384xbf16>
    %294 = arith.truncf %292 : vector<8x64xf32> to vector<8x64xbf16>
    %cst_80 = arith.constant dense<0.000000e+00> : vector<8x384xf32>
    %295 = tpu.matmul %294, %293, %cst_80 {dimension_numbers = #tpu.dot_dimension_numbers<[1], [0], [0], [1], [0, 0, 1, 1], [], []>} : vector<8x64xbf16>, vector<64x384xbf16>, vector<8x384xf32> -> vector<8x384xf32>
    %296 = arith.addf %271, %295 : vector<8x384xf32>
    %297 = vector.extract_strided_slice %193 {offsets = [0, 256], sizes = [8, 64], strides = [1, 1]} : vector<8x384xf32> to vector<8x64xf32>
    %298 = arith.truncf %297 : vector<8x64xf32> to vector<8x64xbf16>
    %299 = vector.extract_strided_slice %194 {offsets = [0, 256], sizes = [8, 64], strides = [1, 1]} : vector<8x384xf32> to vector<8x64xf32>
    %300 = arith.truncf %299 : vector<8x64xf32> to vector<8x64xbf16>
    %cst_81 = arith.constant dense<0.000000e+00> : vector<8x8xf32>
    %301 = tpu.matmul %298, %300, %cst_81 {dimension_numbers = #tpu.dot_dimension_numbers<[1], [1], [0], [0], [0, 0, 1, 0], [], []>} : vector<8x64xbf16>, vector<8x64xbf16>, vector<8x8xf32> -> vector<8x8xf32>
    %cst_82 = arith.constant -1.000000e+30 : f32
    %302 = vector.broadcast %cst_82 : f32 to vector<8x8xf32>
    %303 = arith.select %38, %301, %302 : vector<8x8xi1>, vector<8x8xf32>
    %cst_83 = arith.constant dense<0xFF800000> : vector<8xf32>
    %304 = vector.multi_reduction <maximumf>, %303, %cst_83 [1] : vector<8x8xf32> to vector<8xf32>
    %305 = vector.shape_cast %304 : vector<8xf32> to vector<8x1xf32>
    %306 = vector.broadcast %305 : vector<8x1xf32> to vector<8x8xf32>
    %307 = arith.subf %303, %306 : vector<8x8xf32>
    %308 = math.exp %307 : vector<8x8xf32>
    %cst_84 = arith.constant dense<0.000000e+00> : vector<8xf32>
    %309 = vector.multi_reduction <add>, %308, %cst_84 [1] : vector<8x8xf32> to vector<8xf32>
    %310 = vector.shape_cast %309 : vector<8xf32> to vector<8x1xf32>
    %311 = tpu.reciprocal %310 {approx = true} : vector<8x1xf32> -> vector<8x1xf32>
    %312 = vector.broadcast %311 : vector<8x1xf32> to vector<8x8xf32>
    %313 = arith.mulf %308, %312 : vector<8x8xf32>
    %314 = vector.extract_strided_slice %195 {offsets = [0, 256], sizes = [8, 64], strides = [1, 1]} : vector<8x384xf32> to vector<8x64xf32>
    %315 = arith.truncf %313 : vector<8x8xf32> to vector<8x8xbf16>
    %316 = arith.truncf %314 : vector<8x64xf32> to vector<8x64xbf16>
    %cst_85 = arith.constant dense<0.000000e+00> : vector<8x64xf32>
    %317 = tpu.matmul %315, %316, %cst_85 {dimension_numbers = #tpu.dot_dimension_numbers<[1], [0], [0], [1], [0, 0, 1, 1], [], []>} : vector<8x8xbf16>, vector<8x64xbf16>, vector<8x64xf32> -> vector<8x64xf32>
    %318 = vector.extract_strided_slice %33 {offsets = [256, 0], sizes = [64, 384], strides = [1, 1]} : vector<384x384xbf16> to vector<64x384xbf16>
    %319 = arith.truncf %317 : vector<8x64xf32> to vector<8x64xbf16>
    %cst_86 = arith.constant dense<0.000000e+00> : vector<8x384xf32>
    %320 = tpu.matmul %319, %318, %cst_86 {dimension_numbers = #tpu.dot_dimension_numbers<[1], [0], [0], [1], [0, 0, 1, 1], [], []>} : vector<8x64xbf16>, vector<64x384xbf16>, vector<8x384xf32> -> vector<8x384xf32>
    %321 = arith.addf %296, %320 : vector<8x384xf32>
    %322 = vector.extract_strided_slice %193 {offsets = [0, 320], sizes = [8, 64], strides = [1, 1]} : vector<8x384xf32> to vector<8x64xf32>
    %323 = arith.truncf %322 : vector<8x64xf32> to vector<8x64xbf16>
    %324 = vector.extract_strided_slice %194 {offsets = [0, 320], sizes = [8, 64], strides = [1, 1]} : vector<8x384xf32> to vector<8x64xf32>
    %325 = arith.truncf %324 : vector<8x64xf32> to vector<8x64xbf16>
    %cst_87 = arith.constant dense<0.000000e+00> : vector<8x8xf32>
    %326 = tpu.matmul %323, %325, %cst_87 {dimension_numbers = #tpu.dot_dimension_numbers<[1], [1], [0], [0], [0, 0, 1, 0], [], []>} : vector<8x64xbf16>, vector<8x64xbf16>, vector<8x8xf32> -> vector<8x8xf32>
    %cst_88 = arith.constant -1.000000e+30 : f32
    %327 = vector.broadcast %cst_88 : f32 to vector<8x8xf32>
    %328 = arith.select %38, %326, %327 : vector<8x8xi1>, vector<8x8xf32>
    %cst_89 = arith.constant dense<0xFF800000> : vector<8xf32>
    %329 = vector.multi_reduction <maximumf>, %328, %cst_89 [1] : vector<8x8xf32> to vector<8xf32>
    %330 = vector.shape_cast %329 : vector<8xf32> to vector<8x1xf32>
    %331 = vector.broadcast %330 : vector<8x1xf32> to vector<8x8xf32>
    %332 = arith.subf %328, %331 : vector<8x8xf32>
    %333 = math.exp %332 : vector<8x8xf32>
    %cst_90 = arith.constant dense<0.000000e+00> : vector<8xf32>
    %334 = vector.multi_reduction <add>, %333, %cst_90 [1] : vector<8x8xf32> to vector<8xf32>
    %335 = vector.shape_cast %334 : vector<8xf32> to vector<8x1xf32>
    %336 = tpu.reciprocal %335 {approx = true} : vector<8x1xf32> -> vector<8x1xf32>
    %337 = vector.broadcast %336 : vector<8x1xf32> to vector<8x8xf32>
    %338 = arith.mulf %333, %337 : vector<8x8xf32>
    %339 = vector.extract_strided_slice %195 {offsets = [0, 320], sizes = [8, 64], strides = [1, 1]} : vector<8x384xf32> to vector<8x64xf32>
    %340 = arith.truncf %338 : vector<8x8xf32> to vector<8x8xbf16>
    %341 = arith.truncf %339 : vector<8x64xf32> to vector<8x64xbf16>
    %cst_91 = arith.constant dense<0.000000e+00> : vector<8x64xf32>
    %342 = tpu.matmul %340, %341, %cst_91 {dimension_numbers = #tpu.dot_dimension_numbers<[1], [0], [0], [1], [0, 0, 1, 1], [], []>} : vector<8x8xbf16>, vector<8x64xbf16>, vector<8x64xf32> -> vector<8x64xf32>
    %343 = vector.extract_strided_slice %33 {offsets = [320, 0], sizes = [64, 384], strides = [1, 1]} : vector<384x384xbf16> to vector<64x384xbf16>
    %344 = arith.truncf %342 : vector<8x64xf32> to vector<8x64xbf16>
    %cst_92 = arith.constant dense<0.000000e+00> : vector<8x384xf32>
    %345 = tpu.matmul %344, %343, %cst_92 {dimension_numbers = #tpu.dot_dimension_numbers<[1], [0], [0], [1], [0, 0, 1, 1], [], []>} : vector<8x64xbf16>, vector<64x384xbf16>, vector<8x384xf32> -> vector<8x384xf32>
    %346 = arith.addf %321, %345 : vector<8x384xf32>
    %347 = tpu.concatenate %192, %346 in 0 : vector<8x384xf32>, vector<8x384xf32> -> vector<16x384xf32>
    %348 = arith.addf %3, %347 : vector<16x384xf32>
    %c0_93 = arith.constant 0 : index
    %c0_94 = arith.constant 0 : index
    %c0_95 = arith.constant 0 : index
    %349 = vector.load %arg6[%c0_93, %c0_94, %c0_95] : memref<1x1x384xf32, #tpu.memory_space<vmem>>, vector<1x1x384xf32>
    %350 = vector.shape_cast %349 : vector<1x1x384xf32> to vector<1x384xf32>
    %351 = vector.broadcast %350 : vector<1x384xf32> to vector<16x384xf32>
    %352 = arith.addf %348, %351 : vector<16x384xf32>
    %c0_96 = arith.constant 0 : index
    %c0_97 = arith.constant 0 : index
    %c0_98 = arith.constant 0 : index
    %353 = vector.load %arg7[%c0_96, %c0_97, %c0_98] : memref<1x1x384xf32, #tpu.memory_space<vmem>>, vector<1x1x384xf32>
    %354 = vector.shape_cast %353 : vector<1x1x384xf32> to vector<1x384xf32>
    %c0_99 = arith.constant 0 : index
    %c0_100 = arith.constant 0 : index
    %c0_101 = arith.constant 0 : index
    %355 = vector.load %arg8[%c0_99, %c0_100, %c0_101] : memref<1x1x384xf32, #tpu.memory_space<vmem>>, vector<1x1x384xf32>
    %356 = vector.shape_cast %355 : vector<1x1x384xf32> to vector<1x384xf32>
    %cst_102 = arith.constant dense<0.000000e+00> : vector<16xf32>
    %357 = vector.multi_reduction <add>, %352, %cst_102 [1] : vector<16x384xf32> to vector<16xf32>
    %358 = vector.shape_cast %357 : vector<16xf32> to vector<16x1xf32>
    %cst_103 = arith.constant 3.840000e+02 : f32
    %359 = vector.broadcast %cst_103 : f32 to vector<16x1xf32>
    %360 = arith.divf %358, %359 : vector<16x1xf32>
    %361 = vector.broadcast %360 : vector<16x1xf32> to vector<16x384xf32>
    %362 = arith.subf %352, %361 : vector<16x384xf32>
    %363 = arith.mulf %362, %362 : vector<16x384xf32>
    %cst_104 = arith.constant dense<0.000000e+00> : vector<16xf32>
    %364 = vector.multi_reduction <add>, %363, %cst_104 [1] : vector<16x384xf32> to vector<16xf32>
    %365 = vector.shape_cast %364 : vector<16xf32> to vector<16x1xf32>
    %cst_105 = arith.constant 3.840000e+02 : f32
    %366 = vector.broadcast %cst_105 : f32 to vector<16x1xf32>
    %367 = arith.divf %365, %366 : vector<16x1xf32>
    %368 = vector.broadcast %360 : vector<16x1xf32> to vector<16x384xf32>
    %369 = arith.subf %352, %368 : vector<16x384xf32>
    %cst_106 = arith.constant 9.99999974E-6 : f32
    %370 = vector.broadcast %cst_106 : f32 to vector<16x1xf32>
    %371 = arith.addf %367, %370 : vector<16x1xf32>
    %372 = math.rsqrt %371 : vector<16x1xf32>
    %373 = vector.broadcast %372 : vector<16x1xf32> to vector<16x384xf32>
    %374 = arith.mulf %369, %373 : vector<16x384xf32>
    %375 = vector.broadcast %354 : vector<1x384xf32> to vector<16x384xf32>
    %376 = arith.mulf %374, %375 : vector<16x384xf32>
    %377 = vector.broadcast %356 : vector<1x384xf32> to vector<16x384xf32>
    %378 = arith.addf %376, %377 : vector<16x384xf32>
    %c0_107 = arith.constant 0 : index
    %c0_108 = arith.constant 0 : index
    %c0_109 = arith.constant 0 : index
    %379 = vector.load %arg9[%c0_107, %c0_108, %c0_109] : memref<1x384x1536xbf16, #tpu.memory_space<vmem>>, vector<1x384x1536xbf16>
    %380 = vector.shape_cast %379 : vector<1x384x1536xbf16> to vector<384x1536xbf16>
    %c0_110 = arith.constant 0 : index
    %c0_111 = arith.constant 0 : index
    %c0_112 = arith.constant 0 : index
    %381 = vector.load %arg10[%c0_110, %c0_111, %c0_112] : memref<1x1x1536xf32, #tpu.memory_space<vmem>>, vector<1x1x1536xf32>
    %382 = vector.shape_cast %381 : vector<1x1x1536xf32> to vector<1x1536xf32>
    %c0_113 = arith.constant 0 : index
    %c0_114 = arith.constant 0 : index
    %c0_115 = arith.constant 0 : index
    %383 = vector.load %arg11[%c0_113, %c0_114, %c0_115] : memref<1x1536x384xbf16, #tpu.memory_space<vmem>>, vector<1x1536x384xbf16>
    %384 = vector.shape_cast %383 : vector<1x1536x384xbf16> to vector<1536x384xbf16>
    %c0_116 = arith.constant 0 : index
    %c0_117 = arith.constant 0 : index
    %c0_118 = arith.constant 0 : index
    %385 = vector.load %arg12[%c0_116, %c0_117, %c0_118] : memref<1x1x384xf32, #tpu.memory_space<vmem>>, vector<1x1x384xf32>
    %386 = vector.shape_cast %385 : vector<1x1x384xf32> to vector<1x384xf32>
    %387 = arith.truncf %378 : vector<16x384xf32> to vector<16x384xbf16>
    %cst_119 = arith.constant dense<0.000000e+00> : vector<16x1536xf32>
    %388 = tpu.matmul %387, %380, %cst_119 {dimension_numbers = #tpu.dot_dimension_numbers<[1], [0], [0], [1], [0, 0, 1, 1], [], []>} : vector<16x384xbf16>, vector<384x1536xbf16>, vector<16x1536xf32> -> vector<16x1536xf32>
    %389 = vector.broadcast %382 : vector<1x1536xf32> to vector<16x1536xf32>
    %390 = arith.addf %388, %389 : vector<16x1536xf32>
    %cst_120 = arith.constant 0.000000e+00 : f32
    %391 = vector.broadcast %cst_120 : f32 to vector<16x1536xf32>
    %392 = arith.maximumf %390, %391 : vector<16x1536xf32>
    %393 = arith.truncf %392 : vector<16x1536xf32> to vector<16x1536xbf16>
    %cst_121 = arith.constant dense<0.000000e+00> : vector<16x384xf32>
    %394 = tpu.matmul %393, %384, %cst_121 {dimension_numbers = #tpu.dot_dimension_numbers<[1], [0], [0], [1], [0, 0, 1, 1], [], []>} : vector<16x1536xbf16>, vector<1536x384xbf16>, vector<16x384xf32> -> vector<16x384xf32>
    %395 = vector.broadcast %386 : vector<1x384xf32> to vector<16x384xf32>
    %396 = arith.addf %394, %395 : vector<16x384xf32>
    %397 = arith.addf %352, %396 : vector<16x384xf32>
    %c0_122 = arith.constant 0 : index
    %c0_123 = arith.constant 0 : index
    %398 = vector.load %arg22[%c0_122, %c0_123] : memref<16x384xf32, #tpu.memory_space<vmem>>, vector<16x384xf32>
    tpu.vector_store %arg22[%c0_122, %c0_123], %397 {strides = array<i32>} : memref<16x384xf32, #tpu.memory_space<vmem>>, vector<16x384xf32>,
    %c5_i32 = arith.constant 5 : i32
    %399 = arith.cmpi eq, %arg0, %c5_i32 : i32
    %400 = arith.extui %399 : i1 to i32
    %c0_i32_124 = arith.constant 0 : i32
    %401 = arith.cmpi ne, %400, %c0_i32_124 : i32
    scf.if %401 {
      %c0_125 = arith.constant 0 : index
      %c0_126 = arith.constant 0 : index
      %402 = vector.load %arg13[%c0_125, %c0_126] : memref<1x384xf32, #tpu.memory_space<vmem>>, vector<1x384xf32>
      %c0_127 = arith.constant 0 : index
      %c0_128 = arith.constant 0 : index
      %403 = vector.load %arg14[%c0_127, %c0_128] : memref<1x384xf32, #tpu.memory_space<vmem>>, vector<1x384xf32>
      %cst_129 = arith.constant dense<0.000000e+00> : vector<16xf32>
      %404 = vector.multi_reduction <add>, %397, %cst_129 [1] : vector<16x384xf32> to vector<16xf32>
      %405 = vector.shape_cast %404 : vector<16xf32> to vector<16x1xf32>
      %cst_130 = arith.constant 3.840000e+02 : f32
      %406 = vector.broadcast %cst_130 : f32 to vector<16x1xf32>
      %407 = arith.divf %405, %406 : vector<16x1xf32>
      %408 = vector.broadcast %407 : vector<16x1xf32> to vector<16x384xf32>
      %409 = arith.subf %397, %408 : vector<16x384xf32>
      %410 = arith.mulf %409, %409 : vector<16x384xf32>
      %cst_131 = arith.constant dense<0.000000e+00> : vector<16xf32>
      %411 = vector.multi_reduction <add>, %410, %cst_131 [1] : vector<16x384xf32> to vector<16xf32>
      %412 = vector.shape_cast %411 : vector<16xf32> to vector<16x1xf32>
      %cst_132 = arith.constant 3.840000e+02 : f32
      %413 = vector.broadcast %cst_132 : f32 to vector<16x1xf32>
      %414 = arith.divf %412, %413 : vector<16x1xf32>
      %415 = vector.broadcast %407 : vector<16x1xf32> to vector<16x384xf32>
      %416 = arith.subf %397, %415 : vector<16x384xf32>
      %cst_133 = arith.constant 9.99999974E-6 : f32
      %417 = vector.broadcast %cst_133 : f32 to vector<16x1xf32>
      %418 = arith.addf %414, %417 : vector<16x1xf32>
      %419 = math.rsqrt %418 : vector<16x1xf32>
      %420 = vector.broadcast %419 : vector<16x1xf32> to vector<16x384xf32>
      %421 = arith.mulf %416, %420 : vector<16x384xf32>
      %422 = vector.broadcast %402 : vector<1x384xf32> to vector<16x384xf32>
      %423 = arith.mulf %421, %422 : vector<16x384xf32>
      %424 = vector.broadcast %403 : vector<1x384xf32> to vector<16x384xf32>
      %425 = arith.addf %423, %424 : vector<16x384xf32>
      %c0_134 = arith.constant 0 : index
      %c0_135 = arith.constant 0 : index
      %426 = vector.load %arg15[%c0_134, %c0_135] : memref<384x1536xbf16, #tpu.memory_space<vmem>>, vector<384x1536xbf16>
      %c0_136 = arith.constant 0 : index
      %c0_137 = arith.constant 0 : index
      %427 = vector.load %arg16[%c0_136, %c0_137] : memref<1x1536xf32, #tpu.memory_space<vmem>>, vector<1x1536xf32>
      %c0_138 = arith.constant 0 : index
      %c0_139 = arith.constant 0 : index
      %428 = vector.load %arg17[%c0_138, %c0_139] : memref<1536x384xbf16, #tpu.memory_space<vmem>>, vector<1536x384xbf16>
      %c0_140 = arith.constant 0 : index
      %c0_141 = arith.constant 0 : index
      %429 = vector.load %arg18[%c0_140, %c0_141] : memref<1x384xf32, #tpu.memory_space<vmem>>, vector<1x384xf32>
      %430 = arith.truncf %425 : vector<16x384xf32> to vector<16x384xbf16>
      %cst_142 = arith.constant dense<0.000000e+00> : vector<16x1536xf32>
      %431 = tpu.matmul %430, %426, %cst_142 {dimension_numbers = #tpu.dot_dimension_numbers<[1], [0], [0], [1], [0, 0, 1, 1], [], []>} : vector<16x384xbf16>, vector<384x1536xbf16>, vector<16x1536xf32> -> vector<16x1536xf32>
      %432 = vector.broadcast %427 : vector<1x1536xf32> to vector<16x1536xf32>
      %433 = arith.addf %431, %432 : vector<16x1536xf32>
      %cst_143 = arith.constant 0.000000e+00 : f32
      %434 = vector.broadcast %cst_143 : f32 to vector<16x1536xf32>
      %435 = arith.maximumf %433, %434 : vector<16x1536xf32>
      %436 = arith.truncf %435 : vector<16x1536xf32> to vector<16x1536xbf16>
      %cst_144 = arith.constant dense<0.000000e+00> : vector<16x384xf32>
      %437 = tpu.matmul %436, %428, %cst_144 {dimension_numbers = #tpu.dot_dimension_numbers<[1], [0], [0], [1], [0, 0, 1, 1], [], []>} : vector<16x1536xbf16>, vector<1536x384xbf16>, vector<16x384xf32> -> vector<16x384xf32>
      %438 = vector.broadcast %429 : vector<1x384xf32> to vector<16x384xf32>
      %439 = arith.addf %437, %438 : vector<16x384xf32>
      %c0_145 = arith.constant 0 : index
      %c0_146 = arith.constant 0 : index
      %440 = vector.load %arg19[%c0_145, %c0_146] : memref<384x128xbf16, #tpu.memory_space<vmem>>, vector<384x128xbf16>
      %441 = arith.truncf %439 : vector<16x384xf32> to vector<16x384xbf16>
      %cst_147 = arith.constant dense<0.000000e+00> : vector<16x128xf32>
      %442 = tpu.matmul %441, %440, %cst_147 {dimension_numbers = #tpu.dot_dimension_numbers<[1], [0], [0], [1], [0, 0, 1, 1], [], []>} : vector<16x384xbf16>, vector<384x128xbf16>, vector<16x128xf32> -> vector<16x128xf32>
      %c0_148 = arith.constant 0 : index
      %c0_149 = arith.constant 0 : index
      %443 = vector.load %arg20[%c0_148, %c0_149] : memref<1x128xf32, #tpu.memory_space<vmem>>, vector<1x128xf32>
      %444 = vector.broadcast %443 : vector<1x128xf32> to vector<16x128xf32>
      %445 = arith.addf %442, %444 : vector<16x128xf32>
      %c0_150 = arith.constant 0 : index
      %c0_151 = arith.constant 0 : index
      %446 = vector.load %arg21[%c0_150, %c0_151] : memref<16x128xf32, #tpu.memory_space<vmem>>, vector<16x128xf32>
      tpu.vector_store %arg21[%c0_150, %c0_151], %445 {strides = array<i32>} : memref<16x128xf32, #tpu.memory_space<vmem>>, vector<16x128xf32>,
    } else {
    }
    return
  }
  func.func @transform_0(%arg0: i32) -> (i32, i32) {
    %c0_i32 = arith.constant 0 : i32
    %c0_i32_0 = arith.constant 0 : i32
    %c0_i32_1 = arith.constant 0 : i32
    return %c0_i32, %c0_i32_0 : i32, i32
  }
  func.func @transform_1(%arg0: i32) -> (i32, i32, i32) {
    %c0_i32 = arith.constant 0 : i32
    %c0_i32_0 = arith.constant 0 : i32
    %c0_i32_1 = arith.constant 0 : i32
    return %arg0, %c0_i32, %c0_i32_0 : i32, i32, i32
  }
  func.func @transform_2(%arg0: i32) -> (i32, i32, i32) {
    %c0_i32 = arith.constant 0 : i32
    %c0_i32_0 = arith.constant 0 : i32
    %c0_i32_1 = arith.constant 0 : i32
    return %arg0, %c0_i32, %c0_i32_0 : i32, i32, i32
  }
  func.func @transform_3(%arg0: i32) -> (i32, i32, i32) {
    %c0_i32 = arith.constant 0 : i32
    %c0_i32_0 = arith.constant 0 : i32
    %c0_i32_1 = arith.constant 0 : i32
    return %arg0, %c0_i32, %c0_i32_0 : i32, i32, i32
  }
  func.func @transform_4(%arg0: i32) -> (i32, i32, i32) {
    %c0_i32 = arith.constant 0 : i32
    %c0_i32_0 = arith.constant 0 : i32
    %c0_i32_1 = arith.constant 0 : i32
    return %arg0, %c0_i32, %c0_i32_0 : i32, i32, i32
  }
  func.func @transform_5(%arg0: i32) -> (i32, i32, i32) {
    %c0_i32 = arith.constant 0 : i32
    %c0_i32_0 = arith.constant 0 : i32
    %c0_i32_1 = arith.constant 0 : i32
    return %arg0, %c0_i32, %c0_i32_0 : i32, i32, i32
  }
  func.func @transform_6(%arg0: i32) -> (i32, i32, i32) {
    %c0_i32 = arith.constant 0 : i32
    %c0_i32_0 = arith.constant 0 : i32
    %c0_i32_1 = arith.constant 0 : i32
    return %arg0, %c0_i32, %c0_i32_0 : i32, i32, i32
  }
  func.func @transform_7(%arg0: i32) -> (i32, i32, i32) {
    %c0_i32 = arith.constant 0 : i32
    %c0_i32_0 = arith.constant 0 : i32
    %c0_i32_1 = arith.constant 0 : i32
    return %arg0, %c0_i32, %c0_i32_0 : i32, i32, i32
  }
  func.func @transform_8(%arg0: i32) -> (i32, i32, i32) {
    %c0_i32 = arith.constant 0 : i32
    %c0_i32_0 = arith.constant 0 : i32
    %c0_i32_1 = arith.constant 0 : i32
    return %arg0, %c0_i32, %c0_i32_0 : i32, i32, i32
  }
  func.func @transform_9(%arg0: i32) -> (i32, i32, i32) {
    %c0_i32 = arith.constant 0 : i32
    %c0_i32_0 = arith.constant 0 : i32
    %c0_i32_1 = arith.constant 0 : i32
    return %arg0, %c0_i32, %c0_i32_0 : i32, i32, i32
  }
  func.func @transform_10(%arg0: i32) -> (i32, i32, i32) {
    %c0_i32 = arith.constant 0 : i32
    %c0_i32_0 = arith.constant 0 : i32
    %c0_i32_1 = arith.constant 0 : i32
    return %arg0, %c0_i32, %c0_i32_0 : i32, i32, i32
  }
  func.func @transform_11(%arg0: i32) -> (i32, i32, i32) {
    %c0_i32 = arith.constant 0 : i32
    %c0_i32_0 = arith.constant 0 : i32
    %c0_i32_1 = arith.constant 0 : i32
    return %arg0, %c0_i32, %c0_i32_0 : i32, i32, i32
  }
  func.func @transform_12(%arg0: i32) -> (i32, i32) {
    %c0_i32 = arith.constant 0 : i32
    %c0_i32_0 = arith.constant 0 : i32
    %c0_i32_1 = arith.constant 0 : i32
    return %c0_i32, %c0_i32_0 : i32, i32
  }
  func.func @transform_13(%arg0: i32) -> (i32, i32) {
    %c0_i32 = arith.constant 0 : i32
    %c0_i32_0 = arith.constant 0 : i32
    %c0_i32_1 = arith.constant 0 : i32
    return %c0_i32, %c0_i32_0 : i32, i32
  }
  func.func @transform_14(%arg0: i32) -> (i32, i32) {
    %c0_i32 = arith.constant 0 : i32
    %c0_i32_0 = arith.constant 0 : i32
    %c0_i32_1 = arith.constant 0 : i32
    return %c0_i32, %c0_i32_0 : i32, i32
  }
  func.func @transform_15(%arg0: i32) -> (i32, i32) {
    %c0_i32 = arith.constant 0 : i32
    %c0_i32_0 = arith.constant 0 : i32
    %c0_i32_1 = arith.constant 0 : i32
    return %c0_i32, %c0_i32_0 : i32, i32
  }
  func.func @transform_16(%arg0: i32) -> (i32, i32) {
    %c0_i32 = arith.constant 0 : i32
    %c0_i32_0 = arith.constant 0 : i32
    %c0_i32_1 = arith.constant 0 : i32
    return %c0_i32, %c0_i32_0 : i32, i32
  }
  func.func @transform_17(%arg0: i32) -> (i32, i32) {
    %c0_i32 = arith.constant 0 : i32
    %c0_i32_0 = arith.constant 0 : i32
    %c0_i32_1 = arith.constant 0 : i32
    return %c0_i32, %c0_i32_0 : i32, i32
  }
  func.func @transform_18(%arg0: i32) -> (i32, i32) {
    %c0_i32 = arith.constant 0 : i32
    %c0_i32_0 = arith.constant 0 : i32
    %c0_i32_1 = arith.constant 0 : i32
    return %c0_i32, %c0_i32_0 : i32, i32
  }
  func.func @transform_19(%arg0: i32) -> (i32, i32) {
    %c0_i32 = arith.constant 0 : i32
    %c0_i32_0 = arith.constant 0 : i32
    %c0_i32_1 = arith.constant 0 : i32
    return %c0_i32, %c0_i32_0 : i32, i32
  }
  func.func @transform_20(%arg0: i32) -> (i32, i32) {
    %c0_i32 = arith.constant 0 : i32
    %c0_i32_0 = arith.constant 0 : i32
    %c0_i32_1 = arith.constant 0 : i32
    return %c0_i32, %c0_i32_0 : i32, i32
  }
}

</mosaic_0001>

<bundles_post_ra>
// kernel: gpt_forward.1
= control target key start
LH: loop header
LB: loop body
LE: loop exit
PB: predicated region body
PF: predicated region fallthrough
CT: control target
= control target key end

     0   :  { %s24806_s0 = inlined_call_operand.vmem [shape: f32[16,384], index: 0, kind: input, shape index: {}]   ;;  %s24807_s1 = inlined_call_operand.hbm [shape: f32[6,1,384], index: 1, kind: input, shape index: {}]   ;;  %s24808_s2 = inlined_call_operand.hbm [shape: f32[6,1,384], index: 2, kind: input, shape index: {}]   ;;  %s24809_s3 = inlined_call_operand.hbm [shape: bf16[6,384,1152], index: 3, kind: input, shape index: {}]   ;;  %s24810_s4 = inlined_call_operand.hbm [shape: bf16[6,384,384], index: 4, kind: input, shape index: {}]   ;;  %s24811_s5 = inlined_call_operand.hbm [shape: f32[6,1,384], index: 5, kind: input, shape index: {}]   ;;  %s24812_s6 = inlined_call_operand.hbm [shape: f32[6,1,384], index: 6, kind: input, shape index: {}]   ;;  %s24813_s7 = inlined_call_operand.hbm [shape: f32[6,1,384], index: 7, kind: input, shape index: {}]   ;;  %s24814_s8 = inlined_call_operand.hbm [shape: bf16[6,384,1536], index: 8, kind: input, shape index: {}]   ;;  %s24815_s9 = inlined_call_operand.hbm [shape: f32[6,1,1536], index: 9, kind: input, shape index: {}]   ;;  %s24816_s10 = inlined_call_operand.hbm [shape: bf16[6,1536,384], index: 10, kind: input, shape index: {}]   ;;  %s24817_s11 = inlined_call_operand.hbm [shape: f32[6,1,384], index: 11, kind: input, shape index: {}]   ;;  %s24818_s12 = inlined_call_operand.hbm [shape: f32[1,384], index: 12, kind: input, shape index: {}]   ;;  %s24819_s13 = inlined_call_operand.hbm [shape: f32[1,384], index: 13, kind: input, shape index: {}]   ;;  %s24820_s14 = inlined_call_operand.hbm [shape: bf16[384,1536], index: 14, kind: input, shape index: {}]   ;;  %s24821_s15 = inlined_call_operand.hbm [shape: f32[1,1536], index: 15, kind: input, shape index: {}]   ;;  %s24822_s16 = inlined_call_operand.hbm [shape: bf16[1536,384], index: 16, kind: input, shape index: {}]   ;;  %s24823_s17 = inlined_call_operand.hbm [shape: f32[1,384], index: 17, kind: input, shape index: {}]   ;;  %s24824_s18 = inlined_call_operand.hbm [shape: bf16[384,128], index: 18, kind: input, shape index: {}]   ;;  %s24825_s19 = inlined_call_operand.hbm [shape: f32[1,128], index: 19, kind: input, shape index: {}]   ;;  %s24826_s20 = inlined_call_operand.hbm [shape: f32[16,128], index: 20, kind: output, shape index: {}]  }
   0x1   :  { %24917 = sst [smem:[#allocation87_spill]] %s24806_s0 }
   0x2   :  { %24918 = sst [smem:[#allocation88_spill]] %s24807_s1 }
   0x3   :  { %24919 = sst [smem:[#allocation89_spill]] %s24808_s2 }
   0x4   :  { %24920 = sst [smem:[#allocation90_spill]] %s24809_s3 }
   0x5   :  { %24921 = sst [smem:[#allocation91_spill]] %s24810_s4 }
   0x6   :  { %24922 = sst [smem:[#allocation92_spill]] %s24811_s5 }
   0x7   :  { %24923 = sst [smem:[#allocation93_spill]] %s24812_s6 }
   0x8   :  { %24924 = sst [smem:[#allocation94_spill]] %s24813_s7 }
   0x9   :  { %24925 = sst [smem:[#allocation95_spill]] %s24814_s8 }
   0xa   :  { %24926 = sst [smem:[#allocation96_spill]] %s24815_s9 }
   0xb   :  { %24927 = sst [smem:[#allocation97_spill]] %s24817_s11 }
   0xc   :  { %24928 = sst [smem:[#allocation98_spill]] %s24818_s12 }
   0xd   :  { %24929 = sst [smem:[#allocation99_spill]] %s24820_s14 }
   0xe   :  { %24930 = sst [smem:[#allocation100_spill]] %s24822_s16 }
   0xf   :  { %24931 = sst [smem:[#allocation101_spill]] %s24824_s18 }
  0x10   :  { %24932 = sst [smem:[#allocation102_spill]] %s24826_s20 }
  0x11   :  { %25 = vsyncpa [#allocation4], 0 }
  0x12   :  { %27 = vsyncpa [#allocation4 + $0x1], 0 }
  0x13   :  { %28 = vsyncpa [#allocation7], 0 }
  0x14   :  { %30 = vsyncpa [#allocation7 + $0x1], 0 }
  0x15   :  { %31 = vsyncpa [#allocation10], 0 }
  0x16   :  { %33 = vsyncpa [#allocation10 + $0x1], 0 }
  0x17   :  { %34 = vsyncpa [#allocation13], 0 }
  0x18   :  { %36 = vsyncpa [#allocation13 + $0x1], 0 }
  0x19   :  { %37 = vsyncpa [#allocation16], 0 }
  0x1a   :  { %39 = vsyncpa [#allocation16 + $0x1], 0 }
  0x1b   :  { %40 = vsyncpa [#allocation19], 0 }
  0x1c   :  { %42 = vsyncpa [#allocation19 + $0x1], 0 }
  0x1d   :  { %43 = vsyncpa [#allocation22], 0 }
  0x1e   :  { %44 = vsyncpa [#allocation25], 0 }
  0x1f   :  { %45 = vsyncpa [#allocation28], 0 }
  0x20   :  { %46 = vsyncpa [#allocation31], 0 }
  0x21   :  { %47 = vsyncpa [#allocation5], 0  ;;  %s21916_s1 = smov 0   ;;  %s21918_s22 = smov 0  }
  0x22   :  { %s21920_s23 = smov 0   ;;  %s21922_s24 = smov 0  }
  0x23 LB: > { %24933 = sst [smem:[#allocation45_spill]] %s21764_s22  ;;  %s21774_s2 = smov [#allocation21]   ;;  %s21772_s24 = sphi %s21922_s24, %s25083_s24   ;;  %s21768_s23 = sphi %s21920_s23, %s25086_s23   ;;  %s21764_s22 = sphi %s21918_s22, %s25085_s22   ;;  %s21760_s1 = sphi %s21916_s1, %s25084_s1  }
  0x24   : > { %24934 = sst [smem:[#allocation46_spill]] %s21768_s23  ;;  %s570_s25 = sshll.u32 %s21774_s2, 4  ;;  %s571_s25 = int_to_ptr.vmem [resolvable:$true] %s570_s25 }
  0x25   : > { %s21937_s3 = sadd.s32 4294967295, %s21772_s24   ;;  %p16296_p0 = scmp.ge.s32.totalorder %s21772_s24, 1 }
  0x26   : > { %24935 = sst [smem:[#allocation47_spill]] %s21937_s3  ;;  %p24835_p1 = scmp.eq.s32.totalorder %s21937_s3, 0 }
  0x27   : > { %p554_p2 = scmp.lt.s32.totalorder %s21772_s24, 7  ;;  %s21775_s27 = smov [#allocation24]  }
  0x28   : > { %s591_s28 = sshll.u32 %s21775_s27, 4  ;;  %s21776_s29 = smov [#allocation27]   ;;  %s21949_s28 = int_to_ptr.vmem [resolvable:$true] %s591_s28 }
  0x29   : > { %p21943_p4 = pnand %p16296_p0, %p554_p2  ;;  %s615_s30 = sshll.u32 %s21776_s29, 4  ;;  %s21957_s30 = int_to_ptr.vmem [resolvable:$true] %s615_s30 }
  0x2a   : > { %s24939_s12 = sld [smem:[#allocation98_spill]] }
  0x2b   : > { %s24936_s26 = scalar_select %p21943_p4, 1, 0 }
  0x2c   : > { %p18852_p5 = pneg %p21943_p4 }
  0x2d   : > { %24937 = sst [smem:[#allocation48_spill]] %s24936_s26 }
  0x2e   : > { %p21953_p6 = pnand %p18852_p5, %p24835_p1 }
  0x30   : > { %s24938_s4 = scalar_select %p21953_p6, 1, 0 }
  0x31   : > { %s21118_s2 = scalar_lea.hbm %s24939_s12, 48  ;;  %p21967_p8 = pneg %p21953_p6 }
  0x32   : > { %p21119_p7 = scmp.ne.s32.totalorder %s24939_s12, %s21118_s2  ;;  %p21125_p11 = scmp.lt.u32.totalorder %s21118_s2, %s24939_s12 }
  0x33   : > { %s24940_s27 = scalar_select %p21967_p8, 1, 0 }
  0x34   : > { %p21121_p9 = pnand %p21967_p8, %p21119_p7 }
  0x36   : > { %p21122_p10 = pneg %p21121_p9 }
  0x38   : > { %p21127_p12 = pnand %p21125_p11, %p21122_p10 }
  0x3a   : > { %21130 = shalt.err (!%p21127_p12)
}
  0x3b   : > { %s21131_s0 = scalar_lea.vmem %s571_s25, 48  ;;  %s21138_s20 = scalar_lea.vmem %s571_s25, 64 }
  0x3c   : > { %p21132_p13 = scmp.ne.s32.totalorder %s571_s25, %s21131_s0  ;;  %p21139_p5 = scmp.lt.s32.totalorder %s571_s25, %s571_s25 }
  0x3d   : > { %p21140_p3 = scmp.lt.s32.totalorder %s21138_s20, %s21131_s0 }
  0x3e   : > { %p21134_p0 = pnand %p21132_p13, %p21967_p8 }
  0x3f   : > { %p21141_p1 = por %p21140_p3, %p21139_p5 }
  0x40   : > { %p21135_p2 = pneg %p21134_p0 }
  0x42   : > { %p21142_p4 = pnand %p21141_p1, %p21135_p2 }
  0x44   : > { %21145 = shalt.err (!%p21142_p4)
}
  0x45   : > { %18855 = dma.hbm_to_vmem [thread:$0]  (!%p21953_p6), %s24939_s12, 48, %s571_s25, [#allocation22]  }
  0x46   : > { %s24941_s14 = sld [smem:[#allocation99_spill]] }
  0x4c   : > { %s21146_s29 = scalar_lea.hbm %s24941_s14, 36864 }
  0x4d   : > { %p21147_p7 = scmp.ne.s32.totalorder %s24941_s14, %s21146_s29  ;;  %p21153_p1 = scmp.lt.u32.totalorder %s21146_s29, %s24941_s14 }
  0x4f   : > { %p21149_p9 = pnand %p21147_p7, %p21967_p8 }
  0x51   : > { %p21150_p3 = pneg %p21149_p9 }
  0x53   : > { %p21155_p4 = pnand %p21153_p1, %p21150_p3 }
  0x55   : > { %21158 = shalt.err (!%p21155_p4)
}
  0x56   : > { %s21159_s25 = scalar_lea.vmem %s21949_s28, 36864  ;;  %p21167_p13 = scmp.lt.s32.totalorder %s21949_s28, %s21949_s28 }
  0x57   : > { %p21160_p10 = scmp.ne.s32.totalorder %s21949_s28, %s21159_s25  ;;  %p21168_p0 = scmp.lt.s32.totalorder %s21159_s25, %s21159_s25 }
  0x59   : > { %p21162_p11 = pnand %p21160_p10, %p21967_p8  ;;  %p21169_p2 = por %p21168_p0, %p21167_p13 }
  0x5b   : > { %p21163_p12 = pneg %p21162_p11 }
  0x5d   : > { %p21170_p5 = pnand %p21169_p2, %p21163_p12 }
  0x5f   : > { %21173 = shalt.err (!%p21170_p5)
}
  0x60   : > { %s24839_s7 = smov 768   ;;  %s24840_s9 = smov 48  }
  0x61   : > { %18861 = dma.hbm_to_vmem [thread:$0]  (!%p21953_p6), %s24941_s14, 36864, %s21949_s28, [#allocation25], %s24839_s7, %s24839_s7, %s24840_s9  }
  0x62   : > { %s24942_s16 = sld [smem:[#allocation100_spill]] }
  0x68   : > { %s21174_s29 = scalar_lea.hbm %s24942_s16, 36864 }
  0x69   : > { %p21175_p7 = scmp.ne.s32.totalorder %s24942_s16, %s21174_s29  ;;  %p21181_p1 = scmp.lt.u32.totalorder %s21174_s29, %s24942_s16 }
  0x6b   : > { %p21177_p9 = pnand %p21175_p7, %p21967_p8 }
  0x6d   : > { %p21178_p3 = pneg %p21177_p9 }
  0x6f   : > { %p21183_p4 = pnand %p21181_p1, %p21178_p3 }
  0x71   : > { %21186 = shalt.err (!%p21183_p4)
}
  0x72   : > { %s21187_s28 = scalar_lea.vmem %s21957_s30, 36864  ;;  %p21195_p13 = scmp.lt.s32.totalorder %s21957_s30, %s21957_s30 }
  0x73   : > { %p21188_p10 = scmp.ne.s32.totalorder %s21957_s30, %s21187_s28  ;;  %p21196_p0 = scmp.lt.s32.totalorder %s21187_s28, %s21187_s28 }
  0x75   : > { %p21190_p11 = pnand %p21188_p10, %p21967_p8  ;;  %p21197_p2 = por %p21196_p0, %p21195_p13 }
  0x77   : > { %p21191_p12 = pneg %p21190_p11 }
  0x79   : > { %p21198_p5 = pnand %p21197_p2, %p21191_p12 }
  0x7b   : > { %21201 = shalt.err (!%p21198_p5)
}
  0x7c   : > { %s24841_s26 = smov 192   ;;  %s24843_s12 = smov 12  }
  0x7d   : > { %18867 = dma.hbm_to_vmem [thread:$0]  (!%p21953_p6), %s24942_s16, 36864, %s21957_s30, [#allocation28], %s24841_s26, %s24841_s26, %s24843_s12  }
  0x7e   : > { %s21781_s2 = smov [#allocation30]   ;;  %s24943_s18 = sld [smem:[#allocation101_spill]] }
  0x7f   : > { %s639_s29 = sshll.u32 %s21781_s2, 4  ;;  %s640_s29 = int_to_ptr.vmem [resolvable:$true] %s639_s29 }
  0x84   : > { %s21202_s25 = scalar_lea.hbm %s24943_s18, 3072 }
  0x85   : > { %p21203_p7 = scmp.ne.s32.totalorder %s24943_s18, %s21202_s25  ;;  %p21209_p1 = scmp.lt.u32.totalorder %s21202_s25, %s24943_s18 }
  0x87   : > { %p21205_p9 = pnand %p21203_p7, %p21967_p8 }
  0x89   : > { %p21206_p3 = pneg %p21205_p9 }
  0x8b   : > { %p21211_p4 = pnand %p21209_p1, %p21206_p3 }
  0x8d   : > { %21214 = shalt.err (!%p21211_p4)
}
  0x8e   : > { %s21215_s30 = scalar_lea.vmem %s640_s29, 3072  ;;  %p21223_p13 = scmp.lt.s32.totalorder %s640_s29, %s640_s29 }
  0x8f   : > { %p21216_p10 = scmp.ne.s32.totalorder %s640_s29, %s21215_s30  ;;  %p21224_p0 = scmp.lt.s32.totalorder %s21215_s30, %s21215_s30 }
  0x91   : > { %p21218_p11 = pnand %p21216_p10, %p21967_p8  ;;  %p21225_p2 = por %p21224_p0, %p21223_p13 }
  0x93   : > { %p21219_p12 = pneg %p21218_p11 }
  0x95   : > { %p21226_p5 = pnand %p21225_p2, %p21219_p12 }
  0x97   : > { %21229 = shalt.err (!%p21226_p5)
}
  0x98   : > { %s21782_s7 = smov 64   ;;  %s21783_s14 = smov 4  }
  0x99   : > { %18873 = dma.hbm_to_vmem [thread:$0]  (!%p21953_p6), %s24943_s18, 3072, %s640_s29, [#allocation31], %s21782_s7, %s21782_s7, %s21783_s14  }
  0x9a   : > { %s22054_s11 = sadd.s32 1, %s21772_s24   ;;  %s81_s2 = sadd.s32 1, %s21768_s23 }
  0x9b   : > { %24944 = sst [smem:[#allocation49_spill]] %s22054_s11  ;;  %s78_s0 = ssub.s32 %s21772_s24, %s22054_s11 }
  0x9c   : > { %p88_p7 = scmp.ne.s32.totalorder %s21768_s23, %s21764_s22  ;;  %p79_p9 = scmp.eq.s32.totalorder %s78_s0, 0 }
  0x9d   : > { %p89_p3 = scmp.eq.s32.totalorder %s21772_s24, 0  ;;  %p94_p1 = scmp.ne.s32.totalorder %s21764_s22, %s21760_s1 }
  0x9e   : > { %p18919_p4 = scmp.lt.s32.totalorder %s21772_s24, 6  ;;  %p24946_p11 = scmp.eq.s32.totalorder %s21937_s3, 0 }
  0x9f   : > { %s22066_s20 = scalar_select %p79_p9, %s21768_s23, %s81_s2  }
  0xa0   : > { %p90_p10 = por %p89_p3, %p88_p7  ;;  %p22070_p12 = por %p24946_p11, %p94_p1 }
  0xa1   : > { %24945 = sst [smem:[#allocation50_spill]] %s22066_s20  ;;  %s22075_s29 = sand.u32 1, %s21768_s23  }
  0xa2   : > { %s24947_s25 = scalar_select %p22070_p12, 1, 0 }
  0xa3   : > { %s22078_s28 = smul.u32 48, %s21772_s24  ;;  %p22083_p13 = pnand %p18919_p4, %p90_p10 }
  0xa4   : > { %24948 = sst [smem:[#allocation51_spill]] %s24947_s25  ;;  %s22081_s30 = smul.u32 3, %s22075_s29 }
  0xa5   : > { %s24949_s1 = scalar_select %p22083_p13, 1, 0 }
  0xa6   : > { %s22088_s7 = sand.u32 1, %s21772_s24   ;;  %s24950_s21 = sld [smem:[#allocation89_spill]] }
  0xa7   : > { %s687_s0 = scalar_lea.vmem [#allocation6], %s22081_s30  ;;  %s24859_s18 = scalar_lea.sflag [#allocation7], %s22088_s7 }
  0xa8   : > { %s695_s26 = sshll.u32 %s687_s0, 4  ;;  %p22106_p2 = pneg %p22083_p13  ;;  %s22098_s26 = int_to_ptr.vmem [resolvable:$true] %s695_s26 }
  0xaa   : > { %s24951_s23 = scalar_select %p22106_p2, 1, 0 }
  0xac   : > { %s22094_s2 = scalar_lea.hbm %s24950_s21, %s22078_s28  ;;  %s21235_s0 = scalar_lea.hbm %s24950_s21, 288 }
  0xad   : > { %s21230_s20 = scalar_lea.hbm %s22094_s2, 48  ;;  %p21236_p9 = scmp.lt.u32.totalorder %s22094_s2, %s24950_s21 }
  0xae   : > { %p21231_p0 = scmp.ne.s32.totalorder %s22094_s2, %s21230_s20  ;;  %p21237_p3 = scmp.lt.u32.totalorder %s21235_s0, %s21230_s20 }
  0xaf   : > { %p21239_p4 = scmp.lt.u32.totalorder %s21230_s20, %s22094_s2 }
  0xb0   : > { %p21233_p5 = pnand %p22106_p2, %p21231_p0  ;;  %p21238_p1 = por %p21237_p3, %p21236_p9 }
  0xb2   : > { %p21234_p7 = pneg %p21233_p5  ;;  %p21240_p10 = por %p21239_p4, %p21238_p1 }
  0xb4   : > { %p21241_p11 = pnand %p21240_p10, %p21234_p7 }
  0xb6   : > { %21244 = shalt.err (!%p21241_p11)
}
  0xb7   : > { %s21245_s16 = scalar_lea.vmem %s22098_s26, 48  ;;  %s21784_s14 = smov [#allocation6]  }
  0xb8   : > { %p21246_p0 = scmp.ne.s32.totalorder %s22098_s26, %s21245_s16  ;;  %s21250_s9 = sshll.u32 %s21784_s14, 4  ;;  %s21251_s9 = int_to_ptr.vmem [resolvable:$false] %s21250_s9 }
  0xb9   : > { %s21252_s12 = scalar_lea.vmem %s21251_s9, 96  ;;  %p21253_p6 = scmp.lt.s32.totalorder %s22098_s26, %s21251_s9 }
  0xba   : > { %p21248_p5 = pnand %p21246_p0, %p22106_p2  ;;  %p21254_p8 = scmp.lt.s32.totalorder %s21252_s12, %s21245_s16 }
  0xbc   : > { %p21249_p12 = pneg %p21248_p5  ;;  %p21255_p9 = por %p21254_p8, %p21253_p6 }
  0xbe   : > { %p21256_p3 = pnand %p21255_p9, %p21249_p12 }
  0xc0   : > { %21259 = shalt.err (!%p21256_p3)
}
  0xc1   : > { %18883 = dma.hbm_to_vmem [thread:$0]  (!%p22083_p13), %s22094_s2, 48, %s22098_s26, %s24859_s18  }
  0xc2   : > { %s24952_s11 = smul.u32 9216, %s21772_s24  ;;  %s24953_s14 = sld [smem:[#allocation91_spill]] }
  0xc3   : > { %s24954_s16 = smul.u32 576, %s22075_s29  ;;  %s24861_s3 = scalar_lea.sflag [#allocation10], %s22088_s7 }
  0xc5   : > { %s727_s12 = scalar_lea.vmem [#allocation9], %s24954_s16 }
  0xc6   : > { %s734_s21 = sshll.u32 %s727_s12, 4  ;;  %s22140_s21 = int_to_ptr.vmem [resolvable:$true] %s734_s21 }
  0xc8   : > { %s22136_s9 = scalar_lea.hbm %s24953_s14, %s24952_s11  ;;  %s21265_s11 = scalar_lea.hbm %s24953_s14, 55296 }
  0xc9   : > { %s21260_s25 = scalar_lea.hbm %s22136_s9, 9216  ;;  %p21266_p7 = scmp.lt.u32.totalorder %s22136_s9, %s24953_s14 }
  0xca   : > { %p21261_p6 = scmp.ne.s32.totalorder %s22136_s9, %s21260_s25  ;;  %p21267_p1 = scmp.lt.u32.totalorder %s21265_s11, %s21260_s25 }
  0xcb   : > { %p21269_p10 = scmp.lt.u32.totalorder %s21260_s25, %s22136_s9 }
  0xcc   : > { %p21263_p8 = pnand %p21261_p6, %p22106_p2  ;;  %p21268_p4 = por %p21267_p1, %p21266_p7 }
  0xce   : > { %p21264_p12 = pneg %p21263_p8  ;;  %p21270_p11 = por %p21269_p10, %p21268_p4 }
  0xd0   : > { %p21271_p0 = pnand %p21270_p11, %p21264_p12 }
  0xd2   : > { %21274 = shalt.err (!%p21271_p0)
}
  0xd3   : > { %s21275_s16 = scalar_lea.vmem %s22140_s21, 9216  ;;  %s21785_s12 = smov [#allocation9]  }
  0xd4   : > { %p21276_p5 = scmp.ne.s32.totalorder %s22140_s21, %s21275_s16  ;;  %s21280_s26 = sshll.u32 %s21785_s12, 4  ;;  %s21281_s26 = int_to_ptr.vmem [resolvable:$false] %s21280_s26 }
  0xd5   : > { %s21282_s2 = scalar_lea.vmem %s21281_s26, 18432  ;;  %p21283_p6 = scmp.lt.s32.totalorder %s22140_s21, %s21281_s26 }
  0xd6   : > { %p21278_p9 = pnand %p21276_p5, %p22106_p2  ;;  %p21284_p8 = scmp.lt.s32.totalorder %s21282_s2, %s21275_s16 }
  0xd8   : > { %p21279_p3 = pneg %p21278_p9  ;;  %p21285_p7 = por %p21284_p8, %p21283_p6 }
  0xda   : > { %p21286_p1 = pnand %p21285_p7, %p21279_p3 }
  0xdc   : > { %21289 = shalt.err (!%p21286_p1)
}
  0xdd   : > { %s24955_s25 = smov 12   ;;  %s24956_s11 = smov 192  }
  0xde   : > { %18889 = dma.hbm_to_vmem [thread:$0]  (!%p22083_p13), %s22136_s9, 9216, %s22140_s21, %s24861_s3, %s24956_s11, %s24956_s11, %s24955_s25  }
  0xdf   : > { %s24957_s6 = sld [smem:[#allocation93_spill]]  ;;  %s767_s12 = scalar_lea.vmem [#allocation12], %s22081_s30 }
  0xe0   : > { %s775_s26 = sshll.u32 %s767_s12, 4  ;;  %s776_s26 = int_to_ptr.vmem [resolvable:$true] %s775_s26 }
  0xe5   : > { %s22173_s16 = scalar_lea.hbm %s24957_s6, %s22078_s28  ;;  %s21295_s9 = scalar_lea.hbm %s24957_s6, 288 }
  0xe6   : > { %s21290_s18 = scalar_lea.hbm %s22173_s16, 48  ;;  %p21296_p11 = scmp.lt.u32.totalorder %s22173_s16, %s24957_s6 }
  0xe7   : > { %p21291_p12 = scmp.ne.s32.totalorder %s22173_s16, %s21290_s18  ;;  %p21297_p0 = scmp.lt.u32.totalorder %s21295_s9, %s21290_s18 }
  0xe8   : > { %p21299_p9 = scmp.lt.u32.totalorder %s21290_s18, %s22173_s16 }
  0xe9   : > { %p21293_p4 = pnand %p21291_p12, %p22106_p2  ;;  %p21298_p5 = por %p21297_p0, %p21296_p11 }
  0xeb   : > { %p21294_p10 = pneg %p21293_p4  ;;  %p21300_p3 = por %p21299_p9, %p21298_p5 }
  0xed   : > { %p21301_p6 = pnand %p21300_p3, %p21294_p10 }
  0xef   : > { %21304 = shalt.err (!%p21301_p6)
}
  0xf0   : > { %s21305_s12 = scalar_lea.vmem %s776_s26, 48  ;;  %s21786_s3 = smov [#allocation12]  }
  0xf1   : > { %p21306_p8 = scmp.ne.s32.totalorder %s776_s26, %s21305_s12  ;;  %s21310_s2 = sshll.u32 %s21786_s3, 4  ;;  %s21311_s2 = int_to_ptr.vmem [resolvable:$false] %s21310_s2 }
  0xf2   : > { %s21312_s14 = scalar_lea.vmem %s21311_s2, 96  ;;  %p21313_p12 = scmp.lt.s32.totalorder %s776_s26, %s21311_s2 }
  0xf3   : > { %p21308_p7 = pnand %p21306_p8, %p22106_p2  ;;  %p21314_p4 = scmp.lt.s32.totalorder %s21312_s14, %s21305_s12 }
  0xf5   : > { %p21309_p1 = pneg %p21308_p7  ;;  %p21315_p13 = por %p21314_p4, %p21313_p12 }
  0xf7   : > { %p21316_p0 = pnand %p21315_p13, %p21309_p1 }
  0xf9   : > { %21319 = shalt.err (!%p21316_p0)
}
  0xfa   : > { %p24958_p11 = scmp.ne.s32.totalorder %s24949_s1, 0  ;;  %s24959_s18 = scalar_lea.sflag [#allocation13], %s22088_s7 }
  0xfb   : > { %s24866_s21 = smul.u32 2304, %s22075_s29  ;;  %s24960_s8 = sld [smem:[#allocation95_spill]] }
  0xfc   : > { %18895 = dma.hbm_to_vmem [thread:$0]  (!%p24958_p11), %s22173_s16, 48, %s776_s26, %s24959_s18  }
  0xfd   : > { %s18782_s3 = smul.u32 36864, %s21772_s24  ;;  %s805_s0 = scalar_lea.vmem [#allocation15], %s24866_s21 }
  0xfe   : > { %s812_s12 = sshll.u32 %s805_s0, 4  ;;  %s24872_s26 = scalar_lea.sflag [#allocation16], %s22088_s7  ;;  %s22205_s12 = int_to_ptr.vmem [resolvable:$true] %s812_s12 }
  0xff   : > { %s22210_s16 = scalar_lea.hbm %s24816_s10, %s18782_s3 }
 0x101   : > { %s22201_s2 = scalar_lea.hbm %s24960_s8, %s18782_s3  ;;  %s21325_s22 = scalar_lea.hbm %s24960_s8, 221184 }
 0x102   : > { %s21320_s18 = scalar_lea.hbm %s22201_s2, 36864  ;;  %p21326_p9 = scmp.lt.u32.totalorder %s22201_s2, %s24960_s8 }
 0x103   : > { %p21321_p13 = scmp.ne.s32.totalorder %s22201_s2, %s21320_s18  ;;  %p21327_p3 = scmp.lt.u32.totalorder %s21325_s22, %s21320_s18 }
 0x104   : > { %p21329_p8 = scmp.lt.u32.totalorder %s21320_s18, %s22201_s2 }
 0x105   : > { %p21323_p10 = pnand %p21321_p13, %p22106_p2  ;;  %p21328_p6 = por %p21327_p3, %p21326_p9 }
 0x107   : > { %p21324_p5 = pneg %p21323_p10  ;;  %p21330_p7 = por %p21329_p8, %p21328_p6 }
 0x109   : > { %p21331_p1 = pnand %p21330_p7, %p21324_p5 }
 0x10b   : > { %21334 = shalt.err (!%p21331_p1)
}
 0x10c   : > { %s21335_s6 = scalar_lea.vmem %s22205_s12, 36864  ;;  %s21787_s3 = smov [#allocation15]  }
 0x10d   : > { %p21336_p12 = scmp.ne.s32.totalorder %s22205_s12, %s21335_s6  ;;  %s21340_s0 = sshll.u32 %s21787_s3, 4  ;;  %s21341_s0 = int_to_ptr.vmem [resolvable:$false] %s21340_s0 }
 0x10e   : > { %s21342_s5 = scalar_lea.vmem %s21341_s0, 73728  ;;  %p21343_p13 = scmp.lt.s32.totalorder %s22205_s12, %s21341_s0 }
 0x10f   : > { %p21338_p4 = pnand %p21336_p12, %p22106_p2  ;;  %p21344_p10 = scmp.lt.s32.totalorder %s21342_s5, %s21335_s6 }
 0x111   : > { %p21339_p0 = pneg %p21338_p4  ;;  %p21345_p9 = por %p21344_p10, %p21343_p13 }
 0x113   : > { %p21346_p3 = pnand %p21345_p9, %p21339_p0 }
 0x115   : > { %21349 = shalt.err (!%p21346_p3)
}
 0x116   : > { %s24961_s22 = smov 48   ;;  %s24962_s21 = smov 768  }
 0x117   : > { %18901 = dma.hbm_to_vmem [thread:$0]  (!%p24958_p11), %s22201_s2, 36864, %s22205_s12, %s24872_s26, %s24962_s21, %s24962_s21, %s24961_s22  }
 0x118   : > { %s24963_s14 = smul.u32 2304, %s22075_s29  ;;  %s21788_s20 = smov [#allocation23]  }
 0x119   : > { %s581_s6 = sshll.u32 %s21788_s20, 4  ;;  %s24870_s3 = scalar_lea.sflag [#allocation19], %s22088_s7  ;;  %s22243_s6 = int_to_ptr.vmem [resolvable:$true] %s581_s6 }
 0x11a   : > { %s845_s18 = scalar_lea.vmem [#allocation18], %s24963_s14  ;;  %s21350_s0 = scalar_lea.hbm %s22210_s16, 36864 }
 0x11b   : > { %s852_s9 = sshll.u32 %s845_s18, 4  ;;  %p21351_p5 = scmp.ne.s32.totalorder %s22210_s16, %s21350_s0  ;;  %s22241_s9 = int_to_ptr.vmem [resolvable:$true] %s852_s9 }
 0x11c   : > { %s21355_s2 = scalar_lea.hbm %s24816_s10, 221184  ;;  %p21356_p7 = scmp.lt.u32.totalorder %s22210_s16, %s24816_s10 }
 0x11d   : > { %p21353_p6 = pnand %p21351_p5, %p22106_p2  ;;  %p21357_p1 = scmp.lt.u32.totalorder %s21355_s2, %s21350_s0 }
 0x11e   : > { %p21359_p4 = scmp.lt.u32.totalorder %s21350_s0, %s22210_s16 }
 0x11f   : > { %p21354_p8 = pneg %p21353_p6  ;;  %p21358_p12 = por %p21357_p1, %p21356_p7 }
 0x121   : > { %p21360_p0 = por %p21359_p4, %p21358_p12 }
 0x123   : > { %p21361_p13 = pnand %p21360_p0, %p21354_p8 }
 0x125   : > { %21364 = shalt.err (!%p21361_p13)
}
 0x126   : > { %s21365_s21 = scalar_lea.vmem %s22241_s9, 36864  ;;  %s21789_s8 = smov [#allocation18]  }
 0x127   : > { %p21366_p10 = scmp.ne.s32.totalorder %s22241_s9, %s21365_s21  ;;  %s21370_s14 = sshll.u32 %s21789_s8, 4  ;;  %s21371_s14 = int_to_ptr.vmem [resolvable:$false] %s21370_s14 }
 0x128   : > { %s21372_s18 = scalar_lea.vmem %s21371_s14, 73728  ;;  %p21373_p5 = scmp.lt.s32.totalorder %s22241_s9, %s21371_s14 }
 0x129   : > { %p21368_p9 = pnand %p21366_p10, %p22106_p2  ;;  %p21374_p6 = scmp.lt.s32.totalorder %s21372_s18, %s21365_s21 }
 0x12b   : > { %p21369_p3 = pneg %p21368_p9  ;;  %p21375_p7 = por %p21374_p6, %p21373_p5 }
 0x12d   : > { %p21376_p1 = pnand %p21375_p7, %p21369_p3 }
 0x12f   : > { %21379 = shalt.err (!%p21376_p1)
}
 0x130   : > { %18907 = dma.hbm_to_vmem [thread:$0]  (!%p24958_p11), %s22210_s16, 36864, %s22241_s9, %s24870_s3, %s24956_s11, %s24956_s11, %s24955_s25  }
 0x131   : > { %s21380_s5 = scalar_lea.hbm %s24819_s13, 48  ;;  %p24964_p12 = scmp.ne.s32.totalorder %s24940_s27, 0 }
 0x132   : > { %p21381_p8 = scmp.ne.s32.totalorder %s24819_s13, %s21380_s5  ;;  %p21387_p13 = scmp.lt.u32.totalorder %s21380_s5, %s24819_s13 }
 0x134   : > { %p21383_p4 = pnand %p21381_p8, %p24964_p12 }
 0x136   : > { %p21384_p0 = pneg %p21383_p4 }
 0x138   : > { %p21389_p10 = pnand %p21387_p13, %p21384_p0 }
 0x13a   : > { %21392 = shalt.err (!%p21389_p10)
}
 0x13b   : > { %s21393_s25 = scalar_lea.vmem %s22243_s6, 48  ;;  %s21400_s11 = scalar_lea.vmem %s22243_s6, 64 }
 0x13c   : > { %p21394_p9 = scmp.ne.s32.totalorder %s22243_s6, %s21393_s25  ;;  %p21401_p6 = scmp.lt.s32.totalorder %s22243_s6, %s22243_s6 }
 0x13d   : > { %p21402_p7 = scmp.lt.s32.totalorder %s21400_s11, %s21393_s25 }
 0x13e   : > { %p21396_p3 = pnand %p21394_p9, %p24964_p12 }
 0x13f   : > { %p21403_p1 = por %p21402_p7, %p21401_p6 }
 0x140   : > { %p21397_p5 = pneg %p21396_p3 }
 0x142   : > { %p21404_p8 = pnand %p21403_p1, %p21397_p5 }
 0x144   : > { %21407 = shalt.err (!%p21404_p8)
}
 0x145   : > { %p24965_p4 = scmp.ne.s32.totalorder %s24938_s4, 0  ;;  %s21790_s8 = smov [#allocation26]  }
 0x146   : > { %s605_s14 = sshll.u32 %s21790_s8, 4  ;;  %s21791_s18 = smov [#allocation29]   ;;  %s606_s14 = int_to_ptr.vmem [resolvable:$true] %s605_s14 }
 0x147   : > { %18858 = dma.hbm_to_vmem [thread:$0]  (!%p24965_p4), %s24819_s13, 48, %s22243_s6, [#allocation22]  }
 0x148   : > { %s629_s20 = sshll.u32 %s21791_s18, 4  ;;  %s21408_s2 = scalar_lea.hbm %s24821_s15, 192  ;;  %s22296_s20 = int_to_ptr.vmem [resolvable:$true] %s629_s20 }
 0x149   : > { %p21409_p0 = scmp.ne.s32.totalorder %s24821_s15, %s21408_s2  ;;  %p21415_p9 = scmp.lt.u32.totalorder %s21408_s2, %s24821_s15 }
 0x14b   : > { %p21411_p13 = pnand %p21409_p0, %p24964_p12 }
 0x14d   : > { %p21412_p10 = pneg %p21411_p13 }
 0x14f   : > { %p21417_p3 = pnand %p21415_p9, %p21412_p10 }
 0x151   : > { %21420 = shalt.err (!%p21417_p3)
}
 0x152   : > { %s21421_s25 = scalar_lea.vmem %s606_s14, 192  ;;  %p21429_p1 = scmp.lt.s32.totalorder %s606_s14, %s606_s14 }
 0x153   : > { %p21422_p5 = scmp.ne.s32.totalorder %s606_s14, %s21421_s25  ;;  %p21430_p8 = scmp.lt.s32.totalorder %s21421_s25, %s21421_s25 }
 0x155   : > { %p21424_p6 = pnand %p21422_p5, %p24964_p12  ;;  %p21431_p11 = por %p21430_p8, %p21429_p1 }
 0x157   : > { %p21425_p7 = pneg %p21424_p6 }
 0x159   : > { %p21432_p2 = pnand %p21431_p11, %p21425_p7 }
 0x15b   : > { %21435 = shalt.err (!%p21432_p2)
}
 0x15c   : > { %18864 = dma.hbm_to_vmem [thread:$0]  (!%p24965_p4), %s24821_s15, 192, %s606_s14, [#allocation25]  }
 0x15d   : > { %s21436_s18 = scalar_lea.hbm %s24823_s17, 48 }
 0x15e   : > { %p21437_p0 = scmp.ne.s32.totalorder %s24823_s17, %s21436_s18  ;;  %p21443_p2 = scmp.lt.u32.totalorder %s21436_s18, %s24823_s17 }
 0x160   : > { %p21439_p13 = pnand %p21437_p0, %p24964_p12 }
 0x162   : > { %p21440_p10 = pneg %p21439_p13 }
 0x164   : > { %p21445_p11 = pnand %p21443_p2, %p21440_p10 }
 0x166   : > { %21448 = shalt.err (!%p21445_p11)
}
 0x167   : > { %s21449_s14 = scalar_lea.vmem %s22296_s20, 48  ;;  %s21456_s22 = scalar_lea.vmem %s22296_s20, 64 }
 0x168   : > { %p21450_p9 = scmp.ne.s32.totalorder %s22296_s20, %s21449_s14  ;;  %p21457_p6 = scmp.lt.s32.totalorder %s22296_s20, %s22296_s20 }
 0x169   : > { %p21458_p7 = scmp.lt.s32.totalorder %s21456_s22, %s21449_s14 }
 0x16a   : > { %p21452_p3 = pnand %p21450_p9, %p24964_p12 }
 0x16b   : > { %p21459_p1 = por %p21458_p7, %p21457_p6 }
 0x16c   : > { %p21453_p5 = pneg %p21452_p3 }
 0x16e   : > { %p21460_p8 = pnand %p21459_p1, %p21453_p5 }
 0x170   : > { %21463 = shalt.err (!%p21460_p8)
}
 0x171   : > { %18870 = dma.hbm_to_vmem [thread:$0]  (!%p24965_p4), %s24823_s17, 48, %s22296_s20, [#allocation28]  }
 0x172   : > { %s21792_s25 = smov [#allocation32]   ;;  %s24966_s8 = sld [smem:[#allocation88_spill]] }
 0x173   : > { %s653_s11 = sshll.u32 %s21792_s25, 4  ;;  %s21464_s2 = scalar_lea.hbm %s24825_s19, 16  ;;  %s654_s11 = int_to_ptr.vmem [resolvable:$true] %s653_s11 }
 0x174   : > { %p21465_p0 = scmp.ne.s32.totalorder %s24825_s19, %s21464_s2  ;;  %p21471_p2 = scmp.lt.u32.totalorder %s21464_s2, %s24825_s19 }
 0x176   : > { %p21467_p13 = pnand %p21465_p0, %p24964_p12 }
 0x178   : > { %s22344_s18 = scalar_lea.hbm %s24966_s8, %s22078_s28  ;;  %p21468_p10 = pneg %p21467_p13 }
 0x17a   : > { %p21473_p11 = pnand %p21471_p2, %p21468_p10 }
 0x17c   : > { %21476 = shalt.err (!%p21473_p11)
}
 0x17d   : > { %s21477_s21 = scalar_lea.vmem %s654_s11, 16  ;;  %s21484_s6 = scalar_lea.vmem %s654_s11, 32 }
 0x17e   : > { %p21478_p9 = scmp.ne.s32.totalorder %s654_s11, %s21477_s21  ;;  %p21485_p6 = scmp.lt.s32.totalorder %s654_s11, %s654_s11 }
 0x17f   : > { %p21486_p7 = scmp.lt.s32.totalorder %s21484_s6, %s21477_s21 }
 0x180   : > { %p21480_p3 = pnand %p21478_p9, %p24964_p12 }
 0x181   : > { %p21487_p1 = por %p21486_p7, %p21485_p6 }
 0x182   : > { %p21481_p5 = pneg %p21480_p3 }
 0x184   : > { %p21488_p8 = pnand %p21487_p1, %p21481_p5 }
 0x186   : > { %21491 = shalt.err (!%p21488_p8)
}
 0x187   : > { %18876 = dma.hbm_to_vmem [thread:$0]  (!%p24965_p4), %s24825_s19, 16, %s654_s11, [#allocation31]  }
 0x188   : > { %s668_s27 = scalar_lea.vmem [#allocation3], %s22081_s30  ;;  %s18771_s0 = smul.u32 1728, %s22075_s29 }
 0x189   : > { %s676_s9 = sshll.u32 %s668_s27, 4  ;;  %s18772_s5 = smul.u32 27648, %s21772_s24  ;;  %s22366_s9 = int_to_ptr.vmem [resolvable:$true] %s676_s9 }
 0x18a   : > { %s665_s4 = scalar_lea.sflag [#allocation4], %s22075_s29  ;;  %s21492_s2 = scalar_lea.hbm %s22344_s18, 48 }
 0x18b   : > { %p21493_p12 = scmp.ne.s32.totalorder %s22344_s18, %s21492_s2  ;;  %p24967_p0 = scmp.ne.s32.totalorder %s24951_s23, 0 }
 0x18c   : > { %s21497_s20 = scalar_lea.hbm %s24966_s8, 288  ;;  %p21498_p4 = scmp.lt.u32.totalorder %s22344_s18, %s24966_s8 }
 0x18d   : > { %p21495_p13 = pnand %p21493_p12, %p24967_p0  ;;  %p21499_p2 = scmp.lt.u32.totalorder %s21497_s20, %s21492_s2 }
 0x18e   : > { %p21501_p9 = scmp.lt.u32.totalorder %s21492_s2, %s22344_s18 }
 0x18f   : > { %p21496_p10 = pneg %p21495_p13  ;;  %p21500_p11 = por %p21499_p2, %p21498_p4 }
 0x191   : > { %p21502_p3 = por %p21501_p9, %p21500_p11 }
 0x193   : > { %p21503_p5 = pnand %p21502_p3, %p21496_p10 }
 0x195   : > { %21506 = shalt.err (!%p21503_p5)
}
 0x196   : > { %s21507_s11 = scalar_lea.vmem %s22366_s9, 48  ;;  %s21793_s6 = smov [#allocation3]  }
 0x197   : > { %p21508_p6 = scmp.ne.s32.totalorder %s22366_s9, %s21507_s11  ;;  %s21512_s25 = sshll.u32 %s21793_s6, 4  ;;  %s21513_s25 = int_to_ptr.vmem [resolvable:$false] %s21512_s25 }
 0x198   : > { %s21514_s16 = scalar_lea.vmem %s21513_s25, 96  ;;  %p21515_p8 = scmp.lt.s32.totalorder %s22366_s9, %s21513_s25 }
 0x199   : > { %p21510_p7 = pnand %p21508_p6, %p24967_p0  ;;  %p21516_p12 = scmp.lt.s32.totalorder %s21514_s16, %s21507_s11 }
 0x19b   : > { %p21511_p1 = pneg %p21510_p7  ;;  %p21517_p13 = por %p21516_p12, %p21515_p8 }
 0x19d   : > { %p21518_p4 = pnand %p21517_p13, %p21511_p1 }
 0x19f   : > { %21521 = shalt.err (!%p21518_p4)
}
 0x1a0   : > { %p24968_p10 = scmp.ne.s32.totalorder %s24949_s1, 0  ;;  %s24969_s12 = sld [smem:[#allocation90_spill]] }
 0x1a1   : > { %s706_s20 = scalar_lea.vmem [#allocation8], %s18771_s0 }
 0x1a2   : > { %18880 = dma.hbm_to_vmem [thread:$0]  (!%p24968_p10), %s22344_s18, 48, %s22366_s9, %s665_s4  }
 0x1a3   : > { %s713_s22 = sshll.u32 %s706_s20, 4  ;;  %s22400_s22 = int_to_ptr.vmem [resolvable:$true] %s713_s22 }
 0x1a6   : > { %s22396_s14 = scalar_lea.hbm %s24969_s12, %s18772_s5  ;;  %s21527_s4 = scalar_lea.hbm %s24969_s12, 165888 }
 0x1a7   : > { %s21522_s21 = scalar_lea.hbm %s22396_s14, 27648  ;;  %p21528_p3 = scmp.lt.u32.totalorder %s22396_s14, %s24969_s12 }
 0x1a8   : > { %p21523_p2 = scmp.ne.s32.totalorder %s22396_s14, %s21522_s21  ;;  %p21529_p5 = scmp.lt.u32.totalorder %s21527_s4, %s21522_s21 }
 0x1a9   : > { %p21531_p7 = scmp.lt.u32.totalorder %s21522_s21, %s22396_s14 }
 0x1aa   : > { %p21525_p11 = pnand %p21523_p2, %p24967_p0  ;;  %p21530_p6 = por %p21529_p5, %p21528_p3 }
 0x1ac   : > { %p21526_p9 = pneg %p21525_p11  ;;  %p21532_p1 = por %p21531_p7, %p21530_p6 }
 0x1ae   : > { %p21533_p8 = pnand %p21532_p1, %p21526_p9 }
 0x1b0   : > { %21536 = shalt.err (!%p21533_p8)
}
 0x1b1   : > { %s21537_s0 = scalar_lea.vmem %s22400_s22, 27648  ;;  %s21794_s6 = smov [#allocation8]  }
 0x1b2   : > { %p21538_p12 = scmp.ne.s32.totalorder %s22400_s22, %s21537_s0  ;;  %s21542_s25 = sshll.u32 %s21794_s6, 4  ;;  %s21543_s25 = int_to_ptr.vmem [resolvable:$false] %s21542_s25 }
 0x1b3   : > { %s21544_s16 = scalar_lea.vmem %s21543_s25, 55296  ;;  %p21545_p2 = scmp.lt.s32.totalorder %s22400_s22, %s21543_s25 }
 0x1b4   : > { %p21540_p13 = pnand %p21538_p12, %p24967_p0  ;;  %p21546_p11 = scmp.lt.s32.totalorder %s21544_s16, %s21537_s0 }
 0x1b6   : > { %p21541_p4 = pneg %p21540_p13  ;;  %p21547_p3 = por %p21546_p11, %p21545_p2 }
 0x1b8   : > { %p21548_p5 = pnand %p21547_p3, %p21541_p4 }
 0x1ba   : > { %21551 = shalt.err (!%p21548_p5)
}
 0x1bb   : > { %s21795_s27 = smov 576   ;;  %s21796_s2 = smov 36  }
 0x1bc   : > { %s24970_s20 = scalar_lea.sflag [#allocation7], %s22088_s7  ;;  %s24971_s9 = sld [smem:[#allocation92_spill]] }
 0x1bd   : > { %18886 = dma.hbm_to_vmem [thread:$0]  (!%p24968_p10), %s22396_s14, 27648, %s22400_s22, %s24970_s20, %s21795_s27, %s21795_s27, %s21796_s2  }
 0x1be   : > { %s748_s5 = scalar_lea.vmem [#allocation11], %s22081_s30  ;;  %s24972_s25 = sld [smem:[#allocation94_spill]] }
 0x1bf   : > { %s756_s11 = sshll.u32 %s748_s5, 4  ;;  %s757_s11 = int_to_ptr.vmem [resolvable:$true] %s756_s11 }
 0x1c2   : > { %s22429_s4 = scalar_lea.hbm %s24971_s9, %s22078_s28  ;;  %s21557_s27 = scalar_lea.hbm %s24971_s9, 288 }
 0x1c3   : > { %s21552_s3 = scalar_lea.hbm %s22429_s4, 48  ;;  %p21558_p1 = scmp.lt.u32.totalorder %s22429_s4, %s24971_s9 }
 0x1c4   : > { %s22436_s16 = scalar_lea.hbm %s24972_s25, %s22078_s28  ;;  %p21553_p9 = scmp.ne.s32.totalorder %s22429_s4, %s21552_s3 }
 0x1c5   : > { %p21559_p8 = scmp.lt.u32.totalorder %s21557_s27, %s21552_s3  ;;  %p21561_p13 = scmp.lt.u32.totalorder %s21552_s3, %s22429_s4 }
 0x1c6   : > { %p21555_p6 = pnand %p21553_p9, %p24967_p0 }
 0x1c7   : > { %p21560_p12 = por %p21559_p8, %p21558_p1 }
 0x1c8   : > { %p21556_p7 = pneg %p21555_p6 }
 0x1c9   : > { %p21562_p4 = por %p21561_p13, %p21560_p12 }
 0x1cb   : > { %p21563_p2 = pnand %p21562_p4, %p21556_p7 }
 0x1cd   : > { %21566 = shalt.err (!%p21563_p2)
}
 0x1ce   : > { %s21567_s21 = scalar_lea.vmem %s757_s11, 48  ;;  %s21797_s18 = smov [#allocation11]  }
 0x1cf   : > { %p21568_p11 = scmp.ne.s32.totalorder %s757_s11, %s21567_s21  ;;  %s21572_s5 = sshll.u32 %s21797_s18, 4  ;;  %s21573_s5 = int_to_ptr.vmem [resolvable:$false] %s21572_s5 }
 0x1d0   : > { %s21574_s0 = scalar_lea.vmem %s21573_s5, 96  ;;  %p21575_p9 = scmp.lt.s32.totalorder %s757_s11, %s21573_s5 }
 0x1d1   : > { %p21570_p3 = pnand %p21568_p11, %p24967_p0  ;;  %p21576_p6 = scmp.lt.s32.totalorder %s21574_s0, %s21567_s21 }
 0x1d3   : > { %p21571_p5 = pneg %p21570_p3  ;;  %p21577_p10 = por %p21576_p6, %p21575_p9 }
 0x1d5   : > { %p21578_p1 = pnand %p21577_p10, %p21571_p5 }
 0x1d7   : > { %21581 = shalt.err (!%p21578_p1)
}
 0x1d8   : > { %p24973_p8 = scmp.ne.s32.totalorder %s24949_s1, 0  ;;  %s24974_s3 = scalar_lea.sflag [#allocation10], %s22088_s7 }
 0x1d9   : > { %s786_s6 = scalar_lea.vmem [#allocation14], %s22081_s30  ;;  %s18783_s22 = smul.u32 12, %s22075_s29 }
 0x1da   : > { %18892 = dma.hbm_to_vmem [thread:$0]  (!%p24973_p8), %s22429_s4, 48, %s757_s11, %s24974_s3  }
 0x1db   : > { %s794_s14 = sshll.u32 %s786_s6, 4  ;;  %s18784_s27 = smul.u32 192, %s21772_s24  ;;  %s795_s14 = int_to_ptr.vmem [resolvable:$true] %s794_s14 }
 0x1dc   : > { %s21582_s2 = scalar_lea.hbm %s22436_s16, 48  ;;  %s21587_s18 = scalar_lea.hbm %s24972_s25, 288 }
 0x1dd   : > { %p21583_p10 = scmp.ne.s32.totalorder %s22436_s16, %s21582_s2  ;;  %p21588_p13 = scmp.lt.u32.totalorder %s22436_s16, %s24972_s25 }
 0x1de   : > { %p21589_p4 = scmp.lt.u32.totalorder %s21587_s18, %s21582_s2  ;;  %p21591_p11 = scmp.lt.u32.totalorder %s21582_s2, %s22436_s16 }
 0x1df   : > { %p21585_p7 = pnand %p21583_p10, %p24967_p0 }
 0x1e0   : > { %p21590_p2 = por %p21589_p4, %p21588_p13 }
 0x1e1   : > { %p21586_p12 = pneg %p21585_p7 }
 0x1e2   : > { %p21592_p3 = por %p21591_p11, %p21590_p2 }
 0x1e4   : > { %p21593_p5 = pnand %p21592_p3, %p21586_p12 }
 0x1e6   : > { %21596 = shalt.err (!%p21593_p5)
}
 0x1e7   : > { %s21597_s24 = scalar_lea.vmem %s795_s14, 48  ;;  %s21798_s4 = smov [#allocation14]  }
 0x1e8   : > { %p21598_p9 = scmp.ne.s32.totalorder %s795_s14, %s21597_s24  ;;  %s21602_s11 = sshll.u32 %s21798_s4, 4  ;;  %s21603_s11 = int_to_ptr.vmem [resolvable:$false] %s21602_s11 }
 0x1e9   : > { %s21604_s3 = scalar_lea.vmem %s21603_s11, 96  ;;  %p21605_p10 = scmp.lt.s32.totalorder %s795_s14, %s21603_s11 }
 0x1ea   : > { %p21600_p6 = pnand %p21598_p9, %p24967_p0  ;;  %p21606_p7 = scmp.lt.s32.totalorder %s21604_s3, %s21597_s24 }
 0x1ec   : > { %p21601_p1 = pneg %p21600_p6  ;;  %p21607_p8 = por %p21606_p7, %p21605_p10 }
 0x1ee   : > { %p21608_p4 = pnand %p21607_p8, %p21601_p1 }
 0x1f0   : > { %21611 = shalt.err (!%p21608_p4)
}
 0x1f1   : > { %p24975_p13 = scmp.ne.s32.totalorder %s24949_s1, 0  ;;  %s24976_s6 = scalar_lea.sflag [#allocation13], %s22088_s7 }
 0x1f2   : > { %s24977_s21 = sld [smem:[#allocation96_spill]]  ;;  %s826_s5 = scalar_lea.vmem [#allocation17], %s18783_s22 }
 0x1f3   : > { %18898 = dma.hbm_to_vmem [thread:$0]  (!%p24975_p13), %s22436_s16, 48, %s795_s14, %s24976_s6  }
 0x1f4   : > { %s834_s0 = sshll.u32 %s826_s5, 4  ;;  %s24978_s11 = sld [smem:[#allocation97_spill]]  ;;  %s835_s0 = int_to_ptr.vmem [resolvable:$true] %s834_s0 }
 0x1f8   : > { %s22482_s18 = scalar_lea.hbm %s24977_s21, %s18784_s27  ;;  %s21617_s29 = scalar_lea.hbm %s24977_s21, 1152 }
 0x1f9   : > { %s21612_s26 = scalar_lea.hbm %s22482_s18, 192  ;;  %p21618_p11 = scmp.lt.u32.totalorder %s22482_s18, %s24977_s21 }
 0x1fa   : > { %s22490_s3 = scalar_lea.hbm %s24978_s11, %s22078_s28  ;;  %p21613_p8 = scmp.ne.s32.totalorder %s22482_s18, %s21612_s26 }
 0x1fb   : > { %p21619_p3 = scmp.lt.u32.totalorder %s21617_s29, %s21612_s26  ;;  %p21621_p9 = scmp.lt.u32.totalorder %s21612_s26, %s22482_s18 }
 0x1fc   : > { %p21615_p12 = pnand %p21613_p8, %p24967_p0 }
 0x1fd   : > { %p21620_p5 = por %p21619_p3, %p21618_p11 }
 0x1fe   : > { %p21616_p2 = pneg %p21615_p12 }
 0x1ff   : > { %p21622_p6 = por %p21621_p9, %p21620_p5 }
 0x201   : > { %p21623_p1 = pnand %p21622_p6, %p21616_p2 }
 0x203   : > { %21626 = shalt.err (!%p21623_p1)
}
 0x204   : > { %s21627_s28 = scalar_lea.vmem %s835_s0, 192  ;;  %s21799_s22 = smov [#allocation17]  }
 0x205   : > { %p21628_p10 = scmp.ne.s32.totalorder %s835_s0, %s21627_s28  ;;  %s21632_s2 = sshll.u32 %s21799_s22, 4  ;;  %s21633_s2 = int_to_ptr.vmem [resolvable:$false] %s21632_s2 }
 0x206   : > { %s21634_s20 = scalar_lea.vmem %s21633_s2, 384  ;;  %p21635_p8 = scmp.lt.s32.totalorder %s835_s0, %s21633_s2 }
 0x207   : > { %p21630_p7 = pnand %p21628_p10, %p24967_p0  ;;  %p21636_p12 = scmp.lt.s32.totalorder %s21634_s20, %s21627_s28 }
 0x209   : > { %p21631_p4 = pneg %p21630_p7  ;;  %p21637_p13 = por %p21636_p12, %p21635_p8 }
 0x20b   : > { %p21638_p3 = pnand %p21637_p13, %p21631_p4 }
 0x20d   : > { %21641 = shalt.err (!%p21638_p3)
}
 0x20e   : > { %p24979_p11 = scmp.ne.s32.totalorder %s24949_s1, 0  ;;  %s24980_s26 = scalar_lea.sflag [#allocation16], %s22088_s7 }
 0x20f   : > { %s866_s5 = scalar_lea.vmem [#allocation20], %s22081_s30  ;;  %s21642_s4 = scalar_lea.hbm %s22490_s3, 48 }
 0x210   : > { %18904 = dma.hbm_to_vmem [thread:$0]  (!%p24979_p11), %s22482_s18, 192, %s835_s0, %s24980_s26  }
 0x211   : > { %s874_s24 = sshll.u32 %s866_s5, 4  ;;  %p21643_p2 = scmp.ne.s32.totalorder %s22490_s3, %s21642_s4  ;;  %s875_s24 = int_to_ptr.vmem [resolvable:$true] %s874_s24 }
 0x212   : > { %s21647_s29 = scalar_lea.hbm %s24978_s11, 288  ;;  %p21648_p9 = scmp.lt.u32.totalorder %s22490_s3, %s24978_s11 }
 0x213   : > { %p21645_p13 = pnand %p21643_p2, %p24967_p0  ;;  %p21649_p6 = scmp.lt.u32.totalorder %s21647_s29, %s21642_s4 }
 0x214   : > { %p21651_p10 = scmp.lt.u32.totalorder %s21642_s4, %s22490_s3 }
 0x215   : > { %p21646_p5 = pneg %p21645_p13  ;;  %p21650_p1 = por %p21649_p6, %p21648_p9 }
 0x217   : > { %p21652_p7 = por %p21651_p10, %p21650_p1 }
 0x219   : > { %p21653_p4 = pnand %p21652_p7, %p21646_p5 }
 0x21b   : > { %21656 = shalt.err (!%p21653_p4)
}
 0x21c   : > { %s21657_s30 = scalar_lea.vmem %s875_s24, 48  ;;  %s21800_s18 = smov [#allocation20]  }
 0x21d   : > { %p21658_p8 = scmp.ne.s32.totalorder %s875_s24, %s21657_s30  ;;  %s21662_s0 = sshll.u32 %s21800_s18, 4  ;;  %s21663_s0 = int_to_ptr.vmem [resolvable:$false] %s21662_s0 }
 0x21e   : > { %s21664_s28 = scalar_lea.vmem %s21663_s0, 96  ;;  %p21665_p2 = scmp.lt.s32.totalorder %s875_s24, %s21663_s0 }
 0x21f   : > { %p21660_p12 = pnand %p21658_p8, %p24967_p0  ;;  %p21666_p13 = scmp.lt.s32.totalorder %s21664_s28, %s21657_s30 }
 0x221   : > { %p21661_p3 = pneg %p21660_p12  ;;  %p21667_p11 = por %p21666_p13, %p21665_p2 }
 0x223   : > { %p21668_p6 = pnand %p21667_p11, %p21661_p3 }
 0x225   : > { %21671 = shalt.err (!%p21668_p6)
}
 0x226   : > { %p24981_p9 = scmp.ne.s32.totalorder %s24949_s1, 0  ;;  %s24982_s22 = scalar_lea.sflag [#allocation19], %s22088_s7 }
 0x227   : > { %s24983_s2 = sld [smem:[#allocation48_spill]] }
 0x228   : > { %18910 = dma.hbm_to_vmem [thread:$0]  (!%p24981_p9), %s22490_s3, 48, %s875_s24, %s24982_s22  }
 0x22d   : > { %p24984_p5 = scmp.ne.s32.totalorder %s24983_s2, 0 }
 0x22f   : > { %883 = sbr.rel (%p24984_p5) target bundleno = 11747 (0x2de3), region = 100 }
 0x236   : > { %s24985_s23 = sld [smem:[#allocation45_spill]]  ;;  %s24986_s20 = sld [smem:[#allocation51_spill]] }
 0x23c   : > { %s22534_s26 = sand.u32 1, %s24985_s23   ;;  %p24987_p0 = scmp.ne.s32.totalorder %s24986_s20, 0 }
 0x23d   : > { %s22537_s5 = smul.u32 3, %s22534_s26  ;;  %s886_s4 = scalar_lea.sflag [#allocation4], %s22534_s26 }
 0x23f   : > { %s889_s16 = scalar_lea.vmem [#allocation3], %s22537_s5 }
 0x240   : > { %21715 = dma.done.wait (%p24987_p0), %s886_s4, 48  }
 0x241   : > { %21717 = vsyncadd (%p24987_p0), %s886_s4, 4294967248  ;;  %s24988_s1 = sld [smem:[#allocation47_spill]]  ;;  %s898_s24 = scalar_lea.vmem [#allocation6], %s22537_s5 }
 0x247   : > { %s894_s7 = sand.u32 1, %s24988_s1  }
 0x248   : > { %s895_s3 = scalar_lea.sflag [#allocation7], %s894_s7 }
 0x249   : > { %21719 = dma.done.wait (%p24987_p0), %s895_s3, 27696  }
 0x24a   : > { %21721 = vsyncadd (%p24987_p0), %s895_s3, 4294939600  ;;  %s18790_s14 = smul.u32 1728, %s22534_s26  ;;  %s913_s6 = scalar_lea.sflag [#allocation10], %s894_s7 }
 0x24b   : > { %s18791_s29 = smul.u32 576, %s22534_s26 }
 0x24c   : > { %s22553_s27 = scalar_lea.vmem [#allocation8], %s18790_s14 }
 0x24d   : > { %s22555_s30 = scalar_lea.vmem [#allocation9], %s18791_s29 }
 0x24e   : > { %21723 = dma.done.wait (%p24987_p0), %s913_s6, 9264  }
 0x24f   : > { %21725 = vsyncadd (%p24987_p0), %s913_s6, 4294958032  ;;  %s925_s18 = scalar_lea.vmem [#allocation11], %s22537_s5  ;;  %s931_s0 = scalar_lea.sflag [#allocation13], %s894_s7 }
 0x250   : > { %21727 = dma.done.wait (%p24987_p0), %s931_s0, 96  }
 0x251   : > { %21729 = vsyncadd (%p24987_p0), %s931_s0, 4294967200  ;;  %s18792_s22 = smul.u32 2304, %s22534_s26  ;;  %s949_s23 = scalar_lea.sflag [#allocation16], %s894_s7 }
 0x253   : > { %s22569_s4 = scalar_lea.vmem [#allocation15], %s18792_s22 }
 0x254   : > { %21731 = dma.done.wait (%p24987_p0), %s949_s23, 37056  }
 0x255   : > { %21733 = vsyncadd (%p24987_p0), %s949_s23, 4294930240  ;;  %s18793_s3 = smul.u32 12, %s22534_s26  ;;  %s967_s29 = scalar_lea.sflag [#allocation19], %s894_s7 }
 0x256   : > { %s22578_s6 = scalar_lea.vmem [#allocation18], %s18792_s22 }
 0x257   : > { %s22576_s14 = scalar_lea.vmem [#allocation17], %s18793_s3 }
 0x258   : > { %21735 = dma.done.wait (%p24987_p0), %s967_s29, 36912  }
 0x259   : > { %21737 = vsyncadd (%p24987_p0), %s967_s29, 4294930384  ;;  %p24989_p11 = scmp.eq.s32.totalorder %s24988_s1, 0 }
 0x25b   : > { %21739 = dma.done.wait (%p24989_p11), [#allocation22], 96   ;;  %p24990_p1 = pmov %p24989_p11 }
 0x25d   : > { %21741 = vsyncadd (%p24990_p1), [#allocation22], 4294967200  ;;  %p24991_p10 = pmov %p24990_p1 }
 0x25e   : > { %p24992_p7 = pmov %p24990_p1 }
 0x25f   : > { %21743 = dma.done.wait (%p24991_p10), [#allocation25], 37056  }
 0x260   : > { %21745 = vsyncadd (%p24992_p7), [#allocation25], 4294930240  ;;  %p24993_p4 = pmov %p24990_p1 }
 0x261   : > { %p24994_p8 = pmov %p24990_p1 }
 0x262   : > { %21747 = dma.done.wait (%p24993_p4), [#allocation28], 36912  }
 0x263   : > { %21749 = vsyncadd (%p24994_p8), [#allocation28], 4294930384  ;;  %p24995_p12 = pmov %p24990_p1 }
 0x264   : > { %p24996_p3 = pmov %p24990_p1 }
 0x265   : > { %21751 = dma.done.wait (%p24995_p12), [#allocation31], 3088  }
 0x266   : > { %21753 = vsyncadd (%p24996_p3), [#allocation31], 4294964208  ;;  %p24997_p2 = scmp.ne.s32.totalorder %s24988_s1, 0 }
 0x267   : > { %s24998_s7 = sld [smem:[#allocation87_spill]] (!%p24997_p2) }
 0x268   : > { %1117 = sbr.rel (%p24997_p2) target bundleno = 625 (0x271), region = 180 }
 0x26d   : > { %v1118_v0 = vld [vmem:[%s24998_s7] sm:$0xff] (!%p24997_p2)  ;;  %v1119_v1 = vld [vmem:[%s24998_s7 + $0x8] sm:$0xff] (!%p24997_p2)  ;;  %v1120_v2 = vld [vmem:[%s24998_s7 + $0x10] sm:$0xff] (!%p24997_p2) }
 0x26e   : > { %1124 = vst [vmem:[#allocation2] sm:$0xff] (!%p24997_p2), %v1118_v0  ;;  %1125 = vst [vmem:[#allocation2 + $0x8] sm:$0xff] (!%p24997_p2), %v1119_v1  ;;  %v1121_v3 = vld [vmem:[%s24998_s7 + $0x18] sm:$0xff] (!%p24997_p2)  ;;  %v1122_v4 = vld [vmem:[%s24998_s7 + $0x20] sm:$0xff] (!%p24997_p2) }
 0x26f   : > { %1126 = vst [vmem:[#allocation2 + $0x10] sm:$0xff] %v1120_v2  ;;  %v1123_v5 = vld [vmem:[%s24998_s7 + $0x28] sm:$0xff]  ;;  %1127 = vst [vmem:[#allocation2 + $0x18] sm:$0xff] %v1121_v3 }
 0x270   : > { %1128 = vst [vmem:[#allocation2 + $0x20] sm:$0xff] %v1122_v4  ;;  %1129 = vst [vmem:[#allocation2 + $0x28] sm:$0xff] %v1123_v5 }
 0x271 PF: > { %v18988_v16 = vld [vmem:[%s22553_s27 + $0x4] ss:$36 sps:$4 sm:$0xff]   ;;  %v18990_v17 = vld [vmem:[%s22553_s27 + $0x14] ss:$36 sps:$4 sm:$0xff]   ;;  %v18994_v20 = vld [vmem:[%s22553_s27 + $0x4c] ss:$36 sps:$4 sm:$0xff]  }
 0x272   : > { %v18992_v18 = vld [vmem:[%s22553_s27] ss:$36 sps:$4 sm:$0xff]   ;;  %v18993_v19 = vld [vmem:[%s22553_s27 + $0x10] ss:$36 sps:$4 sm:$0xff]   ;;  %2668 = vmatprep.subr.bf16.mxu1 %v18988_v16  ;;  %2840 = vmatprep.subr.bf16.mxu0 %v18990_v17  ;;  %v18998_v22 = vld [vmem:[%s22553_s27 + $0x48] ss:$36 sps:$4 sm:$0xff]  }
 0x273   : > { %v18996_v21 = vld [vmem:[%s22553_s27 + $0x5c] ss:$36 sps:$4 sm:$0xff]   ;;  %2669 = vmatpush1.bf16.msra.mxu1 %v18992_v18  ;;  %2841 = vmatpush1.bf16.msra.mxu0 %v18993_v19  ;;  %v19000_v24 = vld [vmem:[%s22553_s27 + $0x94] ss:$36 sps:$4 sm:$0xff]   ;;  %v19002_v25 = vld [vmem:[%s22553_s27 + $0xa4] ss:$36 sps:$4 sm:$0xff]  }
 0x274   : > { %v18999_v23 = vld [vmem:[%s22553_s27 + $0x58] ss:$36 sps:$4 sm:$0xff]   ;;  %2670 = vmatprep.subr.bf16.mxu1 %v18994_v20  ;;  %2842 = vmatprep.subr.bf16.mxu0 %v18996_v21  ;;  %v19004_v26 = vld [vmem:[%s22553_s27 + $0x90] ss:$36 sps:$4 sm:$0xff]   ;;  %v19005_v27 = vld [vmem:[%s22553_s27 + $0xa0] ss:$36 sps:$4 sm:$0xff]  }
 0x275   : > { %v19006_v28 = vld [vmem:[%s22553_s27 + $0xdc] ss:$36 sps:$4 sm:$0xff]   ;;  %v19008_v29 = vld [vmem:[%s22553_s27 + $0xec] ss:$36 sps:$4 sm:$0xff]   ;;  %v19012_v32 = vld [vmem:[%s22553_s27 + $0x124] ss:$36 sps:$4 sm:$0xff]  }
 0x276   : > { %v19010_v30 = vld [vmem:[%s22553_s27 + $0xd8] ss:$36 sps:$4 sm:$0xff]   ;;  %v19011_v31 = vld [vmem:[%s22553_s27 + $0xe8] ss:$36 sps:$4 sm:$0xff]   ;;  %v19016_v34 = vld [vmem:[%s22553_s27 + $0x120] ss:$36 sps:$4 sm:$0xff]  }
 0x277   : > { %v22621_v6 = vld [vmem:[#allocation2] sm:$0xff]  ;;  %v22623_v7 = vld [vmem:[#allocation2 + $0x8] sm:$0xff]  ;;  %2671 = vmatpush1.bf16.msra.mxu1 %v18998_v22  ;;  %2843 = vmatpush1.bf16.msra.mxu0 %v18999_v23  ;;  %v19014_v33 = vld [vmem:[%s22553_s27 + $0x134] ss:$36 sps:$4 sm:$0xff]   ;;  %vm21803_vm0 = vmmov 0   ;;  %vm3101_vm1 = vcmask 523264  }
 0x278   : > { %v22625_v8 = vld [vmem:[#allocation2 + $0x10] sm:$0xff]  ;;  %v1138_v9 = vadd.f32 %v22623_v7, %v22621_v6  ;;  %v22629_v10 = vld [vmem:[#allocation2 + $0x18] sm:$0xff]  ;;  %v22631_v11 = vld [vmem:[#allocation2 + $0x20] sm:$0xff]  ;;  %2672 = vmatprep.subr.bf16.mxu1 %v19000_v24  ;;  %2844 = vmatprep.subr.bf16.mxu0 %v19002_v25  ;;  %vm3166_vm2 = vcmask 1043456   ;;  %vm3149_vm4 = vcmask 64512  }
 0x279   : > { %v22633_v12 = vld [vmem:[#allocation2 + $0x28] sm:$0xff]  ;;  %v1142_v13 = vadd.f32 %v22631_v11, %v22629_v10  ;;  %v19020_v37 = vld [vmem:[%s22553_s27 + $0x17c] ss:$36 sps:$4 sm:$0xff]   ;;  %v19024_v40 = vld [vmem:[%s22553_s27 + $0x1b4] ss:$36 sps:$4 sm:$0xff]  }
 0x27a   : > { %v1139_v14 = vadd.f32 %v1138_v9, %v22625_v8  ;;  %v19017_v35 = vld [vmem:[%s22553_s27 + $0x130] ss:$36 sps:$4 sm:$0xff]   ;;  %v19022_v38 = vld [vmem:[%s22553_s27 + $0x168] ss:$36 sps:$4 sm:$0xff]   ;;  %v19023_v39 = vld [vmem:[%s22553_s27 + $0x178] ss:$36 sps:$4 sm:$0xff]  }
 0x27b   : > { %v1143_v15 = vadd.f32 %v1142_v13, %v22633_v12  ;;  %2673 = vmatpush1.bf16.msra.mxu1 %v19004_v26  ;;  %2845 = vmatpush1.bf16.msra.mxu0 %v19005_v27  ;;  %v19018_v36 = vld [vmem:[%s22553_s27 + $0x16c] ss:$36 sps:$4 sm:$0xff]   ;;  %v19026_v41 = vld [vmem:[%s22553_s27 + $0x1c4] ss:$36 sps:$4 sm:$0xff]   ;;  %v19030_v44 = vld [vmem:[%s22553_s27 + $0x1fc] ss:$36 sps:$4 sm:$0xff]  }
 0x27c   : > { %1140 = vadd.xlane.f32.xlu0 %v1139_v14  ;;  %2674 = vmatprep.subr.bf16.mxu1 %v19006_v28  ;;  %v19028_v42 = vld [vmem:[%s22553_s27 + $0x1b0] ss:$36 sps:$4 sm:$0xff]   ;;  %v19029_v43 = vld [vmem:[%s22553_s27 + $0x1c0] ss:$36 sps:$4 sm:$0xff]   ;;  %v19034_v46 = vld [vmem:[%s22553_s27 + $0x1f8] ss:$36 sps:$4 sm:$0xff]  }
 0x27d   : > { %2846 = vmatprep.subr.bf16.mxu0 %v19008_v29  ;;  %v19032_v45 = vld [vmem:[%s22553_s27 + $0x20c] ss:$36 sps:$4 sm:$0xff]   ;;  %v19036_v48 = vld [vmem:[%s22553_s27 + $0x244] ss:$36 sps:$4 sm:$0xff]   ;;  %v19038_v49 = vld [vmem:[%s22553_s27 + $0x254] ss:$36 sps:$4 sm:$0xff]  }
 0x27e   : > { %v19035_v47 = vld [vmem:[%s22553_s27 + $0x208] ss:$36 sps:$4 sm:$0xff]   ;;  %v19040_v50 = vld [vmem:[%s22553_s27 + $0x240] ss:$36 sps:$4 sm:$0xff]   ;;  %v19041_v51 = vld [vmem:[%s22553_s27 + $0x250] ss:$36 sps:$4 sm:$0xff]  }
 0x27f   : > { %2675 = vmatpush1.bf16.msra.mxu1 %v19010_v30  ;;  %2847 = vmatpush1.bf16.msra.mxu0 %v19011_v31  ;;  %v19042_v52 = vld [vmem:[%s22553_s27 + $0x28c] ss:$36 sps:$4 sm:$0xff]   ;;  %v19044_v53 = vld [vmem:[%s22553_s27 + $0x29c] ss:$36 sps:$4 sm:$0xff]   ;;  %v19050_v13 = vld [vmem:[%s22553_s27 + $0x2e4] ss:$36 sps:$4 sm:$0xff]  }
 0x280   : > { %1144 = vadd.xlane.f32.xlu0 %v1143_v15  ;;  %2676 = vmatprep.subr.bf16.mxu1 %v19012_v32  ;;  %v19052_v14 = vld [vmem:[%s22553_s27 + $0x2d0] ss:$36 sps:$4 sm:$0xff]   ;;  %v19053_v15 = vld [vmem:[%s22553_s27 + $0x2e0] ss:$36 sps:$4 sm:$0xff]   ;;  %v19058_v18 = vld [vmem:[%s22553_s27 + $0x318] ss:$36 sps:$4 sm:$0xff]  }
 0x281   : > { %2848 = vmatprep.subr.bf16.mxu0 %v19014_v33  ;;  %v19054_v16 = vld [vmem:[%s22553_s27 + $0x31c] ss:$36 sps:$4 sm:$0xff]   ;;  %v19056_v17 = vld [vmem:[%s22553_s27 + $0x32c] ss:$36 sps:$4 sm:$0xff]   ;;  %v19060_v20 = vld [vmem:[%s22553_s27 + $0x364] ss:$36 sps:$4 sm:$0xff]  }
 0x282   : > { %v19059_v19 = vld [vmem:[%s22553_s27 + $0x328] ss:$36 sps:$4 sm:$0xff]   ;;  %v19062_v21 = vld [vmem:[%s22553_s27 + $0x374] ss:$36 sps:$4 sm:$0xff]   ;;  %v19064_v22 = vld [vmem:[%s22553_s27 + $0x360] ss:$36 sps:$4 sm:$0xff]  }
 0x283   : > { %2677 = vmatpush1.bf16.msra.mxu1 %v19016_v34  ;;  %2849 = vmatpush1.bf16.msra.mxu0 %v19017_v35  ;;  %v19065_v23 = vld [vmem:[%s22553_s27 + $0x370] ss:$36 sps:$4 sm:$0xff]   ;;  %v19068_v25 = vld [vmem:[%s22553_s27 + $0x3bc] ss:$36 sps:$4 sm:$0xff]   ;;  %v19070_v26 = vld [vmem:[%s22553_s27 + $0x3a8] ss:$36 sps:$4 sm:$0xff]  }
 0x284   : > { %2678 = vmatprep.subr.bf16.mxu1 %v19018_v36  ;;  %2850 = vmatprep.subr.bf16.mxu0 %v19020_v37  ;;  %v19066_v24 = vld [vmem:[%s22553_s27 + $0x3ac] ss:$36 sps:$4 sm:$0xff]   ;;  %v19071_v27 = vld [vmem:[%s22553_s27 + $0x3b8] ss:$36 sps:$4 sm:$0xff]   ;;  %v19074_v29 = vld [vmem:[%s22553_s27 + $0x404] ss:$36 sps:$4 sm:$0xff]  }
 0x285   : > { %v19072_v28 = vld [vmem:[%s22553_s27 + $0x3f4] ss:$36 sps:$4 sm:$0xff]   ;;  %v19077_v31 = vld [vmem:[%s22553_s27 + $0x400] ss:$36 sps:$4 sm:$0xff]   ;;  %v19080_v33 = vld [vmem:[%s22553_s27 + $0x44c] ss:$36 sps:$4 sm:$0xff]  }
 0x286   : > { %v19076_v30 = vld [vmem:[%s22553_s27 + $0x3f0] ss:$36 sps:$4 sm:$0xff]   ;;  %v19078_v32 = vld [vmem:[%s22553_s27 + $0x43c] ss:$36 sps:$4 sm:$0xff]   ;;  %v19083_v35 = vld [vmem:[%s22553_s27 + $0x448] ss:$36 sps:$4 sm:$0xff]  }
 0x287   : > { %2679 = vmatpush1.bf16.msra.mxu1 %v19022_v38  ;;  %2851 = vmatpush1.bf16.msra.mxu0 %v19023_v39  ;;  %v19082_v34 = vld [vmem:[%s22553_s27 + $0x438] ss:$36 sps:$4 sm:$0xff]   ;;  %v19086_v36 = vld [vmem:[%s22553_s27 + $0x484] ss:$36 sps:$4 sm:$0xff]  }
 0x288   : > { %2680 = vmatprep.subr.bf16.mxu1 %v19024_v40  ;;  %2852 = vmatprep.subr.bf16.mxu0 %v19026_v41  ;;  %v19089_v37 = vld [vmem:[%s22553_s27 + $0x494] ss:$36 sps:$4 sm:$0xff]   ;;  %v1182_v40 = vlaneseq }
 0x28b   : > { %2681 = vmatpush1.bf16.msra.mxu1 %v19028_v42  ;;  %2853 = vmatpush1.bf16.msra.mxu0 %v19029_v43 }
 0x28c   : > { %2682 = vmatprep.subr.bf16.mxu1 %v19030_v44  ;;  %2854 = vmatprep.subr.bf16.mxu0 %v19032_v45  ;;  %v22736_v44 = vshrl.u32 %v1182_v40, 7 }
 0x28e   : > { %24999 = vst [vmem:[#allocation52_spill] sm:$0xff] %v22736_v44 }
 0x28f   : > { %2683 = vmatpush1.bf16.msra.mxu1 %v19034_v46  ;;  %2855 = vmatpush1.bf16.msra.mxu0 %v19035_v47  ;;  %v22740_v46 = vld [vmem:[%s889_s16] sm:$0x7]  ;;  %v22743_v47 = vsub.s32 1, %v22736_v44  ;;  %s21804_s16 = smov 64  }
 0x290   : > { %2684 = vmatprep.subr.bf16.mxu1 %v19036_v48  ;;  %2856 = vmatprep.subr.bf16.mxu0 %v19038_v49  ;;  %v22746_v48 = vsub.s32 0, %v22736_v44  ;;  %v22750_v49 = vld [vmem:[%s898_s24] sm:$0x7]  ;;  %s25072_s24 = scalar_lea.vmem [#allocation12], %s22537_s5 }
 0x291   : > { %25000 = vst [vmem:[#allocation53_spill] sm:$0xff] %v22743_v47 }
 0x292   : > { %25001 = vst [vmem:[#allocation54_spill] sm:$0xff] %v22746_v48 }
 0x293   : > { %2685 = vmatpush1.bf16.msra.mxu1 %v19040_v50  ;;  %2857 = vmatpush1.bf16.msra.mxu0 %v19041_v51 }
 0x294   : > { %2686 = vmatprep.subr.bf16.mxu1 %v19042_v52  ;;  %2858 = vmatprep.subr.bf16.mxu0 %v19044_v53  ;;  %v1189_v52 = vrot.slane %v22740_v46, %v22743_v47 }
 0x309   : > { %v1141_v54 = vpop.xlane.xlu0 %1140 }
 0x30a   : > { %v1147_v55 = vmul.f32 0.0026041667, %v1141_v54  ;;  %v1185_v54 = vrot.slane %v22740_v46, %v22746_v48 }
 0x30c   : > { %v22678_v56 = vsub.f32 %v22621_v6, %v1147_v55  ;;  %v22681_v57 = vsub.f32 %v22623_v7, %v1147_v55  ;;  %v22684_v58 = vsub.f32 %v22625_v8, %v1147_v55 }
 0x30d   : > { %v1145_v59 = vpop.xlane.xlu0 %1144 }
 0x30e   : > { %v1148_v60 = vmul.f32 0.0026041667, %v1145_v59  ;;  %v1155_v61 = vmul.f32 %v22678_v56, %v22678_v56  ;;  %v1156_v62 = vmul.f32 %v22681_v57, %v22681_v57  ;;  %v1157_v63 = vmul.f32 %v22684_v58, %v22684_v58 }
 0x30f   : > { %v1211_v59 = vrot.slane %v22750_v49, %v22743_v47 }
 0x310   : > { %v22693_v0 = vsub.f32 %v22629_v10, %v1148_v60  ;;  %v22696_v1 = vsub.f32 %v22631_v11, %v1148_v60  ;;  %v22699_v2 = vsub.f32 %v22633_v12, %v1148_v60  ;;  %v1161_v3 = vadd.f32 %v1156_v62, %v1155_v61  ;;  %v19046_v10 = vld [vmem:[%s22553_s27 + $0x288] ss:$36 sps:$4 sm:$0xff]   ;;  %v19047_v11 = vld [vmem:[%s22553_s27 + $0x298] ss:$36 sps:$4 sm:$0xff]  }
 0x311   : > { %2687 = vmatpush1.bf16.msra.mxu1 %v19046_v10  ;;  %2859 = vmatpush1.bf16.msra.mxu0 %v19047_v11  ;;  %v19048_v12 = vld [vmem:[%s22553_s27 + $0x2d4] ss:$36 sps:$4 sm:$0xff]   ;;  %v19092_v10 = vld [vmem:[%s22553_s27 + $0x4cc] ss:$36 sps:$4 sm:$0xff]  }
 0x312   : > { %v1162_v4 = vadd.f32 %v1161_v3, %v1157_v63  ;;  %v1158_v5 = vmul.f32 %v22693_v0, %v22693_v0  ;;  %v1159_v6 = vmul.f32 %v22696_v1, %v22696_v1  ;;  %v1160_v7 = vmul.f32 %v22699_v2, %v22699_v2  ;;  %2688 = vmatprep.subr.bf16.mxu1 %v19048_v12  ;;  %v19090_v12 = vld [vmem:[%s22553_s27 + $0x4c8] ss:$36 sps:$4 sm:$0xff]  }
 0x313   : > { %2860 = vmatprep.subr.bf16.mxu0 %v19050_v13  ;;  %v19093_v13 = vld [vmem:[%s22553_s27 + $0x4d8] ss:$36 sps:$4 sm:$0xff]  }
 0x314   : > { %1163 = vadd.xlane.f32.xlu1 %v1162_v4  ;;  %v1165_v8 = vadd.f32 %v1159_v6, %v1158_v5  ;;  %v19084_v6 = vld [vmem:[%s22553_s27 + $0x480] ss:$36 sps:$4 sm:$0xff]  }
 0x315   : > { %2689 = vmatpush1.bf16.msra.mxu1 %v19052_v14  ;;  %2861 = vmatpush1.bf16.msra.mxu0 %v19053_v15  ;;  %v19098_v14 = vld [vmem:[%s22553_s27 + $0x514] ss:$36 sps:$4 sm:$0xff]   ;;  %v19101_v15 = vld [vmem:[%s22553_s27 + $0x524] ss:$36 sps:$4 sm:$0xff]  }
 0x316   : > { %v1166_v9 = vadd.f32 %v1165_v8, %v1160_v7  ;;  %2690 = vmatprep.subr.bf16.mxu1 %v19054_v16  ;;  %2862 = vmatprep.subr.bf16.mxu0 %v19056_v17  ;;  %v19087_v7 = vld [vmem:[%s22553_s27 + $0x490] ss:$36 sps:$4 sm:$0xff]   ;;  %v19099_v17 = vld [vmem:[%s22553_s27 + $0x520] ss:$36 sps:$4 sm:$0xff]  }
 0x317   : > { %v19096_v16 = vld [vmem:[%s22553_s27 + $0x510] ss:$36 sps:$4 sm:$0xff]  }
 0x318   : > { %1167 = vadd.xlane.f32.xlu1 %v1166_v9 }
 0x319   : > { %2691 = vmatpush1.bf16.msra.mxu1 %v19058_v18  ;;  %2863 = vmatpush1.bf16.msra.mxu0 %v19059_v19  ;;  %v24873_v18 = vmov 0   ;;  %v19104_v19 = vld [vmem:[%s22553_s27 + $0x55c] ss:$36 sps:$4 sm:$0xff]  }
 0x31a   : > { %2692 = vmatprep.subr.bf16.mxu1 %v19060_v20  ;;  %2864 = vmatprep.subr.bf16.mxu0 %v19062_v21  ;;  %v19107_v20 = vld [vmem:[%s22553_s27 + $0x56c] ss:$36 sps:$4 sm:$0xff]   ;;  %v19102_v21 = vld [vmem:[%s22553_s27 + $0x558] ss:$36 sps:$4 sm:$0xff]  }
 0x31d   : > { %2693 = vmatpush1.bf16.msra.mxu1 %v19064_v22  ;;  %2865 = vmatpush1.bf16.msra.mxu0 %v19065_v23  ;;  %v19105_v22 = vld [vmem:[%s22553_s27 + $0x568] ss:$36 sps:$4 sm:$0xff]  }
 0x31e   : > { %2694 = vmatprep.subr.bf16.mxu1 %v19066_v24  ;;  %2866 = vmatprep.subr.bf16.mxu0 %v19068_v25  ;;  %v19110_v23 = vld [vmem:[%s22553_s27 + $0x5a4] ss:$36 sps:$4 sm:$0xff]   ;;  %v19113_v24 = vld [vmem:[%s22553_s27 + $0x5b4] ss:$36 sps:$4 sm:$0xff]  }
 0x31f   : > { %v19108_v25 = vld [vmem:[%s22553_s27 + $0x5a0] ss:$36 sps:$4 sm:$0xff]  }
 0x321   : > { %2695 = vmatpush1.bf16.msra.mxu1 %v19070_v26  ;;  %2867 = vmatpush1.bf16.msra.mxu0 %v19071_v27  ;;  %v19111_v26 = vld [vmem:[%s22553_s27 + $0x5b0] ss:$36 sps:$4 sm:$0xff]  }
 0x322   : > { %2696 = vmatprep.subr.bf16.mxu1 %v19072_v28  ;;  %2868 = vmatprep.subr.bf16.mxu0 %v19074_v29  ;;  %v19116_v27 = vld [vmem:[%s22553_s27 + $0x5ec] ss:$36 sps:$4 sm:$0xff]   ;;  %v19119_v28 = vld [vmem:[%s22553_s27 + $0x5fc] ss:$36 sps:$4 sm:$0xff]  }
 0x323   : > { %v19114_v29 = vld [vmem:[%s22553_s27 + $0x5e8] ss:$36 sps:$4 sm:$0xff]  }
 0x325   : > { %2697 = vmatpush1.bf16.msra.mxu1 %v19076_v30  ;;  %2869 = vmatpush1.bf16.msra.mxu0 %v19077_v31  ;;  %v19117_v30 = vld [vmem:[%s22553_s27 + $0x5f8] ss:$36 sps:$4 sm:$0xff]   ;;  %v22805_v31 = vsub.s32 2, %v22736_v44 }
 0x326   : > { %2698 = vmatprep.subr.bf16.mxu1 %v19078_v32  ;;  %2870 = vmatprep.subr.bf16.mxu0 %v19080_v33  ;;  %v19122_v32 = vld [vmem:[%s22553_s27 + $0x634] ss:$36 sps:$4 sm:$0xff]   ;;  %v19125_v33 = vld [vmem:[%s22553_s27 + $0x644] ss:$36 sps:$4 sm:$0xff]  }
 0x327   : > { %25002 = vst [vmem:[#allocation55_spill] sm:$0xff] %v22805_v31 }
 0x329   : > { %2699 = vmatpush1.bf16.msra.mxu1 %v19082_v34  ;;  %2871 = vmatpush1.bf16.msra.mxu0 %v19083_v35  ;;  %v19120_v35 = vld [vmem:[%s22553_s27 + $0x630] ss:$36 sps:$4 sm:$0xff]  }
 0x32a   : > { %2711 = vmatprep.subr.bf16.mxu1 %v19086_v36  ;;  %2883 = vmatprep.subr.bf16.mxu0 %v19089_v37  ;;  %v19123_v36 = vld [vmem:[%s22553_s27 + $0x640] ss:$36 sps:$4 sm:$0xff]  }
 0x3a1   : > { %v1164_v38 = vpop.xlane.xlu1 %1163 }
 0x3a2   : > { %v1169_v39 = vmul.f32 0.0026041667, %v1164_v38  ;;  %v1193_v38 = vrot.slane %v22740_v46, %v22805_v31  ;;  %v19134_v46 = vld [vmem:[%s22553_s27 + $0xc] ss:$36 sps:$4 sm:$0xff]  }
 0x3a4   : > { %v1171_v41 = vadd.f32 1e-05, %v1169_v39  ;;  %v19128_v39 = vld [vmem:[%s22553_s27 + $0x67c] ss:$36 sps:$4 sm:$0xff]  }
 0x3a5   : > { %v1168_v42 = vpop.xlane.xlu1 %1167 }
 0x3a6   : > { %20212 = vrsqrt.f32 %v1171_v41  ;;  %v1170_v43 = vmul.f32 0.0026041667, %v1168_v42  ;;  %v19131_v41 = vld [vmem:[%s22553_s27 + $0x68c] ss:$36 sps:$4 sm:$0xff]  }
 0x3a8   : > { %v1172_v45 = vadd.f32 1e-05, %v1170_v43  ;;  %v19129_v43 = vld [vmem:[%s22553_s27 + $0x688] ss:$36 sps:$4 sm:$0xff]  }
 0x3aa   : > { %20214 = vrsqrt.f32 %v1172_v45 }
 0x3b0   : > { %v22752_v50 = vpop.eup %20212 }
 0x3b1   : > { %v1176_v51 = vmul.f32 %v22752_v50, %v22681_v57  ;;  %v1175_v53 = vmul.f32 %v22752_v50, %v22678_v56  ;;  %v1207_v57 = vrot.slane %v22750_v49, %v22746_v48  ;;  %v1177_v37 = vmul.f32 %v22752_v50, %v22684_v58  ;;  %v19135_v50 = vld [vmem:[%s22553_s27 + $0x260] ss:$36 sps:$4 sm:$0xff]  }
 0x3b2   : > { %v1215_v58 = vrot.slane %v22750_v49, %v22805_v31 }
 0x3b3   : > { %v1198_v61 = vmul.f32 %v1189_v52, %v1176_v51  ;;  %v1197_v62 = vmul.f32 %v1185_v54, %v1175_v53  ;;  %v1199_v45 = vmul.f32 %v1193_v38, %v1177_v37  ;;  %v19192_v37 = vld [vmem:[%s22553_s27 + $0x3fc] ss:$36 sps:$4 sm:$0xff]  }
 0x3b4   : > { %v22762_v55 = vpop.eup %20214 }
 0x3b5   : > { %v1179_v60 = vmul.f32 %v22762_v55, %v22696_v1  ;;  %v1178_v56 = vmul.f32 %v22762_v55, %v22693_v0  ;;  %v1220_v4 = vadd.f32 %v1211_v59, %v1198_v61  ;;  %v1219_v8 = vadd.f32 %v1207_v57, %v1197_v62  ;;  %v19095_v1 = vld [vmem:[%s22553_s27 + $0x4dc] ss:$36 sps:$4 sm:$0xff]  }
 0x3b6   : > { %v1180_v34 = vmul.f32 %v22762_v55, %v22699_v2  ;;  %v19126_v2 = vld [vmem:[%s22553_s27 + $0x678] ss:$36 sps:$4 sm:$0xff]   ;;  %v1221_v53 = vadd.f32 %v1215_v58, %v1199_v45  ;;  %v19199_v45 = vld [vmem:[%s22553_s27 + $0x4d0] ss:$36 sps:$4 sm:$0xff]  }
 0x3b7   : > { %v1201_v63 = vmul.f32 %v1189_v52, %v1179_v60  ;;  %v1200_v3 = vmul.f32 %v1185_v54, %v1178_v56  ;;  %v19132_v52 = vld [vmem:[%s22553_s27 + $0x8] ss:$36 sps:$4 sm:$0xff]   ;;  %v19136_v54 = vld [vmem:[%s22553_s27 + $0x20] ss:$36 sps:$4 sm:$0xff]   ;;  %v19139_v55 = vld [vmem:[%s22553_s27 + $0x54] ss:$36 sps:$4 sm:$0xff]  }
 0x3b8   : > { %v1202_v42 = vmul.f32 %v1193_v38, %v1180_v34  ;;  %v19141_v60 = vld [vmem:[%s22553_s27 + $0x68] ss:$36 sps:$4 sm:$0xff]   ;;  %v19144_v61 = vld [vmem:[%s22553_s27 + $0x9c] ss:$36 sps:$4 sm:$0xff]   ;;  %v19145_v56 = vld [vmem:[%s22553_s27 + $0x2f0] ss:$36 sps:$4 sm:$0xff]  }
 0x3b9   : > { %v1223_v5 = vadd.f32 %v1211_v59, %v1201_v63  ;;  %v1222_v9 = vadd.f32 %v1207_v57, %v1200_v3  ;;  %v19140_v59 = vld [vmem:[%s22553_s27 + $0x2a8] ss:$36 sps:$4 sm:$0xff]   ;;  %v19137_v57 = vld [vmem:[%s22553_s27 + $0x50] ss:$36 sps:$4 sm:$0xff]   ;;  %v19142_v62 = vld [vmem:[%s22553_s27 + $0x98] ss:$36 sps:$4 sm:$0xff]  }
 0x3ba   : > { %v1224_v51 = vadd.f32 %v1215_v58, %v1202_v42  ;;  %v19146_v63 = vld [vmem:[%s22553_s27 + $0xb0] ss:$36 sps:$4 sm:$0xff]   ;;  %v19149_v3 = vld [vmem:[%s22553_s27 + $0xe4] ss:$36 sps:$4 sm:$0xff]   ;;  %v19190_v38 = vld [vmem:[%s22553_s27 + $0x3f8] ss:$36 sps:$4 sm:$0xff]  }
 0x3bb   : > { %v22776_v11 = vpack.c.bf16 %v1223_v5, %v1220_v4  ;;  %v22778_v0 = vpack.c.bf16 %v1222_v9, %v1219_v8  ;;  %v19150_v4 = vld [vmem:[%s22553_s27 + $0x338] ss:$36 sps:$4 sm:$0xff]   ;;  %v19147_v5 = vld [vmem:[%s22553_s27 + $0xe0] ss:$36 sps:$4 sm:$0xff]   ;;  %v19152_v9 = vld [vmem:[%s22553_s27 + $0x128] ss:$36 sps:$4 sm:$0xff]  }
 0x3bc   : > { %v22829_v49 = vpack.c.bf16 %v1224_v51, %v1221_v53  ;;  %v19155_v8 = vld [vmem:[%s22553_s27 + $0x380] ss:$36 sps:$4 sm:$0xff]   ;;  %v19184_v34 = vld [vmem:[%s22553_s27 + $0x368] ss:$36 sps:$4 sm:$0xff]  }
 0x3bd   : > { %2700 = vmatprep.mubr.bf16.mxu1 %v22776_v11  ;;  %2872 = vmatprep.mubr.bf16.mxu0 %v22776_v11  ;;  %v19198_v42 = vld [vmem:[%s22553_s27 + $0x48c] ss:$36 sps:$4 sm:$0xff]   ;;  %v19204_v58 = vld [vmem:[%s22553_s27 + $0x51c] ss:$36 sps:$4 sm:$0xff]   ;;  %v19207_v51 = vld [vmem:[%s22553_s27 + $0x564] ss:$36 sps:$4 sm:$0xff]  }
 0x3be   : > { %2701 = vmatmul.mubr.bf16.vlgmr.msra.gmra.mrb[0].mxu1 %v22778_v0  ;;  %2873 = vmatmul.mubr.bf16.vlgmr.msra.gmra.mrb[0].mxu0 %v22778_v0  ;;  %v19210_v53 = vld [vmem:[%s22553_s27 + $0x5ac] ss:$36 sps:$4 sm:$0xff]  }
 0x3bf   : > { %2712 = vmatpush1.bf16.msra.mxu1 %v19084_v6  ;;  %2884 = vmatpush1.bf16.msra.mxu0 %v19087_v7  ;;  %v19151_v6 = vld [vmem:[%s22553_s27 + $0xf8] ss:$36 sps:$4 sm:$0xff]   ;;  %v19154_v7 = vld [vmem:[%s22553_s27 + $0x12c] ss:$36 sps:$4 sm:$0xff]  }
 0x3c0   : > { %2713 = vmatprep.subr.bf16.mxu1 %v19092_v10  ;;  %2885 = vmatprep.subr.bf16.mxu0 %v19095_v1  ;;  %v19156_v10 = vld [vmem:[%s22553_s27 + $0x140] ss:$36 sps:$4 sm:$0xff]   ;;  %v19159_v1 = vld [vmem:[%s22553_s27 + $0x174] ss:$36 sps:$4 sm:$0xff]  }
 0x3c1   : > { %2743 = vmatprep.mubr.bf16.mxu1 %v24873_v18  ;;  %2915 = vmatprep.mubr.bf16.mxu0 %v24873_v18 }
 0x3c3   : > { %2714 = vmatpush1.bf16.msra.mxu1 %v19090_v12  ;;  %2886 = vmatpush1.bf16.msra.mxu0 %v19093_v13  ;;  %v19160_v12 = vld [vmem:[%s22553_s27 + $0x3c8] ss:$36 sps:$4 sm:$0xff]   ;;  %v19157_v13 = vld [vmem:[%s22553_s27 + $0x170] ss:$36 sps:$4 sm:$0xff]  }
 0x3c4   : > { %2715 = vmatprep.subr.bf16.mxu1 %v19098_v14  ;;  %2887 = vmatprep.subr.bf16.mxu0 %v19101_v15  ;;  %v19161_v14 = vld [vmem:[%s22553_s27 + $0x188] ss:$36 sps:$4 sm:$0xff]   ;;  %v19164_v15 = vld [vmem:[%s22553_s27 + $0x1bc] ss:$36 sps:$4 sm:$0xff]  }
 0x3c7   : > { %2716 = vmatpush1.bf16.msra.mxu1 %v19096_v16  ;;  %2888 = vmatpush1.bf16.msra.mxu0 %v19099_v17  ;;  %v19165_v16 = vld [vmem:[%s22553_s27 + $0x410] ss:$36 sps:$4 sm:$0xff]   ;;  %v19162_v17 = vld [vmem:[%s22553_s27 + $0x1b8] ss:$36 sps:$4 sm:$0xff]  }
 0x3c8   : > { %2717 = vmatprep.subr.bf16.mxu1 %v19104_v19  ;;  %2889 = vmatprep.subr.bf16.mxu0 %v19107_v20  ;;  %v19166_v19 = vld [vmem:[%s22553_s27 + $0x1d0] ss:$36 sps:$4 sm:$0xff]   ;;  %v19169_v20 = vld [vmem:[%s22553_s27 + $0x204] ss:$36 sps:$4 sm:$0xff]  }
 0x3cb   : > { %2718 = vmatpush1.bf16.msra.mxu1 %v19102_v21  ;;  %2890 = vmatpush1.bf16.msra.mxu0 %v19105_v22  ;;  %v19170_v21 = vld [vmem:[%s22553_s27 + $0x458] ss:$36 sps:$4 sm:$0xff]   ;;  %v19167_v22 = vld [vmem:[%s22553_s27 + $0x200] ss:$36 sps:$4 sm:$0xff]  }
 0x3cc   : > { %2719 = vmatprep.subr.bf16.mxu1 %v19110_v23  ;;  %2891 = vmatprep.subr.bf16.mxu0 %v19113_v24  ;;  %v19171_v23 = vld [vmem:[%s22553_s27 + $0x218] ss:$36 sps:$4 sm:$0xff]   ;;  %v19174_v24 = vld [vmem:[%s22553_s27 + $0x24c] ss:$36 sps:$4 sm:$0xff]  }
 0x3cf   : > { %2720 = vmatpush1.bf16.msra.mxu1 %v19108_v25  ;;  %2892 = vmatpush1.bf16.msra.mxu0 %v19111_v26  ;;  %v19172_v25 = vld [vmem:[%s22553_s27 + $0x248] ss:$36 sps:$4 sm:$0xff]   ;;  %v19177_v26 = vld [vmem:[%s22553_s27 + $0x294] ss:$36 sps:$4 sm:$0xff]  }
 0x3d0   : > { %2721 = vmatprep.subr.bf16.mxu1 %v19116_v27  ;;  %2893 = vmatprep.subr.bf16.mxu0 %v19119_v28  ;;  %v19175_v27 = vld [vmem:[%s22553_s27 + $0x290] ss:$36 sps:$4 sm:$0xff]   ;;  %v19180_v28 = vld [vmem:[%s22553_s27 + $0x2dc] ss:$36 sps:$4 sm:$0xff]  }
 0x3d3   : > { %2722 = vmatpush1.bf16.msra.mxu1 %v19114_v29  ;;  %2894 = vmatpush1.bf16.msra.mxu0 %v19117_v30  ;;  %v19178_v29 = vld [vmem:[%s22553_s27 + $0x2d8] ss:$36 sps:$4 sm:$0xff]   ;;  %v19183_v30 = vld [vmem:[%s22553_s27 + $0x324] ss:$36 sps:$4 sm:$0xff]  }
 0x3d4   : > { %2723 = vmatprep.subr.bf16.mxu1 %v19122_v32  ;;  %2895 = vmatprep.subr.bf16.mxu0 %v19125_v33  ;;  %v19181_v32 = vld [vmem:[%s22553_s27 + $0x320] ss:$36 sps:$4 sm:$0xff]   ;;  %v19186_v33 = vld [vmem:[%s22553_s27 + $0x36c] ss:$36 sps:$4 sm:$0xff]  }
 0x3d7   : > { %2724 = vmatpush1.bf16.msra.mxu1 %v19120_v35  ;;  %2896 = vmatpush1.bf16.msra.mxu0 %v19123_v36  ;;  %v19189_v35 = vld [vmem:[%s22553_s27 + $0x3b4] ss:$36 sps:$4 sm:$0xff]  }
 0x3d8   : > { %2725 = vmatprep.subr.bf16.mxu1 %v19128_v39  ;;  %2897 = vmatprep.subr.bf16.mxu0 %v19131_v41  ;;  %v19187_v36 = vld [vmem:[%s22553_s27 + $0x3b0] ss:$36 sps:$4 sm:$0xff]   ;;  %v19195_v39 = vld [vmem:[%s22553_s27 + $0x444] ss:$36 sps:$4 sm:$0xff]  }
 0x3d9   : > { %v19193_v41 = vld [vmem:[%s22553_s27 + $0x440] ss:$36 sps:$4 sm:$0xff]  }
 0x3db   : > { %2726 = vmatpush1.bf16.msra.mxu1 %v19126_v2  ;;  %2898 = vmatpush1.bf16.msra.mxu0 %v19129_v43  ;;  %v19196_v2 = vld [vmem:[%s22553_s27 + $0x488] ss:$36 sps:$4 sm:$0xff]   ;;  %v19201_v43 = vld [vmem:[%s22553_s27 + $0x4d4] ss:$36 sps:$4 sm:$0xff]  }
 0x3dc   : > { %2754 = vmatprep.subr.bf16.mxu1 %v19134_v46  ;;  %17845 = vmatprep.subr.bf16.mxu0 %v19135_v50  ;;  %v24887_v46 = vmov 0.0   ;;  %v19202_v50 = vld [vmem:[%s22553_s27 + $0x518] ss:$36 sps:$4 sm:$0xff]  }
 0x3de   : > { %2744 = vmatmul.mubr.bf16.vlgmr.msra.gmra.mrb[0].mxu1 %v22829_v49  ;;  %2916 = vmatmul.mubr.bf16.vlgmr.msra.gmra.mrb[0].mxu0 %v22829_v49 }
 0x3df   : > { %2755 = vmatpush1.bf16.msra.mxu1 %v19132_v52  ;;  %2786 = vmatprep.mubr.bf16.mxu1 %v22776_v11  ;;  %v19205_v52 = vld [vmem:[%s22553_s27 + $0x560] ss:$36 sps:$4 sm:$0xff]  }
 0x3e0   : > { %17846 = vmatpush3.bf16.msra.mxu0 %v19136_v54  ;;  %3044 = vmatprep.mubr.bf16.mxu0 %v22776_v11  ;;  %v19208_v54 = vld [vmem:[%s22553_s27 + $0x5a8] ss:$36 sps:$4 sm:$0xff]  }
 0x3e1   : > { %2756 = vmatprep.subr.bf16.mxu1 %v19139_v55  ;;  %17847 = vmatprep.subr.bf16.mxu0 %v19140_v59  ;;  %v19213_v55 = vld [vmem:[%s22553_s27 + $0x5f4] ss:$36 sps:$4 sm:$0xff]  }
 0x3e2   : > { %v19211_v59 = vld [vmem:[%s22553_s27 + $0x5f0] ss:$36 sps:$4 sm:$0xff]  }
 0x3e3   : > { %2757 = vmatpush1.bf16.msra.mxu1 %v19137_v57  ;;  %v19216_v57 = vld [vmem:[%s22553_s27 + $0x63c] ss:$36 sps:$4 sm:$0xff]  }
 0x3e4   : > { %17848 = vmatpush3.bf16.msra.mxu0 %v19141_v60  ;;  %2758 = vmatprep.subr.bf16.mxu1 %v19144_v61  ;;  %v19214_v60 = vld [vmem:[%s22553_s27 + $0x638] ss:$36 sps:$4 sm:$0xff]   ;;  %v19219_v61 = vld [vmem:[%s22553_s27 + $0x684] ss:$36 sps:$4 sm:$0xff]  }
 0x3e5   : > { %17849 = vmatprep.subr.bf16.mxu0 %v19145_v56  ;;  %v19217_v56 = vld [vmem:[%s22553_s27 + $0x680] ss:$36 sps:$4 sm:$0xff]  }
 0x3e7   : > { %2759 = vmatpush1.bf16.msra.mxu1 %v19142_v62  ;;  %v19222_v62 = vld [vmem:[%s22553_s27 + $0x1c] ss:$36 sps:$4 sm:$0xff]  }
 0x3e8   : > { %17850 = vmatpush3.bf16.msra.mxu0 %v19146_v63  ;;  %2760 = vmatprep.subr.bf16.mxu1 %v19149_v3  ;;  %v19220_v63 = vld [vmem:[%s22553_s27 + $0x18] ss:$36 sps:$4 sm:$0xff]   ;;  %v19225_v3 = vld [vmem:[%s22553_s27 + $0x64] ss:$36 sps:$4 sm:$0xff]  }
 0x3e9   : > { %17851 = vmatprep.subr.bf16.mxu0 %v19150_v4  ;;  %v19223_v4 = vld [vmem:[%s22553_s27 + $0x60] ss:$36 sps:$4 sm:$0xff]  }
 0x3eb   : > { %2761 = vmatpush1.bf16.msra.mxu1 %v19147_v5  ;;  %v19228_v5 = vld [vmem:[%s22553_s27 + $0xac] ss:$36 sps:$4 sm:$0xff]  }
 0x3ec   : > { %17852 = vmatpush3.bf16.msra.mxu0 %v19151_v6  ;;  %2762 = vmatprep.subr.bf16.mxu1 %v19154_v7  ;;  %v19226_v6 = vld [vmem:[%s22553_s27 + $0xa8] ss:$36 sps:$4 sm:$0xff]   ;;  %v19231_v7 = vld [vmem:[%s22553_s27 + $0xf4] ss:$36 sps:$4 sm:$0xff]  }
 0x3ed   : > { %17853 = vmatprep.subr.bf16.mxu0 %v19155_v8  ;;  %v19229_v8 = vld [vmem:[%s22553_s27 + $0xf0] ss:$36 sps:$4 sm:$0xff]  }
 0x3ef   : > { %2763 = vmatpush1.bf16.msra.mxu1 %v19152_v9  ;;  %v19234_v9 = vld [vmem:[%s22553_s27 + $0x13c] ss:$36 sps:$4 sm:$0xff]  }
 0x3f0   : > { %17854 = vmatpush3.bf16.msra.mxu0 %v19156_v10  ;;  %2764 = vmatprep.subr.bf16.mxu1 %v19159_v1  ;;  %v19232_v10 = vld [vmem:[%s22553_s27 + $0x138] ss:$36 sps:$4 sm:$0xff]   ;;  %v19235_v1 = vld [vmem:[%s22553_s27 + $0x180] ss:$36 sps:$4 sm:$0xff]  }
 0x3f1   : > { %17855 = vmatprep.subr.bf16.mxu0 %v19160_v12  ;;  %v19240_v12 = vld [vmem:[%s22553_s27 + $0x1cc] ss:$36 sps:$4 sm:$0xff]  }
 0x3f3   : > { %2765 = vmatpush1.bf16.msra.mxu1 %v19157_v13  ;;  %v19238_v13 = vld [vmem:[%s22553_s27 + $0x1c8] ss:$36 sps:$4 sm:$0xff]  }
 0x3f4   : > { %17856 = vmatpush3.bf16.msra.mxu0 %v19161_v14  ;;  %2766 = vmatprep.subr.bf16.mxu1 %v19164_v15  ;;  %v19243_v14 = vld [vmem:[%s22553_s27 + $0x214] ss:$36 sps:$4 sm:$0xff]  }
 0x3f5   : > { %17857 = vmatprep.subr.bf16.mxu0 %v19165_v16  ;;  %v19241_v15 = vld [vmem:[%s22553_s27 + $0x210] ss:$36 sps:$4 sm:$0xff]   ;;  %v19246_v16 = vld [vmem:[%s22553_s27 + $0x25c] ss:$36 sps:$4 sm:$0xff]  }
 0x3f7   : > { %2767 = vmatpush1.bf16.msra.mxu1 %v19162_v17  ;;  %v19244_v17 = vld [vmem:[%s22553_s27 + $0x258] ss:$36 sps:$4 sm:$0xff]  }
 0x3f8   : > { %17858 = vmatpush3.bf16.msra.mxu0 %v19166_v19  ;;  %2768 = vmatprep.subr.bf16.mxu1 %v19169_v20  ;;  %v19249_v19 = vld [vmem:[%s22553_s27 + $0x2a4] ss:$36 sps:$4 sm:$0xff]  }
 0x3f9   : > { %17859 = vmatprep.subr.bf16.mxu0 %v19170_v21  ;;  %v19247_v20 = vld [vmem:[%s22553_s27 + $0x2a0] ss:$36 sps:$4 sm:$0xff]   ;;  %v19252_v21 = vld [vmem:[%s22553_s27 + $0x2ec] ss:$36 sps:$4 sm:$0xff]  }
 0x3fb   : > { %2769 = vmatpush1.bf16.msra.mxu1 %v19167_v22  ;;  %v19250_v22 = vld [vmem:[%s22553_s27 + $0x2e8] ss:$36 sps:$4 sm:$0xff]  }
 0x3fc   : > { %17860 = vmatpush3.bf16.msra.mxu0 %v19171_v23  ;;  %2770 = vmatprep.subr.bf16.mxu1 %v19174_v24  ;;  %v19255_v23 = vld [vmem:[%s22553_s27 + $0x334] ss:$36 sps:$4 sm:$0xff]  }
 0x3fd   : > { %18299 = vmatprep.subr.bf16.mxu0 %v24887_v46  ;;  %v19253_v24 = vld [vmem:[%s22553_s27 + $0x330] ss:$36 sps:$4 sm:$0xff]  }
 0x3ff   : > { %3045 = vmatmul.mubr.bf16.vlgmr.msra.gmra.mrb[4].mxu0 %v22778_v0  ;;  %2771 = vmatpush1.bf16.msra.mxu1 %v19172_v25  ;;  %v19258_v25 = vld [vmem:[%s22553_s27 + $0x37c] ss:$36 sps:$4 sm:$0xff]  }
 0x400   : > { %2772 = vmatprep.subr.bf16.mxu1 %v19177_v26  ;;  %18301 = vmatprep.mubr.msk.bf16.mxu0 %vm21803_vm0, %v24887_v46  ;;  %v19256_v26 = vld [vmem:[%s22553_s27 + $0x378] ss:$36 sps:$4 sm:$0xff]  }
 0x403   : > { %2773 = vmatpush1.bf16.msra.mxu1 %v19175_v27  ;;  %v19261_v27 = vld [vmem:[%s22553_s27 + $0x3c4] ss:$36 sps:$4 sm:$0xff]  }
 0x404   : > { %2774 = vmatprep.subr.bf16.mxu1 %v19180_v28  ;;  %v19259_v28 = vld [vmem:[%s22553_s27 + $0x3c0] ss:$36 sps:$4 sm:$0xff]  }
 0x407   : > { %2775 = vmatpush1.bf16.msra.mxu1 %v19178_v29  ;;  %v19264_v29 = vld [vmem:[%s22553_s27 + $0x40c] ss:$36 sps:$4 sm:$0xff]  }
 0x408   : > { %2776 = vmatprep.subr.bf16.mxu1 %v19183_v30  ;;  %v19262_v30 = vld [vmem:[%s22553_s27 + $0x408] ss:$36 sps:$4 sm:$0xff]  }
 0x40b   : > { %2777 = vmatpush1.bf16.msra.mxu1 %v19181_v32  ;;  %v19267_v32 = vld [vmem:[%s22553_s27 + $0x454] ss:$36 sps:$4 sm:$0xff]  }
 0x40c   : > { %2778 = vmatprep.subr.bf16.mxu1 %v19186_v33  ;;  %v19265_v33 = vld [vmem:[%s22553_s27 + $0x450] ss:$36 sps:$4 sm:$0xff]  }
 0x40f   : > { %2779 = vmatpush1.bf16.msra.mxu1 %v19184_v34  ;;  %v19270_v34 = vld [vmem:[%s22553_s27 + $0x49c] ss:$36 sps:$4 sm:$0xff]  }
 0x410   : > { %2780 = vmatprep.subr.bf16.mxu1 %v19189_v35  ;;  %v19268_v35 = vld [vmem:[%s22553_s27 + $0x498] ss:$36 sps:$4 sm:$0xff]  }
 0x413   : > { %2781 = vmatpush1.bf16.msra.mxu1 %v19187_v36  ;;  %v19273_v36 = vld [vmem:[%s22553_s27 + $0x4e4] ss:$36 sps:$4 sm:$0xff]  }
 0x414   : > { %2782 = vmatprep.subr.bf16.mxu1 %v19192_v37  ;;  %v19271_v37 = vld [vmem:[%s22553_s27 + $0x4e0] ss:$36 sps:$4 sm:$0xff]  }
 0x417   : > { %2783 = vmatpush1.bf16.msra.mxu1 %v19190_v38  ;;  %v19276_v38 = vld [vmem:[%s22553_s27 + $0x52c] ss:$36 sps:$4 sm:$0xff]  }
 0x418   : > { %2784 = vmatprep.subr.bf16.mxu1 %v19195_v39  ;;  %v19274_v39 = vld [vmem:[%s22553_s27 + $0x528] ss:$36 sps:$4 sm:$0xff]  }
 0x41b   : > { %2785 = vmatpush1.bf16.msra.mxu1 %v19193_v41  ;;  %v19279_v41 = vld [vmem:[%s22553_s27 + $0x574] ss:$36 sps:$4 sm:$0xff]  }
 0x41c   : > { %2797 = vmatprep.subr.bf16.mxu1 %v19198_v42  ;;  %v19277_v42 = vld [vmem:[%s22553_s27 + $0x570] ss:$36 sps:$4 sm:$0xff]  }
 0x41e   : > { %2787 = vmatmul.mubr.bf16.vlgmr.msra.gmra.mrb[4].mxu1 %v22778_v0 }
 0x41f   : > { %2798 = vmatpush1.bf16.msra.mxu1 %v19196_v2  ;;  %2829 = vmatprep.mubr.bf16.mxu1 %v24873_v18  ;;  %v19280_v2 = vld [vmem:[%s22553_s27 + $0x5b8] ss:$36 sps:$4 sm:$0xff]  }
 0x420   : > { %2799 = vmatprep.subr.bf16.mxu1 %v19201_v43  ;;  %v19285_v43 = vld [vmem:[%s22553_s27 + $0x604] ss:$36 sps:$4 sm:$0xff]  }
 0x423   : > { %2800 = vmatpush1.bf16.msra.mxu1 %v19199_v45  ;;  %v19283_v45 = vld [vmem:[%s22553_s27 + $0x600] ss:$36 sps:$4 sm:$0xff]  }
 0x424   : > { %2801 = vmatprep.subr.bf16.mxu1 %v19204_v58  ;;  %v19288_v58 = vld [vmem:[%s22553_s27 + $0x64c] ss:$36 sps:$4 sm:$0xff]  }
 0x427   : > { %2802 = vmatpush1.bf16.msra.mxu1 %v19202_v50  ;;  %v19286_v50 = vld [vmem:[%s22553_s27 + $0x648] ss:$36 sps:$4 sm:$0xff]  }
 0x428   : > { %2803 = vmatprep.subr.bf16.mxu1 %v19207_v51  ;;  %v19291_v51 = vld [vmem:[%s22553_s27 + $0x694] ss:$36 sps:$4 sm:$0xff]  }
 0x42b   : > { %2804 = vmatpush1.bf16.msra.mxu1 %v19205_v52  ;;  %v19289_v52 = vld [vmem:[%s22553_s27 + $0x690] ss:$36 sps:$4 sm:$0xff]  }
 0x42c   : > { %2805 = vmatprep.subr.bf16.mxu1 %v19210_v53  ;;  %v19292_v53 = vld [vmem:[%s22553_s27 + $0x4a0] ss:$36 sps:$4 sm:$0xff]  }
 0x42f   : > { %2806 = vmatpush1.bf16.msra.mxu1 %v19208_v54  ;;  %v19293_v54 = vld [vmem:[%s22553_s27 + $0x4e8] ss:$36 sps:$4 sm:$0xff]  }
 0x430   : > { %2807 = vmatprep.subr.bf16.mxu1 %v19213_v55  ;;  %v19294_v55 = vld [vmem:[%s22553_s27 + $0x530] ss:$36 sps:$4 sm:$0xff]  }
 0x433   : > { %2808 = vmatpush1.bf16.msra.mxu1 %v19211_v59  ;;  %v19295_v59 = vld [vmem:[%s22553_s27 + $0x578] ss:$36 sps:$4 sm:$0xff]  }
 0x434   : > { %2809 = vmatprep.subr.bf16.mxu1 %v19216_v57  ;;  %v19296_v57 = vld [vmem:[%s22553_s27 + $0x5c0] ss:$36 sps:$4 sm:$0xff]  }
 0x437   : > { %2810 = vmatpush1.bf16.msra.mxu1 %v19214_v60  ;;  %v19297_v60 = vld [vmem:[%s22553_s27 + $0x608] ss:$36 sps:$4 sm:$0xff]  }
 0x438   : > { %2811 = vmatprep.subr.bf16.mxu1 %v19219_v61 }
 0x43b   : > { %2812 = vmatpush1.bf16.msra.mxu1 %v19217_v56 }
 0x43c   : > { %2926 = vmatprep.subr.bf16.mxu1 %v19222_v62 }
 0x43e   : > { %2830 = vmatmul.mubr.bf16.vlgmr.msra.gmra.mrb[4].mxu1 %v22829_v49 }
 0x43f   : > { %2927 = vmatpush1.bf16.msra.mxu1 %v19220_v63  ;;  %2958 = vmatprep.mubr.bf16.mxu1 %v22776_v11  ;;  %v19237_v11 = vld [vmem:[%s22553_s27 + $0x184] ss:$36 sps:$4 sm:$0xff]  }
 0x440   : > { %2928 = vmatprep.subr.bf16.mxu1 %v19225_v3 }
 0x443   : > { %2929 = vmatpush1.bf16.msra.mxu1 %v19223_v4 }
 0x444   : > { %2930 = vmatprep.subr.bf16.mxu1 %v19228_v5 }
 0x447   : > { %2931 = vmatpush1.bf16.msra.mxu1 %v19226_v6  ;;  %v19298_v6 = vld [vmem:[%s22553_s27 + $0x650] ss:$36 sps:$4 sm:$0xff]  }
 0x448   : > { %2932 = vmatprep.subr.bf16.mxu1 %v19231_v7 }
 0x44b   : > { %2933 = vmatpush1.bf16.msra.mxu1 %v19229_v8 }
 0x44c   : > { %2934 = vmatprep.subr.bf16.mxu1 %v19234_v9  ;;  %v19299_v9 = vld [vmem:[%s22553_s27 + $0x698] ss:$36 sps:$4 sm:$0xff]  }
 0x44f   : > { %2935 = vmatpush1.bf16.msra.mxu1 %v19232_v10 }
 0x450   : > { %2936 = vmatprep.subr.bf16.mxu1 %v19237_v11 }
 0x453   : > { %2937 = vmatpush1.bf16.msra.mxu1 %v19235_v1 }
 0x454   : > { %2938 = vmatprep.subr.bf16.mxu1 %v19240_v12 }
 0x457   : > { %2939 = vmatpush1.bf16.msra.mxu1 %v19238_v13 }
 0x458   : > { %2940 = vmatprep.subr.bf16.mxu1 %v19243_v14 }
 0x45b   : > { %2941 = vmatpush1.bf16.msra.mxu1 %v19241_v15 }
 0x45c   : > { %2942 = vmatprep.subr.bf16.mxu1 %v19246_v16 }
 0x45f   : > { %2943 = vmatpush1.bf16.msra.mxu1 %v19244_v17 }
 0x460   : > { %2944 = vmatprep.subr.bf16.mxu1 %v19249_v19 }
 0x463   : > { %2945 = vmatpush1.bf16.msra.mxu1 %v19247_v20 }
 0x464   : > { %2946 = vmatprep.subr.bf16.mxu1 %v19252_v21 }
 0x467   : > { %2947 = vmatpush1.bf16.msra.mxu1 %v19250_v22 }
 0x468   : > { %2948 = vmatprep.subr.bf16.mxu1 %v19255_v23 }
 0x46b   : > { %2949 = vmatpush1.bf16.msra.mxu1 %v19253_v24 }
 0x46c   : > { %2950 = vmatprep.subr.bf16.mxu1 %v19258_v25 }
 0x46f   : > { %2951 = vmatpush1.bf16.msra.mxu1 %v19256_v26 }
 0x470   : > { %2952 = vmatprep.subr.bf16.mxu1 %v19261_v27 }
 0x473   : > { %2953 = vmatpush1.bf16.msra.mxu1 %v19259_v28 }
 0x474   : > { %2954 = vmatprep.subr.bf16.mxu1 %v19264_v29 }
 0x477   : > { %2955 = vmatpush1.bf16.msra.mxu1 %v19262_v30 }
 0x478   : > { %2956 = vmatprep.subr.bf16.mxu1 %v19267_v32 }
 0x47b   : > { %2957 = vmatpush1.bf16.msra.mxu1 %v19265_v33 }
 0x47c   : > { %2969 = vmatprep.subr.bf16.mxu1 %v19270_v34 }
 0x47e   : > { %2959 = vmatmul.mubr.bf16.vlgmr.msra.gmra.mrb[8].mxu1 %v22778_v0  ;;  %v19282_v0 = vld [vmem:[%s22553_s27 + $0x5bc] ss:$36 sps:$4 sm:$0xff]   ;;  %s25073_s27 = scalar_lea.vmem [#allocation14], %s22537_s5 }
 0x47f   : > { %2970 = vmatpush1.bf16.msra.mxu1 %v19268_v35  ;;  %3001 = vmatprep.mubr.bf16.mxu1 %v24873_v18 }
 0x480   : > { %2971 = vmatprep.subr.bf16.mxu1 %v19273_v36 }
 0x483   : > { %2972 = vmatpush1.bf16.msra.mxu1 %v19271_v37  ;;  %v3097_v37 = vand.u32 127, %v1182_v40 }
 0x484   : > { %2973 = vmatprep.subr.bf16.mxu1 %v19276_v38  ;;  %v20268_v38 = vld [vmem:[#allocation2] sm:$0xff] }
 0x485   : > { %vm23018_vm3 = vcmp.le.s32.totalorder %v3097_v37, %v22736_v44  ;;  %v23080_v37 = vld [vmem:[%s22555_s30 + $0x80] ss:$12 sps:$4 sm:$0xff]  }
 0x487   : > { %2974 = vmatpush1.bf16.msra.mxu1 %v19274_v39 }
 0x488   : > { %2975 = vmatprep.subr.bf16.mxu1 %v19279_v41 }
 0x48b   : > { %2976 = vmatpush1.bf16.msra.mxu1 %v19277_v42 }
 0x48c   : > { %2977 = vmatprep.subr.bf16.mxu1 %v19282_v0 }
 0x48f   : > { %2978 = vmatpush1.bf16.msra.mxu1 %v19280_v2 }
 0x490   : > { %2979 = vmatprep.subr.bf16.mxu1 %v19285_v43 }
 0x493   : > { %2980 = vmatpush1.bf16.msra.mxu1 %v19283_v45 }
 0x494   : > { %2981 = vmatprep.subr.bf16.mxu1 %v19288_v58 }
 0x497   : > { %2982 = vmatpush1.bf16.msra.mxu1 %v19286_v50 }
 0x498   : > { %2983 = vmatprep.subr.bf16.mxu1 %v19291_v51 }
 0x49b   : > { %2984 = vmatpush1.bf16.msra.mxu1 %v19289_v52 }
 0x49c   : > { %18279 = vmatprep.subr.bf16.mxu1 %v24887_v46 }
 0x49e   : > { %3002 = vmatmul.mubr.bf16.vlgmr.msra.gmra.mrb[8].mxu1 %v22829_v49 }
 0x49f   : > { %18280 = vmatpush3.bf16.msra.mxu1 %v19292_v53  ;;  %18295 = vmatprep.mubr.msk.bf16.mxu1 %vm21803_vm0, %v24887_v46 }
 0x4a0   : > { %18281 = vmatprep.subr.bf16.mxu1 %v24887_v46 }
 0x4a3   : > { %18282 = vmatpush3.bf16.msra.mxu1 %v19293_v54 }
 0x4a4   : > { %18283 = vmatprep.subr.bf16.mxu1 %v24887_v46 }
 0x4a7   : > { %18284 = vmatpush3.bf16.msra.mxu1 %v19294_v55 }
 0x4a8   : > { %18285 = vmatprep.subr.bf16.mxu1 %v24887_v46 }
 0x4ab   : > { %18286 = vmatpush3.bf16.msra.mxu1 %v19295_v59 }
 0x4ac   : > { %18287 = vmatprep.subr.bf16.mxu1 %v24887_v46 }
 0x4af   : > { %18288 = vmatpush3.bf16.msra.mxu1 %v19296_v57 }
 0x4b0   : > { %18289 = vmatprep.subr.bf16.mxu1 %v24887_v46 }
 0x4b1   : > { %v2745_v61 = vpop.f32.mrb[0].mxu1  ;;  %v22966_v56 = vpop.f32.mrb[0].mxu0 }
 0x4b2   : > { %v3099_v62 = vpack.c.bf16 %v2745_v61, %v2745_v61  ;;  %v22968_v63 = vpop.f32.mrb[1].mxu1  ;;  %v22970_v3 = vpop.f32.mrb[1].mxu0 }
 0x4b3   : > { %v22972_v4 = vpop.f32.mrb[2].mxu1  ;;  %v22974_v5 = vpop.f32.mrb[2].mxu0  ;;  %18290 = vmatpush3.bf16.msra.mxu1 %v19297_v60  ;;  %v23032_v60 = vpack.c.bf16 %v22968_v63, %v22968_v63 }
 0x4b4   : > { %v22977_v7 = vpop.f32.mrb[3].mxu0  ;;  %3212 = vrot.lane.b32.xlu1 %v3099_v62, %s21804_s16  ;;  %v22980_v8 = vpop.f32.mrb[3].mxu1  ;;  %18291 = vmatprep.subr.bf16.mxu1 %v24887_v46 }
 0x4b5   : > { %25003 = vst [vmem:[#allocation56_spill] sm:$0xff] %v22977_v7 }
 0x4b7   : > { %18292 = vmatpush3.bf16.msra.mxu1 %v19298_v6 }
 0x4b8   : > { %18293 = vmatprep.subr.bf16.mxu1 %v24887_v46 }
 0x4bb   : > { %18294 = vmatpush3.bf16.msra.mxu1 %v19299_v9 }
 0x4bc   : > { %18305 = vmatprep.subr.bf16.mxu1 %v24887_v46 }
 0x4be   : > { %18296 = vmatmul.mubr.bf16.vlgmr.msra.gmra.mrb[12].mxu1 %v22829_v49 }
 0x4bf   : > { %18307 = vmatprep.mubr.msk.bf16.mxu1 %vm21803_vm0, %v24887_v46 }
 0x4d2   : > { %v17861_v10 = vpop.f32.mrb[4].mxu0 }
 0x4d3   : > { %v17862_v11 = vpop.f32.mrb[5].mxu0 }
 0x4d4   : > { %v17863_v1 = vadd.f32 %v17862_v11, %v17861_v10  ;;  %v17864_v12 = vpop.f32.mrb[6].mxu0 }
 0x4d5   : > { %v17865_v13 = vpop.f32.mrb[7].mxu0 }
 0x4d6   : > { %v17866_v14 = vadd.f32 %v17865_v13, %v17864_v12 }
 0x511   : > { %v22989_v15 = vpop.f32.mrb[4].mxu1 }
 0x512   : > { %v2833_v16 = vpop.f32.mrb[5].mxu1 }
 0x513   : > { %v3100_v17 = vpack.c.bf16 %v2833_v16, %v2833_v16  ;;  %v22991_v19 = vpop.f32.mrb[6].mxu1  ;;  %v23043_v16 = vld [vmem:[%s22555_s30 + $0x60] ss:$12 sps:$4 sm:$0xff]  }
 0x514   : > { %25004 = vst [vmem:[#allocation57_spill] sm:$0xff] %v22991_v19  ;;  %v22993_v20 = vpop.f32.mrb[7].mxu1 }
 0x515   : > { %v3106_v49 = vsel %vm3101_vm1, %v3100_v17, 0  ;;  %3215 = vrot.lane.b32.xlu0 %v3100_v17, %s21804_s16  ;;  %v23046_v17 = vld [vmem:[%s22555_s30 + $0x64] ss:$12 sps:$4 sm:$0xff]  }
 0x516   : > { %18300 = vmatpush3.bf16.xpose.msra.mxu0 %v3106_v49  ;;  %v23049_v49 = vld [vmem:[%s22555_s30 + $0x7c] ss:$12 sps:$4 sm:$0xff]  }
 0x517   : > { %18311 = vmatprep.subr.bf16.mxu0 %v24887_v46 }
 0x51d   : > { %18302 = vmatmul.mubr.msk.bf16.vlgmr.msra.gmra.mrb[8].mxu0 %vm3101_vm1, %v3099_v62 }
 0x51e   : > { %18313 = vmatprep.mubr.msk.bf16.mxu0 %vm21803_vm0, %v24887_v46 }
 0x526   : > { %v3213_v29 = vpop.permute.xlu1 %3212 }
 0x571   : > { %v3003_v21 = vpop.f32.mrb[8].mxu1 }
 0x572   : > { %v3162_v22 = vpack.c.bf16 %v3003_v21, %v3003_v21  ;;  %v23001_v23 = vpop.f32.mrb[9].mxu1  ;;  %v23054_v21 = vld [vmem:[%s22555_s30 + $0x78] ss:$12 sps:$4 sm:$0xff]  }
 0x573   : > { %v23003_v24 = vpop.f32.mrb[10].mxu1 }
 0x574   : > { %v3168_v25 = vsel %vm3166_vm2, %v3162_v22, 0  ;;  %v23006_v26 = vpop.f32.mrb[11].mxu1 }
 0x575   : > { %18306 = vmatpush3.bf16.msra.mxu1 %v3168_v25  ;;  %v23062_v25 = vld [vmem:[%s22555_s30 + $0x90] ss:$12 sps:$4 sm:$0xff]  }
 0x576   : > { %18317 = vmatprep.subr.bf16.mxu1 %v24887_v46 }
 0x587   : > { %v3216_v27 = vpop.permute.xlu0 %3215 }
 0x588   : > { %v3221_v28 = vsel %vm3101_vm1, %v3216_v27, 0  ;;  %v23066_v27 = vld [vmem:[%s22555_s30 + $0xac] ss:$12 sps:$4 sm:$0xff]  }
 0x589   : > { %18312 = vmatpush3.bf16.xpose.msra.mxu0 %v3221_v28  ;;  %v23070_v28 = vld [vmem:[%s22555_s30 + $0xa8] ss:$12 sps:$4 sm:$0xff]  }
 0x58a   : > { %3393 = vmatprep.subr.bf16.mxu0 %v23046_v17 }
 0x590   : > { %18314 = vmatmul.mubr.msk.bf16.vlgmr.msra.gmra.mrb[12].mxu0 %vm3101_vm1, %v3213_v29 }
 0x591   : > { %v3087_v30 = vpop.f32.mrb[12].mxu1  ;;  %3425 = vmatprep.mubr.bf16.mxu0 %v24873_v18  ;;  %3394 = vmatpush1.bf16.msra.mxu0 %v23043_v16 }
 0x592   : > { %v23012_v32 = vadd.f32 %v17863_v1, %v3087_v30  ;;  %v18297_v33 = vpop.f32.mrb[13].mxu1  ;;  %3395 = vmatprep.subr.bf16.mxu0 %v23049_v49 }
 0x593   : > { %v3090_v34 = vpop.f32.mrb[14].mxu1 }
 0x594   : > { %v23014_v35 = vadd.f32 %v17866_v14, %v3090_v34  ;;  %v18298_v36 = vpop.f32.mrb[15].mxu1  ;;  %v23075_v34 = vld [vmem:[%s22555_s30 + $0x68] ss:$12 sps:$4 sm:$0xff]  }
 0x595   : > { %3396 = vmatpush1.bf16.msra.mxu0 %v23054_v21 }
 0x596   : > { %25005 = vst [vmem:[#allocation58_spill] sm:$0xff] %v23014_v35 }
 0x5f0   : > { %v3142_v39 = vpop.f32.mrb[8].mxu0 }
 0x5f1   : > { %v3148_v41 = vsel %vm23018_vm3, %v3142_v39, -1e+30  ;;  %v18303_v42 = vpop.f32.mrb[9].mxu0  ;;  %v23087_v39 = vld [vmem:[%s22555_s30 + $0x98] ss:$12 sps:$4 sm:$0xff]  }
 0x5f2   : > { %v3145_v0 = vpop.f32.mrb[10].mxu0  ;;  %v3150_v2 = vsel %vm3149_vm4, %v3148_v41, -inf  ;;  %v23098_v42 = vld [vmem:[%s22555_s30 + $0x4] ss:$12 sps:$4 sm:$0xff]  }
 0x5f3   : > { %3151 = vmax.xlane.f32.xlu1 %v3150_v2  ;;  %v18304_v43 = vpop.f32.mrb[11].mxu0 }
 0x663   : > { %v3257_v45 = vpop.f32.mrb[12].mxu0 }
 0x664   : > { %v3263_v40 = vsel %vm23018_vm3, %v3257_v45, -1e+30  ;;  %v18315_v58 = vpop.f32.mrb[13].mxu0 }
 0x665   : > { %v3260_v50 = vpop.f32.mrb[14].mxu0  ;;  %v3264_v51 = vsel %vm3149_vm4, %v3263_v40, -inf  ;;  %v23102_v58 = vld [vmem:[%s22555_s30] ss:$12 sps:$4 sm:$0xff]  }
 0x666   : > { %3265 = vmax.xlane.f32.xlu0 %v3264_v51  ;;  %v18316_v52 = vpop.f32.mrb[15].mxu0  ;;  %v23105_v50 = vld [vmem:[%s22555_s30 + $0x8] ss:$12 sps:$4 sm:$0xff]  }
 0x680   : > { %v3152_v53 = vpop.xlane.xlu1 %3151 }
 0x681   : > { %v3153_v54 = vsub.f32 %v3148_v41, %v3152_v53  ;;  %v23092_v41 = vld [vmem:[%s22555_s30 + $0xb0] ss:$12 sps:$4 sm:$0xff]  }
 0x682   : > { %v23108_v53 = vld [vmem:[%s22555_s30 + $0x1c] ss:$12 sps:$4 sm:$0xff]  }
 0x683   : > { %v3154_v55 = vmul.f32 1.442695, %v3153_v54 }
 0x685   : > { %20216 = vpow2.f32 %v3154_v55 }
 0x68f   : > { %v20217_v59 = vpop.eup %20216 }
 0x690   : > { %v3156_v57 = vsel %vm3149_vm4, %v20217_v59, 0.0 }
 0x691   : > { %3157 = vadd.xlane.f32.xlu0 %v3156_v57  ;;  %v23118_v57 = vld [vmem:[%s22555_s30 + $0x20] ss:$12 sps:$4 sm:$0xff]  }
 0x6a7   : > { %3277 = vrot.lane.b32.xlu0 %v3162_v22, %s21804_s16  ;;  %v23058_v22 = vld [vmem:[%s22555_s30 + $0x94] ss:$12 sps:$4 sm:$0xff]  }
 0x6a8   : > { %3397 = vmatprep.subr.bf16.mxu0 %v23058_v22 }
 0x6a9   : > { %3398 = vmatpush1.bf16.msra.mxu0 %v23062_v25 }
 0x6aa   : > { %3399 = vmatprep.subr.bf16.mxu0 %v23066_v27 }
 0x6ab   : > { %3883 = vrot.lane.b32.xlu0 %v23032_v60, %s21804_s16 }
 0x6ad   : > { %3400 = vmatpush1.bf16.msra.mxu0 %v23070_v28 }
 0x6ae   : > { %3541 = vmatprep.subr.bf16.mxu0 %v23098_v42 }
 0x6f3   : > { %v3266_v61 = vpop.xlane.xlu0 %3265 }
 0x6f4   : > { %v3267_v62 = vsub.f32 %v3263_v40, %v3266_v61  ;;  %v23123_v61 = vld [vmem:[%s22555_s30 + $0x34] ss:$12 sps:$4 sm:$0xff]  }
 0x6f6   : > { %v3268_v6 = vmul.f32 1.442695, %v3267_v62  ;;  %v23131_v62 = vld [vmem:[%s22555_s30 + $0x30] ss:$12 sps:$4 sm:$0xff]  }
 0x6f8   : > { %20218 = vpow2.f32 %v3268_v6  ;;  %v23134_v6 = vld [vmem:[%s22555_s30 + $0x38] ss:$12 sps:$4 sm:$0xff]  }
 0x702   : > { %v20219_v9 = vpop.eup %20218 }
 0x703   : > { %v3270_v10 = vsel %vm3149_vm4, %v20219_v9, 0.0 }
 0x704   : > { %3271 = vadd.xlane.f32.xlu1 %v3270_v10  ;;  %v23144_v10 = vld [vmem:[%s22555_s30 + $0x48] ss:$12 sps:$4 sm:$0xff]  }
 0x71e   : > { %v3158_v11 = vpop.xlane.xlu0 %3157 }
 0x71f   : > { %20220 = vrcp.f32 %v3158_v11  ;;  %v23147_v11 = vld [vmem:[%s22555_s30 + $0x50] ss:$12 sps:$4 sm:$0xff]  }
 0x722   : > { %v3278_v12 = vpop.permute.xlu0 %3277 }
 0x723   : > { %v3283_v14 = vsel %vm3166_vm2, %v3278_v12, 0 }
 0x726   : > { %v3884_v31 = vpop.permute.xlu0 %3883 }
 0x729   : > { %v20221_v1 = vpop.eup %20220 }
 0x72a   : > { %v3160_v63 = vmul.f32 %v20221_v1, %v20217_v59  ;;  %v23115_v59 = vld [vmem:[%s22555_s30 + $0x18] ss:$12 sps:$4 sm:$0xff]   ;;  %v23153_v1 = vpack.c.bf16 %v23001_v23, %v23001_v23  ;;  %v3623_v23 = vpack.c.bf16 %v22966_v56, %v22966_v56 }
 0x72c   : > { %v3161_v13 = vpack.c.bf16 %v3160_v63, %v3160_v63  ;;  %v3688_v12 = vsel %vm3166_vm2, %v23153_v1, 0 }
 0x72e   : > { %18308 = vmatmul.mubr.msk.bf16.vlgmr.msra.gmra.mrb[16].mxu1 %vm3149_vm4, %v3161_v13  ;;  %v3628_v13 = vsel %vm3101_vm1, %v3623_v23, 0 }
 0x72f   : > { %18318 = vmatpush3.bf16.msra.mxu1 %v3283_v14  ;;  %18319 = vmatprep.mubr.msk.bf16.mxu1 %vm21803_vm0, %v24887_v46 }
 0x730   : > { %18323 = vmatprep.subr.bf16.mxu1 %v24887_v46 }
 0x791   : > { %v3272_v29 = vpop.xlane.xlu1 %3271 }
 0x792   : > { %20222 = vrcp.f32 %v3272_v29 }
 0x79c   : > { %v20223_v30 = vpop.eup %20222 }
 0x79d   : > { %v3274_v33 = vmul.f32 %v20223_v30, %v20219_v9  ;;  %v23139_v9 = vld [vmem:[%s22555_s30 + $0x4c] ss:$12 sps:$4 sm:$0xff]  }
 0x79f   : > { %v3275_v36 = vpack.c.bf16 %v3274_v33, %v3274_v33 }
 0x7a1   : > { %18320 = vmatmul.mubr.msk.bf16.vlgmr.msra.gmra.mrb[20].mxu1 %vm3149_vm4, %v3275_v36 }
 0x7a2   : > { %18324 = vmatpush3.bf16.msra.mxu1 %v23075_v34  ;;  %18331 = vmatprep.mubr.msk.bf16.mxu1 %vm21803_vm0, %v24887_v46 }
 0x7a3   : > { %18325 = vmatprep.subr.bf16.mxu1 %v24887_v46 }
 0x7a6   : > { %18326 = vmatpush3.bf16.msra.mxu1 %v23080_v37 }
 0x7a7   : > { %18327 = vmatprep.subr.bf16.mxu1 %v24887_v46 }
 0x7aa   : > { %18328 = vmatpush3.bf16.msra.mxu1 %v23087_v39 }
 0x7ab   : > { %18329 = vmatprep.subr.bf16.mxu1 %v24887_v46 }
 0x7ae   : > { %18330 = vmatpush3.bf16.msra.mxu1 %v23092_v41 }
 0x7af   : > { %18335 = vmatprep.subr.bf16.mxu1 %v24887_v46 }
 0x801   : > { %v3204_v0 = vpop.f32.mrb[16].mxu1 }
 0x802   : > { %v18309_v2 = vpop.f32.mrb[17].mxu1  ;;  %v3210_v63 = vpack.c.bf16 %v3204_v0, %v3204_v0 }
 0x803   : > { %v3207_v43 = vpop.f32.mrb[18].mxu1 }
 0x804   : > { %v18310_v45 = vpop.f32.mrb[19].mxu1 }
 0x874   : > { %v3319_v40 = vpop.f32.mrb[20].mxu1 }
 0x875   : > { %v3325_v51 = vpack.c.bf16 %v3319_v40, %v3319_v40  ;;  %v18321_v52 = vpop.f32.mrb[21].mxu1 }
 0x876   : > { %v3322_v54 = vpop.f32.mrb[22].mxu1 }
 0x877   : > { %v18322_v55 = vpop.f32.mrb[23].mxu1  ;;  %16559 = vmatmul.mubr.msk.bf16.vlgmr.msra.gmra.mrb[16].mxu0 %vm3101_vm1, %v3325_v51  ;;  %18332 = vmatmul.mubr.msk.bf16.vlgmr.msra.gmra.mrb[24].mxu1 %vm3101_vm1, %v3325_v51 }
 0x878   : > { %3542 = vmatpush1.bf16.msra.mxu0 %v23102_v58  ;;  %18336 = vmatpush3.bf16.msra.mxu1 %v23105_v50 }
 0x879   : > { %3543 = vmatprep.subr.bf16.mxu0 %v23108_v53  ;;  %18337 = vmatprep.subr.bf16.mxu1 %v24887_v46 }
 0x87a   : > { %3573 = vmatprep.mubr.bf16.mxu0 %v24873_v18  ;;  %18343 = vmatprep.mubr.msk.bf16.mxu1 %vm21803_vm0, %v24887_v46 }
 0x87c   : > { %3544 = vmatpush1.bf16.msra.mxu0 %v23115_v59  ;;  %18338 = vmatpush3.bf16.msra.mxu1 %v23118_v57 }
 0x87d   : > { %3545 = vmatprep.subr.bf16.mxu0 %v23123_v61  ;;  %18339 = vmatprep.subr.bf16.mxu1 %v24887_v46 }
 0x880   : > { %3546 = vmatpush1.bf16.msra.mxu0 %v23131_v62  ;;  %18340 = vmatpush3.bf16.msra.mxu1 %v23134_v6 }
 0x881   : > { %3547 = vmatprep.subr.bf16.mxu0 %v23139_v9  ;;  %18341 = vmatprep.subr.bf16.mxu1 %v24887_v46 }
 0x884   : > { %3548 = vmatpush1.bf16.msra.mxu0 %v23144_v10  ;;  %18342 = vmatpush3.bf16.msra.mxu1 %v23147_v11 }
 0x885   : > { %18353 = vmatprep.subr.bf16.mxu1 %v24887_v46  ;;  %18347 = vmatprep.subr.bf16.mxu0 %v24887_v46 }
 0x887   : > { %16573 = vmatmul.mubr.msk.bf16.vlgmr.msra.gmra.mrb[20].mxu0 %vm3101_vm1, %v3210_v63  ;;  %18344 = vmatmul.mubr.msk.bf16.vlgmr.msra.gmra.mrb[28].mxu1 %vm3101_vm1, %v3210_v63 }
 0x888   : > { %18354 = vmatpush3.bf16.msra.mxu1 %v3688_v12  ;;  %18349 = vmatprep.mubr.msk.bf16.mxu0 %vm21803_vm0, %v24887_v46 }
 0x889   : > { %18355 = vmatprep.mubr.msk.bf16.mxu1 %vm21803_vm0, %v24887_v46  ;;  %18359 = vmatprep.subr.bf16.mxu1 %v24887_v46 }
 0x88d   : > { %18348 = vmatpush3.bf16.xpose.msra.mxu0 %v3628_v13 }
 0x894   : > { %18350 = vmatmul.mubr.msk.bf16.vlgmr.msra.gmra.mrb[24].mxu0 %vm3101_vm1, %v23032_v60 }
 0x895   : > { %3830 = vmatprep.mubr.bf16.mxu0 %v24873_v18 }
 0x94a   : > { %v3427_v14 = vpop.f32.mrb[16].mxu0  ;;  %v3468_v29 = vpop.f32.mrb[24].mxu1 }
 0x94b   : > { %v3429_v56 = vpop.f32.mrb[17].mxu0  ;;  %v18333_v30 = vpop.f32.mrb[25].mxu1 }
 0x94c   : > { %v3431_v33 = vpop.f32.mrb[18].mxu0  ;;  %v3471_v36 = vpop.f32.mrb[26].mxu1 }
 0x94d   : > { %v3432_v0 = vpop.f32.mrb[19].mxu0  ;;  %v18334_v2 = vpop.f32.mrb[27].mxu1 }
 0x95a   : > { %v3575_v43 = vpop.f32.mrb[20].mxu0  ;;  %v3616_v45 = vpop.f32.mrb[28].mxu1 }
 0x95b   : > { %v23174_v40 = vadd.f32 %v3575_v43, %v3427_v14  ;;  %v23176_v51 = vadd.f32 %v3616_v45, %v3468_v29  ;;  %v3577_v52 = vpop.f32.mrb[21].mxu0  ;;  %v18345_v54 = vpop.f32.mrb[29].mxu1 }
 0x95c   : > { %v23178_v55 = vadd.f32 %v3577_v52, %v3429_v56  ;;  %v3579_v60 = vpop.f32.mrb[22].mxu0  ;;  %v3619_v63 = vpop.f32.mrb[30].mxu1  ;;  %v23186_v54 = vld [vmem:[%s22555_s30 + $0xc0] ss:$12 sps:$4 sm:$0xff]  }
 0x95d   : > { %v3580_v12 = vpop.f32.mrb[23].mxu0  ;;  %v18346_v13 = vpop.f32.mrb[31].mxu1  ;;  %v23189_v60 = vld [vmem:[%s22555_s30 + $0xc4] ss:$12 sps:$4 sm:$0xff]   ;;  %v23192_v63 = vld [vmem:[%s22555_s30 + $0xdc] ss:$12 sps:$4 sm:$0xff]  }
 0x95e   : > { %3798 = vmatprep.subr.bf16.mxu0 %v23189_v60  ;;  %v23197_v12 = vld [vmem:[%s22555_s30 + $0xd8] ss:$12 sps:$4 sm:$0xff]   ;;  %v23201_v13 = vld [vmem:[%s22555_s30 + $0xf4] ss:$12 sps:$4 sm:$0xff]  }
 0x95f   : > { %3799 = vmatpush1.bf16.msra.mxu0 %v23186_v54 }
 0x960   : > { %3800 = vmatprep.subr.bf16.mxu0 %v23192_v63 }
 0x963   : > { %3801 = vmatpush1.bf16.msra.mxu0 %v23197_v12 }
 0x964   : > { %3802 = vmatprep.subr.bf16.mxu0 %v23201_v13 }
 0x967   : > { %v3664_v30 = vpop.f32.mrb[24].mxu0 }
 0x968   : > { %v3670_v33 = vsel %vm23018_vm3, %v3664_v30, -1e+30  ;;  %v18351_v36 = vpop.f32.mrb[25].mxu0  ;;  %v23209_v30 = vld [vmem:[%s22555_s30 + $0x10c] ss:$12 sps:$4 sm:$0xff]  }
 0x969   : > { %v3667_v14 = vpop.f32.mrb[26].mxu0  ;;  %v3671_v29 = vsel %vm3149_vm4, %v3670_v33, -inf }
 0x96a   : > { %3672 = vmax.xlane.f32.xlu1 %v3671_v29  ;;  %v18352_v0 = vpop.f32.mrb[27].mxu0 }
 0x96b   : > { %v23219_v0 = vld [vmem:[%s22555_s30 + $0xc8] ss:$12 sps:$4 sm:$0xff]  }
 0x9f7   : > { %v3673_v56 = vpop.xlane.xlu1 %3672 }
 0x9f8   : > { %v3674_v2 = vsub.f32 %v3670_v33, %v3673_v56  ;;  %v23213_v33 = vld [vmem:[%s22555_s30 + $0x108] ss:$12 sps:$4 sm:$0xff]  }
 0x9fa   : > { %v3675_v43 = vmul.f32 1.442695, %v3674_v2  ;;  %v23224_v2 = vld [vmem:[%s22555_s30 + $0xe0] ss:$12 sps:$4 sm:$0xff]  }
 0x9fc   : > { %20224 = vpow2.f32 %v3675_v43  ;;  %v23231_v43 = vld [vmem:[%s22555_s30 + $0xf8] ss:$12 sps:$4 sm:$0xff]  }
 0xa06   : > { %v20225_v45 = vpop.eup %20224 }
 0xa07   : > { %v3677_v52 = vsel %vm3149_vm4, %v20225_v45, 0.0 }
 0xa08   : > { %3678 = vadd.xlane.f32.xlu1 %v3677_v52 }
 0xa19   : > { %3886 = vrot.lane.b32.xlu1 %v3623_v23, %s21804_s16  ;;  %v23205_v23 = vld [vmem:[%s22555_s30 + $0xf0] ss:$12 sps:$4 sm:$0xff]  }
 0xa1a   : > { %3803 = vmatpush1.bf16.msra.mxu0 %v23205_v23 }
 0xa1b   : > { %3804 = vmatprep.subr.bf16.mxu0 %v23209_v30 }
 0xa1e   : > { %3805 = vmatpush1.bf16.msra.mxu0 %v23213_v33 }
 0xa1f   : > { %18371 = vmatprep.subr.bf16.mxu0 %v24887_v46 }
 0xa95   : > { %v3679_v36 = vpop.xlane.xlu1 %3678 }
 0xa96   : > { %20226 = vrcp.f32 %v3679_v36 }
 0xa99   : > { %v3887_v52 = vpop.permute.xlu1 %3886 }
 0xa9a   : > { %v3892_v18 = vsel %vm3101_vm1, %v3887_v52, 0 }
 0xaa0   : > { %v20227_v14 = vpop.eup %20226 }
 0xaa1   : > { %v3681_v29 = vmul.f32 %v20227_v14, %v20225_v45  ;;  %v23237_v45 = vld [vmem:[%s22555_s30 + $0x110] ss:$12 sps:$4 sm:$0xff]  }
 0xaa2   : > { %25008 = vst [vmem:[#allocation59_spill] sm:$0xff] %v23237_v45 }
 0xaa3   : > { %v3682_v56 = vpack.c.bf16 %v3681_v29, %v3681_v29 }
 0xaa5   : > { %18356 = vmatmul.mubr.msk.bf16.vlgmr.msra.gmra.mrb[32].mxu1 %vm3149_vm4, %v3682_v56 }
 0xaa6   : > { %18360 = vmatpush3.bf16.msra.mxu1 %v23219_v0  ;;  %18367 = vmatprep.mubr.msk.bf16.mxu1 %vm21803_vm0, %v24887_v46 }
 0xaa7   : > { %18361 = vmatprep.subr.bf16.mxu1 %v24887_v46 }
 0xaaa   : > { %18362 = vmatpush3.bf16.msra.mxu1 %v23224_v2 }
 0xaab   : > { %18363 = vmatprep.subr.bf16.mxu1 %v24887_v46 }
 0xaae   : > { %18364 = vmatpush3.bf16.msra.mxu1 %v23231_v43 }
 0xaaf   : > { %18365 = vmatprep.subr.bf16.mxu1 %v24887_v46 }
 0xab2   : > { %18366 = vmatpush3.bf16.msra.mxu1 %v23237_v45 }
 0xab3   : > { %18377 = vmatprep.subr.bf16.mxu1 %v24887_v46 }
 0xb78   : > { %v3724_v36 = vpop.f32.mrb[32].mxu1 }
 0xb79   : > { %v3730_v14 = vpack.c.bf16 %v3724_v36, %v3724_v36  ;;  %v18357_v29 = vpop.f32.mrb[33].mxu1  ;;  %v25009_v36 = vmov 0  }
 0xb7a   : > { %v3727_v56 = vpop.f32.mrb[34].mxu1 }
 0xb7b   : > { %v18358_v44 = vpop.f32.mrb[35].mxu1  ;;  %16589 = vmatmul.mubr.msk.bf16.vlgmr.msra.gmra.mrb[28].mxu0 %vm3101_vm1, %v3730_v14  ;;  %18368 = vmatmul.mubr.msk.bf16.vlgmr.msra.gmra.mrb[36].mxu1 %vm3101_vm1, %v3730_v14 }
 0xb7c   : > { %18372 = vmatpush3.bf16.xpose.msra.mxu0 %v3892_v18  ;;  %18373 = vmatprep.mubr.msk.bf16.mxu0 %vm21803_vm0, %v24887_v46 }
 0xb7d   : > { %18379 = vmatprep.mubr.msk.bf16.mxu1 %vm21803_vm0, %v24887_v46 }
 0xb83   : > { %18374 = vmatmul.mubr.msk.bf16.vlgmr.msra.gmra.mrb[32].mxu0 %vm3101_vm1, %v3884_v31 }
 0xb84   : > { %4096 = vmatprep.mubr.bf16.mxu0 %v25009_v36 }
 0xc4e   : > { %v3832_v29 = vpop.f32.mrb[28].mxu0  ;;  %v3873_v56 = vpop.f32.mrb[36].mxu1 }
 0xc4f   : > { %v23251_v44 = vadd.f32 %v3832_v29, %v23174_v40  ;;  %v23254_v52 = vadd.f32 %v3873_v56, %v23176_v51  ;;  %v3834_v18 = vpop.f32.mrb[29].mxu0  ;;  %v18369_v14 = vpop.f32.mrb[37].mxu1 }
 0xc50   : > { %v23257_v47 = vadd.f32 %v3834_v18, %v23178_v55  ;;  %v3836_v48 = vpop.f32.mrb[30].mxu0  ;;  %v3876_v46 = vpop.f32.mrb[38].mxu1  ;;  %v23275_v18 = vld [vmem:[%s22555_s30 + $0x13c] ss:$12 sps:$4 sm:$0xff]   ;;  %v23280_v14 = vld [vmem:[%s22555_s30 + $0x138] ss:$12 sps:$4 sm:$0xff]  }
 0xc51   : > { %v3837_v35 = vpop.f32.mrb[31].mxu0  ;;  %v18370_v7 = vpop.f32.mrb[39].mxu1  ;;  %25011 = vst [vmem:[#allocation61_spill] sm:$0xff] %v23275_v18  ;;  %25012 = vst [vmem:[#allocation62_spill] sm:$0xff] %v23280_v14 }
 0xc52   : > { %v4148_v35 = vpack.c.bf16 %v22989_v15, %v22989_v15  ;;  %v23288_v15 = vld [vmem:[%s22555_s30 + $0x150] ss:$12 sps:$4 sm:$0xff]  }
 0xc53   : > { %25014 = vst [vmem:[#allocation64_spill] sm:$0xff] %v23288_v15 }
 0xc56   : > { %v3928_v31 = vpop.f32.mrb[32].mxu0 }
 0xc57   : > { %v3934_v19 = vsel %vm23018_vm3, %v3928_v31, -1e+30  ;;  %v18375_v45 = vpop.f32.mrb[33].mxu0  ;;  %v23292_v31 = vld [vmem:[%s22555_s30 + $0x16c] ss:$12 sps:$4 sm:$0xff]  }
 0xc58   : > { %v3931_v40 = vpop.f32.mrb[34].mxu0  ;;  %v3935_v51 = vsel %vm3149_vm4, %v3934_v19, -inf  ;;  %v23269_v45 = vld [vmem:[%s22555_s30 + $0x120] ss:$12 sps:$4 sm:$0xff]   ;;  %25015 = vst [vmem:[#allocation65_spill] sm:$0xff] %v23292_v31 }
 0xc59   : > { %3936 = vmax.xlane.f32.xlu1 %v3935_v51  ;;  %v18376_v29 = vpop.f32.mrb[35].mxu0  ;;  %25010 = vst [vmem:[#allocation60_spill] sm:$0xff] %v23269_v45  ;;  %v23296_v40 = vld [vmem:[%s22555_s30 + $0x168] ss:$12 sps:$4 sm:$0xff]   ;;  %v25017_v51 = vmov 0.0  }
 0xc5a   : > { %25016 = vst [vmem:[#allocation66_spill] sm:$0xff] %v23296_v40 }
 0xce6   : > { %v3937_v55 = vpop.xlane.xlu1 %3936 }
 0xce7   : > { %v3938_v56 = vsub.f32 %v3934_v19, %v3937_v55  ;;  %v23272_v19 = vld [vmem:[%s22555_s30 + $0x124] ss:$12 sps:$4 sm:$0xff]  }
 0xce8   : > { %4064 = vmatprep.subr.bf16.mxu0 %v23272_v19 }
 0xce9   : > { %v3939_v48 = vmul.f32 1.442695, %v3938_v56  ;;  %4065 = vmatpush1.bf16.msra.mxu0 %v23269_v45 }
 0xcea   : > { %4066 = vmatprep.subr.bf16.mxu0 %v23275_v18 }
 0xceb   : > { %20228 = vpow2.f32 %v3939_v48 }
 0xced   : > { %4067 = vmatpush1.bf16.msra.mxu0 %v23280_v14 }
 0xcf5   : > { %v20229_v46 = vpop.eup %20228 }
 0xcf6   : > { %v3941_v7 = vsel %vm3149_vm4, %v20229_v46, 0.0 }
 0xcf7   : > { %3942 = vadd.xlane.f32.xlu0 %v3941_v7 }
 0xd0d   : > { %3948 = vrot.lane.b32.xlu0 %v23153_v1, %s21804_s16  ;;  %v23284_v1 = vld [vmem:[%s22555_s30 + $0x154] ss:$12 sps:$4 sm:$0xff]  }
 0xd0e   : > { %25013 = vst [vmem:[#allocation63_spill] sm:$0xff] %v23284_v1  ;;  %4068 = vmatprep.subr.bf16.mxu0 %v23284_v1 }
 0xd0f   : > { %4069 = vmatpush1.bf16.msra.mxu0 %v23288_v15  ;;  %v23304_v15 = vld [vmem:[%s22555_s30 + $0x128] ss:$12 sps:$4 sm:$0xff]  }
 0xd10   : > { %4070 = vmatprep.subr.bf16.mxu0 %v23292_v31  ;;  %25018 = vst [vmem:[#allocation67_spill] sm:$0xff] %v23304_v15 }
 0xd11   : > { %4409 = vrot.lane.b32.xlu0 %v4148_v35, %s21804_s16 }
 0xd13   : > { %4071 = vmatpush1.bf16.msra.mxu0 %v23296_v40  ;;  %v23309_v40 = vld [vmem:[%s22555_s30 + $0x140] ss:$12 sps:$4 sm:$0xff]  }
 0xd14   : > { %18395 = vmatprep.subr.bf16.mxu0 %v25017_v51  ;;  %25019 = vst [vmem:[#allocation68_spill] sm:$0xff] %v23309_v40 }
 0xd84   : > { %v3943_v29 = vpop.xlane.xlu0 %3942 }
 0xd85   : > { %20230 = vrcp.f32 %v3943_v29  ;;  %v23316_v29 = vld [vmem:[%s22555_s30 + $0x158] ss:$12 sps:$4 sm:$0xff]  }
 0xd86   : > { %25020 = vst [vmem:[#allocation69_spill] sm:$0xff] %v23316_v29 }
 0xd88   : > { %v3949_v55 = vpop.permute.xlu0 %3948 }
 0xd89   : > { %v3954_v56 = vsel %vm3166_vm2, %v3949_v55, 0  ;;  %v23330_v55 = vpack.c.bf16 %v23012_v32, %v23012_v32 }
 0xd8a   : > { %18378 = vmatpush3.bf16.msra.mxu1 %v3954_v56 }
 0xd8b   : > { %18383 = vmatprep.subr.bf16.mxu1 %v25017_v51 }
 0xd8f   : > { %v20231_v48 = vpop.eup %20230 }
 0xd90   : > { %v3945_v7 = vmul.f32 %v20231_v48, %v20229_v46  ;;  %v23321_v46 = vld [vmem:[%s22555_s30 + $0x170] ss:$12 sps:$4 sm:$0xff]  }
 0xd91   : > { %25021 = vst [vmem:[#allocation70_spill] sm:$0xff] %v23321_v46 }
 0xd92   : > { %v3946_v1 = vpack.c.bf16 %v3945_v7, %v3945_v7 }
 0xd94   : > { %18380 = vmatmul.mubr.msk.bf16.vlgmr.msra.gmra.mrb[40].mxu1 %vm3149_vm4, %v3946_v1  ;;  %v4149_v1 = vpack.c.bf16 %v22970_v3, %v22970_v3 }
 0xd95   : > { %18384 = vmatpush3.bf16.msra.mxu1 %v23304_v15  ;;  %18391 = vmatprep.mubr.msk.bf16.mxu1 %vm21803_vm0, %v25017_v51  ;;  %v4214_v15 = vsel %vm3166_vm2, %v23330_v55, 0 }
 0xd96   : > { %18385 = vmatprep.subr.bf16.mxu1 %v25017_v51 }
 0xd99   : > { %18386 = vmatpush3.bf16.msra.mxu1 %v23309_v40 }
 0xd9a   : > { %18387 = vmatprep.subr.bf16.mxu1 %v25017_v51 }
 0xd9d   : > { %18388 = vmatpush3.bf16.msra.mxu1 %v23316_v29  ;;  %v4154_v29 = vsel %vm3101_vm1, %v4149_v1, 0 }
 0xd9e   : > { %18389 = vmatprep.subr.bf16.mxu1 %v25017_v51 }
 0xda1   : > { %18390 = vmatpush3.bf16.msra.mxu1 %v23321_v46 }
 0xda2   : > { %18401 = vmatprep.subr.bf16.mxu1 %v25017_v51 }
 0xe67   : > { %v3990_v56 = vpop.f32.mrb[40].mxu1 }
 0xe68   : > { %v3996_v48 = vpack.c.bf16 %v3990_v56, %v3990_v56  ;;  %v18381_v7 = vpop.f32.mrb[41].mxu1 }
 0xe69   : > { %v3993_v40 = vpop.f32.mrb[42].mxu1 }
 0xe6a   : > { %v18382_v31 = vpop.f32.mrb[43].mxu1  ;;  %16605 = vmatmul.mubr.msk.bf16.vlgmr.msra.gmra.mrb[36].mxu0 %vm3101_vm1, %v3996_v48  ;;  %18392 = vmatmul.mubr.msk.bf16.vlgmr.msra.gmra.mrb[44].mxu1 %vm3101_vm1, %v3996_v48 }
 0xe6b   : > { %18396 = vmatpush3.bf16.xpose.msra.mxu0 %v4154_v29  ;;  %18402 = vmatpush3.bf16.msra.mxu1 %v4214_v15 }
 0xe6c   : > { %18397 = vmatprep.mubr.msk.bf16.mxu0 %vm21803_vm0, %v25017_v51  ;;  %18403 = vmatprep.mubr.msk.bf16.mxu1 %vm21803_vm0, %v25017_v51 }
 0xe6d   : > { %18407 = vmatprep.subr.bf16.mxu1 %v25017_v51 }
 0xe72   : > { %18398 = vmatmul.mubr.msk.bf16.vlgmr.msra.gmra.mrb[40].mxu0 %vm3101_vm1, %v4148_v35 }
 0xe73   : > { %4356 = vmatprep.mubr.bf16.mxu0 %v25009_v36 }
 0xf3d   : > { %v4098_v3 = vpop.f32.mrb[36].mxu0  ;;  %v4139_v32 = vpop.f32.mrb[44].mxu1 }
 0xf3e   : > { %v23345_v31 = vadd.f32 %v4098_v3, %v23251_v44  ;;  %v23348_v40 = vadd.f32 %v4139_v32, %v23254_v52  ;;  %v4100_v15 = vpop.f32.mrb[37].mxu0  ;;  %v18393_v29 = vpop.f32.mrb[45].mxu1 }
 0xf3f   : > { %v23351_v56 = vadd.f32 %v4100_v15, %v23257_v47  ;;  %v4102_v48 = vpop.f32.mrb[38].mxu0  ;;  %v4142_v7 = vpop.f32.mrb[46].mxu1 }
 0xf40   : > { %v4103_v46 = vpop.f32.mrb[39].mxu0  ;;  %v18394_v14 = vpop.f32.mrb[47].mxu1  ;;  %v23359_v48 = vld [vmem:[%s22555_s30 + $0x180] ss:$12 sps:$4 sm:$0xff]   ;;  %v23362_v7 = vld [vmem:[%s22555_s30 + $0x184] ss:$12 sps:$4 sm:$0xff]  }
 0xf41   : > { %25022 = vst [vmem:[#allocation71_spill] sm:$0xff] %v23359_v48  ;;  %25023 = vst [vmem:[#allocation72_spill] sm:$0xff] %v23362_v7  ;;  %4324 = vmatprep.subr.bf16.mxu0 %v23362_v7 }
 0xf42   : > { %4325 = vmatpush1.bf16.msra.mxu0 %v23359_v48 }
 0xf45   : > { %v4190_v35 = vpop.f32.mrb[40].mxu0 }
 0xf46   : > { %v4196_v18 = vsel %vm23018_vm3, %v4190_v35, -1e+30  ;;  %v18399_v44 = vpop.f32.mrb[41].mxu0  ;;  %v23365_v35 = vld [vmem:[%s22555_s30 + $0x19c] ss:$12 sps:$4 sm:$0xff]  }
 0xf47   : > { %v4193_v3 = vpop.f32.mrb[42].mxu0  ;;  %v4197_v52 = vsel %vm3149_vm4, %v4196_v18, -inf  ;;  %25024 = vst [vmem:[#allocation73_spill] sm:$0xff] %v23365_v35  ;;  %4326 = vmatprep.subr.bf16.mxu0 %v23365_v35  ;;  %v23374_v44 = vld [vmem:[%s22555_s30 + $0x1b4] ss:$12 sps:$4 sm:$0xff]  }
 0xf48   : > { %4198 = vmax.xlane.f32.xlu1 %v4197_v52  ;;  %v18400_v32 = vpop.f32.mrb[43].mxu0  ;;  %25026 = vst [vmem:[#allocation75_spill] sm:$0xff] %v23374_v44  ;;  %v23382_v3 = vld [vmem:[%s22555_s30 + $0x1cc] ss:$12 sps:$4 sm:$0xff]   ;;  %v23386_v52 = vld [vmem:[%s22555_s30 + $0x1c8] ss:$12 sps:$4 sm:$0xff]  }
 0xf49   : > { %25028 = vst [vmem:[#allocation77_spill] sm:$0xff] %v23382_v3  ;;  %25029 = vst [vmem:[#allocation78_spill] sm:$0xff] %v23386_v52 }
 0xfd5   : > { %v4199_v47 = vpop.xlane.xlu1 %4198 }
 0xfd6   : > { %v4200_v15 = vsub.f32 %v4196_v18, %v4199_v47  ;;  %v23370_v18 = vld [vmem:[%s22555_s30 + $0x198] ss:$12 sps:$4 sm:$0xff]  }
 0xfd7   : > { %25025 = vst [vmem:[#allocation74_spill] sm:$0xff] %v23370_v18  ;;  %4327 = vmatpush1.bf16.msra.mxu0 %v23370_v18 }
 0xfd8   : > { %v4201_v46 = vmul.f32 1.442695, %v4200_v15  ;;  %4328 = vmatprep.subr.bf16.mxu0 %v23374_v44 }
 0xfda   : > { %20232 = vpow2.f32 %v4201_v46  ;;  %v23392_v46 = vld [vmem:[%s22555_s30 + $0x188] ss:$12 sps:$4 sm:$0xff]  }
 0xfdb   : > { %25030 = vst [vmem:[#allocation79_spill] sm:$0xff] %v23392_v46 }
 0xfe4   : > { %v20233_v14 = vpop.eup %20232 }
 0xfe5   : > { %v4203_v29 = vsel %vm3149_vm4, %v20233_v14, 0.0 }
 0xfe6   : > { %4204 = vadd.xlane.f32.xlu1 %v4203_v29 }
 0xff7   : > { %4412 = vrot.lane.b32.xlu1 %v4149_v1, %s21804_s16  ;;  %v23378_v1 = vld [vmem:[%s22555_s30 + $0x1b0] ss:$12 sps:$4 sm:$0xff]  }
 0xff8   : > { %25027 = vst [vmem:[#allocation76_spill] sm:$0xff] %v23378_v1  ;;  %4329 = vmatpush1.bf16.msra.mxu0 %v23378_v1  ;;  %v23397_v1 = vld [vmem:[%s22555_s30 + $0x1a0] ss:$12 sps:$4 sm:$0xff]  }
 0xff9   : > { %4330 = vmatprep.subr.bf16.mxu0 %v23382_v3  ;;  %25031 = vst [vmem:[#allocation80_spill] sm:$0xff] %v23397_v1 }
 0xffc   : > { %4331 = vmatpush1.bf16.msra.mxu0 %v23386_v52  ;;  %v23404_v52 = vld [vmem:[%s22555_s30 + $0x1b8] ss:$12 sps:$4 sm:$0xff]  }
 0xffd   : > { %18419 = vmatprep.subr.bf16.mxu0 %v25017_v51  ;;  %25032 = vst [vmem:[#allocation81_spill] sm:$0xff] %v23404_v52 }
0x1073   : > { %v4205_v32 = vpop.xlane.xlu1 %4204 }
0x1074   : > { %20234 = vrcp.f32 %v4205_v32 }
0x1077   : > { %v4413_v32 = vpop.permute.xlu1 %4412 }
0x107e   : > { %v20235_v47 = vpop.eup %20234 }
0x107f   : > { %v4207_v15 = vmul.f32 %v20235_v47, %v20233_v14  ;;  %v23410_v14 = vld [vmem:[%s22555_s30 + $0x1d0] ss:$12 sps:$4 sm:$0xff]  }
0x1080   : > { %25033 = vst [vmem:[#allocation82_spill] sm:$0xff] %v23410_v14 }
0x1081   : > { %v4208_v29 = vpack.c.bf16 %v4207_v15, %v4207_v15 }
0x1083   : > { %18404 = vmatmul.mubr.msk.bf16.vlgmr.msra.gmra.mrb[48].mxu1 %vm3149_vm4, %v4208_v29 }
0x1084   : > { %18408 = vmatpush3.bf16.msra.mxu1 %v23392_v46  ;;  %18415 = vmatprep.mubr.msk.bf16.mxu1 %vm21803_vm0, %v25017_v51 }
0x1085   : > { %18409 = vmatprep.subr.bf16.mxu1 %v25017_v51 }
0x1088   : > { %18410 = vmatpush3.bf16.msra.mxu1 %v23397_v1  ;;  %v4418_v1 = vsel %vm3101_vm1, %v4413_v32, 0 }
0x1089   : > { %18411 = vmatprep.subr.bf16.mxu1 %v25017_v51 }
0x108c   : > { %18412 = vmatpush3.bf16.msra.mxu1 %v23404_v52 }
0x108d   : > { %18413 = vmatprep.subr.bf16.mxu1 %v25017_v51 }
0x1090   : > { %18414 = vmatpush3.bf16.msra.mxu1 %v23410_v14  ;;  %v4410_v14 = vpop.permute.xlu0 %4409 }
0x1091   : > { %18425 = vmatprep.subr.bf16.mxu1 %v25017_v51 }
0x1156   : > { %v4250_v47 = vpop.f32.mrb[48].mxu1 }
0x1157   : > { %v4256_v15 = vpack.c.bf16 %v4250_v47, %v4250_v47  ;;  %v18405_v29 = vpop.f32.mrb[49].mxu1 }
0x1158   : > { %v4253_v46 = vpop.f32.mrb[50].mxu1 }
0x1159   : > { %v18406_v3 = vpop.f32.mrb[51].mxu1  ;;  %16621 = vmatmul.mubr.msk.bf16.vlgmr.msra.gmra.mrb[44].mxu0 %vm3101_vm1, %v4256_v15  ;;  %18416 = vmatmul.mubr.msk.bf16.vlgmr.msra.gmra.mrb[52].mxu1 %vm3101_vm1, %v4256_v15 }
0x115a   : > { %18420 = vmatpush3.bf16.xpose.msra.mxu0 %v4418_v1  ;;  %18421 = vmatprep.mubr.msk.bf16.mxu0 %vm21803_vm0, %v25017_v51 }
0x115b   : > { %18427 = vmatprep.mubr.msk.bf16.mxu1 %vm21803_vm0, %v25017_v51 }
0x1161   : > { %18422 = vmatmul.mubr.msk.bf16.vlgmr.msra.gmra.mrb[48].mxu0 %vm3101_vm1, %v4410_v14 }
0x1162   : > { %4622 = vmatprep.mubr.bf16.mxu0 %v25009_v36 }
0x122c   : > { %v4358_v46 = vpop.f32.mrb[44].mxu0  ;;  %v4399_v47 = vpop.f32.mrb[52].mxu1 }
0x122d   : > { %v23424_v3 = vadd.f32 %v4358_v46, %v23345_v31  ;;  %v23427_v32 = vadd.f32 %v4399_v47, %v23348_v40  ;;  %v4360_v1 = vpop.f32.mrb[45].mxu0  ;;  %v18417_v15 = vpop.f32.mrb[53].mxu1  ;;  %v23453_v46 = vld [vmem:[%s22555_s30 + $0x1e4] ss:$12 sps:$4 sm:$0xff]   ;;  %v23456_v47 = vld [vmem:[%s22555_s30 + $0x1fc] ss:$12 sps:$4 sm:$0xff]  }
0x122e   : > { %v23430_v29 = vadd.f32 %v4360_v1, %v23351_v56  ;;  %v4362_v52 = vpop.f32.mrb[46].mxu0  ;;  %v4402_v44 = vpop.f32.mrb[54].mxu1  ;;  %v23439_v56 = vpack.c.bf16 %v22972_v4, %v22972_v4  ;;  %4590 = vmatprep.subr.bf16.mxu0 %v23453_v46  ;;  %v23461_v1 = vld [vmem:[%s22555_s30 + $0x1f8] ss:$12 sps:$4 sm:$0xff]   ;;  %v23465_v15 = vld [vmem:[%s22555_s30 + $0x214] ss:$12 sps:$4 sm:$0xff]  }
0x122f   : > { %v4363_v18 = vpop.f32.mrb[47].mxu0  ;;  %v18418_v35 = vpop.f32.mrb[55].mxu1  ;;  %v23450_v52 = vld [vmem:[%s22555_s30 + $0x1e0] ss:$12 sps:$4 sm:$0xff]  }
0x1230   : > { %4591 = vmatpush1.bf16.msra.mxu0 %v23450_v52 }
0x1231   : > { %4592 = vmatprep.subr.bf16.mxu0 %v23456_v47 }
0x1234   : > { %v4454_v14 = vpop.f32.mrb[48].mxu0  ;;  %4593 = vmatpush1.bf16.msra.mxu0 %v23461_v1 }
0x1235   : > { %v4460_v48 = vsel %vm23018_vm3, %v4454_v14, -1e+30  ;;  %v18423_v7 = vpop.f32.mrb[49].mxu0  ;;  %4594 = vmatprep.subr.bf16.mxu0 %v23465_v15  ;;  %v23473_v14 = vld [vmem:[%s22555_s30 + $0x22c] ss:$12 sps:$4 sm:$0xff]  }
0x1236   : > { %v4457_v45 = vpop.f32.mrb[50].mxu0  ;;  %v4461_v31 = vsel %vm3149_vm4, %v4460_v48, -inf }
0x1237   : > { %4462 = vmax.xlane.f32.xlu0 %v4461_v31  ;;  %v18424_v40 = vpop.f32.mrb[51].mxu0  ;;  %v23477_v31 = vld [vmem:[%s22555_s30 + $0x228] ss:$12 sps:$4 sm:$0xff]  }
0x1238   : > { %25034 = vst [vmem:[#allocation83_spill] sm:$0xff] %v23477_v31 }
0x124d   : > { %4474 = vrot.lane.b32.xlu0 %v23330_v55, %s21804_s16 }
0x1251   : > { %4784 = vrot.lane.b32.xlu0 %v23439_v56, %s21804_s16 }
0x12c4   : > { %v4463_v35 = vpop.xlane.xlu0 %4462 }
0x12c5   : > { %v4464_v7 = vsub.f32 %v4460_v48, %v4463_v35  ;;  %v4675_v48 = vpack.c.bf16 %v22993_v20, %v22993_v20  ;;  %v23469_v20 = vld [vmem:[%s22555_s30 + $0x210] ss:$12 sps:$4 sm:$0xff]  }
0x12c6   : > { %4595 = vmatpush1.bf16.msra.mxu0 %v23469_v20 }
0x12c7   : > { %v4465_v45 = vmul.f32 1.442695, %v4464_v7  ;;  %4596 = vmatprep.subr.bf16.mxu0 %v23473_v14 }
0x12c8   : > { %v4475_v18 = vpop.permute.xlu0 %4474 }
0x12c9   : > { %20236 = vpow2.f32 %v4465_v45  ;;  %v4480_v44 = vsel %vm3166_vm2, %v4475_v18, 0  ;;  %v23483_v45 = vld [vmem:[%s22555_s30 + $0x1e8] ss:$12 sps:$4 sm:$0xff]  }
0x12ca   : > { %18426 = vmatpush3.bf16.msra.mxu1 %v4480_v44  ;;  %4597 = vmatpush1.bf16.msra.mxu0 %v23477_v31  ;;  %25035 = vst [vmem:[#allocation84_spill] sm:$0xff] %v23483_v45  ;;  %v23488_v44 = vld [vmem:[%s22555_s30 + $0x200] ss:$12 sps:$4 sm:$0xff]  }
0x12cb   : > { %18431 = vmatprep.subr.bf16.mxu1 %v25017_v51  ;;  %18443 = vmatprep.subr.bf16.mxu0 %v25017_v51  ;;  %25036 = vst [vmem:[#allocation85_spill] sm:$0xff] %v23488_v44 }
0x12d3   : > { %v20237_v4 = vpop.eup %20236 }
0x12d4   : > { %v4467_v55 = vsel %vm3149_vm4, %v20237_v4, 0.0 }
0x12d5   : > { %4468 = vadd.xlane.f32.xlu1 %v4467_v55  ;;  %v23495_v55 = vld [vmem:[%s22555_s30 + $0x218] ss:$12 sps:$4 sm:$0xff]  }
0x12d6   : > { %25037 = vst [vmem:[#allocation86_spill] sm:$0xff] %v23495_v55 }
0x12e6   : > { %4787 = vrot.lane.b32.xlu1 %v4675_v48, %s21804_s16 }
0x1362   : > { %v4469_v40 = vpop.xlane.xlu1 %4468 }
0x1363   : > { %20238 = vrcp.f32 %v4469_v40  ;;  %v4735_v40 = vpack.c.bf16 %v23003_v24, %v23003_v24 }
0x1365   : > { %v4740_v31 = vsel %vm3166_vm2, %v4735_v40, 0 }
0x1366   : > { %v4788_v24 = vpop.permute.xlu1 %4787 }
0x136d   : > { %v20239_v35 = vpop.eup %20238 }
0x136e   : > { %v4471_v7 = vmul.f32 %v20239_v35, %v20237_v4  ;;  %v23500_v4 = vld [vmem:[%s22555_s30 + $0x230] ss:$12 sps:$4 sm:$0xff]   ;;  %s25075_s30 = scalar_lea.vmem [#allocation20], %s22537_s5  ;;  %s25076_s5 = sld [smem:[#allocation47_spill]] }
0x1370   : > { %v4472_v18 = vpack.c.bf16 %v4471_v7, %v4471_v7 }
0x1372   : > { %18428 = vmatmul.mubr.msk.bf16.vlgmr.msra.gmra.mrb[56].mxu1 %vm3149_vm4, %v4472_v18 }
0x1373   : > { %18432 = vmatpush3.bf16.msra.mxu1 %v23483_v45  ;;  %18439 = vmatprep.mubr.msk.bf16.mxu1 %vm21803_vm0, %v25017_v51  ;;  %v4680_v45 = vsel %vm3101_vm1, %v4675_v48, 0  ;;  %v4793_v48 = vsel %vm3101_vm1, %v4788_v24, 0 }
0x1374   : > { %18433 = vmatprep.subr.bf16.mxu1 %v25017_v51  ;;  %p17239_p13 = scmp.ne.s32.totalorder %s25076_s5, 5 }
0x1375   : > { %vm21807_vm5 = vmmov (!%p17239_p13), 0  }
0x1377   : > { %18434 = vmatpush3.bf16.msra.mxu1 %v23488_v44 }
0x1378   : > { %18435 = vmatprep.subr.bf16.mxu1 %v25017_v51 }
0x137b   : > { %18436 = vmatpush3.bf16.msra.mxu1 %v23495_v55 }
0x137c   : > { %18437 = vmatprep.subr.bf16.mxu1 %v25017_v51 }
0x137f   : > { %18438 = vmatpush3.bf16.msra.mxu1 %v23500_v4 }
0x1380   : > { %18449 = vmatprep.subr.bf16.mxu1 %v25017_v51 }
0x1445   : > { %v4516_v35 = vpop.f32.mrb[56].mxu1 }
0x1446   : > { %v4522_v7 = vpack.c.bf16 %v4516_v35, %v4516_v35  ;;  %v18429_v18 = vpop.f32.mrb[57].mxu1 }
0x1447   : > { %v4519_v44 = vpop.f32.mrb[58].mxu1 }
0x1448   : > { %v18430_v55 = vpop.f32.mrb[59].mxu1  ;;  %16637 = vmatmul.mubr.msk.bf16.vlgmr.msra.gmra.mrb[52].mxu0 %vm3101_vm1, %v4522_v7  ;;  %18440 = vmatmul.mubr.msk.bf16.vlgmr.msra.gmra.mrb[60].mxu1 %vm3101_vm1, %v4522_v7 }
0x1449   : > { %18444 = vmatpush3.bf16.xpose.msra.mxu0 %v4680_v45  ;;  %18450 = vmatpush3.bf16.msra.mxu1 %v4740_v31  ;;  %v4785_v31 = vpop.permute.xlu0 %4784 }
0x144a   : > { %18445 = vmatprep.mubr.msk.bf16.mxu0 %vm21803_vm0, %v25017_v51  ;;  %18455 = vmatprep.subr.bf16.mxu0 %v25017_v51 }
0x144b   : > { %18451 = vmatprep.mubr.msk.bf16.mxu1 %vm21803_vm0, %v25017_v51  ;;  %18461 = vmatprep.subr.bf16.mxu1 %v25017_v51 }
0x1450   : > { %18446 = vmatmul.mubr.msk.bf16.vlgmr.msra.gmra.mrb[56].mxu0 %vm3101_vm1, %v23439_v56 }
0x1451   : > { %18456 = vmatpush3.bf16.xpose.msra.mxu0 %v4793_v48  ;;  %18457 = vmatprep.mubr.msk.bf16.mxu0 %vm21803_vm0, %v25017_v51 }
0x1452   : > { %4901 = vmatprep.subr.bf16.mxu0 %v23046_v17 }
0x1458   : > { %18458 = vmatmul.mubr.msk.bf16.vlgmr.msra.gmra.mrb[60].mxu0 %vm3101_vm1, %v4785_v31 }
0x1459   : > { %4902 = vmatpush1.bf16.msra.mxu0 %v23043_v16  ;;  %4933 = vmatprep.mubr.bf16.mxu0 %v25009_v36 }
0x145a   : > { %4903 = vmatprep.subr.bf16.mxu0 %v23049_v49 }
0x145d   : > { %4904 = vmatpush1.bf16.msra.mxu0 %v23054_v21 }
0x145e   : > { %4905 = vmatprep.subr.bf16.mxu0 %v23058_v22 }
0x1461   : > { %4906 = vmatpush1.bf16.msra.mxu0 %v23062_v25 }
0x1462   : > { %4907 = vmatprep.subr.bf16.mxu0 %v23066_v27 }
0x1465   : > { %4908 = vmatpush1.bf16.msra.mxu0 %v23070_v28 }
0x1466   : > { %4985 = vmatprep.subr.bf16.mxu0 %v23098_v42 }
0x151b   : > { %v4624_v17 = vpop.f32.mrb[52].mxu0  ;;  %v4665_v56 = vpop.f32.mrb[60].mxu1 }
0x151c   : > { %v23534_v16 = vadd.f32 %v4624_v17, %v23424_v3  ;;  %v23537_v45 = vadd.f32 %v4665_v56, %v23427_v32  ;;  %v4626_v49 = vpop.f32.mrb[53].mxu0  ;;  %v18441_v21 = vpop.f32.mrb[61].mxu1  ;;  %v23551_v56 = vpack.c.bf16 %v22980_v8, %v22980_v8 }
0x151d   : > { %v23540_v22 = vadd.f32 %v4626_v49, %v23430_v29  ;;  %v4628_v25 = vpop.f32.mrb[54].mxu0  ;;  %v4668_v44 = vpop.f32.mrb[62].mxu1 }
0x151e   : > { %v4629_v27 = vpop.f32.mrb[55].mxu0  ;;  %v18442_v55 = vpop.f32.mrb[63].mxu1 }
0x1523   : > { %v4716_v28 = vpop.f32.mrb[56].mxu0 }
0x1524   : > { %v4722_v42 = vsel %vm23018_vm3, %v4716_v28, -1e+30  ;;  %v18447_v35 = vpop.f32.mrb[57].mxu0 }
0x1525   : > { %v4719_v7 = vpop.f32.mrb[58].mxu0  ;;  %v4723_v3 = vsel %vm3149_vm4, %v4722_v42, -inf }
0x1526   : > { %4724 = vmax.xlane.f32.xlu1 %v4723_v3  ;;  %v18448_v32 = vpop.f32.mrb[59].mxu0 }
0x152b   : > { %v4829_v18 = vpop.f32.mrb[60].mxu0 }
0x152c   : > { %v4835_v24 = vsel %vm23018_vm3, %v4829_v18, -1e+30  ;;  %v18459_v29 = vpop.f32.mrb[61].mxu0 }
0x152d   : > { %v4832_v48 = vpop.f32.mrb[62].mxu0  ;;  %v4836_v31 = vsel %vm3149_vm4, %v4835_v24, -inf }
0x152e   : > { %4837 = vmax.xlane.f32.xlu0 %v4836_v31  ;;  %v18460_v17 = vpop.f32.mrb[63].mxu0 }
0x1537   : > { %4849 = vrot.lane.b32.xlu1 %v4735_v40, %s21804_s16 }
0x153b   : > { %5263 = vrot.lane.b32.xlu1 %v23551_v56, %s21804_s16 }
0x15b3   : > { %v4725_v49 = vpop.xlane.xlu1 %4724 }
0x15b4   : > { %v4726_v21 = vsub.f32 %v4722_v42, %v4725_v49 }
0x15b6   : > { %v4727_v25 = vmul.f32 1.442695, %v4726_v21 }
0x15b7   : > { %v4850_v18 = vpop.permute.xlu1 %4849 }
0x15b8   : > { %20240 = vpow2.f32 %v4727_v25 }
0x15bb   : > { %v4838_v44 = vpop.xlane.xlu0 %4837 }
0x15bc   : > { %v4839_v27 = vsub.f32 %v4835_v24, %v4838_v44  ;;  %v4855_v24 = vsel %vm3166_vm2, %v4850_v18, 0 }
0x15be   : > { %v4840_v55 = vmul.f32 1.442695, %v4839_v27 }
0x15c0   : > { %20242 = vpow2.f32 %v4840_v55 }
0x15c2   : > { %v20241_v28 = vpop.eup %20240 }
0x15c3   : > { %v4729_v35 = vsel %vm3149_vm4, %v20241_v28, 0.0 }
0x15c4   : > { %4730 = vadd.xlane.f32.xlu0 %v4729_v35 }
0x15ca   : > { %v20243_v40 = vpop.eup %20242 }
0x15cb   : > { %v4842_v7 = vsel %vm3149_vm4, %v20243_v40, 0.0 }
0x15cc   : > { %4843 = vadd.xlane.f32.xlu0 %v4842_v7 }
0x1651   : > { %v4731_v8 = vpop.xlane.xlu0 %4730 }
0x1652   : > { %20244 = vrcp.f32 %v4731_v8 }
0x1659   : > { %v4844_v3 = vpop.xlane.xlu0 %4843 }
0x165a   : > { %20246 = vrcp.f32 %v4844_v3 }
0x165c   : > { %v20245_v32 = vpop.eup %20244 }
0x165d   : > { %v4733_v42 = vmul.f32 %v20245_v32, %v20241_v28 }
0x165f   : > { %v4734_v29 = vpack.c.bf16 %v4733_v42, %v4733_v42 }
0x1661   : > { %18452 = vmatmul.mubr.msk.bf16.vlgmr.msra.gmra.mrb[64].mxu1 %vm3149_vm4, %v4734_v29 }
0x1662   : > { %18462 = vmatpush3.bf16.msra.mxu1 %v4855_v24  ;;  %18463 = vmatprep.mubr.msk.bf16.mxu1 %vm21803_vm0, %v25017_v51 }
0x1663   : > { %18467 = vmatprep.subr.bf16.mxu1 %v25017_v51 }
0x1664   : > { %v20247_v48 = vpop.eup %20246 }
0x1665   : > { %v4846_v31 = vmul.f32 %v20247_v48, %v20243_v40 }
0x1667   : > { %v4847_v17 = vpack.c.bf16 %v4846_v31, %v4846_v31 }
0x1669   : > { %18464 = vmatmul.mubr.msk.bf16.vlgmr.msra.gmra.mrb[68].mxu1 %vm3149_vm4, %v4847_v17 }
0x166a   : > { %18468 = vmatpush3.bf16.msra.mxu1 %v23075_v34  ;;  %18475 = vmatprep.mubr.msk.bf16.mxu1 %vm21803_vm0, %v25017_v51 }
0x166b   : > { %18469 = vmatprep.subr.bf16.mxu1 %v25017_v51 }
0x166e   : > { %18470 = vmatpush3.bf16.msra.mxu1 %v23080_v37  ;;  %v23592_v37 = vpack.c.bf16 %v23006_v26, %v23006_v26  ;;  %v5067_v26 = vpack.c.bf16 %v22974_v5, %v22974_v5 }
0x166f   : > { %18471 = vmatprep.subr.bf16.mxu1 %v25017_v51 }
0x1672   : > { %18472 = vmatpush3.bf16.msra.mxu1 %v23087_v39 }
0x1673   : > { %18473 = vmatprep.subr.bf16.mxu1 %v25017_v51 }
0x1676   : > { %18474 = vmatpush3.bf16.msra.mxu1 %v23092_v41  ;;  %v5132_v41 = vsel %vm3166_vm2, %v23592_v37, 0 }
0x1677   : > { %18479 = vmatprep.subr.bf16.mxu1 %v25017_v51 }
0x1734   : > { %v4776_v49 = vpop.f32.mrb[64].mxu1 }
0x1735   : > { %v18453_v21 = vpop.f32.mrb[65].mxu1  ;;  %v4782_v39 = vpack.c.bf16 %v4776_v49, %v4776_v49 }
0x1736   : > { %v4779_v34 = vpop.f32.mrb[66].mxu1 }
0x1737   : > { %v18454_v25 = vpop.f32.mrb[67].mxu1  ;;  %v25038_v34 = vld [vmem:[#allocation59_spill] sm:$0xff] }
0x173c   : > { %v4891_v44 = vpop.f32.mrb[68].mxu1 }
0x173d   : > { %v4897_v27 = vpack.c.bf16 %v4891_v44, %v4891_v44  ;;  %v18465_v55 = vpop.f32.mrb[69].mxu1 }
0x173e   : > { %v4894_v28 = vpop.f32.mrb[70].mxu1 }
0x173f   : > { %v18466_v35 = vpop.f32.mrb[71].mxu1  ;;  %16643 = vmatmul.mubr.msk.bf16.vlgmr.msra.gmra.mrb[64].mxu0 %vm3101_vm1, %v4897_v27  ;;  %18476 = vmatmul.mubr.msk.bf16.vlgmr.msra.gmra.mrb[72].mxu1 %vm3101_vm1, %v4897_v27 }
0x1740   : > { %4986 = vmatpush1.bf16.msra.mxu0 %v23102_v58  ;;  %18480 = vmatpush3.bf16.msra.mxu1 %v23105_v50  ;;  %v5072_v58 = vsel %vm3101_vm1, %v5067_v26, 0 }
0x1741   : > { %4987 = vmatprep.subr.bf16.mxu0 %v23108_v53  ;;  %18481 = vmatprep.subr.bf16.mxu1 %v25017_v51 }
0x1742   : > { %5017 = vmatprep.mubr.bf16.mxu0 %v25009_v36  ;;  %18487 = vmatprep.mubr.msk.bf16.mxu1 %vm21803_vm0, %v25017_v51 }
0x1744   : > { %4988 = vmatpush1.bf16.msra.mxu0 %v23115_v59  ;;  %18482 = vmatpush3.bf16.msra.mxu1 %v23118_v57 }
0x1745   : > { %4989 = vmatprep.subr.bf16.mxu0 %v23123_v61  ;;  %18483 = vmatprep.subr.bf16.mxu1 %v25017_v51 }
0x1748   : > { %4990 = vmatpush1.bf16.msra.mxu0 %v23131_v62  ;;  %18484 = vmatpush3.bf16.msra.mxu1 %v23134_v6 }
0x1749   : > { %4991 = vmatprep.subr.bf16.mxu0 %v23139_v9  ;;  %18485 = vmatprep.subr.bf16.mxu1 %v25017_v51 }
0x174c   : > { %4992 = vmatpush1.bf16.msra.mxu0 %v23144_v10  ;;  %18486 = vmatpush3.bf16.msra.mxu1 %v23147_v11 }
0x174d   : > { %18497 = vmatprep.subr.bf16.mxu1 %v25017_v51  ;;  %18491 = vmatprep.subr.bf16.mxu0 %v25017_v51 }
0x174f   : > { %16645 = vmatmul.mubr.msk.bf16.vlgmr.msra.gmra.mrb[68].mxu0 %vm3101_vm1, %v4782_v39  ;;  %18488 = vmatmul.mubr.msk.bf16.vlgmr.msra.gmra.mrb[76].mxu1 %vm3101_vm1, %v4782_v39  ;;  %v25040_v39 = vld [vmem:[#allocation61_spill] sm:$0xff] }
0x1750   : > { %18498 = vmatpush3.bf16.msra.mxu1 %v5132_v41  ;;  %18493 = vmatprep.mubr.msk.bf16.mxu0 %vm21803_vm0, %v25017_v51  ;;  %v25041_v41 = vld [vmem:[#allocation62_spill] sm:$0xff] }
0x1751   : > { %18499 = vmatprep.mubr.msk.bf16.mxu1 %vm21803_vm0, %v25017_v51  ;;  %18503 = vmatprep.subr.bf16.mxu1 %v25017_v51 }
0x1755   : > { %18492 = vmatpush3.bf16.xpose.msra.mxu0 %v5072_v58  ;;  %v25043_v58 = vld [vmem:[#allocation64_spill] sm:$0xff] }
0x1756   : > { %5178 = vmatprep.subr.bf16.mxu0 %v23189_v60 }
0x175c   : > { %18494 = vmatmul.mubr.msk.bf16.vlgmr.msra.gmra.mrb[72].mxu0 %vm3101_vm1, %v23551_v56 }
0x175d   : > { %5179 = vmatpush1.bf16.msra.mxu0 %v23186_v54  ;;  %5210 = vmatprep.mubr.bf16.mxu0 %v25009_v36 }
0x175e   : > { %5180 = vmatprep.subr.bf16.mxu0 %v23192_v63 }
0x1761   : > { %5181 = vmatpush1.bf16.msra.mxu0 %v23197_v12 }
0x1762   : > { %5182 = vmatprep.subr.bf16.mxu0 %v23201_v13 }
0x1765   : > { %5183 = vmatpush1.bf16.msra.mxu0 %v23205_v23 }
0x1766   : > { %5184 = vmatprep.subr.bf16.mxu0 %v23209_v30 }
0x1769   : > { %5185 = vmatpush1.bf16.msra.mxu0 %v23213_v33 }
0x176a   : > { %18515 = vmatprep.subr.bf16.mxu0 %v25017_v51 }
0x1812   : > { %v4935_v5 = vpop.f32.mrb[64].mxu0  ;;  %v4976_v50 = vpop.f32.mrb[72].mxu1 }
0x1813   : > { %v4937_v53 = vpop.f32.mrb[65].mxu0  ;;  %v18477_v59 = vpop.f32.mrb[73].mxu1 }
0x1814   : > { %v4939_v57 = vpop.f32.mrb[66].mxu0  ;;  %v4979_v61 = vpop.f32.mrb[74].mxu1 }
0x1815   : > { %v4940_v62 = vpop.f32.mrb[67].mxu0  ;;  %v18478_v6 = vpop.f32.mrb[75].mxu1 }
0x1822   : > { %v5019_v9 = vpop.f32.mrb[68].mxu0  ;;  %v5060_v10 = vpop.f32.mrb[76].mxu1 }
0x1823   : > { %v23622_v11 = vadd.f32 %v5019_v9, %v4935_v5  ;;  %v23624_v54 = vadd.f32 %v5060_v10, %v4976_v50  ;;  %v5021_v60 = vpop.f32.mrb[69].mxu0  ;;  %v18489_v63 = vpop.f32.mrb[77].mxu1  ;;  %v25044_v5 = vld [vmem:[#allocation65_spill] sm:$0xff]  ;;  %v25045_v50 = vld [vmem:[#allocation66_spill] sm:$0xff] }
0x1824   : > { %v23626_v12 = vadd.f32 %v5021_v60, %v4937_v53  ;;  %v5023_v13 = vpop.f32.mrb[70].mxu0  ;;  %v5063_v23 = vpop.f32.mrb[78].mxu1 }
0x1825   : > { %v5024_v30 = vpop.f32.mrb[71].mxu0  ;;  %v18490_v33 = vpop.f32.mrb[79].mxu1 }
0x182f   : > { %v5108_v56 = vpop.f32.mrb[72].mxu0 }
0x1830   : > { %v5114_v40 = vsel %vm23018_vm3, %v5108_v56, -1e+30  ;;  %v18495_v7 = vpop.f32.mrb[73].mxu0  ;;  %v25046_v56 = vld [vmem:[#allocation57_spill] sm:$0xff] }
0x1831   : > { %v5111_v8 = vpop.f32.mrb[74].mxu0  ;;  %v5115_v3 = vsel %vm3149_vm4, %v5114_v40, -inf }
0x1832   : > { %5116 = vmax.xlane.f32.xlu0 %v5115_v3  ;;  %v18496_v32 = vpop.f32.mrb[75].mxu0 }
0x18bf   : > { %v5117_v42 = vpop.xlane.xlu0 %5116 }
0x18c0   : > { %v5118_v18 = vsub.f32 %v5114_v40, %v5117_v42 }
0x18c2   : > { %v5119_v29 = vmul.f32 1.442695, %v5118_v18 }
0x18c4   : > { %20248 = vpow2.f32 %v5119_v29 }
0x18ce   : > { %v20249_v24 = vpop.eup %20248 }
0x18cf   : > { %v5121_v48 = vsel %vm3149_vm4, %v20249_v24, 0.0 }
0x18d0   : > { %5122 = vadd.xlane.f32.xlu0 %v5121_v48 }
0x18e6   : > { %5266 = vrot.lane.b32.xlu0 %v5067_v26, %s21804_s16  ;;  %v25042_v26 = vld [vmem:[#allocation63_spill] sm:$0xff] }
0x195d   : > { %v5123_v31 = vpop.xlane.xlu0 %5122 }
0x195e   : > { %20250 = vrcp.f32 %v5123_v31  ;;  %v25047_v31 = vld [vmem:[#allocation67_spill] sm:$0xff] }
0x1961   : > { %v5267_v25 = vpop.permute.xlu0 %5266 }
0x1962   : > { %v5272_v28 = vsel %vm3101_vm1, %v5267_v25, 0 }
0x1968   : > { %v20251_v17 = vpop.eup %20250 }
0x1969   : > { %v5125_v49 = vmul.f32 %v20251_v17, %v20249_v24  ;;  %v25048_v17 = vld [vmem:[#allocation68_spill] sm:$0xff] }
0x196b   : > { %v5126_v21 = vpack.c.bf16 %v5125_v49, %v5125_v49  ;;  %v25049_v49 = vld [vmem:[#allocation69_spill] sm:$0xff] }
0x196d   : > { %18500 = vmatmul.mubr.msk.bf16.vlgmr.msra.gmra.mrb[80].mxu1 %vm3149_vm4, %v5126_v21  ;;  %v25050_v21 = vld [vmem:[#allocation70_spill] sm:$0xff] }
0x196e   : > { %18504 = vmatpush3.bf16.msra.mxu1 %v23219_v0  ;;  %18511 = vmatprep.mubr.msk.bf16.mxu1 %vm21803_vm0, %v25017_v51 }
0x196f   : > { %18505 = vmatprep.subr.bf16.mxu1 %v25017_v51 }
0x1972   : > { %18506 = vmatpush3.bf16.msra.mxu1 %v23224_v2  ;;  %v5264_v2 = vpop.permute.xlu1 %5263 }
0x1973   : > { %18507 = vmatprep.subr.bf16.mxu1 %v25017_v51 }
0x1976   : > { %18508 = vmatpush3.bf16.msra.mxu1 %v23231_v43  ;;  %v25039_v43 = vld [vmem:[#allocation60_spill] sm:$0xff] }
0x1977   : > { %18509 = vmatprep.subr.bf16.mxu1 %v25017_v51 }
0x197a   : > { %18510 = vmatpush3.bf16.msra.mxu1 %v25038_v34  ;;  %v25051_v34 = vld [vmem:[#allocation56_spill] sm:$0xff] }
0x197b   : > { %18521 = vmatprep.subr.bf16.mxu1 %v25017_v51  ;;  %v5465_v25 = vpack.c.bf16 %v25051_v34, %v25051_v34 }
0x1a40   : > { %v5168_v44 = vpop.f32.mrb[80].mxu1 }
0x1a41   : > { %v5174_v0 = vpack.c.bf16 %v5168_v44, %v5168_v44  ;;  %v18501_v27 = vpop.f32.mrb[81].mxu1  ;;  %v25052_v44 = vld [vmem:[#allocation58_spill] sm:$0xff] }
0x1a42   : > { %v5171_v55 = vpop.f32.mrb[82].mxu1 }
0x1a43   : > { %v18502_v35 = vpop.f32.mrb[83].mxu1  ;;  %16649 = vmatmul.mubr.msk.bf16.vlgmr.msra.gmra.mrb[76].mxu0 %vm3101_vm1, %v5174_v0  ;;  %18512 = vmatmul.mubr.msk.bf16.vlgmr.msra.gmra.mrb[84].mxu1 %vm3101_vm1, %v5174_v0  ;;  %v23697_v0 = vpack.c.bf16 %v25052_v44, %v25052_v44 }
0x1a44   : > { %18516 = vmatpush3.bf16.xpose.msra.mxu0 %v5272_v28  ;;  %18517 = vmatprep.mubr.msk.bf16.mxu0 %vm21803_vm0, %v25017_v51 }
0x1a45   : > { %18523 = vmatprep.mubr.msk.bf16.mxu1 %vm21803_vm0, %v25017_v51  ;;  %5380 = vmatprep.subr.bf16.mxu0 %v23272_v19 }
0x1a4b   : > { %18518 = vmatmul.mubr.msk.bf16.vlgmr.msra.gmra.mrb[80].mxu0 %vm3101_vm1, %v5264_v2  ;;  %v5470_v2 = vsel %vm3101_vm1, %v5465_v25, 0 }
0x1a4c   : > { %5381 = vmatpush1.bf16.msra.mxu0 %v25039_v43  ;;  %5412 = vmatprep.mubr.bf16.mxu0 %v25009_v36  ;;  %v5530_v43 = vsel %vm3166_vm2, %v23697_v0, 0 }
0x1a4d   : > { %5382 = vmatprep.subr.bf16.mxu0 %v25040_v39 }
0x1a50   : > { %5383 = vmatpush1.bf16.msra.mxu0 %v25041_v41  ;;  %v25053_v41 = vld [vmem:[#allocation72_spill] sm:$0xff] }
0x1a51   : > { %5384 = vmatprep.subr.bf16.mxu0 %v25042_v26  ;;  %v25054_v26 = vld [vmem:[#allocation71_spill] sm:$0xff] }
0x1a54   : > { %5385 = vmatpush1.bf16.msra.mxu0 %v25043_v58  ;;  %v25055_v58 = vld [vmem:[#allocation73_spill] sm:$0xff] }
0x1a55   : > { %5386 = vmatprep.subr.bf16.mxu0 %v25044_v5  ;;  %v25056_v5 = vld [vmem:[#allocation74_spill] sm:$0xff] }
0x1a58   : > { %5387 = vmatpush1.bf16.msra.mxu0 %v25045_v50  ;;  %v25057_v50 = vld [vmem:[#allocation75_spill] sm:$0xff] }
0x1a59   : > { %18539 = vmatprep.subr.bf16.mxu0 %v25017_v51 }
0x1b16   : > { %v5212_v19 = vpop.f32.mrb[76].mxu0  ;;  %v5253_v53 = vpop.f32.mrb[84].mxu1 }
0x1b17   : > { %v23663_v59 = vadd.f32 %v5212_v19, %v23622_v11  ;;  %v23666_v57 = vadd.f32 %v5253_v53, %v23624_v54  ;;  %v5214_v61 = vpop.f32.mrb[77].mxu0  ;;  %v18513_v62 = vpop.f32.mrb[85].mxu1  ;;  %v25058_v19 = vld [vmem:[#allocation76_spill] sm:$0xff]  ;;  %v25059_v53 = vld [vmem:[#allocation77_spill] sm:$0xff] }
0x1b18   : > { %v23669_v6 = vadd.f32 %v5214_v61, %v23626_v12  ;;  %v5216_v9 = vpop.f32.mrb[78].mxu0  ;;  %v5256_v10 = vpop.f32.mrb[86].mxu1  ;;  %v5464_v12 = vpack.c.bf16 %v25046_v56, %v25046_v56  ;;  %v25060_v61 = vld [vmem:[#allocation78_spill] sm:$0xff] }
0x1b19   : > { %v5217_v60 = vpop.f32.mrb[79].mxu0  ;;  %v18514_v63 = vpop.f32.mrb[87].mxu1 }
0x1b1e   : > { %v5308_v13 = vpop.f32.mrb[80].mxu0 }
0x1b1f   : > { %v5314_v23 = vsel %vm23018_vm3, %v5308_v13, -1e+30  ;;  %v18519_v30 = vpop.f32.mrb[81].mxu0 }
0x1b20   : > { %v5311_v33 = vpop.f32.mrb[82].mxu0  ;;  %v5315_v11 = vsel %vm3149_vm4, %v5314_v23, -inf }
0x1b21   : > { %5316 = vmax.xlane.f32.xlu1 %v5315_v11  ;;  %v18520_v54 = vpop.f32.mrb[83].mxu0 }
0x1b32   : > { %5328 = vrot.lane.b32.xlu1 %v23592_v37, %s21804_s16 }
0x1b36   : > { %5661 = vrot.lane.b32.xlu1 %v5464_v12, %s21804_s16 }
0x1bae   : > { %v5317_v40 = vpop.xlane.xlu1 %5316 }
0x1baf   : > { %v5318_v7 = vsub.f32 %v5314_v23, %v5317_v40 }
0x1bb1   : > { %v5319_v8 = vmul.f32 1.442695, %v5318_v7 }
0x1bb2   : > { %v5329_v3 = vpop.permute.xlu1 %5328 }
0x1bb3   : > { %20252 = vpow2.f32 %v5319_v8  ;;  %v5334_v32 = vsel %vm3166_vm2, %v5329_v3, 0 }
0x1bb4   : > { %18522 = vmatpush3.bf16.msra.mxu1 %v5334_v32 }
0x1bb5   : > { %18527 = vmatprep.subr.bf16.mxu1 %v25017_v51 }
0x1bbd   : > { %v20253_v42 = vpop.eup %20252 }
0x1bbe   : > { %v5321_v18 = vsel %vm3149_vm4, %v20253_v42, 0.0 }
0x1bbf   : > { %5322 = vadd.xlane.f32.xlu0 %v5321_v18 }
0x1c4c   : > { %v5323_v37 = vpop.xlane.xlu0 %5322 }
0x1c4d   : > { %20254 = vrcp.f32 %v5323_v37 }
0x1c57   : > { %v20255_v29 = vpop.eup %20254 }
0x1c58   : > { %v5325_v24 = vmul.f32 %v20255_v29, %v20253_v42 }
0x1c5a   : > { %v5326_v48 = vpack.c.bf16 %v5325_v24, %v5325_v24 }
0x1c5c   : > { %18524 = vmatmul.mubr.msk.bf16.vlgmr.msra.gmra.mrb[88].mxu1 %vm3149_vm4, %v5326_v48  ;;  %v25061_v48 = vld [vmem:[#allocation79_spill] sm:$0xff] }
0x1c5d   : > { %18528 = vmatpush3.bf16.msra.mxu1 %v25047_v31  ;;  %18535 = vmatprep.mubr.msk.bf16.mxu1 %vm21803_vm0, %v25017_v51  ;;  %v25062_v31 = vld [vmem:[#allocation80_spill] sm:$0xff] }
0x1c5e   : > { %18529 = vmatprep.subr.bf16.mxu1 %v25017_v51 }
0x1c61   : > { %18530 = vmatpush3.bf16.msra.mxu1 %v25048_v17  ;;  %v25063_v17 = vld [vmem:[#allocation81_spill] sm:$0xff] }
0x1c62   : > { %18531 = vmatprep.subr.bf16.mxu1 %v25017_v51 }
0x1c65   : > { %18532 = vmatpush3.bf16.msra.mxu1 %v25049_v49  ;;  %v25064_v49 = vld [vmem:[#allocation82_spill] sm:$0xff] }
0x1c66   : > { %18533 = vmatprep.subr.bf16.mxu1 %v25017_v51 }
0x1c69   : > { %18534 = vmatpush3.bf16.msra.mxu1 %v25050_v21 }
0x1c6a   : > { %18545 = vmatprep.subr.bf16.mxu1 %v25017_v51 }
0x1d2f   : > { %v5370_v27 = vpop.f32.mrb[88].mxu1 }
0x1d30   : > { %v5376_v55 = vpack.c.bf16 %v5370_v27, %v5370_v27  ;;  %v18525_v28 = vpop.f32.mrb[89].mxu1 }
0x1d31   : > { %v5373_v35 = vpop.f32.mrb[90].mxu1 }
0x1d32   : > { %v18526_v39 = vpop.f32.mrb[91].mxu1  ;;  %16653 = vmatmul.mubr.msk.bf16.vlgmr.msra.gmra.mrb[84].mxu0 %vm3101_vm1, %v5376_v55  ;;  %18536 = vmatmul.mubr.msk.bf16.vlgmr.msra.gmra.mrb[92].mxu1 %vm3101_vm1, %v5376_v55  ;;  %v5662_v35 = vpop.permute.xlu1 %5661 }
0x1d33   : > { %18540 = vmatpush3.bf16.xpose.msra.mxu0 %v5470_v2  ;;  %18546 = vmatpush3.bf16.msra.mxu1 %v5530_v43  ;;  %v25065_v2 = vld [vmem:[#allocation83_spill] sm:$0xff] }
0x1d34   : > { %18541 = vmatprep.mubr.msk.bf16.mxu0 %vm21803_vm0, %v25017_v51  ;;  %18547 = vmatprep.mubr.msk.bf16.mxu1 %vm21803_vm0, %v25017_v51 }
0x1d35   : > { %5576 = vmatprep.subr.bf16.mxu0 %v25053_v41  ;;  %18551 = vmatprep.subr.bf16.mxu1 %v25017_v51 }
0x1d3a   : > { %18542 = vmatmul.mubr.msk.bf16.vlgmr.msra.gmra.mrb[88].mxu0 %vm3101_vm1, %v5464_v12 }
0x1d3b   : > { %5577 = vmatpush1.bf16.msra.mxu0 %v25054_v26  ;;  %5608 = vmatprep.mubr.bf16.mxu0 %v25009_v36 }
0x1d3c   : > { %5578 = vmatprep.subr.bf16.mxu0 %v25055_v58 }
0x1d3f   : > { %5579 = vmatpush1.bf16.msra.mxu0 %v25056_v5 }
0x1d40   : > { %5580 = vmatprep.subr.bf16.mxu0 %v25057_v50 }
0x1d43   : > { %5581 = vmatpush1.bf16.msra.mxu0 %v25058_v19 }
0x1d44   : > { %5582 = vmatprep.subr.bf16.mxu0 %v25059_v53 }
0x1d47   : > { %5583 = vmatpush1.bf16.msra.mxu0 %v25060_v61 }
0x1d48   : > { %18563 = vmatprep.subr.bf16.mxu0 %v25017_v51 }
0x1e05   : > { %v5414_v62 = vpop.f32.mrb[84].mxu0  ;;  %v5455_v9 = vpop.f32.mrb[92].mxu1 }
0x1e06   : > { %v23721_v10 = vadd.f32 %v5414_v62, %v23663_v59  ;;  %v23724_v60 = vadd.f32 %v5455_v9, %v23666_v57  ;;  %v5416_v63 = vpop.f32.mrb[85].mxu0  ;;  %v18537_v13 = vpop.f32.mrb[93].mxu1 }
0x1e07   : > { %v23727_v23 = vadd.f32 %v5416_v63, %v23669_v6  ;;  %v5418_v30 = vpop.f32.mrb[86].mxu0  ;;  %v5458_v33 = vpop.f32.mrb[94].mxu1 }
0x1e08   : > { %v5419_v11 = vpop.f32.mrb[87].mxu0  ;;  %v18538_v54 = vpop.f32.mrb[95].mxu1  ;;  %v25066_v30 = vld [vmem:[#allocation54_spill] sm:$0xff] }
0x1e09   : > { %v20269_v11 = vld [vmem:[#allocation2 + $0x8] sm:$0xff] }
0x1e0a   : > { %v5863_v54 = vadd.f32 %v20269_v11, %v23540_v22  ;;  %v19399_v11 = vld [vmem:[%s22569_s4 + $0x8] ss:$48 sps:$4 sm:$0xff]  }
0x1e0d   : > { %v5506_v56 = vpop.f32.mrb[88].mxu0 }
0x1e0e   : > { %v5512_v12 = vsel %vm23018_vm3, %v5506_v56, -1e+30  ;;  %v18543_v40 = vpop.f32.mrb[89].mxu0 }
0x1e0f   : > { %v5509_v7 = vpop.f32.mrb[90].mxu0  ;;  %v5513_v59 = vsel %vm3149_vm4, %v5512_v12, -inf }
0x1e10   : > { %5514 = vmax.xlane.f32.xlu0 %v5513_v59  ;;  %v18544_v57 = vpop.f32.mrb[91].mxu0  ;;  %v20270_v7 = vld [vmem:[#allocation2 + $0x10] sm:$0xff] }
0x1e11   : > { %v25068_v59 = vld [vmem:[#allocation55_spill] sm:$0xff] }
0x1e9d   : > { %v5515_v8 = vpop.xlane.xlu0 %5514 }
0x1e9e   : > { %v5516_v3 = vsub.f32 %v5512_v12, %v5515_v8 }
0x1ea0   : > { %v5517_v32 = vmul.f32 1.442695, %v5516_v3 }
0x1ea2   : > { %20256 = vpow2.f32 %v5517_v32 }
0x1eac   : > { %v20257_v6 = vpop.eup %20256 }
0x1ead   : > { %v5519_v42 = vsel %vm3149_vm4, %v20257_v6, 0.0 }
0x1eae   : > { %5520 = vadd.xlane.f32.xlu0 %v5519_v42 }
0x1ec4   : > { %5664 = vrot.lane.b32.xlu0 %v5465_v25, %s21804_s16 }
0x1f3b   : > { %v5521_v18 = vpop.xlane.xlu0 %5520 }
0x1f3c   : > { %20258 = vrcp.f32 %v5521_v18 }
0x1f3f   : > { %v5665_v21 = vpop.permute.xlu0 %5664 }
0x1f40   : > { %v5670_v55 = vsel %vm3101_vm1, %v5665_v21, 0 }
0x1f46   : > { %v20259_v37 = vpop.eup %20258 }
0x1f47   : > { %v5523_v29 = vmul.f32 %v20259_v37, %v20257_v6 }
0x1f49   : > { %v5524_v24 = vpack.c.bf16 %v5523_v29, %v5523_v29 }
0x1f4b   : > { %18548 = vmatmul.mubr.msk.bf16.vlgmr.msra.gmra.mrb[96].mxu1 %vm3149_vm4, %v5524_v24 }
0x1f4c   : > { %18552 = vmatpush3.bf16.msra.mxu1 %v25061_v48  ;;  %18559 = vmatprep.mubr.msk.bf16.mxu1 %vm21803_vm0, %v25017_v51 }
0x1f4d   : > { %18553 = vmatprep.subr.bf16.mxu1 %v25017_v51 }
0x1f50   : > { %18554 = vmatpush3.bf16.msra.mxu1 %v25062_v31 }
0x1f51   : > { %18555 = vmatprep.subr.bf16.mxu1 %v25017_v51 }
0x1f54   : > { %18556 = vmatpush3.bf16.msra.mxu1 %v25063_v17 }
0x1f55   : > { %18557 = vmatprep.subr.bf16.mxu1 %v25017_v51 }
0x1f58   : > { %18558 = vmatpush3.bf16.msra.mxu1 %v25064_v49 }
0x1f59   : > { %18569 = vmatprep.subr.bf16.mxu1 %v25017_v51 }
0x201e   : > { %v5566_v34 = vpop.f32.mrb[96].mxu1 }
0x201f   : > { %v5572_v25 = vpack.c.bf16 %v5566_v34, %v5566_v34  ;;  %v18549_v44 = vpop.f32.mrb[97].mxu1 }
0x2020   : > { %v5569_v27 = vpop.f32.mrb[98].mxu1 }
0x2021   : > { %v18550_v28 = vpop.f32.mrb[99].mxu1  ;;  %16657 = vmatmul.mubr.msk.bf16.vlgmr.msra.gmra.mrb[92].mxu0 %vm3101_vm1, %v5572_v25  ;;  %18560 = vmatmul.mubr.msk.bf16.vlgmr.msra.gmra.mrb[100].mxu1 %vm3101_vm1, %v5572_v25  ;;  %v25069_v27 = vld [vmem:[#allocation84_spill] sm:$0xff] }
0x2022   : > { %18564 = vmatpush3.bf16.xpose.msra.mxu0 %v5670_v55  ;;  %18565 = vmatprep.mubr.msk.bf16.mxu0 %vm21803_vm0, %v25017_v51  ;;  %v25070_v55 = vld [vmem:[#allocation85_spill] sm:$0xff]  ;;  %v25071_v28 = vld [vmem:[#allocation86_spill] sm:$0xff] }
0x2023   : > { %18571 = vmatprep.mubr.msk.bf16.mxu1 %vm21803_vm0, %v25017_v51  ;;  %5778 = vmatprep.subr.bf16.mxu0 %v23453_v46 }
0x2029   : > { %18566 = vmatmul.mubr.msk.bf16.vlgmr.msra.gmra.mrb[96].mxu0 %vm3101_vm1, %v5662_v35 }
0x202a   : > { %5779 = vmatpush1.bf16.msra.mxu0 %v23450_v52  ;;  %5810 = vmatprep.mubr.bf16.mxu0 %v25009_v36 }
0x202b   : > { %5780 = vmatprep.subr.bf16.mxu0 %v23456_v47 }
0x202e   : > { %5781 = vmatpush1.bf16.msra.mxu0 %v23461_v1 }
0x202f   : > { %5782 = vmatprep.subr.bf16.mxu0 %v23465_v15 }
0x2032   : > { %5783 = vmatpush1.bf16.msra.mxu0 %v23469_v20 }
0x2033   : > { %5784 = vmatprep.subr.bf16.mxu0 %v23473_v14 }
0x2036   : > { %5785 = vmatpush1.bf16.msra.mxu0 %v25065_v2 }
0x20f4   : > { %v5610_v46 = vpop.f32.mrb[92].mxu0  ;;  %v5651_v43 = vpop.f32.mrb[100].mxu1 }
0x20f5   : > { %v23763_v39 = vadd.f32 %v5610_v46, %v23721_v10  ;;  %v23766_v52 = vadd.f32 %v5651_v43, %v23724_v60  ;;  %v5612_v41 = vpop.f32.mrb[93].mxu0  ;;  %v18561_v47 = vpop.f32.mrb[101].mxu1  ;;  %v5868_v60 = vld [vmem:[%s925_s18] sm:$0x7] }
0x20f6   : > { %v23769_v1 = vadd.f32 %v5612_v41, %v23727_v23  ;;  %v5614_v15 = vpop.f32.mrb[94].mxu0  ;;  %v5654_v20 = vpop.f32.mrb[102].mxu1  ;;  %v5862_v23 = vadd.f32 %v20268_v38, %v23534_v16  ;;  %v23781_v33 = vrot.slane %v5868_v60, %v25066_v30  ;;  %v5864_v16 = vadd.f32 %v20270_v7, %v23537_v45  ;;  %v19396_v38 = vld [vmem:[%s22569_s4] ss:$48 sps:$4 sm:$0xff]  }
0x20f7   : > { %v5615_v26 = vpop.f32.mrb[95].mxu0  ;;  %v18562_v14 = vpop.f32.mrb[103].mxu1  ;;  %v5881_v57 = vrot.slane %v5868_v60, %v25068_v59  ;;  %v19402_v7 = vld [vmem:[%s22569_s4 + $0x60] ss:$48 sps:$4 sm:$0xff]  }
0x20f8   : > { %v23789_v12 = vadd.f32 %v23781_v33, %v5862_v23  ;;  %v19398_v23 = vld [vmem:[%s22569_s4 + $0x4] ss:$48 sps:$4 sm:$0xff]  }
0x20f9   : > { %v23799_v32 = vadd.f32 %v5881_v57, %v5864_v16  ;;  %8159 = vmatprep.subr.bf16.mxu0 %v19398_v23  ;;  %v19405_v16 = vld [vmem:[%s22569_s4 + $0x68] ss:$48 sps:$4 sm:$0xff]  }
0x20fc   : > { %v5706_v58 = vpop.f32.mrb[96].mxu0 }
0x20fd   : > { %v5712_v5 = vsel %vm23018_vm3, %v5706_v58, -1e+30  ;;  %v18567_v50 = vpop.f32.mrb[97].mxu0 }
0x20fe   : > { %v5709_v19 = vpop.f32.mrb[98].mxu0  ;;  %v5713_v53 = vsel %vm3149_vm4, %v5712_v5, -inf  ;;  %v20271_v50 = vld [vmem:[#allocation2 + $0x18] sm:$0xff] }
0x20ff   : > { %5714 = vmax.xlane.f32.xlu1 %v5713_v53  ;;  %v18568_v61 = vpop.f32.mrb[99].mxu0 }
0x2110   : > { %5726 = vrot.lane.b32.xlu1 %v23697_v0, %s21804_s16  ;;  %v25067_v0 = vld [vmem:[#allocation53_spill] sm:$0xff] }
0x2111   : > { %v23785_v56 = vrot.slane %v5868_v60, %v25067_v0 }
0x2113   : > { %v23792_v40 = vadd.f32 %v23785_v56, %v5863_v54  ;;  %v19404_v54 = vld [vmem:[%s22569_s4 + $0x64] ss:$48 sps:$4 sm:$0xff]  }
0x2115   : > { %v5893_v22 = vadd.f32 %v23792_v40, %v23789_v12 }
0x2117   : > { %v5894_v6 = vadd.f32 %v5893_v22, %v23799_v32  ;;  %v19408_v22 = vld [vmem:[%s22569_s4 + $0xc0] ss:$48 sps:$4 sm:$0xff]  }
0x218c   : > { %v5715_v62 = vpop.xlane.xlu1 %5714 }
0x218d   : > { %v5716_v9 = vsub.f32 %v5712_v5, %v5715_v62  ;;  %v20272_v62 = vld [vmem:[#allocation2 + $0x28] sm:$0xff] }
0x218f   : > { %v5717_v10 = vmul.f32 1.442695, %v5716_v9  ;;  %v20273_v9 = vld [vmem:[#allocation2 + $0x20] sm:$0xff] }
0x2190   : > { %v5727_v63 = vpop.permute.xlu1 %5726 }
0x2191   : > { %20260 = vpow2.f32 %v5717_v10  ;;  %v5732_v13 = vsel %vm3166_vm2, %v5727_v63, 0 }
0x2192   : > { %18570 = vmatpush3.bf16.msra.mxu1 %v5732_v13 }
0x2193   : > { %18575 = vmatprep.subr.bf16.mxu1 %v25017_v51 }
0x219b   : > { %v20261_v8 = vpop.eup %20260 }
0x219c   : > { %v5719_v3 = vsel %vm3149_vm4, %v20261_v8, 0.0 }
0x219d   : > { %5720 = vadd.xlane.f32.xlu0 %v5719_v3  ;;  %v19411_v3 = vld [vmem:[%s22569_s4 + $0xc8] ss:$48 sps:$4 sm:$0xff]  }
0x21a1   : > { %5895 = vadd.xlane.f32.xlu0 %v5894_v6  ;;  %v19416_v6 = vld [vmem:[%s22569_s4 + $0x124] ss:$48 sps:$4 sm:$0xff]  }
0x222a   : > { %v5721_v42 = vpop.xlane.xlu0 %5720 }
0x222b   : > { %20262 = vrcp.f32 %v5721_v42  ;;  %v19419_v42 = vld [vmem:[%s22569_s4 + $0x12c] ss:$48 sps:$4 sm:$0xff]  }
0x222e   : > { %v5896_v18 = vpop.xlane.xlu0 %5895 }
0x222f   : > { %v5901_v37 = vmul.f32 0.0026041667, %v5896_v18  ;;  %v19414_v18 = vld [vmem:[%s22569_s4 + $0x120] ss:$48 sps:$4 sm:$0xff]  }
0x2231   : > { %v23803_v45 = vsub.f32 %v23789_v12, %v5901_v37  ;;  %v23806_v29 = vsub.f32 %v23792_v40, %v5901_v37  ;;  %v23809_v24 = vsub.f32 %v23799_v32, %v5901_v37  ;;  %v19417_v37 = vld [vmem:[%s22569_s4 + $0x128] ss:$48 sps:$4 sm:$0xff]  }
0x2233   : > { %v5909_v48 = vmul.f32 %v23803_v45, %v23803_v45  ;;  %v5910_v31 = vmul.f32 %v23806_v29, %v23806_v29  ;;  %v5911_v49 = vmul.f32 %v23809_v24, %v23809_v24 }
0x2235   : > { %v20263_v17 = vpop.eup %20262  ;;  %v5915_v21 = vadd.f32 %v5910_v31, %v5909_v48  ;;  %v19422_v48 = vld [vmem:[%s22569_s4 + $0x184] ss:$48 sps:$4 sm:$0xff]   ;;  %v19425_v31 = vld [vmem:[%s22569_s4 + $0x18c] ss:$48 sps:$4 sm:$0xff]  }
0x2236   : > { %v5723_v34 = vmul.f32 %v20263_v17, %v20261_v8  ;;  %v19413_v8 = vld [vmem:[%s22569_s4 + $0xcc] ss:$48 sps:$4 sm:$0xff]   ;;  %v19420_v17 = vld [vmem:[%s22569_s4 + $0x180] ss:$48 sps:$4 sm:$0xff]  }
0x2237   : > { %v5916_v25 = vadd.f32 %v5915_v21, %v5911_v49  ;;  %v19423_v49 = vld [vmem:[%s22569_s4 + $0x188] ss:$48 sps:$4 sm:$0xff]   ;;  %v19428_v21 = vld [vmem:[%s22569_s4 + $0x1e4] ss:$48 sps:$4 sm:$0xff]  }
0x2238   : > { %v5724_v44 = vpack.c.bf16 %v5723_v34, %v5723_v34  ;;  %v19431_v34 = vld [vmem:[%s22569_s4 + $0x1ec] ss:$48 sps:$4 sm:$0xff]  }
0x2239   : > { %5917 = vadd.xlane.f32.xlu1 %v5916_v25  ;;  %v19426_v25 = vld [vmem:[%s22569_s4 + $0x1e0] ss:$48 sps:$4 sm:$0xff]  }
0x223a   : > { %18572 = vmatmul.mubr.msk.bf16.vlgmr.msra.gmra.mrb[104].mxu1 %vm3149_vm4, %v5724_v44  ;;  %v19429_v44 = vld [vmem:[%s22569_s4 + $0x1e8] ss:$48 sps:$4 sm:$0xff]  }
0x223b   : > { %18576 = vmatpush3.bf16.msra.mxu1 %v25069_v27  ;;  %18583 = vmatprep.mubr.msk.bf16.mxu1 %vm21803_vm0, %v25017_v51  ;;  %v19434_v27 = vld [vmem:[%s22569_s4 + $0x244] ss:$48 sps:$4 sm:$0xff]  }
0x223c   : > { %18577 = vmatprep.subr.bf16.mxu1 %v25017_v51 }
0x223f   : > { %18578 = vmatpush3.bf16.msra.mxu1 %v25070_v55  ;;  %v19437_v55 = vld [vmem:[%s22569_s4 + $0x24c] ss:$48 sps:$4 sm:$0xff]  }
0x2240   : > { %18579 = vmatprep.subr.bf16.mxu1 %v25017_v51 }
0x2243   : > { %18580 = vmatpush3.bf16.msra.mxu1 %v25071_v28  ;;  %v19432_v28 = vld [vmem:[%s22569_s4 + $0x240] ss:$48 sps:$4 sm:$0xff]  }
0x2244   : > { %18581 = vmatprep.subr.bf16.mxu1 %v25017_v51 }
0x2247   : > { %18582 = vmatpush3.bf16.msra.mxu1 %v23500_v4 }
0x230d   : > { %v5768_v35 = vpop.f32.mrb[104].mxu1 }
0x230e   : > { %v5774_v2 = vpack.c.bf16 %v5768_v35, %v5768_v35  ;;  %v18573_v46 = vpop.f32.mrb[105].mxu1  ;;  %v19435_v35 = vld [vmem:[%s22569_s4 + $0x248] ss:$48 sps:$4 sm:$0xff]  }
0x230f   : > { %v5771_v43 = vpop.f32.mrb[106].mxu1  ;;  %v19443_v46 = vld [vmem:[%s22569_s4 + $0x2ac] ss:$48 sps:$4 sm:$0xff]  }
0x2310   : > { %v18574_v41 = vpop.f32.mrb[107].mxu1  ;;  %16661 = vmatmul.mubr.msk.bf16.vlgmr.msra.gmra.mrb[100].mxu0 %vm3101_vm1, %v5774_v2  ;;  %18584 = vmatmul.mubr.msk.bf16.vlgmr.msra.gmra.mrb[108].mxu1 %vm3101_vm1, %v5774_v2  ;;  %v19440_v2 = vld [vmem:[%s22569_s4 + $0x2a4] ss:$48 sps:$4 sm:$0xff]   ;;  %v19438_v43 = vld [vmem:[%s22569_s4 + $0x2a0] ss:$48 sps:$4 sm:$0xff]  }
0x2311   : > { %8160 = vmatpush1.bf16.msra.mxu0 %v19396_v38  ;;  %v19441_v41 = vld [vmem:[%s22569_s4 + $0x2a8] ss:$48 sps:$4 sm:$0xff]  }
0x2312   : > { %8161 = vmatprep.subr.bf16.mxu0 %v19404_v54  ;;  %v19467_v54 = vld [vmem:[%s22569_s4 + $0x42c] ss:$48 sps:$4 sm:$0xff]  }
0x2315   : > { %8162 = vmatpush1.bf16.msra.mxu0 %v19402_v7  ;;  %v19465_v7 = vld [vmem:[%s22569_s4 + $0x428] ss:$48 sps:$4 sm:$0xff]  }
0x23e3   : > { %v5812_v47 = vpop.f32.mrb[100].mxu0  ;;  %v5853_v15 = vpop.f32.mrb[108].mxu1 }
0x23e4   : > { %v5859_v20 = vadd.f32 %v5812_v47, %v23763_v39  ;;  %v5861_v26 = vadd.f32 %v5853_v15, %v23766_v52  ;;  %v5814_v14 = vpop.f32.mrb[101].mxu0  ;;  %v18585_v58 = vpop.f32.mrb[109].mxu1  ;;  %v19446_v47 = vld [vmem:[%s22569_s4 + $0x304] ss:$48 sps:$4 sm:$0xff]   ;;  %v19449_v15 = vld [vmem:[%s22569_s4 + $0x30c] ss:$48 sps:$4 sm:$0xff]  }
0x23e5   : > { %v5860_v51 = vadd.f32 %v5814_v14, %v23769_v1  ;;  %v5816_v4 = vpop.f32.mrb[102].mxu0  ;;  %v5856_v5 = vpop.f32.mrb[110].mxu1  ;;  %v19452_v14 = vld [vmem:[%s22569_s4 + $0x364] ss:$48 sps:$4 sm:$0xff]   ;;  %v19455_v58 = vld [vmem:[%s22569_s4 + $0x36c] ss:$48 sps:$4 sm:$0xff]  }
0x23e6   : > { %v5865_v19 = vadd.f32 %v20271_v50, %v5859_v20  ;;  %v5817_v53 = vpop.f32.mrb[103].mxu0  ;;  %v18586_v61 = vpop.f32.mrb[111].mxu1  ;;  %v5867_v39 = vadd.f32 %v20272_v62, %v5861_v26  ;;  %v19444_v20 = vld [vmem:[%s22569_s4 + $0x300] ss:$48 sps:$4 sm:$0xff]   ;;  %v19447_v26 = vld [vmem:[%s22569_s4 + $0x308] ss:$48 sps:$4 sm:$0xff]  }
0x23e7   : > { %v5866_v52 = vadd.f32 %v20273_v9, %v5860_v51  ;;  %v19450_v51 = vld [vmem:[%s22569_s4 + $0x360] ss:$48 sps:$4 sm:$0xff]   ;;  %v19453_v4 = vld [vmem:[%s22569_s4 + $0x368] ss:$48 sps:$4 sm:$0xff]   ;;  %v19458_v5 = vld [vmem:[%s22569_s4 + $0x3c4] ss:$48 sps:$4 sm:$0xff]  }
0x23e8   : > { %v23833_v10 = vadd.f32 %v23781_v33, %v5865_v19  ;;  %v23838_v60 = vadd.f32 %v5881_v57, %v5867_v39  ;;  %v19401_v33 = vld [vmem:[%s22569_s4 + $0xc] ss:$48 sps:$4 sm:$0xff]   ;;  %v19410_v57 = vld [vmem:[%s22569_s4 + $0xc4] ss:$48 sps:$4 sm:$0xff]   ;;  %v19456_v19 = vld [vmem:[%s22569_s4 + $0x3c0] ss:$48 sps:$4 sm:$0xff]  }
0x23e9   : > { %v23836_v1 = vadd.f32 %v23785_v56, %v5866_v52  ;;  %v19407_v56 = vld [vmem:[%s22569_s4 + $0x6c] ss:$48 sps:$4 sm:$0xff]   ;;  %8245 = vmatprep.subr.bf16.mxu1 %v19401_v33  ;;  %8163 = vmatprep.subr.bf16.mxu0 %v19410_v57  ;;  %v19459_v53 = vld [vmem:[%s22569_s4 + $0x3c8] ss:$48 sps:$4 sm:$0xff]   ;;  %v19464_v33 = vld [vmem:[%s22569_s4 + $0x424] ss:$48 sps:$4 sm:$0xff]  }
0x23ea   : > { %8246 = vmatpush1.bf16.msra.mxu1 %v19399_v11  ;;  %8164 = vmatpush1.bf16.msra.mxu0 %v19408_v22  ;;  %v19461_v50 = vld [vmem:[%s22569_s4 + $0x3cc] ss:$48 sps:$4 sm:$0xff]   ;;  %v19468_v57 = vld [vmem:[%s22569_s4 + $0x480] ss:$48 sps:$4 sm:$0xff]  }
0x23eb   : > { %v5897_v63 = vadd.f32 %v23836_v1, %v23833_v10  ;;  %8247 = vmatprep.subr.bf16.mxu1 %v19407_v56  ;;  %8165 = vmatprep.subr.bf16.mxu0 %v19416_v6  ;;  %v19462_v56 = vld [vmem:[%s22569_s4 + $0x420] ss:$48 sps:$4 sm:$0xff]   ;;  %v19473_v22 = vld [vmem:[%s22569_s4 + $0x48c] ss:$48 sps:$4 sm:$0xff]  }
0x23ec   : > { %v19479_v6 = vld [vmem:[%s22569_s4 + $0x4ec] ss:$48 sps:$4 sm:$0xff]  }
0x23ed   : > { %v5898_v13 = vadd.f32 %v5897_v63, %v23838_v60 }
0x23ee   : > { %8248 = vmatpush1.bf16.msra.mxu1 %v19405_v16  ;;  %8166 = vmatpush1.bf16.msra.mxu0 %v19414_v18  ;;  %v19470_v16 = vld [vmem:[%s22569_s4 + $0x484] ss:$48 sps:$4 sm:$0xff]   ;;  %v19477_v18 = vld [vmem:[%s22569_s4 + $0x4e8] ss:$48 sps:$4 sm:$0xff]  }
0x23ef   : > { %5899 = vadd.xlane.f32.xlu0 %v5898_v13  ;;  %8249 = vmatprep.subr.bf16.mxu1 %v19413_v8  ;;  %v19471_v8 = vld [vmem:[%s22569_s4 + $0x488] ss:$48 sps:$4 sm:$0xff]  }
0x23f0   : > { %8167 = vmatprep.subr.bf16.mxu0 %v19422_v48  ;;  %v19485_v48 = vld [vmem:[%s22569_s4 + $0x54c] ss:$48 sps:$4 sm:$0xff]  }
0x23f2   : > { %8250 = vmatpush1.bf16.msra.mxu1 %v19411_v3  ;;  %8168 = vmatpush1.bf16.msra.mxu0 %v19420_v17  ;;  %v19476_v3 = vld [vmem:[%s22569_s4 + $0x4e4] ss:$48 sps:$4 sm:$0xff]   ;;  %v19483_v17 = vld [vmem:[%s22569_s4 + $0x548] ss:$48 sps:$4 sm:$0xff]  }
0x23f3   : > { %8251 = vmatprep.subr.bf16.mxu1 %v19419_v42  ;;  %8169 = vmatprep.subr.bf16.mxu0 %v19428_v21  ;;  %v19474_v42 = vld [vmem:[%s22569_s4 + $0x4e0] ss:$48 sps:$4 sm:$0xff]   ;;  %v19491_v21 = vld [vmem:[%s22569_s4 + $0x5ac] ss:$48 sps:$4 sm:$0xff]  }
0x23f6   : > { %8252 = vmatpush1.bf16.msra.mxu1 %v19417_v37  ;;  %8170 = vmatpush1.bf16.msra.mxu0 %v19426_v25  ;;  %v19482_v37 = vld [vmem:[%s22569_s4 + $0x544] ss:$48 sps:$4 sm:$0xff]   ;;  %v19489_v25 = vld [vmem:[%s22569_s4 + $0x5a8] ss:$48 sps:$4 sm:$0xff]  }
0x23f7   : > { %8253 = vmatprep.subr.bf16.mxu1 %v19425_v31  ;;  %8171 = vmatprep.subr.bf16.mxu0 %v19434_v27  ;;  %v19480_v31 = vld [vmem:[%s22569_s4 + $0x540] ss:$48 sps:$4 sm:$0xff]   ;;  %v19497_v27 = vld [vmem:[%s22569_s4 + $0x60c] ss:$48 sps:$4 sm:$0xff]  }
0x23fa   : > { %8254 = vmatpush1.bf16.msra.mxu1 %v19423_v49  ;;  %8172 = vmatpush1.bf16.msra.mxu0 %v19432_v28  ;;  %v19488_v49 = vld [vmem:[%s22569_s4 + $0x5a4] ss:$48 sps:$4 sm:$0xff]  }
0x23fb   : > { %8255 = vmatprep.subr.bf16.mxu1 %v19431_v34  ;;  %8173 = vmatprep.subr.bf16.mxu0 %v19440_v2  ;;  %v19486_v34 = vld [vmem:[%s22569_s4 + $0x5a0] ss:$48 sps:$4 sm:$0xff]  }
0x23fe   : > { %8256 = vmatpush1.bf16.msra.mxu1 %v19429_v44  ;;  %8174 = vmatpush1.bf16.msra.mxu0 %v19438_v43  ;;  %v19494_v44 = vld [vmem:[%s22569_s4 + $0x604] ss:$48 sps:$4 sm:$0xff]  }
0x23ff   : > { %8257 = vmatprep.subr.bf16.mxu1 %v19437_v55  ;;  %8175 = vmatprep.subr.bf16.mxu0 %v19446_v47  ;;  %v5918_v55 = vpop.xlane.xlu1 %5917  ;;  %v23928_v47 = vld [vmem:[%s25072_s24] sm:$0x7] }
0x2400   : > { %v5923_v28 = vmul.f32 0.0026041667, %v5918_v55 }
0x2402   : > { %8258 = vmatpush1.bf16.msra.mxu1 %v19435_v35  ;;  %8176 = vmatpush1.bf16.msra.mxu0 %v19444_v20  ;;  %v5925_v35 = vadd.f32 1e-05, %v5923_v28 }
0x2403   : > { %8259 = vmatprep.subr.bf16.mxu1 %v19443_v46  ;;  %8177 = vmatprep.subr.bf16.mxu0 %v19452_v14 }
0x2404   : > { %20264 = vrsqrt.f32 %v5925_v35  ;;  %v5947_v35 = vrot.slane %v23928_v47, %v25068_v59 }
0x2406   : > { %8260 = vmatpush1.bf16.msra.mxu1 %v19441_v41  ;;  %8178 = vmatpush1.bf16.msra.mxu0 %v19450_v51 }
0x2407   : > { %8261 = vmatprep.subr.bf16.mxu1 %v19449_v15  ;;  %8179 = vmatprep.subr.bf16.mxu0 %v19458_v5  ;;  %v23932_v15 = vld [vmem:[%s25073_s27] sm:$0x7] }
0x240a   : > { %8262 = vmatpush1.bf16.msra.mxu1 %v19447_v26  ;;  %8180 = vmatpush1.bf16.msra.mxu0 %v19456_v19  ;;  %v5943_v26 = vrot.slane %v23928_v47, %v25067_v0 }
0x240b   : > { %8263 = vmatprep.subr.bf16.mxu1 %v19455_v58  ;;  %8181 = vmatprep.subr.bf16.mxu0 %v19464_v33  ;;  %v5939_v58 = vrot.slane %v23928_v47, %v25066_v30  ;;  %v19495_v33 = vld [vmem:[%s22569_s4 + $0x608] ss:$48 sps:$4 sm:$0xff]  }
0x240c   : > { %v19537_v47 = vld [vmem:[%s22569_s4 + $0x8a8] ss:$48 sps:$4 sm:$0xff]  }
0x240e   : > { %8264 = vmatpush1.bf16.msra.mxu1 %v19453_v4  ;;  %8182 = vmatpush1.bf16.msra.mxu0 %v19462_v56  ;;  %v23924_v41 = vpop.eup %20264  ;;  %v5965_v4 = vrot.slane %v23932_v15, %v25067_v0  ;;  %v19503_v56 = vld [vmem:[%s22569_s4 + $0x66c] ss:$48 sps:$4 sm:$0xff]  }
0x240f   : > { %8265 = vmatprep.subr.bf16.mxu1 %v19461_v50  ;;  %8183 = vmatprep.subr.bf16.mxu0 %v19470_v16  ;;  %v5930_v20 = vmul.f32 %v23924_v41, %v23806_v29  ;;  %v5929_v14 = vmul.f32 %v23924_v41, %v23803_v45  ;;  %v5961_v29 = vrot.slane %v23932_v15, %v25066_v30  ;;  %v19506_v16 = vld [vmem:[%s22569_s4 + $0x6c4] ss:$48 sps:$4 sm:$0xff]  }
0x2410   : > { %v5931_v28 = vmul.f32 %v23924_v41, %v23809_v24  ;;  %v5969_v24 = vrot.slane %v23932_v15, %v25068_v59  ;;  %v19534_v41 = vld [vmem:[%s22569_s4 + $0x8a0] ss:$48 sps:$4 sm:$0xff]  }
0x2411   : > { %v5952_v50 = vmul.f32 %v5943_v26, %v5930_v20  ;;  %v5951_v19 = vmul.f32 %v5939_v58, %v5929_v14  ;;  %v19539_v20 = vld [vmem:[%s22569_s4 + $0x8ac] ss:$48 sps:$4 sm:$0xff]  }
0x2412   : > { %8266 = vmatpush1.bf16.msra.mxu1 %v19459_v53  ;;  %8184 = vmatpush1.bf16.msra.mxu0 %v19468_v57  ;;  %v19509_v57 = vld [vmem:[%s22569_s4 + $0x6cc] ss:$48 sps:$4 sm:$0xff]  }
0x2413   : > { %8267 = vmatprep.subr.bf16.mxu1 %v19467_v54  ;;  %8185 = vmatprep.subr.bf16.mxu0 %v19476_v3  ;;  %v19500_v54 = vld [vmem:[%s22569_s4 + $0x664] ss:$48 sps:$4 sm:$0xff]  }
0x2414   : > { %v19512_v3 = vld [vmem:[%s22569_s4 + $0x724] ss:$48 sps:$4 sm:$0xff]  }
0x2416   : > { %8268 = vmatpush1.bf16.msra.mxu1 %v19465_v7  ;;  %8186 = vmatpush1.bf16.msra.mxu0 %v19474_v42  ;;  %v19501_v7 = vld [vmem:[%s22569_s4 + $0x668] ss:$48 sps:$4 sm:$0xff]   ;;  %v19510_v42 = vld [vmem:[%s22569_s4 + $0x720] ss:$48 sps:$4 sm:$0xff]  }
0x2417   : > { %8269 = vmatprep.subr.bf16.mxu1 %v19473_v22  ;;  %8187 = vmatprep.subr.bf16.mxu0 %v19482_v37  ;;  %v19507_v22 = vld [vmem:[%s22569_s4 + $0x6c8] ss:$48 sps:$4 sm:$0xff]   ;;  %v19518_v37 = vld [vmem:[%s22569_s4 + $0x784] ss:$48 sps:$4 sm:$0xff]  }
0x241a   : > { %8270 = vmatpush1.bf16.msra.mxu1 %v19471_v8  ;;  %8188 = vmatpush1.bf16.msra.mxu0 %v19480_v31  ;;  %v19504_v8 = vld [vmem:[%s22569_s4 + $0x6c0] ss:$48 sps:$4 sm:$0xff]  }
0x241b   : > { %8271 = vmatprep.subr.bf16.mxu1 %v19479_v6  ;;  %8189 = vmatprep.subr.bf16.mxu0 %v19488_v49  ;;  %v19515_v6 = vld [vmem:[%s22569_s4 + $0x72c] ss:$48 sps:$4 sm:$0xff]   ;;  %v19516_v31 = vld [vmem:[%s22569_s4 + $0x780] ss:$48 sps:$4 sm:$0xff]   ;;  %v19524_v49 = vld [vmem:[%s22569_s4 + $0x7e4] ss:$48 sps:$4 sm:$0xff]  }
0x241e   : > { %8272 = vmatpush1.bf16.msra.mxu1 %v19477_v18  ;;  %8190 = vmatpush1.bf16.msra.mxu0 %v19486_v34  ;;  %v19513_v18 = vld [vmem:[%s22569_s4 + $0x728] ss:$48 sps:$4 sm:$0xff]   ;;  %v19522_v34 = vld [vmem:[%s22569_s4 + $0x7e0] ss:$48 sps:$4 sm:$0xff]  }
0x241f   : > { %8273 = vmatprep.subr.bf16.mxu1 %v19485_v48  ;;  %8202 = vmatprep.subr.bf16.mxu0 %v19494_v44  ;;  %v19521_v48 = vld [vmem:[%s22569_s4 + $0x78c] ss:$48 sps:$4 sm:$0xff]   ;;  %v19530_v44 = vld [vmem:[%s22569_s4 + $0x844] ss:$48 sps:$4 sm:$0xff]  }
0x2422   : > { %8274 = vmatpush1.bf16.msra.mxu1 %v19483_v17  ;;  %v19519_v17 = vld [vmem:[%s22569_s4 + $0x788] ss:$48 sps:$4 sm:$0xff]  }
0x2423   : > { %8275 = vmatprep.subr.bf16.mxu1 %v19491_v21  ;;  %v19527_v21 = vld [vmem:[%s22569_s4 + $0x7ec] ss:$48 sps:$4 sm:$0xff]  }
0x2426   : > { %8276 = vmatpush1.bf16.msra.mxu1 %v19489_v25  ;;  %v19525_v25 = vld [vmem:[%s22569_s4 + $0x7e8] ss:$48 sps:$4 sm:$0xff]  }
0x2427   : > { %8288 = vmatprep.subr.bf16.mxu1 %v19497_v27  ;;  %v19533_v27 = vld [vmem:[%s22569_s4 + $0x84c] ss:$48 sps:$4 sm:$0xff]  }
0x247c   : > { %v5900_v61 = vpop.xlane.xlu0 %5899 }
0x247d   : > { %v5902_v62 = vmul.f32 0.0026041667, %v5900_v61 }
0x247f   : > { %v23888_v39 = vsub.f32 %v23833_v10, %v5902_v62  ;;  %v23891_v9 = vsub.f32 %v23836_v1, %v5902_v62  ;;  %v23894_v52 = vsub.f32 %v23838_v60, %v5902_v62  ;;  %v5974_v62 = vadd.f32 %v5965_v4, %v5952_v50  ;;  %v19548_v50 = vld [vmem:[%s22569_s4 + $0x74] ss:$48 sps:$4 sm:$0xff]  }
0x2481   : > { %v5912_v63 = vmul.f32 %v23888_v39, %v23888_v39  ;;  %v5913_v13 = vmul.f32 %v23891_v9, %v23891_v9  ;;  %v5914_v38 = vmul.f32 %v23894_v52, %v23894_v52 }
0x2483   : > { %v5919_v23 = vadd.f32 %v5913_v13, %v5912_v63  ;;  %v5973_v13 = vadd.f32 %v5961_v29, %v5951_v19  ;;  %v19546_v19 = vld [vmem:[%s22569_s4 + $0x70] ss:$48 sps:$4 sm:$0xff]  }
0x2485   : > { %v5920_v11 = vadd.f32 %v5919_v23, %v5914_v38 }
0x2487   : > { %5921 = vadd.xlane.f32.xlu0 %v5920_v11  ;;  %v19492_v11 = vld [vmem:[%s22569_s4 + $0x600] ss:$48 sps:$4 sm:$0xff]  }
0x2514   : > { %v5922_v2 = vpop.xlane.xlu0 %5921 }
0x2515   : > { %v5924_v46 = vmul.f32 0.0026041667, %v5922_v2  ;;  %v19528_v2 = vld [vmem:[%s22569_s4 + $0x840] ss:$48 sps:$4 sm:$0xff]  }
0x2517   : > { %v5926_v43 = vadd.f32 1e-05, %v5924_v46  ;;  %v19531_v46 = vld [vmem:[%s22569_s4 + $0x848] ss:$48 sps:$4 sm:$0xff]  }
0x2519   : > { %20266 = vrsqrt.f32 %v5926_v43  ;;  %v19536_v43 = vld [vmem:[%s22569_s4 + $0x8a4] ss:$48 sps:$4 sm:$0xff]  }
0x2523   : > { %v23942_v51 = vpop.eup %20266 }
0x2524   : > { %v5933_v5 = vmul.f32 %v23942_v51, %v23891_v9  ;;  %v5932_v45 = vmul.f32 %v23942_v51, %v23888_v39  ;;  %v19498_v39 = vld [vmem:[%s22569_s4 + $0x660] ss:$48 sps:$4 sm:$0xff]   ;;  %v5934_v55 = vmul.f32 %v23942_v51, %v23894_v52  ;;  %v19545_v51 = vld [vmem:[%s22569_s4 + $0x1c] ss:$48 sps:$4 sm:$0xff]  }
0x2526   : > { %v5955_v53 = vmul.f32 %v5943_v26, %v5933_v5  ;;  %v5954_v61 = vmul.f32 %v5939_v58, %v5932_v45  ;;  %v5956_v52 = vmul.f32 %v5947_v35, %v5934_v55  ;;  %v5953_v26 = vmul.f32 %v5947_v35, %v5931_v28  ;;  %v19542_v58 = vld [vmem:[%s22569_s4 + $0x14] ss:$48 sps:$4 sm:$0xff]   ;;  %v19543_v5 = vld [vmem:[%s22569_s4 + $0x18] ss:$48 sps:$4 sm:$0xff]   ;;  %v19551_v45 = vld [vmem:[%s22569_s4 + $0x7c] ss:$48 sps:$4 sm:$0xff]  }
0x2527   : > { %v19599_v55 = vld [vmem:[%s22569_s4 + $0x37c] ss:$48 sps:$4 sm:$0xff]   ;;  %v19594_v28 = vld [vmem:[%s22569_s4 + $0x370] ss:$48 sps:$4 sm:$0xff]   ;;  %v19597_v35 = vld [vmem:[%s22569_s4 + $0x378] ss:$48 sps:$4 sm:$0xff]  }
0x2528   : > { %v5977_v63 = vadd.f32 %v5965_v4, %v5955_v53  ;;  %v5976_v38 = vadd.f32 %v5961_v29, %v5954_v61  ;;  %v5978_v14 = vadd.f32 %v5969_v24, %v5956_v52  ;;  %v5975_v4 = vadd.f32 %v5969_v24, %v5953_v26  ;;  %v19540_v29 = vld [vmem:[%s22569_s4 + $0x10] ss:$48 sps:$4 sm:$0xff]   ;;  %v19549_v53 = vld [vmem:[%s22569_s4 + $0x78] ss:$48 sps:$4 sm:$0xff]   ;;  %v19554_v61 = vld [vmem:[%s22569_s4 + $0xd4] ss:$48 sps:$4 sm:$0xff]  }
0x2529   : > { %v19608_v52 = vld [vmem:[%s22569_s4 + $0x434] ss:$48 sps:$4 sm:$0xff]   ;;  %v19611_v26 = vld [vmem:[%s22569_s4 + $0x43c] ss:$48 sps:$4 sm:$0xff]   ;;  %v19606_v24 = vld [vmem:[%s22569_s4 + $0x430] ss:$48 sps:$4 sm:$0xff]  }
0x252a   : > { %v23952_v23 = vpack.c.bf16 %v5977_v63, %v5974_v62  ;;  %v23956_v9 = vpack.c.bf16 %v5976_v38, %v5973_v13  ;;  %v24003_v15 = vpack.c.bf16 %v5978_v14, %v5975_v4  ;;  %v19557_v62 = vld [vmem:[%s22569_s4 + $0xdc] ss:$48 sps:$4 sm:$0xff]   ;;  %v19552_v63 = vld [vmem:[%s22569_s4 + $0xd0] ss:$48 sps:$4 sm:$0xff]   ;;  %v19555_v13 = vld [vmem:[%s22569_s4 + $0xd8] ss:$48 sps:$4 sm:$0xff]  }
0x252b   : > { %v19560_v38 = vld [vmem:[%s22569_s4 + $0x134] ss:$48 sps:$4 sm:$0xff]   ;;  %v19617_v14 = vld [vmem:[%s22569_s4 + $0x49c] ss:$48 sps:$4 sm:$0xff]  }
0x252c   : > { %8191 = vmatprep.mubr.bf16.mxu0 %v23952_v23  ;;  %8277 = vmatprep.mubr.bf16.mxu1 %v23952_v23  ;;  %v19620_v4 = vld [vmem:[%s22569_s4 + $0x4f4] ss:$48 sps:$4 sm:$0xff]  }
0x252d   : > { %8192 = vmatmul.mubr.bf16.vlgmr.msra.gmra.mrb[104].mxu0 %v23956_v9  ;;  %8278 = vmatmul.mubr.bf16.vlgmr.msra.gmra.mrb[112].mxu1 %v23956_v9 }
0x252e   : > { %8203 = vmatpush1.bf16.msra.mxu0 %v19492_v11  ;;  %8289 = vmatpush1.bf16.msra.mxu1 %v19495_v33  ;;  %v19563_v11 = vld [vmem:[%s22569_s4 + $0x13c] ss:$48 sps:$4 sm:$0xff]   ;;  %v19558_v33 = vld [vmem:[%s22569_s4 + $0x130] ss:$48 sps:$4 sm:$0xff]  }
0x252f   : > { %8204 = vmatprep.subr.bf16.mxu0 %v19500_v54  ;;  %8290 = vmatprep.subr.bf16.mxu1 %v19503_v56  ;;  %v19561_v54 = vld [vmem:[%s22569_s4 + $0x138] ss:$48 sps:$4 sm:$0xff]   ;;  %v19566_v56 = vld [vmem:[%s22569_s4 + $0x194] ss:$48 sps:$4 sm:$0xff]  }
0x2530   : > { %8234 = vmatprep.mubr.bf16.mxu0 %v25009_v36  ;;  %8320 = vmatprep.mubr.bf16.mxu1 %v25009_v36 }
0x2532   : > { %8205 = vmatpush1.bf16.msra.mxu0 %v19498_v39  ;;  %8291 = vmatpush1.bf16.msra.mxu1 %v19501_v7  ;;  %v19569_v39 = vld [vmem:[%s22569_s4 + $0x19c] ss:$48 sps:$4 sm:$0xff]   ;;  %v19564_v7 = vld [vmem:[%s22569_s4 + $0x190] ss:$48 sps:$4 sm:$0xff]  }
0x2533   : > { %8206 = vmatprep.subr.bf16.mxu0 %v19506_v16  ;;  %8292 = vmatprep.subr.bf16.mxu1 %v19509_v57  ;;  %v19567_v16 = vld [vmem:[%s22569_s4 + $0x198] ss:$48 sps:$4 sm:$0xff]   ;;  %v19572_v57 = vld [vmem:[%s22569_s4 + $0x1f4] ss:$48 sps:$4 sm:$0xff]  }
0x2536   : > { %8207 = vmatpush1.bf16.msra.mxu0 %v19504_v8  ;;  %8293 = vmatpush1.bf16.msra.mxu1 %v19507_v22  ;;  %v19575_v8 = vld [vmem:[%s22569_s4 + $0x1fc] ss:$48 sps:$4 sm:$0xff]   ;;  %v19570_v22 = vld [vmem:[%s22569_s4 + $0x1f0] ss:$48 sps:$4 sm:$0xff]  }
0x2537   : > { %8208 = vmatprep.subr.bf16.mxu0 %v19512_v3  ;;  %8294 = vmatprep.subr.bf16.mxu1 %v19515_v6  ;;  %v19573_v3 = vld [vmem:[%s22569_s4 + $0x1f8] ss:$48 sps:$4 sm:$0xff]   ;;  %v19578_v6 = vld [vmem:[%s22569_s4 + $0x254] ss:$48 sps:$4 sm:$0xff]  }
0x253a   : > { %8209 = vmatpush1.bf16.msra.mxu0 %v19510_v42  ;;  %8295 = vmatpush1.bf16.msra.mxu1 %v19513_v18  ;;  %v19581_v42 = vld [vmem:[%s22569_s4 + $0x25c] ss:$48 sps:$4 sm:$0xff]   ;;  %v19576_v18 = vld [vmem:[%s22569_s4 + $0x250] ss:$48 sps:$4 sm:$0xff]  }
0x253b   : > { %8210 = vmatprep.subr.bf16.mxu0 %v19518_v37  ;;  %8296 = vmatprep.subr.bf16.mxu1 %v19521_v48  ;;  %v19579_v37 = vld [vmem:[%s22569_s4 + $0x258] ss:$48 sps:$4 sm:$0xff]   ;;  %v19584_v48 = vld [vmem:[%s22569_s4 + $0x2b4] ss:$48 sps:$4 sm:$0xff]  }
0x253e   : > { %8211 = vmatpush1.bf16.msra.mxu0 %v19516_v31  ;;  %8297 = vmatpush1.bf16.msra.mxu1 %v19519_v17  ;;  %v19587_v31 = vld [vmem:[%s22569_s4 + $0x2bc] ss:$48 sps:$4 sm:$0xff]   ;;  %v19582_v17 = vld [vmem:[%s22569_s4 + $0x2b0] ss:$48 sps:$4 sm:$0xff]  }
0x253f   : > { %8212 = vmatprep.subr.bf16.mxu0 %v19524_v49  ;;  %8298 = vmatprep.subr.bf16.mxu1 %v19527_v21  ;;  %v19585_v49 = vld [vmem:[%s22569_s4 + $0x2b8] ss:$48 sps:$4 sm:$0xff]   ;;  %v19590_v21 = vld [vmem:[%s22569_s4 + $0x314] ss:$48 sps:$4 sm:$0xff]  }
0x2542   : > { %8213 = vmatpush1.bf16.msra.mxu0 %v19522_v34  ;;  %8299 = vmatpush1.bf16.msra.mxu1 %v19525_v25  ;;  %v19593_v34 = vld [vmem:[%s22569_s4 + $0x31c] ss:$48 sps:$4 sm:$0xff]   ;;  %v19588_v25 = vld [vmem:[%s22569_s4 + $0x310] ss:$48 sps:$4 sm:$0xff]  }
0x2543   : > { %8214 = vmatprep.subr.bf16.mxu0 %v19530_v44  ;;  %8300 = vmatprep.subr.bf16.mxu1 %v19533_v27  ;;  %v19591_v44 = vld [vmem:[%s22569_s4 + $0x318] ss:$48 sps:$4 sm:$0xff]   ;;  %v19596_v27 = vld [vmem:[%s22569_s4 + $0x374] ss:$48 sps:$4 sm:$0xff]  }
0x2546   : > { %8215 = vmatpush1.bf16.msra.mxu0 %v19528_v2  ;;  %8301 = vmatpush1.bf16.msra.mxu1 %v19531_v46  ;;  %v19602_v2 = vld [vmem:[%s22569_s4 + $0x3d4] ss:$48 sps:$4 sm:$0xff]   ;;  %v19605_v46 = vld [vmem:[%s22569_s4 + $0x3dc] ss:$48 sps:$4 sm:$0xff]  }
0x2547   : > { %8216 = vmatprep.subr.bf16.mxu0 %v19536_v43  ;;  %8302 = vmatprep.subr.bf16.mxu1 %v19539_v20  ;;  %v19600_v43 = vld [vmem:[%s22569_s4 + $0x3d0] ss:$48 sps:$4 sm:$0xff]   ;;  %v19603_v20 = vld [vmem:[%s22569_s4 + $0x3d8] ss:$48 sps:$4 sm:$0xff]  }
0x254a   : > { %8217 = vmatpush1.bf16.msra.mxu0 %v19534_v41  ;;  %8303 = vmatpush1.bf16.msra.mxu1 %v19537_v47  ;;  %v19609_v41 = vld [vmem:[%s22569_s4 + $0x438] ss:$48 sps:$4 sm:$0xff]   ;;  %v19614_v47 = vld [vmem:[%s22569_s4 + $0x494] ss:$48 sps:$4 sm:$0xff]  }
0x254b   : > { %8331 = vmatprep.subr.bf16.mxu0 %v19542_v58  ;;  %8417 = vmatprep.subr.bf16.mxu1 %v19545_v51  ;;  %v19612_v58 = vld [vmem:[%s22569_s4 + $0x490] ss:$48 sps:$4 sm:$0xff]   ;;  %v19615_v51 = vld [vmem:[%s22569_s4 + $0x498] ss:$48 sps:$4 sm:$0xff]  }
0x254d   : > { %8235 = vmatmul.mubr.bf16.vlgmr.msra.gmra.mrb[104].mxu0 %v24003_v15  ;;  %8321 = vmatmul.mubr.bf16.vlgmr.msra.gmra.mrb[112].mxu1 %v24003_v15 }
0x254e   : > { %8332 = vmatpush1.bf16.msra.mxu0 %v19540_v29  ;;  %8363 = vmatprep.mubr.bf16.mxu0 %v23952_v23  ;;  %v19623_v29 = vld [vmem:[%s22569_s4 + $0x4fc] ss:$48 sps:$4 sm:$0xff]  }
0x254f   : > { %8418 = vmatpush1.bf16.msra.mxu1 %v19543_v5  ;;  %8449 = vmatprep.mubr.bf16.mxu1 %v23952_v23  ;;  %v19618_v5 = vld [vmem:[%s22569_s4 + $0x4f0] ss:$48 sps:$4 sm:$0xff]  }
0x2550   : > { %8333 = vmatprep.subr.bf16.mxu0 %v19548_v50  ;;  %8419 = vmatprep.subr.bf16.mxu1 %v19551_v45  ;;  %v19621_v50 = vld [vmem:[%s22569_s4 + $0x4f8] ss:$48 sps:$4 sm:$0xff]   ;;  %v19626_v45 = vld [vmem:[%s22569_s4 + $0x554] ss:$48 sps:$4 sm:$0xff]  }
0x2552   : > { %8334 = vmatpush1.bf16.msra.mxu0 %v19546_v19  ;;  %v19629_v19 = vld [vmem:[%s22569_s4 + $0x55c] ss:$48 sps:$4 sm:$0xff]  }
0x2553   : > { %8420 = vmatpush1.bf16.msra.mxu1 %v19549_v53  ;;  %8335 = vmatprep.subr.bf16.mxu0 %v19554_v61  ;;  %v19624_v53 = vld [vmem:[%s22569_s4 + $0x550] ss:$48 sps:$4 sm:$0xff]   ;;  %v19627_v61 = vld [vmem:[%s22569_s4 + $0x558] ss:$48 sps:$4 sm:$0xff]  }
0x2554   : > { %8421 = vmatprep.subr.bf16.mxu1 %v19557_v62  ;;  %v19632_v62 = vld [vmem:[%s22569_s4 + $0x5b4] ss:$48 sps:$4 sm:$0xff]  }
0x2556   : > { %8336 = vmatpush1.bf16.msra.mxu0 %v19552_v63  ;;  %v19635_v63 = vld [vmem:[%s22569_s4 + $0x5bc] ss:$48 sps:$4 sm:$0xff]  }
0x2557   : > { %8422 = vmatpush1.bf16.msra.mxu1 %v19555_v13  ;;  %8337 = vmatprep.subr.bf16.mxu0 %v19560_v38  ;;  %v19630_v13 = vld [vmem:[%s22569_s4 + $0x5b0] ss:$48 sps:$4 sm:$0xff]   ;;  %v19633_v38 = vld [vmem:[%s22569_s4 + $0x5b8] ss:$48 sps:$4 sm:$0xff]  }
0x2558   : > { %8423 = vmatprep.subr.bf16.mxu1 %v19563_v11  ;;  %v19638_v11 = vld [vmem:[%s22569_s4 + $0x614] ss:$48 sps:$4 sm:$0xff]  }
0x255a   : > { %8338 = vmatpush1.bf16.msra.mxu0 %v19558_v33  ;;  %v19641_v33 = vld [vmem:[%s22569_s4 + $0x61c] ss:$48 sps:$4 sm:$0xff]  }
0x255b   : > { %8424 = vmatpush1.bf16.msra.mxu1 %v19561_v54  ;;  %8339 = vmatprep.subr.bf16.mxu0 %v19566_v56  ;;  %v19636_v54 = vld [vmem:[%s22569_s4 + $0x610] ss:$48 sps:$4 sm:$0xff]   ;;  %v19639_v56 = vld [vmem:[%s22569_s4 + $0x618] ss:$48 sps:$4 sm:$0xff]  }
0x255c   : > { %8425 = vmatprep.subr.bf16.mxu1 %v19569_v39  ;;  %v19644_v39 = vld [vmem:[%s22569_s4 + $0x674] ss:$48 sps:$4 sm:$0xff]  }
0x255e   : > { %8340 = vmatpush1.bf16.msra.mxu0 %v19564_v7  ;;  %v19647_v7 = vld [vmem:[%s22569_s4 + $0x67c] ss:$48 sps:$4 sm:$0xff]  }
0x255f   : > { %8426 = vmatpush1.bf16.msra.mxu1 %v19567_v16  ;;  %8341 = vmatprep.subr.bf16.mxu0 %v19572_v57  ;;  %v19642_v16 = vld [vmem:[%s22569_s4 + $0x670] ss:$48 sps:$4 sm:$0xff]   ;;  %v19645_v57 = vld [vmem:[%s22569_s4 + $0x678] ss:$48 sps:$4 sm:$0xff]  }
0x2560   : > { %8427 = vmatprep.subr.bf16.mxu1 %v19575_v8  ;;  %v19650_v8 = vld [vmem:[%s22569_s4 + $0x6d4] ss:$48 sps:$4 sm:$0xff]  }
0x2562   : > { %8342 = vmatpush1.bf16.msra.mxu0 %v19570_v22  ;;  %v19653_v22 = vld [vmem:[%s22569_s4 + $0x6dc] ss:$48 sps:$4 sm:$0xff]  }
0x2563   : > { %8428 = vmatpush1.bf16.msra.mxu1 %v19573_v3  ;;  %8343 = vmatprep.subr.bf16.mxu0 %v19578_v6  ;;  %v19648_v3 = vld [vmem:[%s22569_s4 + $0x6d0] ss:$48 sps:$4 sm:$0xff]   ;;  %v19651_v6 = vld [vmem:[%s22569_s4 + $0x6d8] ss:$48 sps:$4 sm:$0xff]  }
0x2564   : > { %8429 = vmatprep.subr.bf16.mxu1 %v19581_v42  ;;  %v19656_v42 = vld [vmem:[%s22569_s4 + $0x734] ss:$48 sps:$4 sm:$0xff]  }
0x2566   : > { %8344 = vmatpush1.bf16.msra.mxu0 %v19576_v18  ;;  %v19659_v18 = vld [vmem:[%s22569_s4 + $0x73c] ss:$48 sps:$4 sm:$0xff]  }
0x2567   : > { %8430 = vmatpush1.bf16.msra.mxu1 %v19579_v37  ;;  %8345 = vmatprep.subr.bf16.mxu0 %v19584_v48  ;;  %v19654_v37 = vld [vmem:[%s22569_s4 + $0x730] ss:$48 sps:$4 sm:$0xff]   ;;  %v19657_v48 = vld [vmem:[%s22569_s4 + $0x738] ss:$48 sps:$4 sm:$0xff]  }
0x2568   : > { %8431 = vmatprep.subr.bf16.mxu1 %v19587_v31  ;;  %v19662_v31 = vld [vmem:[%s22569_s4 + $0x794] ss:$48 sps:$4 sm:$0xff]  }
0x256a   : > { %8346 = vmatpush1.bf16.msra.mxu0 %v19582_v17  ;;  %v19665_v17 = vld [vmem:[%s22569_s4 + $0x79c] ss:$48 sps:$4 sm:$0xff]  }
0x256b   : > { %8432 = vmatpush1.bf16.msra.mxu1 %v19585_v49  ;;  %8347 = vmatprep.subr.bf16.mxu0 %v19590_v21  ;;  %v19660_v49 = vld [vmem:[%s22569_s4 + $0x790] ss:$48 sps:$4 sm:$0xff]   ;;  %v19663_v21 = vld [vmem:[%s22569_s4 + $0x798] ss:$48 sps:$4 sm:$0xff]  }
0x256c   : > { %8433 = vmatprep.subr.bf16.mxu1 %v19593_v34  ;;  %v19668_v34 = vld [vmem:[%s22569_s4 + $0x7f4] ss:$48 sps:$4 sm:$0xff]  }
0x256e   : > { %8348 = vmatpush1.bf16.msra.mxu0 %v19588_v25  ;;  %v19671_v25 = vld [vmem:[%s22569_s4 + $0x7fc] ss:$48 sps:$4 sm:$0xff]  }
0x256f   : > { %8434 = vmatpush1.bf16.msra.mxu1 %v19591_v44  ;;  %8349 = vmatprep.subr.bf16.mxu0 %v19596_v27  ;;  %v19666_v44 = vld [vmem:[%s22569_s4 + $0x7f0] ss:$48 sps:$4 sm:$0xff]   ;;  %v19669_v27 = vld [vmem:[%s22569_s4 + $0x7f8] ss:$48 sps:$4 sm:$0xff]  }
0x2570   : > { %8435 = vmatprep.subr.bf16.mxu1 %v19599_v55  ;;  %v19674_v55 = vld [vmem:[%s22569_s4 + $0x854] ss:$48 sps:$4 sm:$0xff]  }
0x2572   : > { %8350 = vmatpush1.bf16.msra.mxu0 %v19594_v28  ;;  %v19677_v28 = vld [vmem:[%s22569_s4 + $0x85c] ss:$48 sps:$4 sm:$0xff]  }
0x2573   : > { %8436 = vmatpush1.bf16.msra.mxu1 %v19597_v35  ;;  %8351 = vmatprep.subr.bf16.mxu0 %v19602_v2  ;;  %v19672_v35 = vld [vmem:[%s22569_s4 + $0x850] ss:$48 sps:$4 sm:$0xff]   ;;  %v19675_v2 = vld [vmem:[%s22569_s4 + $0x858] ss:$48 sps:$4 sm:$0xff]  }
0x2574   : > { %8437 = vmatprep.subr.bf16.mxu1 %v19605_v46  ;;  %v19680_v46 = vld [vmem:[%s22569_s4 + $0x8b4] ss:$48 sps:$4 sm:$0xff]  }
0x2576   : > { %8352 = vmatpush1.bf16.msra.mxu0 %v19600_v43  ;;  %v19683_v43 = vld [vmem:[%s22569_s4 + $0x8bc] ss:$48 sps:$4 sm:$0xff]  }
0x2577   : > { %8438 = vmatpush1.bf16.msra.mxu1 %v19603_v20  ;;  %8353 = vmatprep.subr.bf16.mxu0 %v19608_v52  ;;  %v19678_v20 = vld [vmem:[%s22569_s4 + $0x8b0] ss:$48 sps:$4 sm:$0xff]   ;;  %v19681_v52 = vld [vmem:[%s22569_s4 + $0x8b8] ss:$48 sps:$4 sm:$0xff]  }
0x2578   : > { %8439 = vmatprep.subr.bf16.mxu1 %v19611_v26  ;;  %v19686_v26 = vld [vmem:[%s22569_s4 + $0x24] ss:$48 sps:$4 sm:$0xff]  }
0x257a   : > { %8354 = vmatpush1.bf16.msra.mxu0 %v19606_v24  ;;  %v19689_v24 = vld [vmem:[%s22569_s4 + $0x2c] ss:$48 sps:$4 sm:$0xff]  }
0x257b   : > { %8440 = vmatpush1.bf16.msra.mxu1 %v19609_v41  ;;  %8355 = vmatprep.subr.bf16.mxu0 %v19614_v47  ;;  %v19684_v41 = vld [vmem:[%s22569_s4 + $0x20] ss:$48 sps:$4 sm:$0xff]   ;;  %v19687_v47 = vld [vmem:[%s22569_s4 + $0x28] ss:$48 sps:$4 sm:$0xff]  }
0x257c   : > { %8441 = vmatprep.subr.bf16.mxu1 %v19617_v14  ;;  %v19692_v14 = vld [vmem:[%s22569_s4 + $0x84] ss:$48 sps:$4 sm:$0xff]  }
0x257e   : > { %8356 = vmatpush1.bf16.msra.mxu0 %v19612_v58  ;;  %v19695_v58 = vld [vmem:[%s22569_s4 + $0x8c] ss:$48 sps:$4 sm:$0xff]  }
0x257f   : > { %8442 = vmatpush1.bf16.msra.mxu1 %v19615_v51  ;;  %8357 = vmatprep.subr.bf16.mxu0 %v19620_v4  ;;  %v19690_v51 = vld [vmem:[%s22569_s4 + $0x80] ss:$48 sps:$4 sm:$0xff]   ;;  %v19693_v4 = vld [vmem:[%s22569_s4 + $0x88] ss:$48 sps:$4 sm:$0xff]  }
0x2580   : > { %8443 = vmatprep.subr.bf16.mxu1 %v19623_v29  ;;  %v19698_v29 = vld [vmem:[%s22569_s4 + $0xe4] ss:$48 sps:$4 sm:$0xff]  }
0x2582   : > { %8358 = vmatpush1.bf16.msra.mxu0 %v19618_v5  ;;  %v19701_v5 = vld [vmem:[%s22569_s4 + $0xec] ss:$48 sps:$4 sm:$0xff]  }
0x2583   : > { %8444 = vmatpush1.bf16.msra.mxu1 %v19621_v50  ;;  %8359 = vmatprep.subr.bf16.mxu0 %v19626_v45  ;;  %v19696_v50 = vld [vmem:[%s22569_s4 + $0xe0] ss:$48 sps:$4 sm:$0xff]   ;;  %v19699_v45 = vld [vmem:[%s22569_s4 + $0xe8] ss:$48 sps:$4 sm:$0xff]  }
0x2584   : > { %8445 = vmatprep.subr.bf16.mxu1 %v19629_v19  ;;  %v19704_v19 = vld [vmem:[%s22569_s4 + $0x144] ss:$48 sps:$4 sm:$0xff]  }
0x2586   : > { %8360 = vmatpush1.bf16.msra.mxu0 %v19624_v53  ;;  %v19707_v53 = vld [vmem:[%s22569_s4 + $0x14c] ss:$48 sps:$4 sm:$0xff]  }
0x2587   : > { %8446 = vmatpush1.bf16.msra.mxu1 %v19627_v61  ;;  %8361 = vmatprep.subr.bf16.mxu0 %v19632_v62  ;;  %v19705_v61 = vld [vmem:[%s22569_s4 + $0x148] ss:$48 sps:$4 sm:$0xff]   ;;  %v19710_v62 = vld [vmem:[%s22569_s4 + $0x1a4] ss:$48 sps:$4 sm:$0xff]  }
0x2588   : > { %8447 = vmatprep.subr.bf16.mxu1 %v19635_v63  ;;  %v19713_v63 = vld [vmem:[%s22569_s4 + $0x1ac] ss:$48 sps:$4 sm:$0xff]  }
0x258a   : > { %8362 = vmatpush1.bf16.msra.mxu0 %v19630_v13  ;;  %v19708_v13 = vld [vmem:[%s22569_s4 + $0x1a0] ss:$48 sps:$4 sm:$0xff]  }
0x258b   : > { %8448 = vmatpush1.bf16.msra.mxu1 %v19633_v38  ;;  %8374 = vmatprep.subr.bf16.mxu0 %v19638_v11  ;;  %v19711_v38 = vld [vmem:[%s22569_s4 + $0x1a8] ss:$48 sps:$4 sm:$0xff]   ;;  %v19716_v11 = vld [vmem:[%s22569_s4 + $0x204] ss:$48 sps:$4 sm:$0xff]  }
0x258c   : > { %8460 = vmatprep.subr.bf16.mxu1 %v19641_v33  ;;  %v19719_v33 = vld [vmem:[%s22569_s4 + $0x20c] ss:$48 sps:$4 sm:$0xff]  }
0x258d   : > { %8364 = vmatmul.mubr.bf16.vlgmr.msra.gmra.mrb[108].mxu0 %v23956_v9 }
0x258e   : > { %8450 = vmatmul.mubr.bf16.vlgmr.msra.gmra.mrb[116].mxu1 %v23956_v9  ;;  %8375 = vmatpush1.bf16.msra.mxu0 %v19636_v54  ;;  %v19714_v54 = vld [vmem:[%s22569_s4 + $0x200] ss:$48 sps:$4 sm:$0xff]  }
0x258f   : > { %8461 = vmatpush1.bf16.msra.mxu1 %v19639_v56  ;;  %8376 = vmatprep.subr.bf16.mxu0 %v19644_v39  ;;  %v19717_v56 = vld [vmem:[%s22569_s4 + $0x208] ss:$48 sps:$4 sm:$0xff]   ;;  %v19722_v39 = vld [vmem:[%s22569_s4 + $0x264] ss:$48 sps:$4 sm:$0xff]  }
0x2590   : > { %8462 = vmatprep.subr.bf16.mxu1 %v19647_v7  ;;  %8406 = vmatprep.mubr.bf16.mxu0 %v25009_v36  ;;  %v19725_v7 = vld [vmem:[%s22569_s4 + $0x26c] ss:$48 sps:$4 sm:$0xff]  }
0x2591   : > { %8492 = vmatprep.mubr.bf16.mxu1 %v25009_v36 }
0x2592   : > { %8377 = vmatpush1.bf16.msra.mxu0 %v19642_v16  ;;  %v19720_v16 = vld [vmem:[%s22569_s4 + $0x260] ss:$48 sps:$4 sm:$0xff]  }
0x2593   : > { %8463 = vmatpush1.bf16.msra.mxu1 %v19645_v57  ;;  %8378 = vmatprep.subr.bf16.mxu0 %v19650_v8  ;;  %v19723_v57 = vld [vmem:[%s22569_s4 + $0x268] ss:$48 sps:$4 sm:$0xff]   ;;  %v19728_v8 = vld [vmem:[%s22569_s4 + $0x2c4] ss:$48 sps:$4 sm:$0xff]  }
0x2594   : > { %8464 = vmatprep.subr.bf16.mxu1 %v19653_v22  ;;  %v19731_v22 = vld [vmem:[%s22569_s4 + $0x2cc] ss:$48 sps:$4 sm:$0xff]  }
0x2596   : > { %8379 = vmatpush1.bf16.msra.mxu0 %v19648_v3  ;;  %v19726_v3 = vld [vmem:[%s22569_s4 + $0x2c0] ss:$48 sps:$4 sm:$0xff]  }
0x2597   : > { %8465 = vmatpush1.bf16.msra.mxu1 %v19651_v6  ;;  %8380 = vmatprep.subr.bf16.mxu0 %v19656_v42  ;;  %v19729_v6 = vld [vmem:[%s22569_s4 + $0x2c8] ss:$48 sps:$4 sm:$0xff]   ;;  %v19734_v42 = vld [vmem:[%s22569_s4 + $0x324] ss:$48 sps:$4 sm:$0xff]  }
0x2598   : > { %8466 = vmatprep.subr.bf16.mxu1 %v19659_v18  ;;  %v19737_v18 = vld [vmem:[%s22569_s4 + $0x32c] ss:$48 sps:$4 sm:$0xff]  }
0x259a   : > { %8381 = vmatpush1.bf16.msra.mxu0 %v19654_v37  ;;  %v19732_v37 = vld [vmem:[%s22569_s4 + $0x320] ss:$48 sps:$4 sm:$0xff]  }
0x259b   : > { %8467 = vmatpush1.bf16.msra.mxu1 %v19657_v48  ;;  %8382 = vmatprep.subr.bf16.mxu0 %v19662_v31  ;;  %v19735_v48 = vld [vmem:[%s22569_s4 + $0x328] ss:$48 sps:$4 sm:$0xff]   ;;  %v19740_v31 = vld [vmem:[%s22569_s4 + $0x384] ss:$48 sps:$4 sm:$0xff]  }
0x259c   : > { %8468 = vmatprep.subr.bf16.mxu1 %v19665_v17  ;;  %v19743_v17 = vld [vmem:[%s22569_s4 + $0x38c] ss:$48 sps:$4 sm:$0xff]  }
0x259e   : > { %8383 = vmatpush1.bf16.msra.mxu0 %v19660_v49  ;;  %v19738_v49 = vld [vmem:[%s22569_s4 + $0x380] ss:$48 sps:$4 sm:$0xff]  }
0x259f   : > { %8469 = vmatpush1.bf16.msra.mxu1 %v19663_v21  ;;  %8384 = vmatprep.subr.bf16.mxu0 %v19668_v34  ;;  %v19741_v21 = vld [vmem:[%s22569_s4 + $0x388] ss:$48 sps:$4 sm:$0xff]   ;;  %v19746_v34 = vld [vmem:[%s22569_s4 + $0x3e4] ss:$48 sps:$4 sm:$0xff]  }
0x25a0   : > { %8470 = vmatprep.subr.bf16.mxu1 %v19671_v25  ;;  %v19749_v25 = vld [vmem:[%s22569_s4 + $0x3ec] ss:$48 sps:$4 sm:$0xff]  }
0x25a2   : > { %8385 = vmatpush1.bf16.msra.mxu0 %v19666_v44  ;;  %v19744_v44 = vld [vmem:[%s22569_s4 + $0x3e0] ss:$48 sps:$4 sm:$0xff]  }
0x25a3   : > { %8471 = vmatpush1.bf16.msra.mxu1 %v19669_v27  ;;  %8386 = vmatprep.subr.bf16.mxu0 %v19674_v55  ;;  %v19747_v27 = vld [vmem:[%s22569_s4 + $0x3e8] ss:$48 sps:$4 sm:$0xff]   ;;  %v19752_v55 = vld [vmem:[%s22569_s4 + $0x444] ss:$48 sps:$4 sm:$0xff]  }
0x25a4   : > { %8472 = vmatprep.subr.bf16.mxu1 %v19677_v28  ;;  %v19755_v28 = vld [vmem:[%s22569_s4 + $0x44c] ss:$48 sps:$4 sm:$0xff]  }
0x25a6   : > { %8387 = vmatpush1.bf16.msra.mxu0 %v19672_v35  ;;  %v19750_v35 = vld [vmem:[%s22569_s4 + $0x440] ss:$48 sps:$4 sm:$0xff]  }
0x25a7   : > { %8473 = vmatpush1.bf16.msra.mxu1 %v19675_v2  ;;  %8388 = vmatprep.subr.bf16.mxu0 %v19680_v46  ;;  %v19753_v2 = vld [vmem:[%s22569_s4 + $0x448] ss:$48 sps:$4 sm:$0xff]   ;;  %v19758_v46 = vld [vmem:[%s22569_s4 + $0x4a4] ss:$48 sps:$4 sm:$0xff]  }
0x25a8   : > { %8474 = vmatprep.subr.bf16.mxu1 %v19683_v43  ;;  %v19761_v43 = vld [vmem:[%s22569_s4 + $0x4ac] ss:$48 sps:$4 sm:$0xff]  }
0x25aa   : > { %8389 = vmatpush1.bf16.msra.mxu0 %v19678_v20  ;;  %v19756_v20 = vld [vmem:[%s22569_s4 + $0x4a0] ss:$48 sps:$4 sm:$0xff]  }
0x25ab   : > { %8475 = vmatpush1.bf16.msra.mxu1 %v19681_v52  ;;  %8503 = vmatprep.subr.bf16.mxu0 %v19686_v26  ;;  %v19759_v52 = vld [vmem:[%s22569_s4 + $0x4a8] ss:$48 sps:$4 sm:$0xff]   ;;  %v19764_v26 = vld [vmem:[%s22569_s4 + $0x504] ss:$48 sps:$4 sm:$0xff]  }
0x25ac   : > { %8589 = vmatprep.subr.bf16.mxu1 %v19689_v24  ;;  %v19767_v24 = vld [vmem:[%s22569_s4 + $0x50c] ss:$48 sps:$4 sm:$0xff]  }
0x25ad   : > { %8407 = vmatmul.mubr.bf16.vlgmr.msra.gmra.mrb[108].mxu0 %v24003_v15 }
0x25ae   : > { %8493 = vmatmul.mubr.bf16.vlgmr.msra.gmra.mrb[116].mxu1 %v24003_v15  ;;  %8504 = vmatpush1.bf16.msra.mxu0 %v19684_v41  ;;  %v19762_v41 = vld [vmem:[%s22569_s4 + $0x500] ss:$48 sps:$4 sm:$0xff]  }
0x25af   : > { %8535 = vmatprep.mubr.bf16.mxu0 %v23952_v23  ;;  %8590 = vmatpush1.bf16.msra.mxu1 %v19687_v47  ;;  %v19765_v47 = vld [vmem:[%s22569_s4 + $0x508] ss:$48 sps:$4 sm:$0xff]  }
0x25b0   : > { %8621 = vmatprep.mubr.bf16.mxu1 %v23952_v23  ;;  %8505 = vmatprep.subr.bf16.mxu0 %v19692_v14  ;;  %v19702_v23 = vld [vmem:[%s22569_s4 + $0x140] ss:$48 sps:$4 sm:$0xff]   ;;  %v19770_v14 = vld [vmem:[%s22569_s4 + $0x564] ss:$48 sps:$4 sm:$0xff]  }
0x25b1   : > { %8591 = vmatprep.subr.bf16.mxu1 %v19695_v58  ;;  %v19773_v58 = vld [vmem:[%s22569_s4 + $0x56c] ss:$48 sps:$4 sm:$0xff]  }
0x25b2   : > { %8506 = vmatpush1.bf16.msra.mxu0 %v19690_v51  ;;  %v19768_v51 = vld [vmem:[%s22569_s4 + $0x560] ss:$48 sps:$4 sm:$0xff]  }
0x25b3   : > { %8592 = vmatpush1.bf16.msra.mxu1 %v19693_v4  ;;  %8507 = vmatprep.subr.bf16.mxu0 %v19698_v29  ;;  %v19771_v4 = vld [vmem:[%s22569_s4 + $0x568] ss:$48 sps:$4 sm:$0xff]   ;;  %v19776_v29 = vld [vmem:[%s22569_s4 + $0x5c4] ss:$48 sps:$4 sm:$0xff]  }
0x25b4   : > { %8593 = vmatprep.subr.bf16.mxu1 %v19701_v5  ;;  %v19779_v5 = vld [vmem:[%s22569_s4 + $0x5cc] ss:$48 sps:$4 sm:$0xff]  }
0x25b6   : > { %8508 = vmatpush1.bf16.msra.mxu0 %v19696_v50  ;;  %v19774_v50 = vld [vmem:[%s22569_s4 + $0x5c0] ss:$48 sps:$4 sm:$0xff]  }
0x25b7   : > { %8594 = vmatpush1.bf16.msra.mxu1 %v19699_v45  ;;  %8509 = vmatprep.subr.bf16.mxu0 %v19704_v19  ;;  %v19777_v45 = vld [vmem:[%s22569_s4 + $0x5c8] ss:$48 sps:$4 sm:$0xff]   ;;  %v19782_v19 = vld [vmem:[%s22569_s4 + $0x624] ss:$48 sps:$4 sm:$0xff]  }
0x25b8   : > { %8595 = vmatprep.subr.bf16.mxu1 %v19707_v53  ;;  %v19785_v53 = vld [vmem:[%s22569_s4 + $0x62c] ss:$48 sps:$4 sm:$0xff]  }
0x25ba   : > { %8510 = vmatpush1.bf16.msra.mxu0 %v19702_v23  ;;  %v19780_v23 = vld [vmem:[%s22569_s4 + $0x620] ss:$48 sps:$4 sm:$0xff]  }
0x25bb   : > { %8596 = vmatpush1.bf16.msra.mxu1 %v19705_v61  ;;  %8511 = vmatprep.subr.bf16.mxu0 %v19710_v62  ;;  %v19783_v61 = vld [vmem:[%s22569_s4 + $0x628] ss:$48 sps:$4 sm:$0xff]   ;;  %v19788_v62 = vld [vmem:[%s22569_s4 + $0x684] ss:$48 sps:$4 sm:$0xff]  }
0x25bc   : > { %8597 = vmatprep.subr.bf16.mxu1 %v19713_v63  ;;  %v19791_v63 = vld [vmem:[%s22569_s4 + $0x68c] ss:$48 sps:$4 sm:$0xff]  }
0x25be   : > { %8512 = vmatpush1.bf16.msra.mxu0 %v19708_v13  ;;  %v19786_v13 = vld [vmem:[%s22569_s4 + $0x680] ss:$48 sps:$4 sm:$0xff]  }
0x25bf   : > { %8598 = vmatpush1.bf16.msra.mxu1 %v19711_v38  ;;  %8513 = vmatprep.subr.bf16.mxu0 %v19716_v11  ;;  %v19789_v38 = vld [vmem:[%s22569_s4 + $0x688] ss:$48 sps:$4 sm:$0xff]   ;;  %v19794_v11 = vld [vmem:[%s22569_s4 + $0x6e4] ss:$48 sps:$4 sm:$0xff]  }
0x25c0   : > { %8599 = vmatprep.subr.bf16.mxu1 %v19719_v33  ;;  %v19797_v33 = vld [vmem:[%s22569_s4 + $0x6ec] ss:$48 sps:$4 sm:$0xff]  }
0x25c2   : > { %8514 = vmatpush1.bf16.msra.mxu0 %v19714_v54  ;;  %v19795_v54 = vld [vmem:[%s22569_s4 + $0x6e8] ss:$48 sps:$4 sm:$0xff]  }
0x25c3   : > { %8600 = vmatpush1.bf16.msra.mxu1 %v19717_v56  ;;  %8515 = vmatprep.subr.bf16.mxu0 %v19722_v39  ;;  %v19800_v56 = vld [vmem:[%s22569_s4 + $0x744] ss:$48 sps:$4 sm:$0xff]   ;;  %v19803_v39 = vld [vmem:[%s22569_s4 + $0x74c] ss:$48 sps:$4 sm:$0xff]  }
0x25c4   : > { %8601 = vmatprep.subr.bf16.mxu1 %v19725_v7  ;;  %v19798_v7 = vld [vmem:[%s22569_s4 + $0x740] ss:$48 sps:$4 sm:$0xff]  }
0x25c6   : > { %8516 = vmatpush1.bf16.msra.mxu0 %v19720_v16  ;;  %v19801_v16 = vld [vmem:[%s22569_s4 + $0x748] ss:$48 sps:$4 sm:$0xff]  }
0x25c7   : > { %8602 = vmatpush1.bf16.msra.mxu1 %v19723_v57  ;;  %8517 = vmatprep.subr.bf16.mxu0 %v19728_v8  ;;  %v19809_v57 = vld [vmem:[%s22569_s4 + $0x7ac] ss:$48 sps:$4 sm:$0xff]   ;;  %v19804_v8 = vld [vmem:[%s22569_s4 + $0x7a0] ss:$48 sps:$4 sm:$0xff]  }
0x25c8   : > { %8603 = vmatprep.subr.bf16.mxu1 %v19731_v22  ;;  %v19807_v22 = vld [vmem:[%s22569_s4 + $0x7a8] ss:$48 sps:$4 sm:$0xff]  }
0x25ca   : > { %8518 = vmatpush1.bf16.msra.mxu0 %v19726_v3  ;;  %v19812_v3 = vld [vmem:[%s22569_s4 + $0x804] ss:$48 sps:$4 sm:$0xff]  }
0x25cb   : > { %8604 = vmatpush1.bf16.msra.mxu1 %v19729_v6  ;;  %8519 = vmatprep.subr.bf16.mxu0 %v19734_v42  ;;  %v19815_v6 = vld [vmem:[%s22569_s4 + $0x80c] ss:$48 sps:$4 sm:$0xff]   ;;  %v19810_v42 = vld [vmem:[%s22569_s4 + $0x800] ss:$48 sps:$4 sm:$0xff]  }
0x25cc   : > { %8605 = vmatprep.subr.bf16.mxu1 %v19737_v18  ;;  %v19813_v18 = vld [vmem:[%s22569_s4 + $0x808] ss:$48 sps:$4 sm:$0xff]  }
0x25ce   : > { %8520 = vmatpush1.bf16.msra.mxu0 %v19732_v37  ;;  %v19818_v37 = vld [vmem:[%s22569_s4 + $0x864] ss:$48 sps:$4 sm:$0xff]  }
0x25cf   : > { %8606 = vmatpush1.bf16.msra.mxu1 %v19735_v48  ;;  %8521 = vmatprep.subr.bf16.mxu0 %v19740_v31  ;;  %v19821_v48 = vld [vmem:[%s22569_s4 + $0x86c] ss:$48 sps:$4 sm:$0xff]   ;;  %v19816_v31 = vld [vmem:[%s22569_s4 + $0x860] ss:$48 sps:$4 sm:$0xff]  }
0x25d0   : > { %8607 = vmatprep.subr.bf16.mxu1 %v19743_v17  ;;  %v19819_v17 = vld [vmem:[%s22569_s4 + $0x868] ss:$48 sps:$4 sm:$0xff]  }
0x25d2   : > { %8522 = vmatpush1.bf16.msra.mxu0 %v19738_v49  ;;  %v19824_v49 = vld [vmem:[%s22569_s4 + $0x8c4] ss:$48 sps:$4 sm:$0xff]  }
0x25d3   : > { %8608 = vmatpush1.bf16.msra.mxu1 %v19741_v21  ;;  %8523 = vmatprep.subr.bf16.mxu0 %v19746_v34  ;;  %v19827_v21 = vld [vmem:[%s22569_s4 + $0x8cc] ss:$48 sps:$4 sm:$0xff]   ;;  %v19822_v34 = vld [vmem:[%s22569_s4 + $0x8c0] ss:$48 sps:$4 sm:$0xff]  }
0x25d4   : > { %8609 = vmatprep.subr.bf16.mxu1 %v19749_v25  ;;  %v19825_v25 = vld [vmem:[%s22569_s4 + $0x8c8] ss:$48 sps:$4 sm:$0xff]  }
0x25d6   : > { %8524 = vmatpush1.bf16.msra.mxu0 %v19744_v44  ;;  %v19830_v44 = vld [vmem:[%s22578_s6 + $0x4] ss:$12 sps:$4 sm:$0xff]  }
0x25d7   : > { %8610 = vmatpush1.bf16.msra.mxu1 %v19747_v27  ;;  %8525 = vmatprep.subr.bf16.mxu0 %v19752_v55  ;;  %v19831_v27 = vld [vmem:[%s22578_s6 + $0xc8] ss:$12 sps:$4 sm:$0xff]   ;;  %v19828_v55 = vld [vmem:[%s22578_s6] ss:$12 sps:$4 sm:$0xff]  }
0x25d8   : > { %8611 = vmatprep.subr.bf16.mxu1 %v19755_v28  ;;  %v19832_v28 = vld [vmem:[%s22578_s6 + $0x8] ss:$12 sps:$4 sm:$0xff]  }
0x25da   : > { %8526 = vmatpush1.bf16.msra.mxu0 %v19750_v35  ;;  %v19835_v35 = vld [vmem:[%s22578_s6 + $0x1c] ss:$12 sps:$4 sm:$0xff]  }
0x25db   : > { %8612 = vmatpush1.bf16.msra.mxu1 %v19753_v2  ;;  %8527 = vmatprep.subr.bf16.mxu0 %v19758_v46  ;;  %v19836_v2 = vld [vmem:[%s22578_s6 + $0xe0] ss:$12 sps:$4 sm:$0xff]   ;;  %v19833_v46 = vld [vmem:[%s22578_s6 + $0x18] ss:$12 sps:$4 sm:$0xff]  }
0x25dc   : > { %8613 = vmatprep.subr.bf16.mxu1 %v19761_v43  ;;  %v19837_v43 = vld [vmem:[%s22578_s6 + $0x20] ss:$12 sps:$4 sm:$0xff]  }
0x25de   : > { %8528 = vmatpush1.bf16.msra.mxu0 %v19756_v20  ;;  %v19840_v20 = vld [vmem:[%s22578_s6 + $0x34] ss:$12 sps:$4 sm:$0xff]  }
0x25df   : > { %8614 = vmatpush1.bf16.msra.mxu1 %v19759_v52  ;;  %8529 = vmatprep.subr.bf16.mxu0 %v19764_v26  ;;  %v19841_v52 = vld [vmem:[%s22578_s6 + $0xf8] ss:$12 sps:$4 sm:$0xff]   ;;  %v19838_v26 = vld [vmem:[%s22578_s6 + $0x30] ss:$12 sps:$4 sm:$0xff]  }
0x25e0   : > { %8615 = vmatprep.subr.bf16.mxu1 %v19767_v24  ;;  %v19845_v24 = vld [vmem:[%s22578_s6 + $0x4c] ss:$12 sps:$4 sm:$0xff]  }
0x25e2   : > { %8530 = vmatpush1.bf16.msra.mxu0 %v19762_v41  ;;  %v19846_v41 = vld [vmem:[%s22578_s6 + $0x110] ss:$12 sps:$4 sm:$0xff]  }
0x25e3   : > { %8616 = vmatpush1.bf16.msra.mxu1 %v19765_v47  ;;  %8531 = vmatprep.subr.bf16.mxu0 %v19770_v14  ;;  %v19843_v47 = vld [vmem:[%s22578_s6 + $0x48] ss:$12 sps:$4 sm:$0xff]   ;;  %v19847_v14 = vld [vmem:[%s22578_s6 + $0x50] ss:$12 sps:$4 sm:$0xff]  }
0x25e4   : > { %8617 = vmatprep.subr.bf16.mxu1 %v19773_v58  ;;  %v19850_v58 = vld [vmem:[%s22578_s6 + $0x64] ss:$12 sps:$4 sm:$0xff]  }
0x25e6   : > { %8532 = vmatpush1.bf16.msra.mxu0 %v19768_v51  ;;  %v19851_v51 = vld [vmem:[%s22578_s6 + $0x128] ss:$12 sps:$4 sm:$0xff]  }
0x25e7   : > { %8618 = vmatpush1.bf16.msra.mxu1 %v19771_v4  ;;  %8533 = vmatprep.subr.bf16.mxu0 %v19776_v29  ;;  %v19848_v4 = vld [vmem:[%s22578_s6 + $0x60] ss:$12 sps:$4 sm:$0xff]  }
0x25e8   : > { %8619 = vmatprep.subr.bf16.mxu1 %v19779_v5  ;;  %v24232_v29 = vld [vmem:[%s22576_s14] sm:$0xff] }
0x25e9   : > { %v25074_v5 = vld [vmem:[#allocation52_spill] sm:$0xff] }
0x25ea   : > { %8534 = vmatpush1.bf16.msra.mxu0 %v19774_v50  ;;  %v24235_v50 = vsub.s32 3, %v25074_v5 }
0x25eb   : > { %8620 = vmatpush1.bf16.msra.mxu1 %v19777_v45  ;;  %8546 = vmatprep.subr.bf16.mxu0 %v19782_v19  ;;  %v19852_v45 = vld [vmem:[%s22578_s6 + $0x68] ss:$12 sps:$4 sm:$0xff]  }
0x25ec   : > { %8632 = vmatprep.subr.bf16.mxu1 %v19785_v53  ;;  %v19855_v19 = vld [vmem:[%s22578_s6 + $0x7c] ss:$12 sps:$4 sm:$0xff]   ;;  %v19856_v53 = vld [vmem:[%s22578_s6 + $0x140] ss:$12 sps:$4 sm:$0xff]  }
0x25ed   : > { %8536 = vmatmul.mubr.bf16.vlgmr.msra.gmra.mrb[112].mxu0 %v23956_v9 }
0x25ee   : > { %8622 = vmatmul.mubr.bf16.vlgmr.msra.gmra.mrb[120].mxu1 %v23956_v9  ;;  %8547 = vmatpush1.bf16.msra.mxu0 %v19780_v23  ;;  %v19792_v9 = vld [vmem:[%s22569_s4 + $0x6e0] ss:$48 sps:$4 sm:$0xff]   ;;  %v6662_v23 = vrot.slane %v24232_v29, %v25066_v30 }
0x25ef   : > { %8633 = vmatpush1.bf16.msra.mxu1 %v19783_v61  ;;  %8548 = vmatprep.subr.bf16.mxu0 %v19788_v62  ;;  %v6670_v61 = vrot.slane %v24232_v29, %v25068_v59  ;;  %v6666_v62 = vrot.slane %v24232_v29, %v25067_v0 }
0x25f0   : > { %8634 = vmatprep.subr.bf16.mxu1 %v19791_v63  ;;  %8578 = vmatprep.mubr.bf16.mxu0 %v25009_v36  ;;  %v6674_v63 = vrot.slane %v24232_v29, %v24235_v50 }
0x25f1   : > { %8664 = vmatprep.mubr.bf16.mxu1 %v25009_v36  ;;  %v19806_v36 = vld [vmem:[%s22569_s4 + $0x7a4] ss:$48 sps:$4 sm:$0xff]  }
0x25f2   : > { %8549 = vmatpush1.bf16.msra.mxu0 %v19786_v13  ;;  %v19853_v13 = vld [vmem:[%s22578_s6 + $0x78] ss:$12 sps:$4 sm:$0xff]  }
0x25f3   : > { %8635 = vmatpush1.bf16.msra.mxu1 %v19789_v38  ;;  %8550 = vmatprep.subr.bf16.mxu0 %v19794_v11  ;;  %v19857_v38 = vld [vmem:[%s22578_s6 + $0x80] ss:$12 sps:$4 sm:$0xff]  }
0x25f4   : > { %8636 = vmatprep.subr.bf16.mxu1 %v19797_v33  ;;  %v19860_v11 = vld [vmem:[%s22578_s6 + $0x94] ss:$12 sps:$4 sm:$0xff]  }
0x25f6   : > { %8551 = vmatpush1.bf16.msra.mxu0 %v19792_v9 }
0x25f7   : > { %8637 = vmatpush1.bf16.msra.mxu1 %v19795_v54  ;;  %8552 = vmatprep.subr.bf16.mxu0 %v19800_v56  ;;  %v19861_v54 = vld [vmem:[%s22578_s6 + $0x158] ss:$12 sps:$4 sm:$0xff]  }
0x25f8   : > { %8638 = vmatprep.subr.bf16.mxu1 %v19803_v39 }
0x25fa   : > { %8553 = vmatpush1.bf16.msra.mxu0 %v19798_v7 }
0x25fb   : > { %8639 = vmatpush1.bf16.msra.mxu1 %v19801_v16  ;;  %8554 = vmatprep.subr.bf16.mxu0 %v19806_v36 }
0x25fc   : > { %8640 = vmatprep.subr.bf16.mxu1 %v19809_v57 }
0x25fe   : > { %8555 = vmatpush1.bf16.msra.mxu0 %v19804_v8 }
0x25ff   : > { %8641 = vmatpush1.bf16.msra.mxu1 %v19807_v22  ;;  %8556 = vmatprep.subr.bf16.mxu0 %v19812_v3  ;;  %v19858_v3 = vld [vmem:[%s22578_s6 + $0x90] ss:$12 sps:$4 sm:$0xff]  }
0x2600   : > { %8642 = vmatprep.subr.bf16.mxu1 %v19815_v6 }
0x2602   : > { %8557 = vmatpush1.bf16.msra.mxu0 %v19810_v42 }
0x2603   : > { %8643 = vmatpush1.bf16.msra.mxu1 %v19813_v18  ;;  %8558 = vmatprep.subr.bf16.mxu0 %v19818_v37 }
0x2604   : > { %8644 = vmatprep.subr.bf16.mxu1 %v19821_v48  ;;  %v19862_v48 = vld [vmem:[%s22578_s6 + $0x98] ss:$12 sps:$4 sm:$0xff]  }
0x2606   : > { %8559 = vmatpush1.bf16.msra.mxu0 %v19816_v31  ;;  %v19865_v31 = vld [vmem:[%s22578_s6 + $0xac] ss:$12 sps:$4 sm:$0xff]  }
0x2607   : > { %8645 = vmatpush1.bf16.msra.mxu1 %v19819_v17  ;;  %8560 = vmatprep.subr.bf16.mxu0 %v19824_v49 }
0x2608   : > { %8646 = vmatprep.subr.bf16.mxu1 %v19827_v21  ;;  %v19866_v21 = vld [vmem:[%s22578_s6 + $0x170] ss:$12 sps:$4 sm:$0xff]  }
0x260a   : > { %8561 = vmatpush1.bf16.msra.mxu0 %v19822_v34 }
0x260b   : > { %8647 = vmatpush1.bf16.msra.mxu1 %v19825_v25  ;;  %10263 = vmatprep.subr.bf16.mxu0 %v19830_v44 }
0x260c   : > { %17984 = vmatprep.subr.bf16.mxu1 %v19831_v27 }
0x260d   : > { %8579 = vmatmul.mubr.bf16.vlgmr.msra.gmra.mrb[112].mxu0 %v24003_v15 }
0x260e   : > { %8665 = vmatmul.mubr.bf16.vlgmr.msra.gmra.mrb[120].mxu1 %v24003_v15  ;;  %10264 = vmatpush1.bf16.msra.mxu0 %v19828_v55  ;;  %v19842_v15 = vld [vmem:[%s22578_s6 + $0x38] ss:$12 sps:$4 sm:$0xff]  }
0x260f   : > { %17985 = vmatpush3.bf16.msra.mxu1 %v19832_v28  ;;  %10265 = vmatprep.subr.bf16.mxu0 %v19835_v35 }
0x2610   : > { %17986 = vmatprep.subr.bf16.mxu1 %v19836_v2 }
0x2612   : > { %10266 = vmatpush1.bf16.msra.mxu0 %v19833_v46  ;;  %v19863_v46 = vld [vmem:[%s22578_s6 + $0xa8] ss:$12 sps:$4 sm:$0xff]  }
0x2613   : > { %17987 = vmatpush3.bf16.msra.mxu1 %v19837_v43  ;;  %10267 = vmatprep.subr.bf16.mxu0 %v19840_v20 }
0x2614   : > { %17988 = vmatprep.subr.bf16.mxu1 %v19841_v52  ;;  %v19867_v52 = vld [vmem:[%s22578_s6 + $0xb0] ss:$12 sps:$4 sm:$0xff]  }
0x2616   : > { %10268 = vmatpush1.bf16.msra.mxu0 %v19838_v26 }
0x2617   : > { %17989 = vmatpush3.bf16.msra.mxu1 %v19842_v15  ;;  %10269 = vmatprep.subr.bf16.mxu0 %v19845_v24  ;;  %v19870_v24 = vld [vmem:[%s22578_s6 + $0xc4] ss:$12 sps:$4 sm:$0xff]  }
0x2618   : > { %17990 = vmatprep.subr.bf16.mxu1 %v19846_v41  ;;  %v19871_v41 = vld [vmem:[%s22578_s6 + $0x248] ss:$12 sps:$4 sm:$0xff]  }
0x261a   : > { %10270 = vmatpush1.bf16.msra.mxu0 %v19843_v47  ;;  %v19868_v47 = vld [vmem:[%s22578_s6 + $0xc0] ss:$12 sps:$4 sm:$0xff]  }
0x261b   : > { %17991 = vmatpush3.bf16.msra.mxu1 %v19847_v14  ;;  %10271 = vmatprep.subr.bf16.mxu0 %v19850_v58  ;;  %v19872_v14 = vld [vmem:[%s22578_s6 + $0x188] ss:$12 sps:$4 sm:$0xff]  }
0x261c   : > { %17992 = vmatprep.subr.bf16.mxu1 %v19851_v51  ;;  %v19875_v58 = vld [vmem:[%s22578_s6 + $0xdc] ss:$12 sps:$4 sm:$0xff]   ;;  %v19876_v51 = vld [vmem:[%s22578_s6 + $0x260] ss:$12 sps:$4 sm:$0xff]  }
0x261e   : > { %10272 = vmatpush1.bf16.msra.mxu0 %v19848_v4  ;;  %v19873_v4 = vld [vmem:[%s22578_s6 + $0xd8] ss:$12 sps:$4 sm:$0xff]  }
0x261f   : > { %17993 = vmatpush3.bf16.msra.mxu1 %v19852_v45  ;;  %10273 = vmatprep.subr.bf16.mxu0 %v19855_v19  ;;  %v19877_v45 = vld [vmem:[%s22578_s6 + $0x1a0] ss:$12 sps:$4 sm:$0xff]  }
0x2620   : > { %v8236_v33 = vpop.f32.mrb[104].mxu0  ;;  %v8322_v9 = vpop.f32.mrb[112].mxu1  ;;  %17994 = vmatprep.subr.bf16.mxu1 %v19856_v53  ;;  %v19880_v19 = vld [vmem:[%s22578_s6 + $0xf4] ss:$12 sps:$4 sm:$0xff]   ;;  %v19881_v53 = vld [vmem:[%s22578_s6 + $0x278] ss:$12 sps:$4 sm:$0xff]  }
0x2621   : > { %v18607_v56 = vadd.f32 %v8236_v33, %v6662_v23  ;;  %v18611_v39 = vadd.f32 %v8322_v9, %v6670_v61  ;;  %v8238_v7 = vpop.f32.mrb[105].mxu0  ;;  %v8324_v16 = vpop.f32.mrb[113].mxu1  ;;  %v19891_v33 = vld [vmem:[%s22578_s6 + $0x2a8] ss:$12 sps:$4 sm:$0xff]   ;;  %v19888_v9 = vld [vmem:[%s22578_s6 + $0x120] ss:$12 sps:$4 sm:$0xff]  }
0x2622   : > { %v18608_v36 = vadd.f32 %v8238_v7, %v6666_v62  ;;  %v18612_v57 = vadd.f32 %v8324_v16, %v6674_v63  ;;  %v8240_v8 = vpop.f32.mrb[106].mxu0  ;;  %v8326_v22 = vpop.f32.mrb[114].mxu1  ;;  %10274 = vmatpush1.bf16.msra.mxu0 %v19853_v13  ;;  %v19883_v13 = vld [vmem:[%s22578_s6 + $0x108] ss:$12 sps:$4 sm:$0xff]   ;;  %v19893_v7 = vld [vmem:[%s22578_s6 + $0x138] ss:$12 sps:$4 sm:$0xff]  }
0x2623   : > { %v18609_v6 = vadd.f32 %v8240_v8, %v6662_v23  ;;  %v18613_v42 = vadd.f32 %v8326_v22, %v6670_v61  ;;  %17995 = vmatpush3.bf16.msra.mxu1 %v19857_v38  ;;  %v8242_v18 = vpop.f32.mrb[107].mxu0  ;;  %v8328_v37 = vpop.f32.mrb[115].mxu1  ;;  %10275 = vmatprep.subr.bf16.mxu0 %v19860_v11  ;;  %v8675_v34 = vmax.f32 %v18607_v56, 0.0  ;;  %v8677_v25 = vmax.f32 %v18611_v39, 0.0  ;;  %v19878_v23 = vld [vmem:[%s22578_s6 + $0xf0] ss:$12 sps:$4 sm:$0xff]  }
0x2624   : > { %v18610_v17 = vadd.f32 %v8242_v18, %v6666_v62  ;;  %v18614_v49 = vadd.f32 %v8328_v37, %v6674_v63  ;;  %17996 = vmatprep.subr.bf16.mxu1 %v19861_v54  ;;  %v8676_v55 = vmax.f32 %v18608_v36, 0.0  ;;  %v8678_v28 = vmax.f32 %v18612_v57, 0.0  ;;  %v19882_v61 = vld [vmem:[%s22578_s6 + $0x1b8] ss:$12 sps:$4 sm:$0xff]   ;;  %v19886_v63 = vld [vmem:[%s22578_s6 + $0x290] ss:$12 sps:$4 sm:$0xff]  }
0x2625   : > { %v8687_v44 = vmax.f32 %v18609_v6, 0.0  ;;  %v8689_v27 = vmax.f32 %v18613_v42, 0.0  ;;  %v19885_v62 = vld [vmem:[%s22578_s6 + $0x10c] ss:$12 sps:$4 sm:$0xff]   ;;  %v19887_v38 = vld [vmem:[%s22578_s6 + $0x1d0] ss:$12 sps:$4 sm:$0xff]  }
0x2626   : > { %v8688_v35 = vmax.f32 %v18610_v17, 0.0  ;;  %v8690_v2 = vmax.f32 %v18614_v49, 0.0  ;;  %10276 = vmatpush1.bf16.msra.mxu0 %v19858_v3  ;;  %v19890_v11 = vld [vmem:[%s22578_s6 + $0x124] ss:$12 sps:$4 sm:$0xff]   ;;  %v19892_v54 = vld [vmem:[%s22578_s6 + $0x1e8] ss:$12 sps:$4 sm:$0xff]  }
0x2627   : > { %v24257_v43 = vpack.c.bf16 %v8687_v44, %v8675_v34  ;;  %v24259_v20 = vpack.c.bf16 %v8689_v27, %v8677_v25  ;;  %17997 = vmatpush3.bf16.msra.mxu1 %v19862_v48  ;;  %10277 = vmatprep.subr.bf16.mxu0 %v19865_v31  ;;  %v19895_v56 = vld [vmem:[%s22578_s6 + $0x13c] ss:$12 sps:$4 sm:$0xff]   ;;  %v19896_v39 = vld [vmem:[%s22578_s6 + $0x2c0] ss:$12 sps:$4 sm:$0xff]   ;;  %v19901_v57 = vld [vmem:[%s22578_s6 + $0x2d8] ss:$12 sps:$4 sm:$0xff]  }
0x2628   : > { %v8700_v26 = vpack.c.bf16 %v8688_v35, %v8676_v55  ;;  %v24262_v15 = vpack.c.bf16 %v8690_v2, %v8678_v28  ;;  %17998 = vmatprep.subr.bf16.mxu1 %v19866_v21  ;;  %v19897_v16 = vld [vmem:[%s22578_s6 + $0x200] ss:$12 sps:$4 sm:$0xff]   ;;  %v19898_v8 = vld [vmem:[%s22578_s6 + $0x150] ss:$12 sps:$4 sm:$0xff]   ;;  %v19902_v22 = vld [vmem:[%s22578_s6 + $0x218] ss:$12 sps:$4 sm:$0xff]  }
0x2629   : > { %v19900_v36 = vld [vmem:[%s22578_s6 + $0x154] ss:$12 sps:$4 sm:$0xff]   ;;  %v19905_v3 = vld [vmem:[%s22578_s6 + $0x16c] ss:$12 sps:$4 sm:$0xff]   ;;  %v19906_v6 = vld [vmem:[%s22578_s6 + $0x2f0] ss:$12 sps:$4 sm:$0xff]  }
0x262a   : > { %10278 = vmatpush1.bf16.msra.mxu0 %v19863_v46  ;;  %10295 = vmatprep.mubr.bf16.mxu0 %v8700_v26  ;;  %v19903_v42 = vld [vmem:[%s22578_s6 + $0x168] ss:$12 sps:$4 sm:$0xff]   ;;  %v19907_v18 = vld [vmem:[%s22578_s6 + $0x230] ss:$12 sps:$4 sm:$0xff]   ;;  %v19908_v31 = vld [vmem:[%s22578_s6 + $0x180] ss:$12 sps:$4 sm:$0xff]  }
0x262b   : > { %17999 = vmatpush3.bf16.msra.mxu1 %v19867_v52  ;;  %10553 = vmatprep.mubr.bf16.mxu1 %v8700_v26  ;;  %v19910_v37 = vld [vmem:[%s22578_s6 + $0x184] ss:$12 sps:$4 sm:$0xff]   ;;  %v19932_v48 = vld [vmem:[%s22578_s6 + $0x3c8] ss:$12 sps:$4 sm:$0xff]   ;;  %v19937_v21 = vld [vmem:[%s22578_s6 + $0x3e0] ss:$12 sps:$4 sm:$0xff]  }
0x262c   : > { %10279 = vmatprep.subr.bf16.mxu0 %v19870_v24  ;;  %18006 = vmatprep.subr.bf16.mxu1 %v19871_v41  ;;  %v19913_v17 = vld [vmem:[%s22578_s6 + $0x19c] ss:$12 sps:$4 sm:$0xff]   ;;  %v19911_v34 = vld [vmem:[%s22578_s6 + $0x198] ss:$12 sps:$4 sm:$0xff]   ;;  %v19916_v25 = vld [vmem:[%s22578_s6 + $0x1b4] ss:$12 sps:$4 sm:$0xff]  }
0x262d   : > { %v19933_v49 = vld [vmem:[%s22578_s6 + $0x308] ss:$12 sps:$4 sm:$0xff]   ;;  %v19938_v44 = vld [vmem:[%s22578_s6 + $0x320] ss:$12 sps:$4 sm:$0xff]   ;;  %v19942_v27 = vld [vmem:[%s22578_s6 + $0x3f8] ss:$12 sps:$4 sm:$0xff]  }
0x262e   : > { %10554 = vmatmul.mubr.bf16.vlgmr.msra.gmra.mrb[124].mxu1 %v24257_v43  ;;  %10280 = vmatpush1.bf16.msra.mxu0 %v19868_v47  ;;  %v19914_v55 = vld [vmem:[%s22578_s6 + $0x1b0] ss:$12 sps:$4 sm:$0xff]   ;;  %v19919_v28 = vld [vmem:[%s22578_s6 + $0x1cc] ss:$12 sps:$4 sm:$0xff]   ;;  %v19917_v46 = vld [vmem:[%s22578_s6 + $0x1c8] ss:$12 sps:$4 sm:$0xff]  }
0x262f   : > { %18007 = vmatpush3.bf16.msra.mxu1 %v19872_v14  ;;  %10594 = vmatprep.mubr.bf16.mxu1 %v24262_v15  ;;  %v19943_v35 = vld [vmem:[%s22578_s6 + $0x338] ss:$12 sps:$4 sm:$0xff]   ;;  %v19947_v2 = vld [vmem:[%s22578_s6 + $0x410] ss:$12 sps:$4 sm:$0xff]   ;;  %v19952_v26 = vld [vmem:[%s22578_s6 + $0x428] ss:$12 sps:$4 sm:$0xff]  }
0x2630   : > { %10281 = vmatprep.subr.bf16.mxu0 %v19875_v58  ;;  %18008 = vmatprep.subr.bf16.mxu1 %v19876_v51  ;;  %v19948_v52 = vld [vmem:[%s22578_s6 + $0x350] ss:$12 sps:$4 sm:$0xff]   ;;  %v19953_v41 = vld [vmem:[%s22578_s6 + $0x368] ss:$12 sps:$4 sm:$0xff]   ;;  %v19957_v47 = vld [vmem:[%s22578_s6 + $0x440] ss:$12 sps:$4 sm:$0xff]  }
0x2631   : > { %v19925_v24 = vld [vmem:[%s22578_s6 + $0x1fc] ss:$12 sps:$4 sm:$0xff]   ;;  %v19923_v14 = vld [vmem:[%s22578_s6 + $0x1f8] ss:$12 sps:$4 sm:$0xff]   ;;  %v19928_v58 = vld [vmem:[%s22578_s6 + $0x214] ss:$12 sps:$4 sm:$0xff]  }
0x2632   : > { %10282 = vmatpush1.bf16.msra.mxu0 %v19873_v4  ;;  %v19958_v51 = vld [vmem:[%s22578_s6 + $0x380] ss:$12 sps:$4 sm:$0xff]   ;;  %v19962_v4 = vld [vmem:[%s22578_s6 + $0x458] ss:$12 sps:$4 sm:$0xff]  }
0x2633   : > { %18009 = vmatpush3.bf16.msra.mxu1 %v19877_v45  ;;  %10283 = vmatprep.subr.bf16.mxu0 %v19880_v19  ;;  %v19926_v45 = vld [vmem:[%s22578_s6 + $0x210] ss:$12 sps:$4 sm:$0xff]   ;;  %v19931_v19 = vld [vmem:[%s22578_s6 + $0x22c] ss:$12 sps:$4 sm:$0xff]  }
0x2634   : > { %18010 = vmatprep.subr.bf16.mxu1 %v19881_v53  ;;  %v19963_v53 = vld [vmem:[%s22578_s6 + $0x398] ss:$12 sps:$4 sm:$0xff]  }
0x2636   : > { %10284 = vmatpush1.bf16.msra.mxu0 %v19878_v23  ;;  %v19967_v23 = vld [vmem:[%s22578_s6 + $0x470] ss:$12 sps:$4 sm:$0xff]  }
0x2637   : > { %18011 = vmatpush3.bf16.msra.mxu1 %v19882_v61  ;;  %10285 = vmatprep.subr.bf16.mxu0 %v19885_v62  ;;  %v19929_v61 = vld [vmem:[%s22578_s6 + $0x228] ss:$12 sps:$4 sm:$0xff]   ;;  %v19936_v62 = vld [vmem:[%s22578_s6 + $0x244] ss:$12 sps:$4 sm:$0xff]  }
0x2638   : > { %18012 = vmatprep.subr.bf16.mxu1 %v19886_v63  ;;  %v19968_v63 = vld [vmem:[%s22578_s6 + $0x3b0] ss:$12 sps:$4 sm:$0xff]  }
0x263a   : > { %10286 = vmatpush1.bf16.msra.mxu0 %v19883_v13  ;;  %v19972_v13 = vld [vmem:[%s22578_s6 + $0x548] ss:$12 sps:$4 sm:$0xff]  }
0x263b   : > { %18013 = vmatpush3.bf16.msra.mxu1 %v19887_v38  ;;  %10287 = vmatprep.subr.bf16.mxu0 %v19890_v11  ;;  %v19934_v38 = vld [vmem:[%s22578_s6 + $0x240] ss:$12 sps:$4 sm:$0xff]   ;;  %v19941_v11 = vld [vmem:[%s22578_s6 + $0x25c] ss:$12 sps:$4 sm:$0xff]  }
0x263c   : > { %18014 = vmatprep.subr.bf16.mxu1 %v19891_v33  ;;  %v19939_v33 = vld [vmem:[%s22578_s6 + $0x258] ss:$12 sps:$4 sm:$0xff]  }
0x263e   : > { %10288 = vmatpush1.bf16.msra.mxu0 %v19888_v9  ;;  %v19946_v9 = vld [vmem:[%s22578_s6 + $0x274] ss:$12 sps:$4 sm:$0xff]  }
0x263f   : > { %18015 = vmatpush3.bf16.msra.mxu1 %v19892_v54  ;;  %10289 = vmatprep.subr.bf16.mxu0 %v19895_v56  ;;  %v19944_v54 = vld [vmem:[%s22578_s6 + $0x270] ss:$12 sps:$4 sm:$0xff]   ;;  %v19951_v56 = vld [vmem:[%s22578_s6 + $0x28c] ss:$12 sps:$4 sm:$0xff]  }
0x2640   : > { %18016 = vmatprep.subr.bf16.mxu1 %v19896_v39  ;;  %v19949_v39 = vld [vmem:[%s22578_s6 + $0x288] ss:$12 sps:$4 sm:$0xff]  }
0x2642   : > { %10290 = vmatpush1.bf16.msra.mxu0 %v19893_v7  ;;  %v19956_v7 = vld [vmem:[%s22578_s6 + $0x2a4] ss:$12 sps:$4 sm:$0xff]  }
0x2643   : > { %18017 = vmatpush3.bf16.msra.mxu1 %v19897_v16  ;;  %10291 = vmatprep.subr.bf16.mxu0 %v19900_v36  ;;  %v6677_v16 = vsub.s32 4, %v25074_v5  ;;  %v19954_v36 = vld [vmem:[%s22578_s6 + $0x2a0] ss:$12 sps:$4 sm:$0xff]  }
0x2644   : > { %18018 = vmatprep.subr.bf16.mxu1 %v19901_v57  ;;  %v6685_v57 = vsub.s32 6, %v25074_v5 }
0x2646   : > { %10292 = vmatpush1.bf16.msra.mxu0 %v19898_v8  ;;  %v6681_v8 = vsub.s32 5, %v25074_v5 }
0x2647   : > { %18019 = vmatpush3.bf16.msra.mxu1 %v19902_v22  ;;  %10293 = vmatprep.subr.bf16.mxu0 %v19905_v3  ;;  %v6689_v22 = vsub.s32 7, %v25074_v5  ;;  %v19961_v3 = vld [vmem:[%s22578_s6 + $0x2bc] ss:$12 sps:$4 sm:$0xff]  }
0x2648   : > { %18020 = vmatprep.subr.bf16.mxu1 %v19906_v6  ;;  %v6678_v6 = vrot.slane %v24232_v29, %v6677_v16 }
0x264a   : > { %10294 = vmatpush1.bf16.msra.mxu0 %v19903_v42  ;;  %v6686_v42 = vrot.slane %v24232_v29, %v6685_v57 }
0x264b   : > { %18021 = vmatpush3.bf16.msra.mxu1 %v19907_v18  ;;  %10306 = vmatprep.subr.bf16.mxu0 %v19910_v37  ;;  %v6682_v18 = vrot.slane %v24232_v29, %v6681_v8  ;;  %v19959_v37 = vld [vmem:[%s22578_s6 + $0x2b8] ss:$12 sps:$4 sm:$0xff]  }
0x264c   : > { %18028 = vmatprep.subr.bf16.mxu1 %v19932_v48  ;;  %v6690_v48 = vrot.slane %v24232_v29, %v6689_v22  ;;  %v19971_v29 = vld [vmem:[%s22578_s6 + $0x2ec] ss:$12 sps:$4 sm:$0xff]  }
0x264d   : > { %10296 = vmatmul.mubr.bf16.vlgmr.msra.gmra.mrb[116].mxu0 %v24257_v43  ;;  %v19922_v43 = vld [vmem:[%s22578_s6 + $0x1e4] ss:$12 sps:$4 sm:$0xff]  }
0x264e   : > { %10595 = vmatmul.mubr.bf16.vlgmr.msra.gmra.mrb[128].mxu1 %v24259_v20  ;;  %10307 = vmatpush1.bf16.msra.mxu0 %v19908_v31  ;;  %v19966_v31 = vld [vmem:[%s22578_s6 + $0x2d4] ss:$12 sps:$4 sm:$0xff]  }
0x264f   : > { %10338 = vmatprep.mubr.bf16.mxu0 %v24262_v15  ;;  %10308 = vmatprep.subr.bf16.mxu0 %v19913_v17  ;;  %v19920_v15 = vld [vmem:[%s22578_s6 + $0x1e0] ss:$12 sps:$4 sm:$0xff]  }
0x2650   : > { %18029 = vmatpush3.bf16.msra.mxu1 %v19933_v49 }
0x2651   : > { %18030 = vmatprep.subr.bf16.mxu1 %v19937_v21 }
0x2652   : > { %10309 = vmatpush1.bf16.msra.mxu0 %v19911_v34 }
0x2653   : > { %10310 = vmatprep.subr.bf16.mxu0 %v19916_v25 }
0x2654   : > { %18031 = vmatpush3.bf16.msra.mxu1 %v19938_v44 }
0x2655   : > { %18032 = vmatprep.subr.bf16.mxu1 %v19942_v27 }
0x2656   : > { %10311 = vmatpush1.bf16.msra.mxu0 %v19914_v55 }
0x2657   : > { %10312 = vmatprep.subr.bf16.mxu0 %v19919_v28  ;;  %v19964_v28 = vld [vmem:[%s22578_s6 + $0x2d0] ss:$12 sps:$4 sm:$0xff]  }
0x2658   : > { %18033 = vmatpush3.bf16.msra.mxu1 %v19943_v35 }
0x2659   : > { %18034 = vmatprep.subr.bf16.mxu1 %v19947_v2 }
0x265a   : > { %10313 = vmatpush1.bf16.msra.mxu0 %v19917_v46 }
0x265b   : > { %10314 = vmatprep.subr.bf16.mxu0 %v19922_v43 }
0x265c   : > { %18035 = vmatpush3.bf16.msra.mxu1 %v19948_v52 }
0x265d   : > { %18036 = vmatprep.subr.bf16.mxu1 %v19952_v26 }
0x265e   : > { %10315 = vmatpush1.bf16.msra.mxu0 %v19920_v15 }
0x265f   : > { %10316 = vmatprep.subr.bf16.mxu0 %v19925_v24 }
0x2660   : > { %18037 = vmatpush3.bf16.msra.mxu1 %v19953_v41 }
0x2661   : > { %18038 = vmatprep.subr.bf16.mxu1 %v19957_v47 }
0x2662   : > { %10317 = vmatpush1.bf16.msra.mxu0 %v19923_v14 }
0x2663   : > { %10318 = vmatprep.subr.bf16.mxu0 %v19928_v58 }
0x2664   : > { %18039 = vmatpush3.bf16.msra.mxu1 %v19958_v51 }
0x2665   : > { %18040 = vmatprep.subr.bf16.mxu1 %v19962_v4  ;;  %v19969_v4 = vld [vmem:[%s22578_s6 + $0x2e8] ss:$12 sps:$4 sm:$0xff]  }
0x2666   : > { %10319 = vmatpush1.bf16.msra.mxu0 %v19926_v45 }
0x2667   : > { %10320 = vmatprep.subr.bf16.mxu0 %v19931_v19 }
0x2668   : > { %18041 = vmatpush3.bf16.msra.mxu1 %v19963_v53 }
0x2669   : > { %18042 = vmatprep.subr.bf16.mxu1 %v19967_v23  ;;  %v19976_v23 = vld [vmem:[%s22578_s6 + $0x304] ss:$12 sps:$4 sm:$0xff]  }
0x266a   : > { %10321 = vmatpush1.bf16.msra.mxu0 %v19929_v61 }
0x266b   : > { %10322 = vmatprep.subr.bf16.mxu0 %v19936_v62 }
0x266c   : > { %18043 = vmatpush3.bf16.msra.mxu1 %v19968_v63  ;;  %v19973_v63 = vld [vmem:[%s22578_s6 + $0x488] ss:$12 sps:$4 sm:$0xff]  }
0x266d   : > { %18050 = vmatprep.subr.bf16.mxu1 %v19972_v13 }
0x266e   : > { %10323 = vmatpush1.bf16.msra.mxu0 %v19934_v38  ;;  %v19977_v38 = vld [vmem:[%s22578_s6 + $0x560] ss:$12 sps:$4 sm:$0xff]  }
0x266f   : > { %10324 = vmatprep.subr.bf16.mxu0 %v19941_v11  ;;  %v19974_v11 = vld [vmem:[%s22578_s6 + $0x300] ss:$12 sps:$4 sm:$0xff]  }
0x2672   : > { %10325 = vmatpush1.bf16.msra.mxu0 %v19939_v33  ;;  %v19981_v33 = vld [vmem:[%s22578_s6 + $0x31c] ss:$12 sps:$4 sm:$0xff]  }
0x2673   : > { %10326 = vmatprep.subr.bf16.mxu0 %v19946_v9  ;;  %v19978_v9 = vld [vmem:[%s22578_s6 + $0x4a0] ss:$12 sps:$4 sm:$0xff]  }
0x2676   : > { %10327 = vmatpush1.bf16.msra.mxu0 %v19944_v54  ;;  %v19982_v54 = vld [vmem:[%s22578_s6 + $0x578] ss:$12 sps:$4 sm:$0xff]  }
0x2677   : > { %10328 = vmatprep.subr.bf16.mxu0 %v19951_v56  ;;  %v19979_v56 = vld [vmem:[%s22578_s6 + $0x318] ss:$12 sps:$4 sm:$0xff]  }
0x267a   : > { %10329 = vmatpush1.bf16.msra.mxu0 %v19949_v39  ;;  %v19986_v39 = vld [vmem:[%s22578_s6 + $0x334] ss:$12 sps:$4 sm:$0xff]  }
0x267b   : > { %10330 = vmatprep.subr.bf16.mxu0 %v19956_v7  ;;  %v19983_v7 = vld [vmem:[%s22578_s6 + $0x4b8] ss:$12 sps:$4 sm:$0xff]  }
0x267e   : > { %10331 = vmatpush1.bf16.msra.mxu0 %v19954_v36  ;;  %v19987_v36 = vld [vmem:[%s22578_s6 + $0x590] ss:$12 sps:$4 sm:$0xff]  }
0x267f   : > { %10332 = vmatprep.subr.bf16.mxu0 %v19961_v3  ;;  %v19984_v3 = vld [vmem:[%s22578_s6 + $0x330] ss:$12 sps:$4 sm:$0xff]  }
0x2680   : > { %v8408_v17 = vpop.f32.mrb[108].mxu0 }
0x2681   : > { %v18615_v49 = vadd.f32 %v8408_v17, %v6678_v6  ;;  %v8494_v21 = vpop.f32.mrb[116].mxu1  ;;  %v8410_v34 = vpop.f32.mrb[109].mxu0  ;;  %v19994_v17 = vld [vmem:[%s22578_s6 + $0x360] ss:$12 sps:$4 sm:$0xff]  }
0x2682   : > { %v18619_v25 = vadd.f32 %v8494_v21, %v6686_v42  ;;  %v18616_v44 = vadd.f32 %v8410_v34, %v6682_v18  ;;  %v8496_v27 = vpop.f32.mrb[117].mxu1  ;;  %v8412_v55 = vpop.f32.mrb[110].mxu0  ;;  %10333 = vmatpush1.bf16.msra.mxu0 %v19959_v37  ;;  %v19996_v37 = vld [vmem:[%s22578_s6 + $0x364] ss:$12 sps:$4 sm:$0xff]   ;;  %v19998_v21 = vld [vmem:[%s22578_s6 + $0x500] ss:$12 sps:$4 sm:$0xff]  }
0x2683   : > { %v18620_v35 = vadd.f32 %v8496_v27, %v6690_v48  ;;  %v18617_v2 = vadd.f32 %v8412_v55, %v6678_v6  ;;  %v8498_v46 = vpop.f32.mrb[118].mxu1  ;;  %v8414_v5 = vpop.f32.mrb[111].mxu0  ;;  %10334 = vmatprep.subr.bf16.mxu0 %v19966_v31  ;;  %v8679_v15 = vmax.f32 %v18615_v49, 0.0  ;;  %v19988_v6 = vld [vmem:[%s22578_s6 + $0x4d0] ss:$12 sps:$4 sm:$0xff]  }
0x2684   : > { %v18621_v43 = vadd.f32 %v8498_v46, %v6686_v42  ;;  %v18618_v52 = vadd.f32 %v8414_v5, %v6682_v18  ;;  %v8500_v26 = vpop.f32.mrb[119].mxu1  ;;  %v8681_v47 = vmax.f32 %v18619_v25, 0.0  ;;  %v8680_v14 = vmax.f32 %v18616_v44, 0.0  ;;  %v19992_v42 = vld [vmem:[%s22578_s6 + $0x5a8] ss:$12 sps:$4 sm:$0xff]  }
0x2685   : > { %v8691_v24 = vmax.f32 %v18617_v2, 0.0  ;;  %v18622_v41 = vadd.f32 %v8500_v26, %v6690_v48  ;;  %v8682_v45 = vmax.f32 %v18620_v35, 0.0  ;;  %v19989_v18 = vld [vmem:[%s22578_s6 + $0x348] ss:$12 sps:$4 sm:$0xff]   ;;  %v19997_v31 = vld [vmem:[%s22578_s6 + $0x5c0] ss:$12 sps:$4 sm:$0xff]  }
0x2686   : > { %v8693_v58 = vmax.f32 %v18621_v43, 0.0  ;;  %v8692_v51 = vmax.f32 %v18618_v52, 0.0  ;;  %10335 = vmatpush1.bf16.msra.mxu0 %v19964_v28  ;;  %v19993_v48 = vld [vmem:[%s22578_s6 + $0x4e8] ss:$12 sps:$4 sm:$0xff]   ;;  %v20002_v34 = vld [vmem:[%s22578_s6 + $0x5d8] ss:$12 sps:$4 sm:$0xff]  }
0x2687   : > { %v24366_v19 = vpack.c.bf16 %v8691_v24, %v8679_v15  ;;  %v8694_v53 = vmax.f32 %v18622_v41, 0.0  ;;  %10336 = vmatprep.subr.bf16.mxu0 %v19971_v29  ;;  %v20001_v49 = vld [vmem:[%s22578_s6 + $0x37c] ss:$12 sps:$4 sm:$0xff]   ;;  %v19999_v25 = vld [vmem:[%s22578_s6 + $0x378] ss:$12 sps:$4 sm:$0xff]  }
0x2688   : > { %v24369_v61 = vpack.c.bf16 %v8693_v58, %v8681_v47  ;;  %v8704_v62 = vpack.c.bf16 %v8692_v51, %v8680_v14  ;;  %v20006_v44 = vld [vmem:[%s22578_s6 + $0x394] ss:$12 sps:$4 sm:$0xff]   ;;  %v20003_v27 = vld [vmem:[%s22578_s6 + $0x518] ss:$12 sps:$4 sm:$0xff]   ;;  %v20007_v55 = vld [vmem:[%s22578_s6 + $0x5f0] ss:$12 sps:$4 sm:$0xff]  }
0x2689   : > { %v24372_v13 = vpack.c.bf16 %v8694_v53, %v8682_v45  ;;  %v20004_v28 = vld [vmem:[%s22578_s6 + $0x390] ss:$12 sps:$4 sm:$0xff]   ;;  %v20011_v35 = vld [vmem:[%s22578_s6 + $0x3ac] ss:$12 sps:$4 sm:$0xff]   ;;  %v20036_v46 = vld [vmem:[%s22578_s6 + $0x6c8] ss:$12 sps:$4 sm:$0xff]  }
0x268a   : > { %10337 = vmatpush1.bf16.msra.mxu0 %v19969_v4  ;;  %10635 = vmatprep.mubr.bf16.mxu1 %v8704_v62  ;;  %v20008_v2 = vld [vmem:[%s22578_s6 + $0x530] ss:$12 sps:$4 sm:$0xff]   ;;  %v20009_v5 = vld [vmem:[%s22578_s6 + $0x3a8] ss:$12 sps:$4 sm:$0xff]   ;;  %v20041_v52 = vld [vmem:[%s22578_s6 + $0x6e0] ss:$12 sps:$4 sm:$0xff]  }
0x268b   : > { %10636 = vmatmul.mubr.bf16.vlgmr.msra.gmra.mrb[132].mxu1 %v24366_v19  ;;  %10349 = vmatprep.subr.bf16.mxu0 %v19976_v23  ;;  %v20014_v29 = vld [vmem:[%s22578_s6 + $0x3c4] ss:$12 sps:$4 sm:$0xff]   ;;  %v20037_v43 = vld [vmem:[%s22578_s6 + $0x608] ss:$12 sps:$4 sm:$0xff]   ;;  %v20012_v26 = vld [vmem:[%s22578_s6 + $0x3c0] ss:$12 sps:$4 sm:$0xff]  }
0x268c   : > { %18051 = vmatpush3.bf16.msra.mxu1 %v19973_v63  ;;  %10676 = vmatprep.mubr.bf16.mxu1 %v24372_v13  ;;  %v20017_v15 = vld [vmem:[%s22578_s6 + $0x3dc] ss:$12 sps:$4 sm:$0xff]   ;;  %v20042_v24 = vld [vmem:[%s22578_s6 + $0x620] ss:$12 sps:$4 sm:$0xff]   ;;  %v20046_v41 = vld [vmem:[%s22578_s6 + $0x6f8] ss:$12 sps:$4 sm:$0xff]  }
0x268d   : > { %10339 = vmatmul.mubr.bf16.vlgmr.msra.gmra.mrb[116].mxu0 %v24259_v20  ;;  %18052 = vmatprep.subr.bf16.mxu1 %v19977_v38  ;;  %v19991_v20 = vld [vmem:[%s22578_s6 + $0x34c] ss:$12 sps:$4 sm:$0xff]   ;;  %v20020_v14 = vld [vmem:[%s22578_s6 + $0x3f4] ss:$12 sps:$4 sm:$0xff]   ;;  %v20051_v51 = vld [vmem:[%s22578_s6 + $0x710] ss:$12 sps:$4 sm:$0xff]  }
0x268e   : > { %10350 = vmatpush1.bf16.msra.mxu0 %v19974_v11  ;;  %10381 = vmatprep.mubr.bf16.mxu0 %v8704_v62  ;;  %v20015_v47 = vld [vmem:[%s22578_s6 + $0x3d8] ss:$12 sps:$4 sm:$0xff]   ;;  %v20018_v4 = vld [vmem:[%s22578_s6 + $0x3f0] ss:$12 sps:$4 sm:$0xff]   ;;  %v20056_v23 = vld [vmem:[%s22578_s6 + $0x728] ss:$12 sps:$4 sm:$0xff]  }
0x268f   : > { %10351 = vmatprep.subr.bf16.mxu0 %v19981_v33  ;;  %v20047_v58 = vld [vmem:[%s22578_s6 + $0x638] ss:$12 sps:$4 sm:$0xff]   ;;  %v20052_v53 = vld [vmem:[%s22578_s6 + $0x650] ss:$12 sps:$4 sm:$0xff]   ;;  %v20021_v62 = vld [vmem:[%s22578_s6 + $0x408] ss:$12 sps:$4 sm:$0xff]  }
0x2690   : > { %18053 = vmatpush3.bf16.msra.mxu1 %v19978_v9  ;;  %v20023_v45 = vld [vmem:[%s22578_s6 + $0x40c] ss:$12 sps:$4 sm:$0xff]   ;;  %v20026_v63 = vld [vmem:[%s22578_s6 + $0x424] ss:$12 sps:$4 sm:$0xff]   ;;  %v20057_v38 = vld [vmem:[%s22578_s6 + $0x668] ss:$12 sps:$4 sm:$0xff]  }
0x2691   : > { %18054 = vmatprep.subr.bf16.mxu1 %v19982_v54  ;;  %v20061_v11 = vld [vmem:[%s22578_s6 + $0x740] ss:$12 sps:$4 sm:$0xff]   ;;  %v20029_v9 = vld [vmem:[%s22578_s6 + $0x43c] ss:$12 sps:$4 sm:$0xff]  }
0x2692   : > { %10352 = vmatpush1.bf16.msra.mxu0 %v19979_v56  ;;  %v20024_v33 = vld [vmem:[%s22578_s6 + $0x420] ss:$12 sps:$4 sm:$0xff]   ;;  %v20066_v56 = vld [vmem:[%s22578_s6 + $0x758] ss:$12 sps:$4 sm:$0xff]  }
0x2693   : > { %10353 = vmatprep.subr.bf16.mxu0 %v19986_v39  ;;  %v20062_v54 = vld [vmem:[%s22578_s6 + $0x680] ss:$12 sps:$4 sm:$0xff]   ;;  %v20027_v39 = vld [vmem:[%s22578_s6 + $0x438] ss:$12 sps:$4 sm:$0xff]  }
0x2694   : > { %18055 = vmatpush3.bf16.msra.mxu1 %v19983_v7  ;;  %v20032_v7 = vld [vmem:[%s22578_s6 + $0x454] ss:$12 sps:$4 sm:$0xff]  }
0x2695   : > { %18056 = vmatprep.subr.bf16.mxu1 %v19987_v36  ;;  %v20067_v36 = vld [vmem:[%s22578_s6 + $0x698] ss:$12 sps:$4 sm:$0xff]  }
0x2696   : > { %10354 = vmatpush1.bf16.msra.mxu0 %v19984_v3  ;;  %v20071_v3 = vld [vmem:[%s22578_s6 + $0x770] ss:$12 sps:$4 sm:$0xff]  }
0x2697   : > { %10355 = vmatprep.subr.bf16.mxu0 %v19991_v20  ;;  %v20030_v20 = vld [vmem:[%s22578_s6 + $0x450] ss:$12 sps:$4 sm:$0xff]  }
0x2698   : > { %18057 = vmatpush3.bf16.msra.mxu1 %v19988_v6  ;;  %v20035_v6 = vld [vmem:[%s22578_s6 + $0x46c] ss:$12 sps:$4 sm:$0xff]  }
0x2699   : > { %18058 = vmatprep.subr.bf16.mxu1 %v19992_v42  ;;  %v20072_v42 = vld [vmem:[%s22578_s6 + $0x6b0] ss:$12 sps:$4 sm:$0xff]  }
0x269a   : > { %10356 = vmatpush1.bf16.msra.mxu0 %v19989_v18  ;;  %v20076_v18 = vld [vmem:[%s22578_s6 + $0x848] ss:$12 sps:$4 sm:$0xff]  }
0x269b   : > { %10357 = vmatprep.subr.bf16.mxu0 %v19996_v37  ;;  %v20033_v37 = vld [vmem:[%s22578_s6 + $0x468] ss:$12 sps:$4 sm:$0xff]  }
0x269c   : > { %18059 = vmatpush3.bf16.msra.mxu1 %v19993_v48  ;;  %v20040_v48 = vld [vmem:[%s22578_s6 + $0x484] ss:$12 sps:$4 sm:$0xff]  }
0x269d   : > { %18060 = vmatprep.subr.bf16.mxu1 %v19997_v31  ;;  %v20038_v31 = vld [vmem:[%s22578_s6 + $0x480] ss:$12 sps:$4 sm:$0xff]  }
0x269e   : > { %10358 = vmatpush1.bf16.msra.mxu0 %v19994_v17  ;;  %v20045_v17 = vld [vmem:[%s22578_s6 + $0x49c] ss:$12 sps:$4 sm:$0xff]  }
0x269f   : > { %10359 = vmatprep.subr.bf16.mxu0 %v20001_v49  ;;  %v20043_v49 = vld [vmem:[%s22578_s6 + $0x498] ss:$12 sps:$4 sm:$0xff]  }
0x26a0   : > { %18061 = vmatpush3.bf16.msra.mxu1 %v19998_v21  ;;  %v20050_v21 = vld [vmem:[%s22578_s6 + $0x4b4] ss:$12 sps:$4 sm:$0xff]  }
0x26a1   : > { %18062 = vmatprep.subr.bf16.mxu1 %v20002_v34  ;;  %v20048_v34 = vld [vmem:[%s22578_s6 + $0x4b0] ss:$12 sps:$4 sm:$0xff]  }
0x26a2   : > { %10360 = vmatpush1.bf16.msra.mxu0 %v19999_v25  ;;  %v20055_v25 = vld [vmem:[%s22578_s6 + $0x4cc] ss:$12 sps:$4 sm:$0xff]  }
0x26a3   : > { %10361 = vmatprep.subr.bf16.mxu0 %v20006_v44  ;;  %v20053_v44 = vld [vmem:[%s22578_s6 + $0x4c8] ss:$12 sps:$4 sm:$0xff]  }
0x26a4   : > { %18063 = vmatpush3.bf16.msra.mxu1 %v20003_v27  ;;  %v20060_v27 = vld [vmem:[%s22578_s6 + $0x4e4] ss:$12 sps:$4 sm:$0xff]  }
0x26a5   : > { %18064 = vmatprep.subr.bf16.mxu1 %v20007_v55  ;;  %v6268_v55 = vld [vmem:[%s22576_s14 + $0x8] sm:$0xf] }
0x26a6   : > { %10362 = vmatpush1.bf16.msra.mxu0 %v20004_v28  ;;  %v20065_v28 = vld [vmem:[%s22578_s6 + $0x4fc] ss:$12 sps:$4 sm:$0xff]  }
0x26a7   : > { %10363 = vmatprep.subr.bf16.mxu0 %v20011_v35  ;;  %v6702_v35 = vrot.slane %v6268_v55, %v25068_v59 }
0x26a8   : > { %18065 = vmatpush3.bf16.msra.mxu1 %v20008_v2  ;;  %v6698_v2 = vrot.slane %v6268_v55, %v25067_v0 }
0x26a9   : > { %18072 = vmatprep.subr.bf16.mxu1 %v20036_v46  ;;  %v20063_v46 = vld [vmem:[%s22578_s6 + $0x4f8] ss:$12 sps:$4 sm:$0xff]  }
0x26aa   : > { %10364 = vmatpush1.bf16.msra.mxu0 %v20009_v5  ;;  %v6706_v5 = vrot.slane %v6268_v55, %v24235_v50 }
0x26ab   : > { %10677 = vmatmul.mubr.bf16.vlgmr.msra.gmra.mrb[136].mxu1 %v24369_v61  ;;  %10365 = vmatprep.subr.bf16.mxu0 %v20014_v29  ;;  %v20070_v29 = vld [vmem:[%s22578_s6 + $0x514] ss:$12 sps:$4 sm:$0xff]  }
0x26ac   : > { %18073 = vmatpush3.bf16.msra.mxu1 %v20037_v43 }
0x26ad   : > { %18074 = vmatprep.subr.bf16.mxu1 %v20041_v52 }
0x26ae   : > { %10366 = vmatpush1.bf16.msra.mxu0 %v20012_v26 }
0x26af   : > { %10367 = vmatprep.subr.bf16.mxu0 %v20017_v15 }
0x26b0   : > { %18075 = vmatpush3.bf16.msra.mxu1 %v20042_v24 }
0x26b1   : > { %18076 = vmatprep.subr.bf16.mxu1 %v20046_v41 }
0x26b2   : > { %10368 = vmatpush1.bf16.msra.mxu0 %v20015_v47 }
0x26b3   : > { %10369 = vmatprep.subr.bf16.mxu0 %v20020_v14 }
0x26b4   : > { %18077 = vmatpush3.bf16.msra.mxu1 %v20047_v58  ;;  %v20068_v58 = vld [vmem:[%s22578_s6 + $0x510] ss:$12 sps:$4 sm:$0xff]  }
0x26b5   : > { %18078 = vmatprep.subr.bf16.mxu1 %v20051_v51 }
0x26b6   : > { %10370 = vmatpush1.bf16.msra.mxu0 %v20018_v4 }
0x26b7   : > { %10371 = vmatprep.subr.bf16.mxu0 %v20023_v45 }
0x26b8   : > { %18079 = vmatpush3.bf16.msra.mxu1 %v20052_v53 }
0x26b9   : > { %18080 = vmatprep.subr.bf16.mxu1 %v20056_v23  ;;  %v20075_v23 = vld [vmem:[%s22578_s6 + $0x52c] ss:$12 sps:$4 sm:$0xff]  }
0x26ba   : > { %10372 = vmatpush1.bf16.msra.mxu0 %v20021_v62 }
0x26bb   : > { %10373 = vmatprep.subr.bf16.mxu0 %v20026_v63 }
0x26bc   : > { %18081 = vmatpush3.bf16.msra.mxu1 %v20057_v38 }
0x26bd   : > { %18082 = vmatprep.subr.bf16.mxu1 %v20061_v11 }
0x26be   : > { %10374 = vmatpush1.bf16.msra.mxu0 %v20024_v33 }
0x26bf   : > { %10375 = vmatprep.subr.bf16.mxu0 %v20029_v9 }
0x26c0   : > { %18083 = vmatpush3.bf16.msra.mxu1 %v20062_v54 }
0x26c1   : > { %18084 = vmatprep.subr.bf16.mxu1 %v20066_v56 }
0x26c2   : > { %10376 = vmatpush1.bf16.msra.mxu0 %v20027_v39 }
0x26c3   : > { %10377 = vmatprep.subr.bf16.mxu0 %v20032_v7 }
0x26c4   : > { %18085 = vmatpush3.bf16.msra.mxu1 %v20067_v36  ;;  %v20073_v36 = vld [vmem:[%s22578_s6 + $0x528] ss:$12 sps:$4 sm:$0xff]  }
0x26c5   : > { %18086 = vmatprep.subr.bf16.mxu1 %v20071_v3 }
0x26c6   : > { %10378 = vmatpush1.bf16.msra.mxu0 %v20030_v20 }
0x26c7   : > { %10379 = vmatprep.subr.bf16.mxu0 %v20035_v6 }
0x26c8   : > { %18087 = vmatpush3.bf16.msra.mxu1 %v20072_v42  ;;  %v20080_v42 = vld [vmem:[%s22578_s6 + $0x544] ss:$12 sps:$4 sm:$0xff]  }
0x26c9   : > { %18094 = vmatprep.subr.bf16.mxu1 %v20076_v18 }
0x26ca   : > { %10380 = vmatpush1.bf16.msra.mxu0 %v20033_v37 }
0x26cb   : > { %10392 = vmatprep.subr.bf16.mxu0 %v20040_v48  ;;  %v20077_v48 = vld [vmem:[%s22578_s6 + $0x788] ss:$12 sps:$4 sm:$0xff]  }
0x26cd   : > { %10382 = vmatmul.mubr.bf16.vlgmr.msra.gmra.mrb[116].mxu0 %v24366_v19  ;;  %v20058_v19 = vld [vmem:[%s22578_s6 + $0x4e0] ss:$12 sps:$4 sm:$0xff]  }
0x26ce   : > { %10393 = vmatpush1.bf16.msra.mxu0 %v20038_v31  ;;  %10424 = vmatprep.mubr.bf16.mxu0 %v24372_v13  ;;  %v6694_v13 = vrot.slane %v6268_v55, %v25066_v30  ;;  %v20091_v55 = vld [vmem:[%s22578_s6 + $0x890] ss:$12 sps:$4 sm:$0xff]  }
0x26cf   : > { %10394 = vmatprep.subr.bf16.mxu0 %v20045_v17  ;;  %v20081_v17 = vld [vmem:[%s22578_s6 + $0x860] ss:$12 sps:$4 sm:$0xff]  }
0x26d2   : > { %10395 = vmatpush1.bf16.msra.mxu0 %v20043_v49  ;;  %v20078_v49 = vld [vmem:[%s22578_s6 + $0x540] ss:$12 sps:$4 sm:$0xff]  }
0x26d3   : > { %10396 = vmatprep.subr.bf16.mxu0 %v20050_v21  ;;  %v20085_v21 = vld [vmem:[%s22578_s6 + $0x55c] ss:$12 sps:$4 sm:$0xff]  }
0x26d6   : > { %10397 = vmatpush1.bf16.msra.mxu0 %v20048_v34  ;;  %v20082_v34 = vld [vmem:[%s22578_s6 + $0x7a0] ss:$12 sps:$4 sm:$0xff]  }
0x26d7   : > { %10398 = vmatprep.subr.bf16.mxu0 %v20055_v25  ;;  %v20086_v25 = vld [vmem:[%s22578_s6 + $0x878] ss:$12 sps:$4 sm:$0xff]  }
0x26da   : > { %10399 = vmatpush1.bf16.msra.mxu0 %v20053_v44  ;;  %v20083_v44 = vld [vmem:[%s22578_s6 + $0x558] ss:$12 sps:$4 sm:$0xff]  }
0x26db   : > { %10400 = vmatprep.subr.bf16.mxu0 %v20060_v27  ;;  %v20090_v27 = vld [vmem:[%s22578_s6 + $0x574] ss:$12 sps:$4 sm:$0xff]  }
0x26de   : > { %10401 = vmatpush1.bf16.msra.mxu0 %v20058_v19  ;;  %v20087_v19 = vld [vmem:[%s22578_s6 + $0x7b8] ss:$12 sps:$4 sm:$0xff]  }
0x26df   : > { %10402 = vmatprep.subr.bf16.mxu0 %v20065_v28  ;;  %v20088_v28 = vld [vmem:[%s22578_s6 + $0x570] ss:$12 sps:$4 sm:$0xff]  }
0x26e0   : > { %v8580_v43 = vpop.f32.mrb[112].mxu0 }
0x26e1   : > { %v18623_v52 = vadd.f32 %v8580_v43, %v6694_v13  ;;  %v8666_v26 = vpop.f32.mrb[120].mxu1  ;;  %v8582_v15 = vpop.f32.mrb[113].mxu0  ;;  %v20101_v43 = vld [vmem:[%s22578_s6 + $0x8c0] ss:$12 sps:$4 sm:$0xff]  }
0x26e2   : > { %v18627_v24 = vadd.f32 %v8666_v26, %v6702_v35  ;;  %v18624_v41 = vadd.f32 %v8582_v15, %v6698_v2  ;;  %v8668_v47 = vpop.f32.mrb[121].mxu1  ;;  %v8584_v14 = vpop.f32.mrb[114].mxu0  ;;  %10403 = vmatpush1.bf16.msra.mxu0 %v20063_v46  ;;  %v20093_v46 = vld [vmem:[%s22578_s6 + $0x588] ss:$12 sps:$4 sm:$0xff]   ;;  %v20102_v15 = vld [vmem:[%s22578_s6 + $0x800] ss:$12 sps:$4 sm:$0xff]  }
0x26e3   : > { %v18628_v51 = vadd.f32 %v8668_v47, %v6706_v5  ;;  %v18625_v4 = vadd.f32 %v8584_v14, %v6694_v13  ;;  %v8670_v45 = vpop.f32.mrb[122].mxu1  ;;  %v8586_v53 = vpop.f32.mrb[115].mxu0  ;;  %10404 = vmatprep.subr.bf16.mxu0 %v20070_v29  ;;  %v8683_v11 = vmax.f32 %v18623_v52, 0.0  ;;  %v20095_v13 = vld [vmem:[%s22578_s6 + $0x58c] ss:$12 sps:$4 sm:$0xff]  }
0x26e4   : > { %v18629_v62 = vadd.f32 %v8670_v45, %v6702_v35  ;;  %v18626_v63 = vadd.f32 %v8586_v53, %v6698_v2  ;;  %v8672_v38 = vpop.f32.mrb[123].mxu1  ;;  %v8685_v54 = vmax.f32 %v18627_v24, 0.0  ;;  %v8684_v56 = vmax.f32 %v18624_v41, 0.0  ;;  %v20092_v35 = vld [vmem:[%s22578_s6 + $0x7d0] ss:$12 sps:$4 sm:$0xff]  }
0x26e5   : > { %v8695_v33 = vmax.f32 %v18625_v4, 0.0  ;;  %v18630_v9 = vadd.f32 %v8672_v38, %v6706_v5  ;;  %v8686_v3 = vmax.f32 %v18628_v51, 0.0  ;;  %v20096_v2 = vld [vmem:[%s22578_s6 + $0x8a8] ss:$12 sps:$4 sm:$0xff]   ;;  %v20100_v5 = vld [vmem:[%s22578_s6 + $0x5a4] ss:$12 sps:$4 sm:$0xff]  }
0x26e6   : > { %v8697_v39 = vmax.f32 %v18629_v62, 0.0  ;;  %v8696_v7 = vmax.f32 %v18626_v63, 0.0  ;;  %10405 = vmatpush1.bf16.msra.mxu0 %v20068_v58  ;;  %v20097_v29 = vld [vmem:[%s22578_s6 + $0x7e8] ss:$12 sps:$4 sm:$0xff]   ;;  %v20098_v52 = vld [vmem:[%s22578_s6 + $0x5a0] ss:$12 sps:$4 sm:$0xff]  }
0x26e7   : > { %v24463_v20 = vpack.c.bf16 %v8695_v33, %v8683_v11  ;;  %v8698_v6 = vmax.f32 %v18630_v9, 0.0  ;;  %10406 = vmatprep.subr.bf16.mxu0 %v20075_v23  ;;  %v20105_v26 = vld [vmem:[%s22578_s6 + $0x5bc] ss:$12 sps:$4 sm:$0xff]   ;;  %v20106_v24 = vld [vmem:[%s22578_s6 + $0x8d8] ss:$12 sps:$4 sm:$0xff]  }
0x26e8   : > { %v24466_v18 = vpack.c.bf16 %v8697_v39, %v8685_v54  ;;  %v24468_v37 = vpack.c.bf16 %v8696_v7, %v8684_v56  ;;  %v20103_v41 = vld [vmem:[%s22578_s6 + $0x5b8] ss:$12 sps:$4 sm:$0xff]   ;;  %v20110_v47 = vld [vmem:[%s22578_s6 + $0x5d4] ss:$12 sps:$4 sm:$0xff]   ;;  %v20111_v51 = vld [vmem:[%s22578_s6 + $0x8f0] ss:$12 sps:$4 sm:$0xff]  }
0x26e9   : > { %v24471_v31 = vpack.c.bf16 %v8698_v6, %v8686_v3  ;;  %v20107_v14 = vld [vmem:[%s22578_s6 + $0x818] ss:$12 sps:$4 sm:$0xff]   ;;  %v20108_v45 = vld [vmem:[%s22578_s6 + $0x5d0] ss:$12 sps:$4 sm:$0xff]   ;;  %v20113_v33 = vld [vmem:[%s22578_s6 + $0x5e8] ss:$12 sps:$4 sm:$0xff]  }
0x26ea   : > { %10407 = vmatpush1.bf16.msra.mxu0 %v20073_v36  ;;  %10717 = vmatprep.mubr.bf16.mxu1 %v24468_v37  ;;  %v20115_v62 = vld [vmem:[%s22578_s6 + $0x5ec] ss:$12 sps:$4 sm:$0xff]   ;;  %v20112_v38 = vld [vmem:[%s22578_s6 + $0x830] ss:$12 sps:$4 sm:$0xff]   ;;  %v20124_v7 = vld [vmem:[%s22578_s6 + $0x634] ss:$12 sps:$4 sm:$0xff]  }
0x26eb   : > { %10718 = vmatmul.mubr.bf16.vlgmr.msra.gmra.mrb[140].mxu1 %v24463_v20  ;;  %10408 = vmatprep.subr.bf16.mxu0 %v20080_v42  ;;  %v20118_v9 = vld [vmem:[%s22578_s6 + $0x604] ss:$12 sps:$4 sm:$0xff]   ;;  %v20116_v54 = vld [vmem:[%s22578_s6 + $0x600] ss:$12 sps:$4 sm:$0xff]   ;;  %v20121_v56 = vld [vmem:[%s22578_s6 + $0x61c] ss:$12 sps:$4 sm:$0xff]  }
0x26ec   : > { %18095 = vmatpush3.bf16.msra.mxu1 %v20077_v48  ;;  %10758 = vmatprep.mubr.bf16.mxu1 %v24471_v31  ;;  %v20119_v39 = vld [vmem:[%s22578_s6 + $0x618] ss:$12 sps:$4 sm:$0xff]   ;;  %v20122_v36 = vld [vmem:[%s22578_s6 + $0x630] ss:$12 sps:$4 sm:$0xff]   ;;  %v20125_v6 = vld [vmem:[%s22578_s6 + $0x648] ss:$12 sps:$4 sm:$0xff]  }
0x26ed   : > { %18096 = vmatprep.subr.bf16.mxu1 %v20081_v17  ;;  %v20127_v3 = vld [vmem:[%s22578_s6 + $0x64c] ss:$12 sps:$4 sm:$0xff]   ;;  %v20130_v42 = vld [vmem:[%s22578_s6 + $0x664] ss:$12 sps:$4 sm:$0xff]  }
0x26ee   : > { %10409 = vmatpush1.bf16.msra.mxu0 %v20078_v49  ;;  %v24521_v48 = vld [vmem:[%s25075_s30] sm:$0x7] }
0x26ef   : > { %10410 = vmatprep.subr.bf16.mxu0 %v20085_v21  ;;  %v20131_v17 = vld [vmem:[%s22578_s6 + $0x678] ss:$12 sps:$4 sm:$0xff]   ;;  %v8723_v49 = vrot.slane %v24521_v48, %v25068_v59  ;;  %v20136_v21 = vld [vmem:[%s22578_s6 + $0x694] ss:$12 sps:$4 sm:$0xff]  }
0x26f0   : > { %18097 = vmatpush3.bf16.msra.mxu1 %v20082_v34 }
0x26f1   : > { %18098 = vmatprep.subr.bf16.mxu1 %v20086_v25 }
0x26f2   : > { %10411 = vmatpush1.bf16.msra.mxu0 %v20083_v44  ;;  %v20134_v44 = vld [vmem:[%s22578_s6 + $0x690] ss:$12 sps:$4 sm:$0xff]  }
0x26f3   : > { %10412 = vmatprep.subr.bf16.mxu0 %v20090_v27 }
0x26f4   : > { %18099 = vmatpush3.bf16.msra.mxu1 %v20087_v19 }
0x26f5   : > { %18100 = vmatprep.subr.bf16.mxu1 %v20091_v55 }
0x26f6   : > { %10413 = vmatpush1.bf16.msra.mxu0 %v20088_v28  ;;  %v20139_v28 = vld [vmem:[%s22578_s6 + $0x6ac] ss:$12 sps:$4 sm:$0xff]  }
0x26f7   : > { %10414 = vmatprep.subr.bf16.mxu0 %v20095_v13 }
0x26f8   : > { %18101 = vmatpush3.bf16.msra.mxu1 %v20092_v35 }
0x26f9   : > { %18102 = vmatprep.subr.bf16.mxu1 %v20096_v2 }
0x26fa   : > { %10415 = vmatpush1.bf16.msra.mxu0 %v20093_v46  ;;  %v20137_v46 = vld [vmem:[%s22578_s6 + $0x6a8] ss:$12 sps:$4 sm:$0xff]  }
0x26fb   : > { %10416 = vmatprep.subr.bf16.mxu0 %v20100_v5 }
0x26fc   : > { %18103 = vmatpush3.bf16.msra.mxu1 %v20097_v29  ;;  %v20142_v29 = vld [vmem:[%s22578_s6 + $0x6c4] ss:$12 sps:$4 sm:$0xff]  }
0x26fd   : > { %18104 = vmatprep.subr.bf16.mxu1 %v20101_v43  ;;  %v20140_v43 = vld [vmem:[%s22578_s6 + $0x6c0] ss:$12 sps:$4 sm:$0xff]  }
0x26fe   : > { %10417 = vmatpush1.bf16.msra.mxu0 %v20098_v52  ;;  %v20145_v52 = vld [vmem:[%s22578_s6 + $0x6dc] ss:$12 sps:$4 sm:$0xff]  }
0x26ff   : > { %10418 = vmatprep.subr.bf16.mxu0 %v20105_v26  ;;  %v20143_v26 = vld [vmem:[%s22578_s6 + $0x6d8] ss:$12 sps:$4 sm:$0xff]  }
0x2700   : > { %18105 = vmatpush3.bf16.msra.mxu1 %v20102_v15  ;;  %v20148_v15 = vld [vmem:[%s22578_s6 + $0x6f4] ss:$12 sps:$4 sm:$0xff]  }
0x2701   : > { %v18000_v58 = vpop.f32.mrb[124].mxu1  ;;  %18106 = vmatprep.subr.bf16.mxu1 %v20106_v24  ;;  %v20146_v24 = vld [vmem:[%s22578_s6 + $0x6f0] ss:$12 sps:$4 sm:$0xff]  }
0x2702   : > { %v18001_v4 = vpop.f32.mrb[125].mxu1  ;;  %10419 = vmatpush1.bf16.msra.mxu0 %v20103_v41  ;;  %v20151_v41 = vld [vmem:[%s22578_s6 + $0x70c] ss:$12 sps:$4 sm:$0xff]  }
0x2703   : > { %v18002_v53 = vadd.f32 %v18001_v4, %v18000_v58  ;;  %v18003_v23 = vpop.f32.mrb[126].mxu1  ;;  %10420 = vmatprep.subr.bf16.mxu0 %v20110_v47  ;;  %v20149_v47 = vld [vmem:[%s22578_s6 + $0x708] ss:$12 sps:$4 sm:$0xff]   ;;  %v20152_v58 = vld [vmem:[%s22578_s6 + $0x720] ss:$12 sps:$4 sm:$0xff]  }
0x2704   : > { %v18004_v63 = vpop.f32.mrb[127].mxu1  ;;  %18107 = vmatpush3.bf16.msra.mxu1 %v20107_v14  ;;  %v20154_v14 = vld [vmem:[%s22578_s6 + $0x724] ss:$12 sps:$4 sm:$0xff]  }
0x2705   : > { %v18005_v11 = vadd.f32 %v18004_v63, %v18003_v23  ;;  %18108 = vmatprep.subr.bf16.mxu1 %v20111_v51  ;;  %v10556_v27 = vadd.f32 %v18002_v53, %v8723_v49  ;;  %v20157_v51 = vld [vmem:[%s22578_s6 + $0x73c] ss:$12 sps:$4 sm:$0xff]   ;;  %v20155_v4 = vld [vmem:[%s22578_s6 + $0x738] ss:$12 sps:$4 sm:$0xff]  }
0x2706   : > { %10421 = vmatpush1.bf16.msra.mxu0 %v20108_v45  ;;  %v20160_v45 = vld [vmem:[%s22578_s6 + $0x754] ss:$12 sps:$4 sm:$0xff]   ;;  %v20158_v53 = vld [vmem:[%s22578_s6 + $0x750] ss:$12 sps:$4 sm:$0xff]   ;;  %v20163_v23 = vld [vmem:[%s22578_s6 + $0x76c] ss:$12 sps:$4 sm:$0xff]  }
0x2707   : > { %10422 = vmatprep.subr.bf16.mxu0 %v20115_v62  ;;  %v10559_v35 = vadd.f32 %v18005_v11, %v8723_v49  ;;  %v20161_v62 = vld [vmem:[%s22578_s6 + $0x768] ss:$12 sps:$4 sm:$0xff]   ;;  %v20166_v63 = vld [vmem:[%s22578_s6 + $0x784] ss:$12 sps:$4 sm:$0xff]  }
0x2708   : > { %18109 = vmatpush3.bf16.msra.mxu1 %v20112_v38  ;;  %v20164_v38 = vld [vmem:[%s22578_s6 + $0x780] ss:$12 sps:$4 sm:$0xff]   ;;  %v20169_v11 = vld [vmem:[%s22578_s6 + $0x79c] ss:$12 sps:$4 sm:$0xff]  }
0x270a   : > { %10423 = vmatpush1.bf16.msra.mxu0 %v20113_v33  ;;  %v20167_v33 = vld [vmem:[%s22578_s6 + $0x798] ss:$12 sps:$4 sm:$0xff]  }
0x270b   : > { %10759 = vmatmul.mubr.bf16.vlgmr.msra.gmra.mrb[144].mxu1 %v24466_v18  ;;  %10435 = vmatprep.subr.bf16.mxu0 %v20118_v9  ;;  %v20172_v9 = vld [vmem:[%s22578_s6 + $0x7b4] ss:$12 sps:$4 sm:$0xff]  }
0x270d   : > { %10425 = vmatmul.mubr.bf16.vlgmr.msra.gmra.mrb[116].mxu0 %v24369_v61  ;;  %v20128_v61 = vld [vmem:[%s22578_s6 + $0x660] ss:$12 sps:$4 sm:$0xff]  }
0x270e   : > { %10436 = vmatpush1.bf16.msra.mxu0 %v20116_v54  ;;  %10467 = vmatprep.mubr.bf16.mxu0 %v24468_v37  ;;  %v20133_v37 = vld [vmem:[%s22578_s6 + $0x67c] ss:$12 sps:$4 sm:$0xff]  }
0x270f   : > { %10437 = vmatprep.subr.bf16.mxu0 %v20121_v56  ;;  %v20170_v54 = vld [vmem:[%s22578_s6 + $0x7b0] ss:$12 sps:$4 sm:$0xff]   ;;  %v20175_v56 = vld [vmem:[%s22578_s6 + $0x7cc] ss:$12 sps:$4 sm:$0xff]  }
0x2712   : > { %10438 = vmatpush1.bf16.msra.mxu0 %v20119_v39  ;;  %v20173_v39 = vld [vmem:[%s22578_s6 + $0x7c8] ss:$12 sps:$4 sm:$0xff]  }
0x2713   : > { %10439 = vmatprep.subr.bf16.mxu0 %v20124_v7  ;;  %v20178_v7 = vld [vmem:[%s22578_s6 + $0x7e4] ss:$12 sps:$4 sm:$0xff]  }
0x2716   : > { %10440 = vmatpush1.bf16.msra.mxu0 %v20122_v36  ;;  %v20181_v36 = vld [vmem:[%s22578_s6 + $0x7fc] ss:$12 sps:$4 sm:$0xff]  }
0x2717   : > { %10441 = vmatprep.subr.bf16.mxu0 %v20127_v3  ;;  %v20179_v3 = vld [vmem:[%s22578_s6 + $0x7f8] ss:$12 sps:$4 sm:$0xff]  }
0x271a   : > { %10442 = vmatpush1.bf16.msra.mxu0 %v20125_v6 }
0x271b   : > { %10443 = vmatprep.subr.bf16.mxu0 %v20130_v42  ;;  %v20184_v42 = vld [vmem:[%s22578_s6 + $0x814] ss:$12 sps:$4 sm:$0xff]  }
0x271e   : > { %10444 = vmatpush1.bf16.msra.mxu0 %v20128_v61 }
0x271f   : > { %10445 = vmatprep.subr.bf16.mxu0 %v20133_v37 }
0x2721   : > { %v18022_v34 = vpop.f32.mrb[128].mxu1 }
0x2722   : > { %v18023_v25 = vpop.f32.mrb[129].mxu1  ;;  %10446 = vmatpush1.bf16.msra.mxu0 %v20131_v17 }
0x2723   : > { %v18024_v19 = vadd.f32 %v18023_v25, %v18022_v34  ;;  %v18025_v55 = vpop.f32.mrb[130].mxu1  ;;  %10447 = vmatprep.subr.bf16.mxu0 %v20136_v21  ;;  %v20182_v34 = vld [vmem:[%s22578_s6 + $0x810] ss:$12 sps:$4 sm:$0xff]   ;;  %v20187_v25 = vld [vmem:[%s22578_s6 + $0x82c] ss:$12 sps:$4 sm:$0xff]  }
0x2724   : > { %v18026_v13 = vpop.f32.mrb[131].mxu1 }
0x2725   : > { %v24529_v59 = vadd.f32 %v18024_v19, %v10556_v27  ;;  %v18027_v2 = vadd.f32 %v18026_v13, %v18025_v55  ;;  %v20185_v27 = vld [vmem:[%s22578_s6 + $0x828] ss:$12 sps:$4 sm:$0xff]   ;;  %v20190_v19 = vld [vmem:[%s22578_s6 + $0x844] ss:$12 sps:$4 sm:$0xff]   ;;  %v20188_v55 = vld [vmem:[%s22578_s6 + $0x840] ss:$12 sps:$4 sm:$0xff]  }
0x2726   : > { %10448 = vmatpush1.bf16.msra.mxu0 %v20134_v44  ;;  %v20191_v13 = vld [vmem:[%s22578_s6 + $0x858] ss:$12 sps:$4 sm:$0xff]  }
0x2727   : > { %v24532_v5 = vadd.f32 %v18027_v2, %v10559_v35  ;;  %10449 = vmatprep.subr.bf16.mxu0 %v20139_v28  ;;  %v20193_v28 = vld [vmem:[%s22578_s6 + $0x85c] ss:$12 sps:$4 sm:$0xff]   ;;  %v20196_v35 = vld [vmem:[%s22578_s6 + $0x874] ss:$12 sps:$4 sm:$0xff]   ;;  %v20199_v2 = vld [vmem:[%s22578_s6 + $0x88c] ss:$12 sps:$4 sm:$0xff]  }
0x272a   : > { %10450 = vmatpush1.bf16.msra.mxu0 %v20137_v46  ;;  %v20197_v46 = vld [vmem:[%s22578_s6 + $0x888] ss:$12 sps:$4 sm:$0xff]  }
0x272b   : > { %10451 = vmatprep.subr.bf16.mxu0 %v20142_v29  ;;  %v20200_v29 = vld [vmem:[%s22578_s6 + $0x8a0] ss:$12 sps:$4 sm:$0xff]  }
0x272e   : > { %10452 = vmatpush1.bf16.msra.mxu0 %v20140_v43  ;;  %v20205_v43 = vld [vmem:[%s22578_s6 + $0x8bc] ss:$12 sps:$4 sm:$0xff]  }
0x272f   : > { %10453 = vmatprep.subr.bf16.mxu0 %v20145_v52 }
0x2732   : > { %10454 = vmatpush1.bf16.msra.mxu0 %v20143_v26  ;;  %v20203_v26 = vld [vmem:[%s22578_s6 + $0x8b8] ss:$12 sps:$4 sm:$0xff]  }
0x2733   : > { %10455 = vmatprep.subr.bf16.mxu0 %v20148_v15 }
0x2736   : > { %10456 = vmatpush1.bf16.msra.mxu0 %v20146_v24  ;;  %v20208_v24 = vld [vmem:[%s22578_s6 + $0x8d4] ss:$12 sps:$4 sm:$0xff]  }
0x2737   : > { %10457 = vmatprep.subr.bf16.mxu0 %v20151_v41 }
0x273a   : > { %10458 = vmatpush1.bf16.msra.mxu0 %v20149_v47 }
0x273b   : > { %10459 = vmatprep.subr.bf16.mxu0 %v20154_v14 }
0x273e   : > { %10460 = vmatpush1.bf16.msra.mxu0 %v20152_v58 }
0x273f   : > { %10461 = vmatprep.subr.bf16.mxu0 %v20157_v51 }
0x2742   : > { %10462 = vmatpush1.bf16.msra.mxu0 %v20155_v4  ;;  %v20206_v4 = vld [vmem:[%s22578_s6 + $0x8d0] ss:$12 sps:$4 sm:$0xff]  }
0x2743   : > { %10463 = vmatprep.subr.bf16.mxu0 %v20160_v45  ;;  %v20211_v45 = vld [vmem:[%s22578_s6 + $0x8ec] ss:$12 sps:$4 sm:$0xff]  }
0x2746   : > { %10464 = vmatpush1.bf16.msra.mxu0 %v20158_v53 }
0x2747   : > { %10465 = vmatprep.subr.bf16.mxu0 %v20163_v23  ;;  %v20209_v23 = vld [vmem:[%s22578_s6 + $0x8e8] ss:$12 sps:$4 sm:$0xff]  }
0x274a   : > { %10466 = vmatpush1.bf16.msra.mxu0 %v20161_v62 }
0x274b   : > { %10478 = vmatprep.subr.bf16.mxu0 %v20166_v63 }
0x274d   : > { %10468 = vmatmul.mubr.bf16.vlgmr.msra.gmra.mrb[116].mxu0 %v24463_v20  ;;  %v20176_v20 = vld [vmem:[%s22578_s6 + $0x7e0] ss:$12 sps:$4 sm:$0xff]  }
0x274e   : > { %10479 = vmatpush1.bf16.msra.mxu0 %v20164_v38  ;;  %10510 = vmatprep.mubr.bf16.mxu0 %v24471_v31 }
0x274f   : > { %10480 = vmatprep.subr.bf16.mxu0 %v20169_v11 }
0x2752   : > { %10481 = vmatpush1.bf16.msra.mxu0 %v20167_v33 }
0x2753   : > { %10482 = vmatprep.subr.bf16.mxu0 %v20172_v9 }
0x2756   : > { %10483 = vmatpush1.bf16.msra.mxu0 %v20170_v54 }
0x2757   : > { %10484 = vmatprep.subr.bf16.mxu0 %v20175_v56 }
0x275a   : > { %10485 = vmatpush1.bf16.msra.mxu0 %v20173_v39 }
0x275b   : > { %10486 = vmatprep.subr.bf16.mxu0 %v20178_v7 }
0x275e   : > { %10487 = vmatpush1.bf16.msra.mxu0 %v20176_v20  ;;  %v18044_v31 = vpop.f32.mrb[132].mxu1 }
0x275f   : > { %v18045_v6 = vpop.f32.mrb[133].mxu1  ;;  %10488 = vmatprep.subr.bf16.mxu0 %v20181_v36 }
0x2760   : > { %v18046_v61 = vadd.f32 %v18045_v6, %v18044_v31  ;;  %v18047_v37 = vpop.f32.mrb[134].mxu1 }
0x2761   : > { %v18048_v17 = vpop.f32.mrb[135].mxu1 }
0x2762   : > { %v10638_v49 = vadd.f32 %v18046_v61, %v24529_v59  ;;  %v18049_v21 = vadd.f32 %v18048_v17, %v18047_v37  ;;  %10489 = vmatpush1.bf16.msra.mxu0 %v20179_v3  ;;  %v20194_v59 = vld [vmem:[%s22578_s6 + $0x870] ss:$12 sps:$4 sm:$0xff]   ;;  %v8715_v37 = vrot.slane %v24521_v48, %v25066_v30  ;;  %v8719_v17 = vrot.slane %v24521_v48, %v25067_v0 }
0x2763   : > { %10490 = vmatprep.subr.bf16.mxu0 %v20184_v42 }
0x2764   : > { %v10641_v44 = vadd.f32 %v18049_v21, %v24532_v5  ;;  %v20202_v5 = vld [vmem:[%s22578_s6 + $0x8a4] ss:$12 sps:$4 sm:$0xff]  }
0x2766   : > { %10491 = vmatpush1.bf16.msra.mxu0 %v20182_v34 }
0x2767   : > { %10492 = vmatprep.subr.bf16.mxu0 %v20187_v25 }
0x276a   : > { %10493 = vmatpush1.bf16.msra.mxu0 %v20185_v27 }
0x276b   : > { %10494 = vmatprep.subr.bf16.mxu0 %v20190_v19 }
0x276e   : > { %10495 = vmatpush1.bf16.msra.mxu0 %v20188_v55 }
0x276f   : > { %10496 = vmatprep.subr.bf16.mxu0 %v20193_v28  ;;  %v20276_v28 = vld [vmem:[#allocation24] ss:$48 sps:$4 sm:$0xff] (!%p17239_p13)  }
0x2772   : > { %10497 = vmatpush1.bf16.msra.mxu0 %v20191_v13  ;;  %v20277_v13 = vld [vmem:[#allocation24 + $0x64] ss:$48 sps:$4 sm:$0xff] (!%p17239_p13)  }
0x2773   : > { %10498 = vmatprep.subr.bf16.mxu0 %v20196_v35  ;;  %v20279_v35 = vld [vmem:[#allocation24 + $0x60] ss:$48 sps:$4 sm:$0xff] (!%p17239_p13)  }
0x2776   : > { %10499 = vmatpush1.bf16.msra.mxu0 %v20194_v59  ;;  %v20280_v59 = vld [vmem:[#allocation24 + $0xc4] ss:$48 sps:$4 sm:$0xff] (!%p17239_p13)  }
0x2777   : > { %10500 = vmatprep.subr.bf16.mxu0 %v20199_v2  ;;  %v20298_v2 = vld [vmem:[#allocation24 + $0x604] ss:$48 sps:$4 sm:$0xff] (!%p17239_p13)  }
0x277a   : > { %10501 = vmatpush1.bf16.msra.mxu0 %v20197_v46  ;;  %v20282_v46 = vld [vmem:[#allocation24 + $0xc0] ss:$48 sps:$4 sm:$0xff] (!%p17239_p13)  }
0x277b   : > { %10502 = vmatprep.subr.bf16.mxu0 %v20202_v5  ;;  %v20302_v5 = vld [vmem:[#allocation24 + $0x600] ss:$48 sps:$4 sm:$0xff] (!%p17239_p13)  }
0x277e   : > { %v18066_v52 = vpop.f32.mrb[136].mxu1  ;;  %10503 = vmatpush1.bf16.msra.mxu0 %v20200_v29  ;;  %v20304_v29 = vld [vmem:[#allocation24 + $0x664] ss:$48 sps:$4 sm:$0xff] (!%p17239_p13)  }
0x277f   : > { %v18067_v15 = vpop.f32.mrb[137].mxu1  ;;  %10504 = vmatprep.subr.bf16.mxu0 %v20205_v43  ;;  %v20283_v43 = vld [vmem:[#allocation24 + $0x124] ss:$48 sps:$4 sm:$0xff] (!%p17239_p13)  }
0x2780   : > { %v18068_v41 = vadd.f32 %v18067_v15, %v18066_v52  ;;  %v18069_v47 = vpop.f32.mrb[138].mxu1  ;;  %v20308_v52 = vld [vmem:[#allocation24 + $0x660] ss:$48 sps:$4 sm:$0xff] (!%p17239_p13)   ;;  %v20286_v15 = vld [vmem:[#allocation24 + $0x184] ss:$48 sps:$4 sm:$0xff] (!%p17239_p13)  }
0x2781   : > { %v18070_v14 = vpop.f32.mrb[139].mxu1 }
0x2782   : > { %v10679_v58 = vadd.f32 %v18068_v41, %v10638_v49  ;;  %v18071_v51 = vadd.f32 %v18070_v14, %v18069_v47  ;;  %10505 = vmatpush1.bf16.msra.mxu0 %v20203_v26  ;;  %v20285_v26 = vld [vmem:[#allocation24 + $0x120] ss:$48 sps:$4 sm:$0xff] (!%p17239_p13)   ;;  %v20289_v41 = vld [vmem:[#allocation24 + $0x1e4] ss:$48 sps:$4 sm:$0xff] (!%p17239_p13)  }
0x2783   : > { %10506 = vmatprep.subr.bf16.mxu0 %v20208_v24  ;;  %v20288_v24 = vld [vmem:[#allocation24 + $0x180] ss:$48 sps:$4 sm:$0xff] (!%p17239_p13)   ;;  %v20292_v14 = vld [vmem:[#allocation24 + $0x244] ss:$48 sps:$4 sm:$0xff] (!%p17239_p13)  }
0x2784   : > { %v10682_v53 = vadd.f32 %v18071_v51, %v10641_v44  ;;  %v20291_v47 = vld [vmem:[#allocation24 + $0x1e0] ss:$48 sps:$4 sm:$0xff] (!%p17239_p13)   ;;  %v20295_v51 = vld [vmem:[#allocation24 + $0x2a4] ss:$48 sps:$4 sm:$0xff] (!%p17239_p13)  }
0x2786   : > { %10507 = vmatpush1.bf16.msra.mxu0 %v20206_v4  ;;  %v20297_v4 = vld [vmem:[#allocation24 + $0x2a0] ss:$48 sps:$4 sm:$0xff] (!%p17239_p13)  }
0x2787   : > { %10508 = vmatprep.subr.bf16.mxu0 %v20211_v45  ;;  %v20300_v45 = vld [vmem:[#allocation24 + $0x304] ss:$48 sps:$4 sm:$0xff] (!%p17239_p13)  }
0x278a   : > { %10509 = vmatpush1.bf16.msra.mxu0 %v20209_v23  ;;  %v20306_v23 = vld [vmem:[#allocation24 + $0x364] ss:$48 sps:$4 sm:$0xff] (!%p17239_p13)  }
0x278b   : > { %13094 = vmatprep.subr.bf16.mxu0 (!%p17239_p13), %v20298_v2  ;;  %v20340_v2 = vld [vmem:[#allocation24 + $0x8a4] ss:$48 sps:$4 sm:$0xff] (!%p17239_p13)  }
0x278d   : > { %10511 = vmatmul.mubr.bf16.vlgmr.msra.gmra.mrb[116].mxu0 %v24466_v18 }
0x278e   : > { %13095 = vmatpush1.bf16.msra.mxu0 (!%p17239_p13), %v20302_v5  ;;  %v20342_v5 = vld [vmem:[#allocation24 + $0x5a4] ss:$48 sps:$4 sm:$0xff] (!%p17239_p13)  }
0x278f   : > { %13096 = vmatprep.subr.bf16.mxu0 (!%p17239_p13), %v20304_v29  ;;  %v20344_v29 = vld [vmem:[#allocation24 + $0x8a0] ss:$48 sps:$4 sm:$0xff] (!%p17239_p13)  }
0x2792   : > { %13097 = vmatpush1.bf16.msra.mxu0 (!%p17239_p13), %v20308_v52  ;;  %v20348_v52 = vld [vmem:[#allocation24 + $0x14] ss:$48 sps:$4 sm:$0xff] (!%p17239_p13)  }
0x27be   : > { %v18088_v62 = vpop.f32.mrb[140].mxu1 }
0x27bf   : > { %v18089_v63 = vpop.f32.mrb[141].mxu1 }
0x27c0   : > { %v18090_v38 = vadd.f32 %v18089_v63, %v18088_v62  ;;  %v18091_v11 = vpop.f32.mrb[142].mxu1 }
0x27c1   : > { %v18092_v33 = vpop.f32.mrb[143].mxu1 }
0x27c2   : > { %v10720_v9 = vadd.f32 %v18090_v38, %v10679_v58  ;;  %v18093_v54 = vadd.f32 %v18092_v33, %v18091_v11  ;;  %v20294_v58 = vld [vmem:[#allocation24 + $0x240] ss:$48 sps:$4 sm:$0xff] (!%p17239_p13)  }
0x27c4   : > { %v10723_v56 = vadd.f32 %v18093_v54, %v10682_v53  ;;  %v20303_v53 = vld [vmem:[#allocation24 + $0x300] ss:$48 sps:$4 sm:$0xff] (!%p17239_p13)  }
0x27de   : > { %v18110_v39 = vpop.f32.mrb[144].mxu1 }
0x27df   : > { %v18111_v7 = vpop.f32.mrb[145].mxu1 }
0x27e0   : > { %v18112_v20 = vadd.f32 %v18111_v7, %v18110_v39  ;;  %v18113_v36 = vpop.f32.mrb[146].mxu1 }
0x27e1   : > { %v18114_v31 = vpop.f32.mrb[147].mxu1 }
0x27e2   : > { %v10761_v3 = vadd.f32 %v18112_v20, %v10720_v9  ;;  %v18115_v6 = vadd.f32 %v18114_v31, %v18113_v36 }
0x27e4   : > { %v24588_v42 = vadd.f32 %v10761_v3, %v23799_v32  ;;  %v10764_v61 = vadd.f32 %v18115_v6, %v10723_v56 }
0x27e6   : > { %10775 = vst [vmem:[#allocation2 + $0x10] sm:$0xff] %v24588_v42  ;;  %v24592_v18 = vadd.f32 %v10764_v61, %v23838_v60 }
0x27e8   : > { %10778 = vst [vmem:[#allocation2 + $0x28] sm:$0xff] %v24592_v18 }
0x2860   : > { %v10512_v49 = vpop.f32.mrb[116].mxu0 }
0x2861   : > { %v18631_v21 = vadd.f32 %v10512_v49, %v8715_v37  ;;  %v10514_v34 = vpop.f32.mrb[117].mxu0 }
0x2862   : > { %v18632_v25 = vadd.f32 %v10514_v34, %v8719_v17  ;;  %v10516_v32 = vpop.f32.mrb[118].mxu0  ;;  %10782 = sbr.rel (%p17239_p13) target bundleno = 11712 (0x2dc0), region = 184  ;;  %v20310_v34 = vld [vmem:[#allocation24 + $0x6c4] ss:$48 sps:$4 sm:$0xff] (!%p17239_p13)  }
0x2863   : > { %v24600_v44 = vadd.f32 %v18631_v21, %v23789_v12  ;;  %v18633_v27 = vadd.f32 %v10516_v32, %v8715_v37  ;;  %v10518_v19 = vpop.f32.mrb[119].mxu0  ;;  %v20309_v21 = vld [vmem:[#allocation24 + $0x360] ss:$48 sps:$4 sm:$0xff] (!%p17239_p13)   ;;  %13098 = vmatprep.subr.bf16.mxu0 (!%p17239_p13), %v20310_v34 }
0x2864   : > { %v24603_v60 = vadd.f32 %v18632_v25, %v23792_v40  ;;  %v18634_v55 = vadd.f32 %v10518_v19, %v8719_v17  ;;  %v20314_v25 = vld [vmem:[#allocation24 + $0x6c0] ss:$48 sps:$4 sm:$0xff] (!%p17239_p13)  }
0x2865   : > { %10773 = vst [vmem:[#allocation2] sm:$0xff] %v24600_v44  ;;  %v24607_v30 = vadd.f32 %v18633_v27, %v23833_v10  ;;  %v20315_v32 = vld [vmem:[#allocation24 + $0x3c0] ss:$48 sps:$4 sm:$0xff] (!%p17239_p13)   ;;  %13099 = vmatpush1.bf16.msra.mxu0 (!%p17239_p13), %v20314_v25  ;;  %v20318_v27 = vld [vmem:[#allocation24 + $0x424] ss:$48 sps:$4 sm:$0xff] (!%p17239_p13)  }
0x2866   : > { %10774 = vst [vmem:[#allocation2 + $0x8] sm:$0xff] %v24603_v60  ;;  %v24611_v0 = vadd.f32 %v18634_v55, %v23836_v1  ;;  %v10785_v12 = vadd.f32 (!%p17239_p13), %v24603_v60, %v24600_v44  ;;  %v20274_v1 = vld [vmem:[#allocation24 + $0x4] ss:$48 sps:$4 sm:$0xff] (!%p17239_p13)   ;;  %v20320_v19 = vld [vmem:[#allocation24 + $0x720] ss:$48 sps:$4 sm:$0xff] (!%p17239_p13)  }
0x2867   : > { %10776 = vst [vmem:[#allocation2 + $0x18] sm:$0xff] %v24607_v30  ;;  %13051 = vmatprep.subr.bf16.mxu1 (!%p17239_p13), %v20274_v1  ;;  %v20322_v55 = vld [vmem:[#allocation24 + $0x784] ss:$48 sps:$4 sm:$0xff] (!%p17239_p13)   ;;  %v20333_v1 = vld [vmem:[#allocation24 + $0x4e0] ss:$48 sps:$4 sm:$0xff] (!%p17239_p13)  }
0x2868   : > { %10777 = vst [vmem:[#allocation2 + $0x20] sm:$0xff] %v24611_v0  ;;  %v10789_v40 = vadd.f32 (!%p17239_p13), %v24611_v0, %v24607_v30  ;;  %v10786_v10 = vadd.f32 (!%p17239_p13), %v10785_v12, %v24588_v42  ;;  %13052 = vmatpush1.bf16.msra.mxu1 (!%p17239_p13), %v20276_v28  ;;  %v20327_v12 = vld [vmem:[#allocation24 + $0x480] ss:$48 sps:$4 sm:$0xff] (!%p17239_p13)   ;;  %v20334_v28 = vld [vmem:[#allocation24 + $0x844] ss:$48 sps:$4 sm:$0xff] (!%p17239_p13)  }
0x2869   : > { %13053 = vmatprep.subr.bf16.mxu1 %v20277_v13  ;;  %v20336_v13 = vld [vmem:[#allocation24 + $0x544] ss:$48 sps:$4 sm:$0xff]  }
0x286a   : > { %10787 = vadd.xlane.f32.xlu0 %v10786_v10  ;;  %v10790_v48 = vadd.f32 %v10789_v40, %v24592_v18  ;;  %v20328_v40 = vld [vmem:[#allocation24 + $0x7e4] ss:$48 sps:$4 sm:$0xff]  }
0x286b   : > { %v20330_v10 = vld [vmem:[#allocation24 + $0x4e4] ss:$48 sps:$4 sm:$0xff]  }
0x286c   : > { %13054 = vmatpush1.bf16.msra.mxu1 %v20279_v35  ;;  %v20338_v35 = vld [vmem:[#allocation24 + $0x840] ss:$48 sps:$4 sm:$0xff]  }
0x286d   : > { %13055 = vmatprep.subr.bf16.mxu1 %v20280_v59  ;;  %v20339_v59 = vld [vmem:[#allocation24 + $0x540] ss:$48 sps:$4 sm:$0xff]  }
0x286e   : > { %10791 = vadd.xlane.f32.xlu0 %v10790_v48  ;;  %v20332_v48 = vld [vmem:[#allocation24 + $0x7e0] ss:$48 sps:$4 sm:$0xff]  }
0x2870   : > { %13056 = vmatpush1.bf16.msra.mxu1 %v20282_v46  ;;  %v21805_v46 = vmov 0  }
0x2871   : > { %13057 = vmatprep.subr.bf16.mxu1 %v20283_v43  ;;  %13126 = vmatprep.mubr.bf16.mxu0 %v21805_v46  ;;  %v20345_v43 = vld [vmem:[#allocation24 + $0x5a0] ss:$48 sps:$4 sm:$0xff]  }
0x2874   : > { %13058 = vmatpush1.bf16.msra.mxu1 %v20285_v26  ;;  %v20351_v26 = vld [vmem:[#allocation24 + $0xc] ss:$48 sps:$4 sm:$0xff]  }
0x2875   : > { %13059 = vmatprep.subr.bf16.mxu1 %v20286_v15 }
0x2878   : > { %13060 = vmatpush1.bf16.msra.mxu1 %v20288_v24 }
0x2879   : > { %13061 = vmatprep.subr.bf16.mxu1 %v20289_v41 }
0x287c   : > { %13062 = vmatpush1.bf16.msra.mxu1 %v20291_v47 }
0x287d   : > { %13063 = vmatprep.subr.bf16.mxu1 %v20292_v14 }
0x2880   : > { %13064 = vmatpush1.bf16.msra.mxu1 %v20294_v58 }
0x2881   : > { %13065 = vmatprep.subr.bf16.mxu1 %v20295_v51  ;;  %v10783_v51 = vld [vmem:[#allocation21] sm:$0x7] }
0x2884   : > { %13066 = vmatpush1.bf16.msra.mxu1 %v20297_v4 }
0x2885   : > { %13067 = vmatprep.subr.bf16.mxu1 %v20300_v45  ;;  %v10784_v45 = vld [vmem:[#allocation23] sm:$0x7] }
0x2888   : > { %13068 = vmatpush1.bf16.msra.mxu1 %v20303_v53 }
0x2889   : > { %13069 = vmatprep.subr.bf16.mxu1 %v20306_v23  ;;  %v25077_v23 = vld [vmem:[#allocation53_spill] sm:$0xff] }
0x288c   : > { %13070 = vmatpush1.bf16.msra.mxu1 %v20309_v21 }
0x28f7   : > { %v10788_v62 = vpop.xlane.xlu0 %10787 }
0x28f8   : > { %v10793_v63 = vmul.f32 0.0026041667, %v10788_v62  ;;  %v10835_v62 = vrot.slane %v10783_v51, %v25077_v23 }
0x28fa   : > { %v24623_v38 = vsub.f32 %v24600_v44, %v10793_v63  ;;  %v24626_v11 = vsub.f32 %v24603_v60, %v10793_v63  ;;  %v24629_v33 = vsub.f32 %v24588_v42, %v10793_v63  ;;  %v20316_v44 = vld [vmem:[#allocation24 + $0x724] ss:$48 sps:$4 sm:$0xff]   ;;  %v20321_v60 = vld [vmem:[#allocation24 + $0x420] ss:$48 sps:$4 sm:$0xff]  }
0x28fb   : > { %v10792_v9 = vpop.xlane.xlu0 %10791  ;;  %13100 = vmatprep.subr.bf16.mxu0 %v20316_v44 }
0x28fc   : > { %v10794_v54 = vmul.f32 0.0026041667, %v10792_v9  ;;  %v10801_v56 = vmul.f32 %v24623_v38, %v24623_v38  ;;  %v10802_v39 = vmul.f32 %v24626_v11, %v24626_v11  ;;  %v10803_v7 = vmul.f32 %v24629_v33, %v24629_v33  ;;  %13101 = vmatpush1.bf16.msra.mxu0 %v20320_v19  ;;  %v25078_v9 = vld [vmem:[#allocation55_spill] sm:$0xff] }
0x28fd   : > { %13102 = vmatprep.subr.bf16.mxu0 %v20322_v55  ;;  %v20346_v19 = vld [vmem:[#allocation24 + $0x10] ss:$48 sps:$4 sm:$0xff]  }
0x28fe   : > { %v24638_v20 = vsub.f32 %v24607_v30, %v10794_v54  ;;  %v24641_v36 = vsub.f32 %v24611_v0, %v10794_v54  ;;  %v24644_v31 = vsub.f32 %v24592_v18, %v10794_v54  ;;  %v10807_v3 = vadd.f32 %v10802_v39, %v10801_v56  ;;  %v20312_v18 = vld [vmem:[#allocation24 + $0x3c4] ss:$48 sps:$4 sm:$0xff]   ;;  %v20326_v0 = vld [vmem:[#allocation24 + $0x780] ss:$48 sps:$4 sm:$0xff]  }
0x28ff   : > { %13071 = vmatprep.subr.bf16.mxu1 %v20312_v18  ;;  %v20324_v30 = vld [vmem:[#allocation24 + $0x484] ss:$48 sps:$4 sm:$0xff]   ;;  %v10839_v54 = vrot.slane %v10783_v51, %v25078_v9 }
0x2900   : > { %v10808_v6 = vadd.f32 %v10807_v3, %v10803_v7  ;;  %v10804_v42 = vmul.f32 %v24638_v20, %v24638_v20  ;;  %v10805_v61 = vmul.f32 %v24641_v36, %v24641_v36  ;;  %v10806_v37 = vmul.f32 %v24644_v31, %v24644_v31  ;;  %13072 = vmatpush1.bf16.msra.mxu1 %v20315_v32  ;;  %v25079_v39 = vld [vmem:[#allocation54_spill] sm:$0xff] }
0x2901   : > { %13073 = vmatprep.subr.bf16.mxu1 %v20318_v27  ;;  %13103 = vmatpush1.bf16.msra.mxu0 %v20326_v0  ;;  %v10831_v7 = vrot.slane %v10783_v51, %v25079_v39  ;;  %v10853_v21 = vrot.slane %v10784_v45, %v25079_v39  ;;  %v20382_v51 = vld [vmem:[#allocation24 + $0x250] ss:$48 sps:$4 sm:$0xff]  }
0x2902   : > { %10809 = vadd.xlane.f32.xlu1 %v10808_v6  ;;  %v10811_v17 = vadd.f32 %v10805_v61, %v10804_v42  ;;  %13104 = vmatprep.subr.bf16.mxu0 %v20328_v40  ;;  %v10857_v6 = vrot.slane %v10784_v45, %v25077_v23  ;;  %v10861_v42 = vrot.slane %v10784_v45, %v25078_v9  ;;  %v20352_v40 = vld [vmem:[#allocation24 + $0x70] ss:$48 sps:$4 sm:$0xff]   ;;  %v20390_v45 = vld [vmem:[#allocation24 + $0x2b4] ss:$48 sps:$4 sm:$0xff]  }
0x2904   : > { %v10812_v49 = vadd.f32 %v10811_v17, %v10806_v37  ;;  %13074 = vmatpush1.bf16.msra.mxu1 %v20321_v60 }
0x2905   : > { %13075 = vmatprep.subr.bf16.mxu1 %v20324_v30  ;;  %13105 = vmatpush1.bf16.msra.mxu0 %v20332_v48  ;;  %v20360_v48 = vld [vmem:[#allocation24 + $0xd4] ss:$48 sps:$4 sm:$0xff]  }
0x2906   : > { %10813 = vadd.xlane.f32.xlu1 %v10812_v49  ;;  %13106 = vmatprep.subr.bf16.mxu0 %v20334_v28  ;;  %v20358_v28 = vld [vmem:[#allocation24 + $0xd0] ss:$48 sps:$4 sm:$0xff]  }
0x2908   : > { %13076 = vmatpush1.bf16.msra.mxu1 %v20327_v12  ;;  %v20357_v12 = vld [vmem:[#allocation24 + $0x6c] ss:$48 sps:$4 sm:$0xff]  }
0x2909   : > { %13077 = vmatprep.subr.bf16.mxu1 %v20330_v10  ;;  %13107 = vmatpush1.bf16.msra.mxu0 %v20338_v35  ;;  %v20355_v10 = vld [vmem:[#allocation24 + $0x68] ss:$48 sps:$4 sm:$0xff]   ;;  %v20366_v35 = vld [vmem:[#allocation24 + $0x134] ss:$48 sps:$4 sm:$0xff]  }
0x290a   : > { %13108 = vmatprep.subr.bf16.mxu0 %v20340_v2  ;;  %v20364_v2 = vld [vmem:[#allocation24 + $0x130] ss:$48 sps:$4 sm:$0xff]  }
0x290c   : > { %13078 = vmatpush1.bf16.msra.mxu1 %v20333_v1  ;;  %v20363_v1 = vld [vmem:[#allocation24 + $0xcc] ss:$48 sps:$4 sm:$0xff]  }
0x290d   : > { %13079 = vmatprep.subr.bf16.mxu1 %v20336_v13  ;;  %13109 = vmatpush1.bf16.msra.mxu0 %v20344_v29  ;;  %v20361_v13 = vld [vmem:[#allocation24 + $0xc8] ss:$48 sps:$4 sm:$0xff]   ;;  %v20372_v29 = vld [vmem:[#allocation24 + $0x194] ss:$48 sps:$4 sm:$0xff]  }
0x290e   : > { %13223 = vmatprep.subr.bf16.mxu0 %v20348_v52  ;;  %v20370_v52 = vld [vmem:[#allocation24 + $0x190] ss:$48 sps:$4 sm:$0xff]  }
0x2910   : > { %13080 = vmatpush1.bf16.msra.mxu1 %v20339_v59  ;;  %v20369_v59 = vld [vmem:[#allocation24 + $0x12c] ss:$48 sps:$4 sm:$0xff]  }
0x2911   : > { %13081 = vmatprep.subr.bf16.mxu1 %v20342_v5  ;;  %v20367_v5 = vld [vmem:[#allocation24 + $0x128] ss:$48 sps:$4 sm:$0xff]  }
0x2914   : > { %13082 = vmatpush1.bf16.msra.mxu1 %v20345_v43  ;;  %v20375_v43 = vld [vmem:[#allocation24 + $0x18c] ss:$48 sps:$4 sm:$0xff]  }
0x2915   : > { %13137 = vmatprep.subr.bf16.mxu1 %v20351_v26  ;;  %v20373_v26 = vld [vmem:[#allocation24 + $0x188] ss:$48 sps:$4 sm:$0xff]  }
0x298f   : > { %v10810_v15 = vpop.xlane.xlu1 %10809 }
0x2990   : > { %v10815_v24 = vmul.f32 0.0026041667, %v10810_v15  ;;  %v20378_v15 = vld [vmem:[#allocation24 + $0x1f4] ss:$48 sps:$4 sm:$0xff]  }
0x2992   : > { %v10817_v41 = vadd.f32 1e-05, %v10815_v24  ;;  %v20381_v24 = vld [vmem:[#allocation24 + $0x1ec] ss:$48 sps:$4 sm:$0xff]  }
0x2993   : > { %v10814_v47 = vpop.xlane.xlu1 %10813 }
0x2994   : > { %21114 = vrsqrt.f32 %v10817_v41  ;;  %v10816_v14 = vmul.f32 0.0026041667, %v10814_v47  ;;  %v20376_v41 = vld [vmem:[#allocation24 + $0x1f0] ss:$48 sps:$4 sm:$0xff]   ;;  %v20379_v47 = vld [vmem:[#allocation24 + $0x1e8] ss:$48 sps:$4 sm:$0xff]  }
0x2996   : > { %v10818_v58 = vadd.f32 1e-05, %v10816_v14  ;;  %v20384_v14 = vld [vmem:[#allocation24 + $0x254] ss:$48 sps:$4 sm:$0xff]  }
0x2998   : > { %21116 = vrsqrt.f32 %v10818_v58  ;;  %v20387_v58 = vld [vmem:[#allocation24 + $0x24c] ss:$48 sps:$4 sm:$0xff]  }
0x299e   : > { %v21115_v4 = vpop.eup %21114 }
0x299f   : > { %v10822_v53 = vmul.f32 %v21115_v4, %v24626_v11  ;;  %v10823_v63 = vmul.f32 %v21115_v4, %v24629_v33  ;;  %v10821_v56 = vmul.f32 %v21115_v4, %v24623_v38  ;;  %v20385_v4 = vld [vmem:[#allocation24 + $0x248] ss:$48 sps:$4 sm:$0xff]  }
0x29a1   : > { %v10844_v37 = vmul.f32 %v10835_v62, %v10822_v53  ;;  %v10845_v17 = vmul.f32 %v10839_v54, %v10823_v63  ;;  %v10843_v33 = vmul.f32 %v10831_v7, %v10821_v56  ;;  %v20393_v53 = vld [vmem:[#allocation24 + $0x2ac] ss:$48 sps:$4 sm:$0xff]   ;;  %v20391_v63 = vld [vmem:[#allocation24 + $0x2a8] ss:$48 sps:$4 sm:$0xff]  }
0x29a2   : > { %v21117_v3 = vpop.eup %21116  ;;  %v20399_v56 = vld [vmem:[#allocation24 + $0x30c] ss:$48 sps:$4 sm:$0xff]  }
0x29a3   : > { %v10825_v61 = vmul.f32 %v21117_v3, %v24641_v36  ;;  %v10826_v11 = vmul.f32 %v21117_v3, %v24644_v31  ;;  %v10824_v49 = vmul.f32 %v21117_v3, %v24638_v20  ;;  %v10866_v25 = vadd.f32 %v10857_v6, %v10844_v37  ;;  %v20349_v31 = vld [vmem:[#allocation24 + $0x8] ss:$48 sps:$4 sm:$0xff]   ;;  %v20354_v20 = vld [vmem:[#allocation24 + $0x74] ss:$48 sps:$4 sm:$0xff]  }
0x29a4   : > { %v10867_v44 = vadd.f32 %v10861_v42, %v10845_v17  ;;  %v10865_v60 = vadd.f32 %v10853_v21, %v10843_v33  ;;  %v20397_v3 = vld [vmem:[#allocation24 + $0x308] ss:$48 sps:$4 sm:$0xff]   ;;  %v20411_v17 = vld [vmem:[#allocation24 + $0x3cc] ss:$48 sps:$4 sm:$0xff]  }
0x29a5   : > { %v10847_v34 = vmul.f32 %v10835_v62, %v10825_v61  ;;  %v10848_v38 = vmul.f32 %v10839_v54, %v10826_v11  ;;  %v10846_v18 = vmul.f32 %v10831_v7, %v10824_v49  ;;  %v20388_v62 = vld [vmem:[#allocation24 + $0x2b0] ss:$48 sps:$4 sm:$0xff]   ;;  %v20396_v54 = vld [vmem:[#allocation24 + $0x314] ss:$48 sps:$4 sm:$0xff]   ;;  %v20403_v37 = vld [vmem:[#allocation24 + $0x368] ss:$48 sps:$4 sm:$0xff]  }
0x29a6   : > { %v20394_v7 = vld [vmem:[#allocation24 + $0x310] ss:$48 sps:$4 sm:$0xff]   ;;  %v20408_v11 = vld [vmem:[#allocation24 + $0x3d4] ss:$48 sps:$4 sm:$0xff]   ;;  %v20409_v33 = vld [vmem:[#allocation24 + $0x3c8] ss:$48 sps:$4 sm:$0xff]  }
0x29a7   : > { %v10869_v32 = vadd.f32 %v10857_v6, %v10847_v34  ;;  %v10870_v27 = vadd.f32 %v10861_v42, %v10848_v38  ;;  %v10868_v55 = vadd.f32 %v10853_v21, %v10846_v18  ;;  %v20402_v6 = vld [vmem:[#allocation24 + $0x374] ss:$48 sps:$4 sm:$0xff]   ;;  %v20405_v42 = vld [vmem:[#allocation24 + $0x36c] ss:$48 sps:$4 sm:$0xff]   ;;  %v20400_v61 = vld [vmem:[#allocation24 + $0x370] ss:$48 sps:$4 sm:$0xff]  }
0x29a8   : > { %v20406_v49 = vld [vmem:[#allocation24 + $0x3d0] ss:$48 sps:$4 sm:$0xff]   ;;  %v20414_v21 = vld [vmem:[#allocation24 + $0x434] ss:$48 sps:$4 sm:$0xff]   ;;  %v20417_v34 = vld [vmem:[#allocation24 + $0x42c] ss:$48 sps:$4 sm:$0xff]  }
0x29a9   : > { %v24665_v36 = vpack.c.bf16 %v10869_v32, %v10866_v25  ;;  %v24667_v30 = vpack.c.bf16 %v10870_v27, %v10867_v44  ;;  %v24669_v0 = vpack.c.bf16 %v10868_v55, %v10865_v60  ;;  %v20412_v38 = vld [vmem:[#allocation24 + $0x430] ss:$48 sps:$4 sm:$0xff]   ;;  %v20415_v18 = vld [vmem:[#allocation24 + $0x428] ss:$48 sps:$4 sm:$0xff]   ;;  %v20420_v25 = vld [vmem:[#allocation24 + $0x494] ss:$48 sps:$4 sm:$0xff]  }
0x29aa   : > { %v20423_v32 = vld [vmem:[#allocation24 + $0x48c] ss:$48 sps:$4 sm:$0xff]   ;;  %v20418_v44 = vld [vmem:[#allocation24 + $0x490] ss:$48 sps:$4 sm:$0xff]   ;;  %v20421_v27 = vld [vmem:[#allocation24 + $0x488] ss:$48 sps:$4 sm:$0xff]  }
0x29ab   : > { %13083 = vmatprep.mubr.bf16.mxu1 %v24665_v36  ;;  %13127 = vmatmul.mubr.bf16.vlgmr.msra.gmra.mrb[0].mxu0 %v24667_v30  ;;  %v20429_v60 = vld [vmem:[#allocation24 + $0x4ec] ss:$48 sps:$4 sm:$0xff]   ;;  %v20424_v55 = vld [vmem:[#allocation24 + $0x4f0] ss:$48 sps:$4 sm:$0xff]  }
0x29ac   : > { %13224 = vmatpush1.bf16.msra.mxu0 %v20346_v19  ;;  %13084 = vmatmul.mubr.bf16.vlgmr.msra.gmra.mrb[0].mxu1 %v24669_v0  ;;  %v20426_v19 = vld [vmem:[#allocation24 + $0x4f4] ss:$48 sps:$4 sm:$0xff]  }
0x29ad   : > { %13138 = vmatpush1.bf16.msra.mxu1 %v20349_v31  ;;  %13255 = vmatprep.mubr.bf16.mxu0 %v24665_v36  ;;  %v20427_v31 = vld [vmem:[#allocation24 + $0x4e8] ss:$48 sps:$4 sm:$0xff]  }
0x29ae   : > { %13169 = vmatprep.mubr.bf16.mxu1 %v24665_v36  ;;  %13225 = vmatprep.subr.bf16.mxu0 %v20354_v20  ;;  %v20432_v20 = vld [vmem:[#allocation24 + $0x554] ss:$48 sps:$4 sm:$0xff]  }
0x29af   : > { %13139 = vmatprep.subr.bf16.mxu1 %v20357_v12  ;;  %v20435_v12 = vld [vmem:[#allocation24 + $0x54c] ss:$48 sps:$4 sm:$0xff]  }
0x29b0   : > { %13226 = vmatpush1.bf16.msra.mxu0 %v20352_v40  ;;  %v20430_v40 = vld [vmem:[#allocation24 + $0x550] ss:$48 sps:$4 sm:$0xff]  }
0x29b1   : > { %13140 = vmatpush1.bf16.msra.mxu1 %v20355_v10  ;;  %13227 = vmatprep.subr.bf16.mxu0 %v20360_v48  ;;  %v20433_v10 = vld [vmem:[#allocation24 + $0x548] ss:$48 sps:$4 sm:$0xff]   ;;  %v20438_v48 = vld [vmem:[#allocation24 + $0x5b4] ss:$48 sps:$4 sm:$0xff]  }
0x29b2   : > { %13141 = vmatprep.subr.bf16.mxu1 %v20363_v1  ;;  %v20441_v1 = vld [vmem:[#allocation24 + $0x5ac] ss:$48 sps:$4 sm:$0xff]  }
0x29b4   : > { %13228 = vmatpush1.bf16.msra.mxu0 %v20358_v28  ;;  %v20436_v28 = vld [vmem:[#allocation24 + $0x5b0] ss:$48 sps:$4 sm:$0xff]  }
0x29b5   : > { %13142 = vmatpush1.bf16.msra.mxu1 %v20361_v13  ;;  %13229 = vmatprep.subr.bf16.mxu0 %v20366_v35  ;;  %v20439_v13 = vld [vmem:[#allocation24 + $0x5a8] ss:$48 sps:$4 sm:$0xff]   ;;  %v20444_v35 = vld [vmem:[#allocation24 + $0x614] ss:$48 sps:$4 sm:$0xff]  }
0x29b6   : > { %13143 = vmatprep.subr.bf16.mxu1 %v20369_v59  ;;  %v20447_v59 = vld [vmem:[#allocation24 + $0x60c] ss:$48 sps:$4 sm:$0xff]  }
0x29b8   : > { %13230 = vmatpush1.bf16.msra.mxu0 %v20364_v2  ;;  %v20442_v2 = vld [vmem:[#allocation24 + $0x610] ss:$48 sps:$4 sm:$0xff]  }
0x29b9   : > { %13144 = vmatpush1.bf16.msra.mxu1 %v20367_v5  ;;  %13231 = vmatprep.subr.bf16.mxu0 %v20372_v29  ;;  %v20445_v5 = vld [vmem:[#allocation24 + $0x608] ss:$48 sps:$4 sm:$0xff]   ;;  %v20450_v29 = vld [vmem:[#allocation24 + $0x674] ss:$48 sps:$4 sm:$0xff]  }
0x29ba   : > { %13145 = vmatprep.subr.bf16.mxu1 %v20375_v43  ;;  %v20453_v43 = vld [vmem:[#allocation24 + $0x66c] ss:$48 sps:$4 sm:$0xff]  }
0x29bc   : > { %13232 = vmatpush1.bf16.msra.mxu0 %v20370_v52  ;;  %v20448_v52 = vld [vmem:[#allocation24 + $0x670] ss:$48 sps:$4 sm:$0xff]  }
0x29bd   : > { %13146 = vmatpush1.bf16.msra.mxu1 %v20373_v26  ;;  %13233 = vmatprep.subr.bf16.mxu0 %v20378_v15  ;;  %v20451_v26 = vld [vmem:[#allocation24 + $0x668] ss:$48 sps:$4 sm:$0xff]   ;;  %v20456_v15 = vld [vmem:[#allocation24 + $0x6d4] ss:$48 sps:$4 sm:$0xff]  }
0x29be   : > { %13147 = vmatprep.subr.bf16.mxu1 %v20381_v24  ;;  %v20459_v24 = vld [vmem:[#allocation24 + $0x6cc] ss:$48 sps:$4 sm:$0xff]  }
0x29c0   : > { %13234 = vmatpush1.bf16.msra.mxu0 %v20376_v41  ;;  %v20454_v41 = vld [vmem:[#allocation24 + $0x6d0] ss:$48 sps:$4 sm:$0xff]  }
0x29c1   : > { %13148 = vmatpush1.bf16.msra.mxu1 %v20379_v47  ;;  %13235 = vmatprep.subr.bf16.mxu0 %v20384_v14  ;;  %v20457_v47 = vld [vmem:[#allocation24 + $0x6c8] ss:$48 sps:$4 sm:$0xff]   ;;  %v20462_v14 = vld [vmem:[#allocation24 + $0x734] ss:$48 sps:$4 sm:$0xff]  }
0x29c2   : > { %13149 = vmatprep.subr.bf16.mxu1 %v20387_v58  ;;  %v20465_v58 = vld [vmem:[#allocation24 + $0x72c] ss:$48 sps:$4 sm:$0xff]  }
0x29c4   : > { %13236 = vmatpush1.bf16.msra.mxu0 %v20382_v51  ;;  %v20460_v51 = vld [vmem:[#allocation24 + $0x730] ss:$48 sps:$4 sm:$0xff]  }
0x29c5   : > { %13150 = vmatpush1.bf16.msra.mxu1 %v20385_v4  ;;  %13237 = vmatprep.subr.bf16.mxu0 %v20390_v45  ;;  %v20463_v4 = vld [vmem:[#allocation24 + $0x728] ss:$48 sps:$4 sm:$0xff]   ;;  %v20468_v45 = vld [vmem:[#allocation24 + $0x794] ss:$48 sps:$4 sm:$0xff]  }
0x29c6   : > { %13151 = vmatprep.subr.bf16.mxu1 %v20393_v53  ;;  %v20471_v53 = vld [vmem:[#allocation24 + $0x78c] ss:$48 sps:$4 sm:$0xff]  }
0x29c8   : > { %13238 = vmatpush1.bf16.msra.mxu0 %v20388_v62  ;;  %v20466_v62 = vld [vmem:[#allocation24 + $0x790] ss:$48 sps:$4 sm:$0xff]  }
0x29c9   : > { %13152 = vmatpush1.bf16.msra.mxu1 %v20391_v63  ;;  %13239 = vmatprep.subr.bf16.mxu0 %v20396_v54  ;;  %v20469_v63 = vld [vmem:[#allocation24 + $0x788] ss:$48 sps:$4 sm:$0xff]   ;;  %v20474_v54 = vld [vmem:[#allocation24 + $0x7f4] ss:$48 sps:$4 sm:$0xff]  }
0x29ca   : > { %13153 = vmatprep.subr.bf16.mxu1 %v20399_v56  ;;  %v20477_v56 = vld [vmem:[#allocation24 + $0x7ec] ss:$48 sps:$4 sm:$0xff]  }
0x29cc   : > { %13240 = vmatpush1.bf16.msra.mxu0 %v20394_v7  ;;  %v20472_v7 = vld [vmem:[#allocation24 + $0x7f0] ss:$48 sps:$4 sm:$0xff]  }
0x29cd   : > { %13154 = vmatpush1.bf16.msra.mxu1 %v20397_v3  ;;  %13241 = vmatprep.subr.bf16.mxu0 %v20402_v6  ;;  %v20475_v3 = vld [vmem:[#allocation24 + $0x7e8] ss:$48 sps:$4 sm:$0xff]   ;;  %v20480_v6 = vld [vmem:[#allocation24 + $0x854] ss:$48 sps:$4 sm:$0xff]  }
0x29ce   : > { %13155 = vmatprep.subr.bf16.mxu1 %v20405_v42  ;;  %v20483_v42 = vld [vmem:[#allocation24 + $0x84c] ss:$48 sps:$4 sm:$0xff]  }
0x29d0   : > { %13242 = vmatpush1.bf16.msra.mxu0 %v20400_v61  ;;  %v20478_v61 = vld [vmem:[#allocation24 + $0x850] ss:$48 sps:$4 sm:$0xff]  }
0x29d1   : > { %13156 = vmatpush1.bf16.msra.mxu1 %v20403_v37  ;;  %13243 = vmatprep.subr.bf16.mxu0 %v20408_v11  ;;  %v20481_v37 = vld [vmem:[#allocation24 + $0x848] ss:$48 sps:$4 sm:$0xff]   ;;  %v20486_v11 = vld [vmem:[#allocation24 + $0x8b4] ss:$48 sps:$4 sm:$0xff]  }
0x29d2   : > { %13157 = vmatprep.subr.bf16.mxu1 %v20411_v17  ;;  %v20489_v17 = vld [vmem:[#allocation24 + $0x8ac] ss:$48 sps:$4 sm:$0xff]  }
0x29d4   : > { %13244 = vmatpush1.bf16.msra.mxu0 %v20406_v49  ;;  %v20484_v49 = vld [vmem:[#allocation24 + $0x8b0] ss:$48 sps:$4 sm:$0xff]  }
0x29d5   : > { %13158 = vmatpush1.bf16.msra.mxu1 %v20409_v33  ;;  %13245 = vmatprep.subr.bf16.mxu0 %v20414_v21  ;;  %v20487_v33 = vld [vmem:[#allocation24 + $0x8a8] ss:$48 sps:$4 sm:$0xff]   ;;  %v20492_v21 = vld [vmem:[#allocation24 + $0x24] ss:$48 sps:$4 sm:$0xff]  }
0x29d6   : > { %13159 = vmatprep.subr.bf16.mxu1 %v20417_v34  ;;  %v20495_v34 = vld [vmem:[#allocation24 + $0x1c] ss:$48 sps:$4 sm:$0xff]  }
0x29d8   : > { %13246 = vmatpush1.bf16.msra.mxu0 %v20412_v38  ;;  %v20490_v38 = vld [vmem:[#allocation24 + $0x20] ss:$48 sps:$4 sm:$0xff]  }
0x29d9   : > { %13160 = vmatpush1.bf16.msra.mxu1 %v20415_v18  ;;  %13247 = vmatprep.subr.bf16.mxu0 %v20420_v25  ;;  %v20493_v18 = vld [vmem:[#allocation24 + $0x18] ss:$48 sps:$4 sm:$0xff]   ;;  %v20498_v25 = vld [vmem:[#allocation24 + $0x84] ss:$48 sps:$4 sm:$0xff]  }
0x29da   : > { %13161 = vmatprep.subr.bf16.mxu1 %v20423_v32  ;;  %v20501_v32 = vld [vmem:[#allocation24 + $0x7c] ss:$48 sps:$4 sm:$0xff]  }
0x29dc   : > { %13248 = vmatpush1.bf16.msra.mxu0 %v20418_v44  ;;  %v20496_v44 = vld [vmem:[#allocation24 + $0x80] ss:$48 sps:$4 sm:$0xff]  }
0x29dd   : > { %13162 = vmatpush1.bf16.msra.mxu1 %v20421_v27  ;;  %13249 = vmatprep.subr.bf16.mxu0 %v20426_v19  ;;  %v20499_v27 = vld [vmem:[#allocation24 + $0x78] ss:$48 sps:$4 sm:$0xff]   ;;  %v20504_v19 = vld [vmem:[#allocation24 + $0xe4] ss:$48 sps:$4 sm:$0xff]  }
0x29de   : > { %13163 = vmatprep.subr.bf16.mxu1 %v20429_v60  ;;  %v20507_v60 = vld [vmem:[#allocation24 + $0xdc] ss:$48 sps:$4 sm:$0xff]  }
0x29e0   : > { %13250 = vmatpush1.bf16.msra.mxu0 %v20424_v55  ;;  %v20502_v55 = vld [vmem:[#allocation24 + $0xe0] ss:$48 sps:$4 sm:$0xff]  }
0x29e1   : > { %13164 = vmatpush1.bf16.msra.mxu1 %v20427_v31  ;;  %13251 = vmatprep.subr.bf16.mxu0 %v20432_v20  ;;  %v20505_v31 = vld [vmem:[#allocation24 + $0xd8] ss:$48 sps:$4 sm:$0xff]   ;;  %v20510_v20 = vld [vmem:[#allocation24 + $0x144] ss:$48 sps:$4 sm:$0xff]  }
0x29e2   : > { %13165 = vmatprep.subr.bf16.mxu1 %v20435_v12  ;;  %v20513_v12 = vld [vmem:[#allocation24 + $0x13c] ss:$48 sps:$4 sm:$0xff]  }
0x29e4   : > { %13252 = vmatpush1.bf16.msra.mxu0 %v20430_v40  ;;  %v20508_v40 = vld [vmem:[#allocation24 + $0x140] ss:$48 sps:$4 sm:$0xff]  }
0x29e5   : > { %13166 = vmatpush1.bf16.msra.mxu1 %v20433_v10  ;;  %13253 = vmatprep.subr.bf16.mxu0 %v20438_v48  ;;  %v20511_v10 = vld [vmem:[#allocation24 + $0x138] ss:$48 sps:$4 sm:$0xff]   ;;  %v20516_v48 = vld [vmem:[#allocation24 + $0x1a4] ss:$48 sps:$4 sm:$0xff]  }
0x29e6   : > { %13167 = vmatprep.subr.bf16.mxu1 %v20441_v1  ;;  %v20519_v1 = vld [vmem:[#allocation24 + $0x19c] ss:$48 sps:$4 sm:$0xff]  }
0x29e8   : > { %13254 = vmatpush1.bf16.msra.mxu0 %v20436_v28  ;;  %v20514_v28 = vld [vmem:[#allocation24 + $0x1a0] ss:$48 sps:$4 sm:$0xff]  }
0x29e9   : > { %13168 = vmatpush1.bf16.msra.mxu1 %v20439_v13  ;;  %13266 = vmatprep.subr.bf16.mxu0 %v20444_v35  ;;  %v20517_v13 = vld [vmem:[#allocation24 + $0x198] ss:$48 sps:$4 sm:$0xff]   ;;  %v20522_v35 = vld [vmem:[#allocation24 + $0x204] ss:$48 sps:$4 sm:$0xff]  }
0x29ea   : > { %13180 = vmatprep.subr.bf16.mxu1 %v20447_v59  ;;  %v20525_v59 = vld [vmem:[#allocation24 + $0x1fc] ss:$48 sps:$4 sm:$0xff]  }
0x29eb   : > { %13256 = vmatmul.mubr.bf16.vlgmr.msra.gmra.mrb[4].mxu0 %v24669_v0 }
0x29ec   : > { %13170 = vmatmul.mubr.bf16.vlgmr.msra.gmra.mrb[4].mxu1 %v24669_v0  ;;  %13267 = vmatpush1.bf16.msra.mxu0 %v20442_v2  ;;  %v20520_v2 = vld [vmem:[#allocation24 + $0x200] ss:$48 sps:$4 sm:$0xff]  }
0x29ed   : > { %13181 = vmatpush1.bf16.msra.mxu1 %v20445_v5  ;;  %13268 = vmatprep.subr.bf16.mxu0 %v20450_v29  ;;  %v20523_v5 = vld [vmem:[#allocation24 + $0x1f8] ss:$48 sps:$4 sm:$0xff]   ;;  %v20528_v29 = vld [vmem:[#allocation24 + $0x264] ss:$48 sps:$4 sm:$0xff]  }
0x29ee   : > { %13182 = vmatprep.subr.bf16.mxu1 %v20453_v43  ;;  %13298 = vmatprep.mubr.bf16.mxu0 %v21805_v46  ;;  %v20531_v43 = vld [vmem:[#allocation24 + $0x25c] ss:$48 sps:$4 sm:$0xff]  }
0x29ef   : > { %13212 = vmatprep.mubr.bf16.mxu1 %v21805_v46 }
0x29f0   : > { %13269 = vmatpush1.bf16.msra.mxu0 %v20448_v52  ;;  %v20526_v52 = vld [vmem:[#allocation24 + $0x260] ss:$48 sps:$4 sm:$0xff]  }
0x29f1   : > { %13183 = vmatpush1.bf16.msra.mxu1 %v20451_v26  ;;  %13270 = vmatprep.subr.bf16.mxu0 %v20456_v15  ;;  %v20529_v26 = vld [vmem:[#allocation24 + $0x258] ss:$48 sps:$4 sm:$0xff]   ;;  %v20534_v15 = vld [vmem:[#allocation24 + $0x2c4] ss:$48 sps:$4 sm:$0xff]  }
0x29f2   : > { %13184 = vmatprep.subr.bf16.mxu1 %v20459_v24  ;;  %v20537_v24 = vld [vmem:[#allocation24 + $0x2bc] ss:$48 sps:$4 sm:$0xff]  }
0x29f4   : > { %13271 = vmatpush1.bf16.msra.mxu0 %v20454_v41  ;;  %v20532_v41 = vld [vmem:[#allocation24 + $0x2c0] ss:$48 sps:$4 sm:$0xff]  }
0x29f5   : > { %13185 = vmatpush1.bf16.msra.mxu1 %v20457_v47  ;;  %13272 = vmatprep.subr.bf16.mxu0 %v20462_v14  ;;  %v20535_v47 = vld [vmem:[#allocation24 + $0x2b8] ss:$48 sps:$4 sm:$0xff]   ;;  %v20540_v14 = vld [vmem:[#allocation24 + $0x324] ss:$48 sps:$4 sm:$0xff]  }
0x29f6   : > { %13186 = vmatprep.subr.bf16.mxu1 %v20465_v58  ;;  %v20543_v58 = vld [vmem:[#allocation24 + $0x31c] ss:$48 sps:$4 sm:$0xff]  }
0x29f8   : > { %13273 = vmatpush1.bf16.msra.mxu0 %v20460_v51  ;;  %v20538_v51 = vld [vmem:[#allocation24 + $0x320] ss:$48 sps:$4 sm:$0xff]  }
0x29f9   : > { %13187 = vmatpush1.bf16.msra.mxu1 %v20463_v4  ;;  %13274 = vmatprep.subr.bf16.mxu0 %v20468_v45  ;;  %v20541_v4 = vld [vmem:[#allocation24 + $0x318] ss:$48 sps:$4 sm:$0xff]   ;;  %v20546_v45 = vld [vmem:[#allocation24 + $0x384] ss:$48 sps:$4 sm:$0xff]  }
0x29fa   : > { %13188 = vmatprep.subr.bf16.mxu1 %v20471_v53  ;;  %v20549_v53 = vld [vmem:[#allocation24 + $0x37c] ss:$48 sps:$4 sm:$0xff]  }
0x29fc   : > { %13275 = vmatpush1.bf16.msra.mxu0 %v20466_v62  ;;  %v20544_v62 = vld [vmem:[#allocation24 + $0x380] ss:$48 sps:$4 sm:$0xff]  }
0x29fd   : > { %13189 = vmatpush1.bf16.msra.mxu1 %v20469_v63  ;;  %13276 = vmatprep.subr.bf16.mxu0 %v20474_v54  ;;  %v20547_v63 = vld [vmem:[#allocation24 + $0x378] ss:$48 sps:$4 sm:$0xff]   ;;  %v20552_v54 = vld [vmem:[#allocation24 + $0x3e4] ss:$48 sps:$4 sm:$0xff]  }
0x29fe   : > { %13190 = vmatprep.subr.bf16.mxu1 %v20477_v56  ;;  %v20555_v56 = vld [vmem:[#allocation24 + $0x3dc] ss:$48 sps:$4 sm:$0xff]  }
0x2a00   : > { %13277 = vmatpush1.bf16.msra.mxu0 %v20472_v7  ;;  %v20550_v7 = vld [vmem:[#allocation24 + $0x3e0] ss:$48 sps:$4 sm:$0xff]  }
0x2a01   : > { %13191 = vmatpush1.bf16.msra.mxu1 %v20475_v3  ;;  %13278 = vmatprep.subr.bf16.mxu0 %v20480_v6  ;;  %v20553_v3 = vld [vmem:[#allocation24 + $0x3d8] ss:$48 sps:$4 sm:$0xff]   ;;  %v20558_v6 = vld [vmem:[#allocation24 + $0x444] ss:$48 sps:$4 sm:$0xff]  }
0x2a02   : > { %13192 = vmatprep.subr.bf16.mxu1 %v20483_v42  ;;  %v20561_v42 = vld [vmem:[#allocation24 + $0x43c] ss:$48 sps:$4 sm:$0xff]  }
0x2a04   : > { %13279 = vmatpush1.bf16.msra.mxu0 %v20478_v61  ;;  %v20556_v61 = vld [vmem:[#allocation24 + $0x440] ss:$48 sps:$4 sm:$0xff]  }
0x2a05   : > { %13193 = vmatpush1.bf16.msra.mxu1 %v20481_v37  ;;  %13280 = vmatprep.subr.bf16.mxu0 %v20486_v11  ;;  %v20559_v37 = vld [vmem:[#allocation24 + $0x438] ss:$48 sps:$4 sm:$0xff]   ;;  %v20564_v11 = vld [vmem:[#allocation24 + $0x4a4] ss:$48 sps:$4 sm:$0xff]  }
0x2a06   : > { %13194 = vmatprep.subr.bf16.mxu1 %v20489_v17  ;;  %v20567_v17 = vld [vmem:[#allocation24 + $0x49c] ss:$48 sps:$4 sm:$0xff]  }
0x2a08   : > { %13281 = vmatpush1.bf16.msra.mxu0 %v20484_v49  ;;  %v20562_v49 = vld [vmem:[#allocation24 + $0x4a0] ss:$48 sps:$4 sm:$0xff]  }
0x2a09   : > { %13195 = vmatpush1.bf16.msra.mxu1 %v20487_v33  ;;  %13395 = vmatprep.subr.bf16.mxu0 %v20492_v21  ;;  %v20565_v33 = vld [vmem:[#allocation24 + $0x498] ss:$48 sps:$4 sm:$0xff]   ;;  %v20570_v21 = vld [vmem:[#allocation24 + $0x504] ss:$48 sps:$4 sm:$0xff]  }
0x2a0a   : > { %13309 = vmatprep.subr.bf16.mxu1 %v20495_v34  ;;  %v20573_v34 = vld [vmem:[#allocation24 + $0x4fc] ss:$48 sps:$4 sm:$0xff]  }
0x2a0b   : > { %13299 = vmatmul.mubr.bf16.vlgmr.msra.gmra.mrb[4].mxu0 %v24667_v30 }
0x2a0c   : > { %13213 = vmatmul.mubr.bf16.vlgmr.msra.gmra.mrb[4].mxu1 %v24667_v30  ;;  %13396 = vmatpush1.bf16.msra.mxu0 %v20490_v38  ;;  %v20568_v38 = vld [vmem:[#allocation24 + $0x500] ss:$48 sps:$4 sm:$0xff]  }
0x2a0d   : > { %13427 = vmatprep.mubr.bf16.mxu0 %v24665_v36  ;;  %13310 = vmatpush1.bf16.msra.mxu1 %v20493_v18  ;;  %v20571_v18 = vld [vmem:[#allocation24 + $0x4f8] ss:$48 sps:$4 sm:$0xff]  }
0x2a0e   : > { %13341 = vmatprep.mubr.bf16.mxu1 %v24665_v36  ;;  %13397 = vmatprep.subr.bf16.mxu0 %v20498_v25  ;;  %v20576_v25 = vld [vmem:[#allocation24 + $0x564] ss:$48 sps:$4 sm:$0xff]  }
0x2a0f   : > { %13311 = vmatprep.subr.bf16.mxu1 %v20501_v32  ;;  %v20579_v32 = vld [vmem:[#allocation24 + $0x55c] ss:$48 sps:$4 sm:$0xff]  }
0x2a10   : > { %13398 = vmatpush1.bf16.msra.mxu0 %v20496_v44  ;;  %v20574_v44 = vld [vmem:[#allocation24 + $0x560] ss:$48 sps:$4 sm:$0xff]  }
0x2a11   : > { %13312 = vmatpush1.bf16.msra.mxu1 %v20499_v27  ;;  %13399 = vmatprep.subr.bf16.mxu0 %v20504_v19  ;;  %v20577_v27 = vld [vmem:[#allocation24 + $0x558] ss:$48 sps:$4 sm:$0xff]   ;;  %v20582_v19 = vld [vmem:[#allocation24 + $0x5c4] ss:$48 sps:$4 sm:$0xff]  }
0x2a12   : > { %13313 = vmatprep.subr.bf16.mxu1 %v20507_v60  ;;  %v20585_v60 = vld [vmem:[#allocation24 + $0x5bc] ss:$48 sps:$4 sm:$0xff]  }
0x2a14   : > { %13400 = vmatpush1.bf16.msra.mxu0 %v20502_v55  ;;  %v20580_v55 = vld [vmem:[#allocation24 + $0x5c0] ss:$48 sps:$4 sm:$0xff]  }
0x2a15   : > { %13314 = vmatpush1.bf16.msra.mxu1 %v20505_v31  ;;  %13401 = vmatprep.subr.bf16.mxu0 %v20510_v20  ;;  %v20583_v31 = vld [vmem:[#allocation24 + $0x5b8] ss:$48 sps:$4 sm:$0xff]   ;;  %v20588_v20 = vld [vmem:[#allocation24 + $0x624] ss:$48 sps:$4 sm:$0xff]  }
0x2a16   : > { %13315 = vmatprep.subr.bf16.mxu1 %v20513_v12  ;;  %v20591_v12 = vld [vmem:[#allocation24 + $0x61c] ss:$48 sps:$4 sm:$0xff]  }
0x2a18   : > { %13402 = vmatpush1.bf16.msra.mxu0 %v20508_v40  ;;  %v20586_v40 = vld [vmem:[#allocation24 + $0x620] ss:$48 sps:$4 sm:$0xff]  }
0x2a19   : > { %13316 = vmatpush1.bf16.msra.mxu1 %v20511_v10  ;;  %13403 = vmatprep.subr.bf16.mxu0 %v20516_v48  ;;  %v20589_v10 = vld [vmem:[#allocation24 + $0x618] ss:$48 sps:$4 sm:$0xff]   ;;  %v20594_v48 = vld [vmem:[#allocation24 + $0x684] ss:$48 sps:$4 sm:$0xff]  }
0x2a1a   : > { %13317 = vmatprep.subr.bf16.mxu1 %v20519_v1  ;;  %v20597_v1 = vld [vmem:[#allocation24 + $0x67c] ss:$48 sps:$4 sm:$0xff]  }
0x2a1c   : > { %13404 = vmatpush1.bf16.msra.mxu0 %v20514_v28  ;;  %v20592_v28 = vld [vmem:[#allocation24 + $0x680] ss:$48 sps:$4 sm:$0xff]  }
0x2a1d   : > { %13318 = vmatpush1.bf16.msra.mxu1 %v20517_v13  ;;  %13405 = vmatprep.subr.bf16.mxu0 %v20522_v35  ;;  %v20595_v13 = vld [vmem:[#allocation24 + $0x678] ss:$48 sps:$4 sm:$0xff]   ;;  %v20600_v35 = vld [vmem:[#allocation24 + $0x6e4] ss:$48 sps:$4 sm:$0xff]  }
0x2a1e   : > { %13319 = vmatprep.subr.bf16.mxu1 %v20525_v59  ;;  %v20603_v59 = vld [vmem:[#allocation24 + $0x6dc] ss:$48 sps:$4 sm:$0xff]  }
0x2a20   : > { %13406 = vmatpush1.bf16.msra.mxu0 %v20520_v2  ;;  %v20598_v2 = vld [vmem:[#allocation24 + $0x6e0] ss:$48 sps:$4 sm:$0xff]  }
0x2a21   : > { %13320 = vmatpush1.bf16.msra.mxu1 %v20523_v5  ;;  %13407 = vmatprep.subr.bf16.mxu0 %v20528_v29  ;;  %v20601_v5 = vld [vmem:[#allocation24 + $0x6d8] ss:$48 sps:$4 sm:$0xff]   ;;  %v20606_v29 = vld [vmem:[#allocation24 + $0x744] ss:$48 sps:$4 sm:$0xff]  }
0x2a22   : > { %13321 = vmatprep.subr.bf16.mxu1 %v20531_v43  ;;  %v20609_v43 = vld [vmem:[#allocation24 + $0x73c] ss:$48 sps:$4 sm:$0xff]  }
0x2a24   : > { %13408 = vmatpush1.bf16.msra.mxu0 %v20526_v52  ;;  %v20604_v52 = vld [vmem:[#allocation24 + $0x740] ss:$48 sps:$4 sm:$0xff]  }
0x2a25   : > { %13322 = vmatpush1.bf16.msra.mxu1 %v20529_v26  ;;  %13409 = vmatprep.subr.bf16.mxu0 %v20534_v15  ;;  %v20607_v26 = vld [vmem:[#allocation24 + $0x738] ss:$48 sps:$4 sm:$0xff]   ;;  %v20612_v15 = vld [vmem:[#allocation24 + $0x7a4] ss:$48 sps:$4 sm:$0xff]  }
0x2a26   : > { %13323 = vmatprep.subr.bf16.mxu1 %v20537_v24  ;;  %v20615_v24 = vld [vmem:[#allocation24 + $0x79c] ss:$48 sps:$4 sm:$0xff]  }
0x2a28   : > { %13410 = vmatpush1.bf16.msra.mxu0 %v20532_v41  ;;  %v20610_v41 = vld [vmem:[#allocation24 + $0x7a0] ss:$48 sps:$4 sm:$0xff]  }
0x2a29   : > { %13324 = vmatpush1.bf16.msra.mxu1 %v20535_v47  ;;  %13411 = vmatprep.subr.bf16.mxu0 %v20540_v14  ;;  %v20613_v47 = vld [vmem:[#allocation24 + $0x798] ss:$48 sps:$4 sm:$0xff]   ;;  %v20618_v14 = vld [vmem:[#allocation24 + $0x804] ss:$48 sps:$4 sm:$0xff]  }
0x2a2a   : > { %13325 = vmatprep.subr.bf16.mxu1 %v20543_v58  ;;  %v20621_v58 = vld [vmem:[#allocation24 + $0x7fc] ss:$48 sps:$4 sm:$0xff]  }
0x2a2c   : > { %13412 = vmatpush1.bf16.msra.mxu0 %v20538_v51  ;;  %v20616_v51 = vld [vmem:[#allocation24 + $0x800] ss:$48 sps:$4 sm:$0xff]  }
0x2a2d   : > { %13326 = vmatpush1.bf16.msra.mxu1 %v20541_v4  ;;  %13413 = vmatprep.subr.bf16.mxu0 %v20546_v45  ;;  %v20619_v4 = vld [vmem:[#allocation24 + $0x7f8] ss:$48 sps:$4 sm:$0xff]   ;;  %v20624_v45 = vld [vmem:[#allocation24 + $0x864] ss:$48 sps:$4 sm:$0xff]  }
0x2a2e   : > { %13327 = vmatprep.subr.bf16.mxu1 %v20549_v53  ;;  %v20627_v53 = vld [vmem:[#allocation24 + $0x85c] ss:$48 sps:$4 sm:$0xff]  }
0x2a30   : > { %13414 = vmatpush1.bf16.msra.mxu0 %v20544_v62  ;;  %v20622_v62 = vld [vmem:[#allocation24 + $0x860] ss:$48 sps:$4 sm:$0xff]  }
0x2a31   : > { %13328 = vmatpush1.bf16.msra.mxu1 %v20547_v63  ;;  %13415 = vmatprep.subr.bf16.mxu0 %v20552_v54  ;;  %v20625_v63 = vld [vmem:[#allocation24 + $0x858] ss:$48 sps:$4 sm:$0xff]   ;;  %v20630_v54 = vld [vmem:[#allocation24 + $0x8c4] ss:$48 sps:$4 sm:$0xff]  }
0x2a32   : > { %13329 = vmatprep.subr.bf16.mxu1 %v20555_v56  ;;  %v20633_v56 = vld [vmem:[#allocation24 + $0x8bc] ss:$48 sps:$4 sm:$0xff]  }
0x2a34   : > { %13416 = vmatpush1.bf16.msra.mxu0 %v20550_v7  ;;  %v20628_v7 = vld [vmem:[#allocation24 + $0x8c0] ss:$48 sps:$4 sm:$0xff]  }
0x2a35   : > { %13330 = vmatpush1.bf16.msra.mxu1 %v20553_v3  ;;  %13417 = vmatprep.subr.bf16.mxu0 %v20558_v6  ;;  %v20631_v3 = vld [vmem:[#allocation24 + $0x8b8] ss:$48 sps:$4 sm:$0xff]   ;;  %v20636_v6 = vld [vmem:[#allocation27 + $0x4] ss:$12 sps:$4 sm:$0xff]  }
0x2a36   : > { %13331 = vmatprep.subr.bf16.mxu1 %v20561_v42  ;;  %v20639_v42 = vld [vmem:[#allocation24 + $0x2c] ss:$48 sps:$4 sm:$0xff]  }
0x2a38   : > { %13418 = vmatpush1.bf16.msra.mxu0 %v20556_v61  ;;  %v20634_v61 = vld [vmem:[#allocation27] ss:$12 sps:$4 sm:$0xff]  }
0x2a39   : > { %13332 = vmatpush1.bf16.msra.mxu1 %v20559_v37  ;;  %13419 = vmatprep.subr.bf16.mxu0 %v20564_v11  ;;  %v20637_v37 = vld [vmem:[#allocation24 + $0x28] ss:$48 sps:$4 sm:$0xff]  }
0x2a3a   : > { %13333 = vmatprep.subr.bf16.mxu1 %v20567_v17  ;;  %v20642_v11 = vld [vmem:[#allocation27 + $0x1c] ss:$12 sps:$4 sm:$0xff]   ;;  %v20645_v17 = vld [vmem:[#allocation24 + $0x8c] ss:$48 sps:$4 sm:$0xff]  }
0x2a3c   : > { %13420 = vmatpush1.bf16.msra.mxu0 %v20562_v49  ;;  %v20640_v49 = vld [vmem:[#allocation27 + $0x18] ss:$12 sps:$4 sm:$0xff]  }
0x2a3d   : > { %13334 = vmatpush1.bf16.msra.mxu1 %v20565_v33  ;;  %13421 = vmatprep.subr.bf16.mxu0 %v20570_v21  ;;  %v20643_v33 = vld [vmem:[#allocation24 + $0x88] ss:$48 sps:$4 sm:$0xff]   ;;  %v20648_v21 = vld [vmem:[#allocation27 + $0x34] ss:$12 sps:$4 sm:$0xff]  }
0x2a3e   : > { %13335 = vmatprep.subr.bf16.mxu1 %v20573_v34  ;;  %v20651_v34 = vld [vmem:[#allocation24 + $0xec] ss:$48 sps:$4 sm:$0xff]  }
0x2a40   : > { %13422 = vmatpush1.bf16.msra.mxu0 %v20568_v38  ;;  %v20646_v38 = vld [vmem:[#allocation27 + $0x30] ss:$12 sps:$4 sm:$0xff]  }
0x2a41   : > { %13336 = vmatpush1.bf16.msra.mxu1 %v20571_v18  ;;  %13423 = vmatprep.subr.bf16.mxu0 %v20576_v25  ;;  %v20649_v18 = vld [vmem:[#allocation24 + $0xe8] ss:$48 sps:$4 sm:$0xff]  }
0x2a42   : > { %13337 = vmatprep.subr.bf16.mxu1 %v20579_v32  ;;  %v20654_v25 = vld [vmem:[#allocation27 + $0x4c] ss:$12 sps:$4 sm:$0xff]   ;;  %v20657_v32 = vld [vmem:[#allocation24 + $0x14c] ss:$48 sps:$4 sm:$0xff]  }
0x2a44   : > { %13424 = vmatpush1.bf16.msra.mxu0 %v20574_v44  ;;  %v20652_v44 = vld [vmem:[#allocation27 + $0x48] ss:$12 sps:$4 sm:$0xff]  }
0x2a45   : > { %13338 = vmatpush1.bf16.msra.mxu1 %v20577_v27  ;;  %13425 = vmatprep.subr.bf16.mxu0 %v20582_v19  ;;  %v20655_v27 = vld [vmem:[#allocation24 + $0x148] ss:$48 sps:$4 sm:$0xff]   ;;  %v20660_v19 = vld [vmem:[#allocation27 + $0x64] ss:$12 sps:$4 sm:$0xff]  }
0x2a46   : > { %13339 = vmatprep.subr.bf16.mxu1 %v20585_v60  ;;  %v20658_v60 = vld [vmem:[#allocation27 + $0x60] ss:$12 sps:$4 sm:$0xff]  }
0x2a48   : > { %13426 = vmatpush1.bf16.msra.mxu0 %v20580_v55  ;;  %v20661_v55 = vld [vmem:[#allocation24 + $0x1a8] ss:$48 sps:$4 sm:$0xff]  }
0x2a49   : > { %13340 = vmatpush1.bf16.msra.mxu1 %v20583_v31  ;;  %13438 = vmatprep.subr.bf16.mxu0 %v20588_v20  ;;  %v20666_v31 = vld [vmem:[#allocation27 + $0x7c] ss:$12 sps:$4 sm:$0xff]   ;;  %v24691_v20 = vld [vmem:[#allocation26] sm:$0xff] }
0x2a4a   : > { %13352 = vmatprep.subr.bf16.mxu1 %v20591_v12  ;;  %v20669_v12 = vld [vmem:[#allocation24 + $0x20c] ss:$48 sps:$4 sm:$0xff]  }
0x2a4b   : > { %13428 = vmatmul.mubr.bf16.vlgmr.msra.gmra.mrb[8].mxu0 %v24669_v0 }
0x2a4c   : > { %13342 = vmatmul.mubr.bf16.vlgmr.msra.gmra.mrb[8].mxu1 %v24669_v0  ;;  %13439 = vmatpush1.bf16.msra.mxu0 %v20586_v40  ;;  %v20664_v40 = vld [vmem:[#allocation27 + $0x78] ss:$12 sps:$4 sm:$0xff]  }
0x2a4d   : > { %13353 = vmatpush1.bf16.msra.mxu1 %v20589_v10  ;;  %13440 = vmatprep.subr.bf16.mxu0 %v20594_v48  ;;  %v11554_v10 = vrot.slane %v24691_v20, %v25079_v39  ;;  %v20667_v48 = vld [vmem:[#allocation24 + $0x208] ss:$48 sps:$4 sm:$0xff]  }
0x2a4e   : > { %13354 = vmatprep.subr.bf16.mxu1 %v20597_v1  ;;  %13470 = vmatprep.mubr.bf16.mxu0 %v21805_v46  ;;  %v11558_v1 = vrot.slane %v24691_v20, %v25077_v23 }
0x2a4f   : > { %13384 = vmatprep.mubr.bf16.mxu1 %v21805_v46 }
0x2a50   : > { %13441 = vmatpush1.bf16.msra.mxu0 %v20592_v28  ;;  %v20672_v28 = vld [vmem:[#allocation27 + $0x94] ss:$12 sps:$4 sm:$0xff]  }
0x2a51   : > { %13355 = vmatpush1.bf16.msra.mxu1 %v20595_v13  ;;  %13442 = vmatprep.subr.bf16.mxu0 %v20600_v35  ;;  %v20675_v35 = vld [vmem:[#allocation24 + $0x26c] ss:$48 sps:$4 sm:$0xff]  }
0x2a52   : > { %13356 = vmatprep.subr.bf16.mxu1 %v20603_v59 }
0x2a54   : > { %13443 = vmatpush1.bf16.msra.mxu0 %v20598_v2 }
0x2a55   : > { %13357 = vmatpush1.bf16.msra.mxu1 %v20601_v5  ;;  %13444 = vmatprep.subr.bf16.mxu0 %v20606_v29 }
0x2a56   : > { %13358 = vmatprep.subr.bf16.mxu1 %v20609_v43 }
0x2a58   : > { %13445 = vmatpush1.bf16.msra.mxu0 %v20604_v52  ;;  %v20670_v52 = vld [vmem:[#allocation27 + $0x90] ss:$12 sps:$4 sm:$0xff]  }
0x2a59   : > { %13359 = vmatpush1.bf16.msra.mxu1 %v20607_v26  ;;  %13446 = vmatprep.subr.bf16.mxu0 %v20612_v15 }
0x2a5a   : > { %13360 = vmatprep.subr.bf16.mxu1 %v20615_v24 }
0x2a5c   : > { %13447 = vmatpush1.bf16.msra.mxu0 %v20610_v41  ;;  %v20673_v41 = vld [vmem:[#allocation24 + $0x268] ss:$48 sps:$4 sm:$0xff]  }
0x2a5d   : > { %13361 = vmatpush1.bf16.msra.mxu1 %v20613_v47  ;;  %13448 = vmatprep.subr.bf16.mxu0 %v20618_v14  ;;  %v20678_v47 = vld [vmem:[#allocation27 + $0xac] ss:$12 sps:$4 sm:$0xff]  }
0x2a5e   : > { %13362 = vmatprep.subr.bf16.mxu1 %v20621_v58 }
0x2a60   : > { %13449 = vmatpush1.bf16.msra.mxu0 %v20616_v51 }
0x2a61   : > { %13363 = vmatpush1.bf16.msra.mxu1 %v20619_v4  ;;  %13450 = vmatprep.subr.bf16.mxu0 %v20624_v45  ;;  %v20681_v4 = vld [vmem:[#allocation24 + $0x2cc] ss:$48 sps:$4 sm:$0xff]  }
0x2a62   : > { %13364 = vmatprep.subr.bf16.mxu1 %v20627_v53 }
0x2a64   : > { %13451 = vmatpush1.bf16.msra.mxu0 %v20622_v62 }
0x2a65   : > { %13365 = vmatpush1.bf16.msra.mxu1 %v20625_v63  ;;  %13452 = vmatprep.subr.bf16.mxu0 %v20630_v54  ;;  %v20676_v63 = vld [vmem:[#allocation27 + $0xa8] ss:$12 sps:$4 sm:$0xff]  }
0x2a66   : > { %13366 = vmatprep.subr.bf16.mxu1 %v20633_v56  ;;  %v20679_v56 = vld [vmem:[#allocation24 + $0x2c8] ss:$48 sps:$4 sm:$0xff]  }
0x2a68   : > { %13453 = vmatpush1.bf16.msra.mxu0 %v20628_v7  ;;  %v20684_v7 = vld [vmem:[#allocation27 + $0xc4] ss:$12 sps:$4 sm:$0xff]  }
0x2a69   : > { %13367 = vmatpush1.bf16.msra.mxu1 %v20631_v3  ;;  %15155 = vmatprep.subr.bf16.mxu0 %v20636_v6 }
0x2a6a   : > { %13481 = vmatprep.subr.bf16.mxu1 %v20639_v42  ;;  %v20687_v42 = vld [vmem:[#allocation24 + $0x32c] ss:$48 sps:$4 sm:$0xff]  }
0x2a6b   : > { %13471 = vmatmul.mubr.bf16.vlgmr.msra.gmra.mrb[8].mxu0 %v24667_v30 }
0x2a6c   : > { %13385 = vmatmul.mubr.bf16.vlgmr.msra.gmra.mrb[8].mxu1 %v24667_v30  ;;  %15156 = vmatpush1.bf16.msra.mxu0 %v20634_v61 }
0x2a6d   : > { %13482 = vmatpush1.bf16.msra.mxu1 %v20637_v37  ;;  %13513 = vmatprep.mubr.bf16.mxu1 %v24665_v36  ;;  %v20663_v36 = vld [vmem:[#allocation24 + $0x1ac] ss:$48 sps:$4 sm:$0xff]  }
0x2a6e   : > { %15157 = vmatprep.subr.bf16.mxu0 %v20642_v11  ;;  %13483 = vmatprep.subr.bf16.mxu1 %v20645_v17  ;;  %v20682_v17 = vld [vmem:[#allocation27 + $0xc0] ss:$12 sps:$4 sm:$0xff]  }
0x2a70   : > { %15158 = vmatpush1.bf16.msra.mxu0 %v20640_v49  ;;  %v20685_v49 = vld [vmem:[#allocation24 + $0x328] ss:$48 sps:$4 sm:$0xff]  }
0x2a71   : > { %13484 = vmatpush1.bf16.msra.mxu1 %v20643_v33  ;;  %15159 = vmatprep.subr.bf16.mxu0 %v20648_v21  ;;  %v20690_v21 = vld [vmem:[#allocation27 + $0xdc] ss:$12 sps:$4 sm:$0xff]  }
0x2a72   : > { %13485 = vmatprep.subr.bf16.mxu1 %v20651_v34  ;;  %v20693_v34 = vld [vmem:[#allocation24 + $0x38c] ss:$48 sps:$4 sm:$0xff]  }
0x2a74   : > { %15160 = vmatpush1.bf16.msra.mxu0 %v20646_v38  ;;  %v20688_v38 = vld [vmem:[#allocation27 + $0xd8] ss:$12 sps:$4 sm:$0xff]  }
0x2a75   : > { %13486 = vmatpush1.bf16.msra.mxu1 %v20649_v18  ;;  %15161 = vmatprep.subr.bf16.mxu0 %v20654_v25  ;;  %v20691_v18 = vld [vmem:[#allocation24 + $0x388] ss:$48 sps:$4 sm:$0xff]   ;;  %v20696_v25 = vld [vmem:[#allocation27 + $0xf4] ss:$12 sps:$4 sm:$0xff]  }
0x2a76   : > { %13487 = vmatprep.subr.bf16.mxu1 %v20657_v32  ;;  %v20699_v32 = vld [vmem:[#allocation24 + $0x3ec] ss:$48 sps:$4 sm:$0xff]  }
0x2a78   : > { %15162 = vmatpush1.bf16.msra.mxu0 %v20652_v44  ;;  %v20694_v44 = vld [vmem:[#allocation27 + $0xf0] ss:$12 sps:$4 sm:$0xff]  }
0x2a79   : > { %13488 = vmatpush1.bf16.msra.mxu1 %v20655_v27  ;;  %15163 = vmatprep.subr.bf16.mxu0 %v20660_v19  ;;  %v20697_v27 = vld [vmem:[#allocation24 + $0x3e8] ss:$48 sps:$4 sm:$0xff]  }
0x2a7a   : > { %13489 = vmatprep.subr.bf16.mxu1 %v20663_v36  ;;  %v20702_v19 = vld [vmem:[#allocation27 + $0x10c] ss:$12 sps:$4 sm:$0xff]   ;;  %v20705_v36 = vld [vmem:[#allocation24 + $0x44c] ss:$48 sps:$4 sm:$0xff]  }
0x2a7c   : > { %15164 = vmatpush1.bf16.msra.mxu0 %v20658_v60  ;;  %v20700_v60 = vld [vmem:[#allocation27 + $0x108] ss:$12 sps:$4 sm:$0xff]  }
0x2a7d   : > { %13490 = vmatpush1.bf16.msra.mxu1 %v20661_v55  ;;  %15165 = vmatprep.subr.bf16.mxu0 %v20666_v31  ;;  %v20703_v55 = vld [vmem:[#allocation24 + $0x448] ss:$48 sps:$4 sm:$0xff]   ;;  %v20708_v31 = vld [vmem:[#allocation27 + $0x124] ss:$12 sps:$4 sm:$0xff]  }
0x2a7e   : > { %v13128_v13 = vpop.f32.mrb[0].mxu0  ;;  %13491 = vmatprep.subr.bf16.mxu1 %v20669_v12  ;;  %v20711_v12 = vld [vmem:[#allocation24 + $0x4ac] ss:$48 sps:$4 sm:$0xff]  }
0x2a7f   : > { %v13085_v59 = vpop.f32.mrb[0].mxu1  ;;  %v13130_v2 = vpop.f32.mrb[1].mxu0 }
0x2a80   : > { %v13086_v5 = vadd.f32 %v13085_v59, %v11554_v10  ;;  %15166 = vmatpush1.bf16.msra.mxu0 %v20664_v40  ;;  %v13087_v29 = vpop.f32.mrb[1].mxu1  ;;  %v13132_v43 = vpop.f32.mrb[2].mxu0  ;;  %v20706_v40 = vld [vmem:[#allocation27 + $0x120] ss:$12 sps:$4 sm:$0xff]  }
0x2a81   : > { %v13088_v26 = vadd.f32 %v13087_v29, %v11558_v1  ;;  %13492 = vmatpush1.bf16.msra.mxu1 %v20667_v48  ;;  %v13089_v15 = vpop.f32.mrb[2].mxu1  ;;  %v13134_v24 = vpop.f32.mrb[3].mxu0  ;;  %15167 = vmatprep.subr.bf16.mxu0 %v20672_v28  ;;  %v20714_v48 = vld [vmem:[#allocation27 + $0x13c] ss:$12 sps:$4 sm:$0xff]   ;;  %v20712_v28 = vld [vmem:[#allocation27 + $0x138] ss:$12 sps:$4 sm:$0xff]  }
0x2a82   : > { %v13129_v14 = vadd.f32 %v13128_v13, %v13086_v5  ;;  %v13090_v58 = vadd.f32 %v13089_v15, %v11554_v10  ;;  %v13091_v51 = vpop.f32.mrb[3].mxu1  ;;  %13493 = vmatprep.subr.bf16.mxu1 %v20675_v35  ;;  %v20709_v10 = vld [vmem:[#allocation24 + $0x4a8] ss:$48 sps:$4 sm:$0xff]   ;;  %v20720_v35 = vld [vmem:[#allocation27 + $0x154] ss:$12 sps:$4 sm:$0xff]  }
0x2a83   : > { %v13131_v45 = vadd.f32 %v13130_v2, %v13088_v26  ;;  %v13092_v53 = vadd.f32 %v13091_v51, %v11558_v1  ;;  %v20717_v1 = vld [vmem:[#allocation24 + $0x50c] ss:$48 sps:$4 sm:$0xff]   ;;  %v20715_v13 = vld [vmem:[#allocation24 + $0x508] ss:$48 sps:$4 sm:$0xff]   ;;  %v20736_v51 = vld [vmem:[#allocation27 + $0x198] ss:$12 sps:$4 sm:$0xff]  }
0x2a84   : > { %v13133_v62 = vadd.f32 %v13132_v43, %v13090_v58  ;;  %15168 = vmatpush1.bf16.msra.mxu0 %v20670_v52  ;;  %v13567_v3 = vmax.f32 %v13129_v14, 0.0  ;;  %v20723_v59 = vld [vmem:[#allocation24 + $0x56c] ss:$48 sps:$4 sm:$0xff]   ;;  %v20721_v5 = vld [vmem:[#allocation24 + $0x568] ss:$48 sps:$4 sm:$0xff]  }
0x2a85   : > { %v13135_v54 = vadd.f32 %v13134_v24, %v13092_v53  ;;  %13494 = vmatpush1.bf16.msra.mxu1 %v20673_v41  ;;  %15169 = vmatprep.subr.bf16.mxu0 %v20678_v47  ;;  %v13568_v61 = vmax.f32 %v13131_v45, 0.0  ;;  %v20718_v2 = vld [vmem:[#allocation27 + $0x150] ss:$12 sps:$4 sm:$0xff]   ;;  %v20726_v29 = vld [vmem:[#allocation27 + $0x16c] ss:$12 sps:$4 sm:$0xff]  }
0x2a86   : > { %v13579_v6 = vmax.f32 %v13133_v62, 0.0  ;;  %13495 = vmatprep.subr.bf16.mxu1 %v20681_v4  ;;  %v20729_v43 = vld [vmem:[#allocation24 + $0x5cc] ss:$48 sps:$4 sm:$0xff]   ;;  %v20724_v52 = vld [vmem:[#allocation27 + $0x168] ss:$12 sps:$4 sm:$0xff]  }
0x2a87   : > { %v13580_v37 = vmax.f32 %v13135_v54, 0.0  ;;  %v20727_v26 = vld [vmem:[#allocation24 + $0x5c8] ss:$48 sps:$4 sm:$0xff]   ;;  %v20732_v15 = vld [vmem:[#allocation27 + $0x184] ss:$12 sps:$4 sm:$0xff]  }
0x2a88   : > { %v24697_v11 = vpack.c.bf16 %v13579_v6, %v13567_v3  ;;  %15170 = vmatpush1.bf16.msra.mxu0 %v20676_v63  ;;  %v20735_v24 = vld [vmem:[#allocation24 + $0x62c] ss:$48 sps:$4 sm:$0xff]   ;;  %v20733_v47 = vld [vmem:[#allocation24 + $0x628] ss:$48 sps:$4 sm:$0xff]  }
0x2a89   : > { %13496 = vmatpush1.bf16.msra.mxu1 %v20679_v56  ;;  %15171 = vmatprep.subr.bf16.mxu0 %v20684_v7  ;;  %v24699_v33 = vpack.c.bf16 %v13580_v37, %v13568_v61  ;;  %v20730_v41 = vld [vmem:[#allocation27 + $0x180] ss:$12 sps:$4 sm:$0xff]   ;;  %v20738_v14 = vld [vmem:[#allocation27 + $0x19c] ss:$12 sps:$4 sm:$0xff]   ;;  %v20756_v3 = vld [vmem:[#allocation27 + $0x1e4] ss:$12 sps:$4 sm:$0xff]  }
0x2a8a   : > { %13497 = vmatprep.subr.bf16.mxu1 %v20687_v42  ;;  %v20741_v58 = vld [vmem:[#allocation24 + $0x68c] ss:$48 sps:$4 sm:$0xff]   ;;  %v20739_v4 = vld [vmem:[#allocation24 + $0x688] ss:$48 sps:$4 sm:$0xff]  }
0x2a8b   : > { %15187 = vmatprep.mubr.bf16.mxu0 %v24699_v33  ;;  %v20744_v45 = vld [vmem:[#allocation27 + $0x1b4] ss:$12 sps:$4 sm:$0xff]   ;;  %v20742_v62 = vld [vmem:[#allocation27 + $0x1b0] ss:$12 sps:$4 sm:$0xff]   ;;  %v20750_v54 = vld [vmem:[#allocation27 + $0x1cc] ss:$12 sps:$4 sm:$0xff]  }
0x2a8c   : > { %15172 = vmatpush1.bf16.msra.mxu0 %v20682_v17  ;;  %v20747_v53 = vld [vmem:[#allocation24 + $0x6ec] ss:$48 sps:$4 sm:$0xff]   ;;  %v20745_v63 = vld [vmem:[#allocation24 + $0x6e8] ss:$48 sps:$4 sm:$0xff]   ;;  %v20760_v17 = vld [vmem:[#allocation27 + $0x1f8] ss:$12 sps:$4 sm:$0xff]  }
0x2a8d   : > { %13498 = vmatpush1.bf16.msra.mxu1 %v20685_v49  ;;  %15173 = vmatprep.subr.bf16.mxu0 %v20690_v21  ;;  %v20753_v56 = vld [vmem:[#allocation24 + $0x74c] ss:$48 sps:$4 sm:$0xff]   ;;  %v20751_v7 = vld [vmem:[#allocation24 + $0x748] ss:$48 sps:$4 sm:$0xff]  }
0x2a8e   : > { %13499 = vmatprep.subr.bf16.mxu1 %v20693_v34  ;;  %v20759_v6 = vld [vmem:[#allocation24 + $0x7ac] ss:$48 sps:$4 sm:$0xff]   ;;  %v20762_v61 = vld [vmem:[#allocation27 + $0x1fc] ss:$12 sps:$4 sm:$0xff]  }
0x2a8f   : > { %v20754_v42 = vld [vmem:[#allocation27 + $0x1e0] ss:$12 sps:$4 sm:$0xff]  }
0x2a90   : > { %15174 = vmatpush1.bf16.msra.mxu0 %v20688_v38  ;;  %v20765_v37 = vld [vmem:[#allocation24 + $0x80c] ss:$48 sps:$4 sm:$0xff]   ;;  %v20763_v49 = vld [vmem:[#allocation24 + $0x808] ss:$48 sps:$4 sm:$0xff]  }
0x2a91   : > { %13500 = vmatpush1.bf16.msra.mxu1 %v20691_v18  ;;  %15175 = vmatprep.subr.bf16.mxu0 %v20696_v25  ;;  %v20768_v21 = vld [vmem:[#allocation27 + $0x214] ss:$12 sps:$4 sm:$0xff]   ;;  %v20766_v38 = vld [vmem:[#allocation27 + $0x210] ss:$12 sps:$4 sm:$0xff]   ;;  %v20774_v25 = vld [vmem:[#allocation27 + $0x22c] ss:$12 sps:$4 sm:$0xff]  }
0x2a92   : > { %13501 = vmatprep.subr.bf16.mxu1 %v20699_v32  ;;  %v20771_v34 = vld [vmem:[#allocation24 + $0x86c] ss:$48 sps:$4 sm:$0xff]   ;;  %v20769_v18 = vld [vmem:[#allocation24 + $0x868] ss:$48 sps:$4 sm:$0xff]  }
0x2a93   : > { %v20777_v32 = vld [vmem:[#allocation24 + $0x8cc] ss:$48 sps:$4 sm:$0xff]  }
0x2a94   : > { %15176 = vmatpush1.bf16.msra.mxu0 %v20694_v44  ;;  %v20772_v44 = vld [vmem:[#allocation27 + $0x228] ss:$12 sps:$4 sm:$0xff]  }
0x2a95   : > { %13502 = vmatpush1.bf16.msra.mxu1 %v20697_v27  ;;  %15177 = vmatprep.subr.bf16.mxu0 %v20702_v19  ;;  %v20775_v27 = vld [vmem:[#allocation24 + $0x8c8] ss:$48 sps:$4 sm:$0xff]   ;;  %v20780_v19 = vld [vmem:[#allocation27 + $0x244] ss:$12 sps:$4 sm:$0xff]  }
0x2a96   : > { %13503 = vmatprep.subr.bf16.mxu1 %v20705_v36  ;;  %v20781_v36 = vld [vmem:[#allocation27 + $0xc8] ss:$12 sps:$4 sm:$0xff]  }
0x2a98   : > { %15178 = vmatpush1.bf16.msra.mxu0 %v20700_v60  ;;  %v20778_v60 = vld [vmem:[#allocation27 + $0x240] ss:$12 sps:$4 sm:$0xff]  }
0x2a99   : > { %13504 = vmatpush1.bf16.msra.mxu1 %v20703_v55  ;;  %15179 = vmatprep.subr.bf16.mxu0 %v20708_v31  ;;  %v20782_v55 = vld [vmem:[#allocation27 + $0x8] ss:$12 sps:$4 sm:$0xff]  }
0x2a9a   : > { %13505 = vmatprep.subr.bf16.mxu1 %v20711_v12  ;;  %v20785_v31 = vld [vmem:[#allocation27 + $0x25c] ss:$12 sps:$4 sm:$0xff]   ;;  %v20786_v12 = vld [vmem:[#allocation27 + $0xe0] ss:$12 sps:$4 sm:$0xff]  }
0x2a9c   : > { %15180 = vmatpush1.bf16.msra.mxu0 %v20706_v40  ;;  %v20783_v40 = vld [vmem:[#allocation27 + $0x258] ss:$12 sps:$4 sm:$0xff]  }
0x2a9d   : > { %13506 = vmatpush1.bf16.msra.mxu1 %v20709_v10  ;;  %15181 = vmatprep.subr.bf16.mxu0 %v20714_v48  ;;  %v20787_v10 = vld [vmem:[#allocation27 + $0x20] ss:$12 sps:$4 sm:$0xff]  }
0x2a9e   : > { %13507 = vmatprep.subr.bf16.mxu1 %v20717_v1  ;;  %v20790_v48 = vld [vmem:[#allocation27 + $0x274] ss:$12 sps:$4 sm:$0xff]   ;;  %v20791_v1 = vld [vmem:[#allocation27 + $0xf8] ss:$12 sps:$4 sm:$0xff]  }
0x2aa0   : > { %15182 = vmatpush1.bf16.msra.mxu0 %v20712_v28  ;;  %v20788_v28 = vld [vmem:[#allocation27 + $0x270] ss:$12 sps:$4 sm:$0xff]  }
0x2aa1   : > { %13508 = vmatpush1.bf16.msra.mxu1 %v20715_v13  ;;  %15183 = vmatprep.subr.bf16.mxu0 %v20720_v35  ;;  %v20792_v13 = vld [vmem:[#allocation27 + $0x38] ss:$12 sps:$4 sm:$0xff]  }
0x2aa2   : > { %13509 = vmatprep.subr.bf16.mxu1 %v20723_v59  ;;  %v20795_v35 = vld [vmem:[#allocation27 + $0x28c] ss:$12 sps:$4 sm:$0xff]   ;;  %v20796_v59 = vld [vmem:[#allocation27 + $0x110] ss:$12 sps:$4 sm:$0xff]  }
0x2aa4   : > { %15184 = vmatpush1.bf16.msra.mxu0 %v20718_v2  ;;  %v20797_v2 = vld [vmem:[#allocation27 + $0x50] ss:$12 sps:$4 sm:$0xff]  }
0x2aa5   : > { %13510 = vmatpush1.bf16.msra.mxu1 %v20721_v5  ;;  %15185 = vmatprep.subr.bf16.mxu0 %v20726_v29  ;;  %v20800_v5 = vld [vmem:[#allocation27 + $0x2a4] ss:$12 sps:$4 sm:$0xff]   ;;  %v20798_v29 = vld [vmem:[#allocation27 + $0x2a0] ss:$12 sps:$4 sm:$0xff]  }
0x2aa6   : > { %13511 = vmatprep.subr.bf16.mxu1 %v20729_v43  ;;  %v20802_v43 = vld [vmem:[#allocation27 + $0x68] ss:$12 sps:$4 sm:$0xff]  }
0x2aa8   : > { %15186 = vmatpush1.bf16.msra.mxu0 %v20724_v52  ;;  %v20805_v52 = vld [vmem:[#allocation27 + $0x2bc] ss:$12 sps:$4 sm:$0xff]  }
0x2aa9   : > { %13512 = vmatpush1.bf16.msra.mxu1 %v20727_v26  ;;  %15198 = vmatprep.subr.bf16.mxu0 %v20732_v15  ;;  %v20806_v26 = vld [vmem:[#allocation27 + $0x140] ss:$12 sps:$4 sm:$0xff]  }
0x2aaa   : > { %13524 = vmatprep.subr.bf16.mxu1 %v20735_v24  ;;  %v11570_v24 = vrot.slane %v24691_v20, %v6677_v16 }
0x2aab   : > { %15188 = vmatmul.mubr.bf16.vlgmr.msra.gmra.mrb[12].mxu0 %v24697_v11 }
0x2aac   : > { %13514 = vmatmul.mubr.bf16.vlgmr.msra.gmra.mrb[12].mxu1 %v24669_v0  ;;  %15199 = vmatpush1.bf16.msra.mxu0 %v20730_v41  ;;  %v20748_v0 = vld [vmem:[#allocation27 + $0x1c8] ss:$12 sps:$4 sm:$0xff]   ;;  %v11562_v41 = vrot.slane %v24691_v20, %v25078_v9 }
0x2aad   : > { %13525 = vmatpush1.bf16.msra.mxu1 %v20733_v47  ;;  %15200 = vmatprep.subr.bf16.mxu0 %v20738_v14  ;;  %v11574_v47 = vrot.slane %v24691_v20, %v6681_v8  ;;  %v20803_v14 = vld [vmem:[#allocation27 + $0x2b8] ss:$12 sps:$4 sm:$0xff]   ;;  %v20808_v8 = vld [vmem:[#allocation27 + $0x2d0] ss:$12 sps:$4 sm:$0xff]  }
0x2aae   : > { %13526 = vmatprep.subr.bf16.mxu1 %v20741_v58  ;;  %13556 = vmatprep.mubr.bf16.mxu1 %v21805_v46  ;;  %v20757_v46 = vld [vmem:[#allocation24 + $0x7a8] ss:$48 sps:$4 sm:$0xff]   ;;  %v11566_v58 = vrot.slane %v24691_v20, %v24235_v50 }
0x2ab0   : > { %15201 = vmatpush1.bf16.msra.mxu0 %v20736_v51  ;;  %v20807_v51 = vld [vmem:[#allocation27 + $0x80] ss:$12 sps:$4 sm:$0xff]  }
0x2ab1   : > { %13527 = vmatpush1.bf16.msra.mxu1 %v20739_v4  ;;  %15202 = vmatprep.subr.bf16.mxu0 %v20744_v45  ;;  %v20810_v4 = vld [vmem:[#allocation27 + $0x2d4] ss:$12 sps:$4 sm:$0xff]  }
0x2ab2   : > { %13528 = vmatprep.subr.bf16.mxu1 %v20747_v53  ;;  %v20811_v53 = vld [vmem:[#allocation27 + $0x158] ss:$12 sps:$4 sm:$0xff]  }
0x2ab4   : > { %15203 = vmatpush1.bf16.msra.mxu0 %v20742_v62 }
0x2ab5   : > { %13529 = vmatpush1.bf16.msra.mxu1 %v20745_v63  ;;  %15204 = vmatprep.subr.bf16.mxu0 %v20750_v54 }
0x2ab6   : > { %13530 = vmatprep.subr.bf16.mxu1 %v20753_v56 }
0x2ab8   : > { %15205 = vmatpush1.bf16.msra.mxu0 %v20748_v0 }
0x2ab9   : > { %13531 = vmatpush1.bf16.msra.mxu1 %v20751_v7  ;;  %15206 = vmatprep.subr.bf16.mxu0 %v20756_v3 }
0x2aba   : > { %13532 = vmatprep.subr.bf16.mxu1 %v20759_v6 }
0x2abc   : > { %15207 = vmatpush1.bf16.msra.mxu0 %v20754_v42 }
0x2abd   : > { %13533 = vmatpush1.bf16.msra.mxu1 %v20757_v46  ;;  %15208 = vmatprep.subr.bf16.mxu0 %v20762_v61  ;;  %v20812_v61 = vld [vmem:[#allocation27 + $0x98] ss:$12 sps:$4 sm:$0xff]  }
0x2abe   : > { %13534 = vmatprep.subr.bf16.mxu1 %v20765_v37  ;;  %v20815_v37 = vld [vmem:[#allocation27 + $0x2ec] ss:$12 sps:$4 sm:$0xff]  }
0x2ac0   : > { %15209 = vmatpush1.bf16.msra.mxu0 %v20760_v17 }
0x2ac1   : > { %13535 = vmatpush1.bf16.msra.mxu1 %v20763_v49  ;;  %15210 = vmatprep.subr.bf16.mxu0 %v20768_v21 }
0x2ac2   : > { %13536 = vmatprep.subr.bf16.mxu1 %v20771_v34  ;;  %v20816_v34 = vld [vmem:[#allocation27 + $0x170] ss:$12 sps:$4 sm:$0xff]  }
0x2ac4   : > { %15211 = vmatpush1.bf16.msra.mxu0 %v20766_v38 }
0x2ac5   : > { %13537 = vmatpush1.bf16.msra.mxu1 %v20769_v18  ;;  %15212 = vmatprep.subr.bf16.mxu0 %v20774_v25 }
0x2ac6   : > { %13538 = vmatprep.subr.bf16.mxu1 %v20777_v32 }
0x2ac8   : > { %15213 = vmatpush1.bf16.msra.mxu0 %v20772_v44 }
0x2ac9   : > { %13539 = vmatpush1.bf16.msra.mxu1 %v20775_v27  ;;  %15214 = vmatprep.subr.bf16.mxu0 %v20780_v19 }
0x2aca   : > { %18116 = vmatprep.subr.bf16.mxu1 %v20781_v36  ;;  %v20813_v36 = vld [vmem:[#allocation27 + $0x2e8] ss:$12 sps:$4 sm:$0xff]  }
0x2acc   : > { %13557 = vmatmul.mubr.bf16.vlgmr.msra.gmra.mrb[12].mxu1 %v24667_v30  ;;  %15215 = vmatpush1.bf16.msra.mxu0 %v20778_v60  ;;  %v20793_v30 = vld [vmem:[#allocation27 + $0x288] ss:$12 sps:$4 sm:$0xff]  }
0x2acd   : > { %18117 = vmatpush3.bf16.msra.mxu1 %v20782_v55  ;;  %15445 = vmatprep.mubr.bf16.mxu1 %v24699_v33  ;;  %v20801_v33 = vld [vmem:[#allocation27 + $0x128] ss:$12 sps:$4 sm:$0xff]  }
0x2ace   : > { %15216 = vmatprep.subr.bf16.mxu0 %v20785_v31  ;;  %18118 = vmatprep.subr.bf16.mxu1 %v20786_v12  ;;  %v20817_v12 = vld [vmem:[#allocation27 + $0xb0] ss:$12 sps:$4 sm:$0xff]  }
0x2ad0   : > { %15217 = vmatpush1.bf16.msra.mxu0 %v20783_v40 }
0x2ad1   : > { %18119 = vmatpush3.bf16.msra.mxu1 %v20787_v10  ;;  %15218 = vmatprep.subr.bf16.mxu0 %v20790_v48  ;;  %v20820_v48 = vld [vmem:[#allocation27 + $0x304] ss:$12 sps:$4 sm:$0xff]  }
0x2ad2   : > { %18120 = vmatprep.subr.bf16.mxu1 %v20791_v1  ;;  %v20821_v1 = vld [vmem:[#allocation27 + $0x248] ss:$12 sps:$4 sm:$0xff]  }
0x2ad4   : > { %15219 = vmatpush1.bf16.msra.mxu0 %v20788_v28 }
0x2ad5   : > { %18121 = vmatpush3.bf16.msra.mxu1 %v20792_v13  ;;  %15220 = vmatprep.subr.bf16.mxu0 %v20795_v35  ;;  %v20818_v13 = vld [vmem:[#allocation27 + $0x300] ss:$12 sps:$4 sm:$0xff]   ;;  %v20825_v35 = vld [vmem:[#allocation27 + $0x31c] ss:$12 sps:$4 sm:$0xff]  }
0x2ad6   : > { %18122 = vmatprep.subr.bf16.mxu1 %v20796_v59  ;;  %v20822_v59 = vld [vmem:[#allocation27 + $0x188] ss:$12 sps:$4 sm:$0xff]  }
0x2ad8   : > { %15221 = vmatpush1.bf16.msra.mxu0 %v20793_v30  ;;  %v20826_v30 = vld [vmem:[#allocation27 + $0x260] ss:$12 sps:$4 sm:$0xff]  }
0x2ad9   : > { %18123 = vmatpush3.bf16.msra.mxu1 %v20797_v2  ;;  %15222 = vmatprep.subr.bf16.mxu0 %v20800_v5  ;;  %v20823_v2 = vld [vmem:[#allocation27 + $0x318] ss:$12 sps:$4 sm:$0xff]   ;;  %v20830_v5 = vld [vmem:[#allocation27 + $0x334] ss:$12 sps:$4 sm:$0xff]  }
0x2ada   : > { %18124 = vmatprep.subr.bf16.mxu1 %v20801_v33  ;;  %v20827_v33 = vld [vmem:[#allocation27 + $0x1a0] ss:$12 sps:$4 sm:$0xff]  }
0x2adc   : > { %15223 = vmatpush1.bf16.msra.mxu0 %v20798_v29  ;;  %v20831_v29 = vld [vmem:[#allocation27 + $0x278] ss:$12 sps:$4 sm:$0xff]  }
0x2add   : > { %18125 = vmatpush3.bf16.msra.mxu1 %v20802_v43  ;;  %15224 = vmatprep.subr.bf16.mxu0 %v20805_v52  ;;  %v20828_v43 = vld [vmem:[#allocation27 + $0x330] ss:$12 sps:$4 sm:$0xff]   ;;  %v20835_v52 = vld [vmem:[#allocation27 + $0x34c] ss:$12 sps:$4 sm:$0xff]  }
0x2ade   : > { %v13300_v45 = vpop.f32.mrb[4].mxu0  ;;  %18126 = vmatprep.subr.bf16.mxu1 %v20806_v26  ;;  %v20832_v26 = vld [vmem:[#allocation27 + $0x1b8] ss:$12 sps:$4 sm:$0xff]  }
0x2adf   : > { %v18707_v16 = vadd.f32 %v13300_v45, %v11570_v24  ;;  %v13214_v62 = vpop.f32.mrb[4].mxu1  ;;  %v13302_v63 = vpop.f32.mrb[5].mxu0  ;;  %v20846_v45 = vld [vmem:[#allocation27 + $0x2c0] ss:$12 sps:$4 sm:$0xff]  }
0x2ae0   : > { %v18703_v54 = vadd.f32 %v13214_v62, %v11562_v41  ;;  %v18708_v56 = vadd.f32 %v13302_v63, %v11574_v47  ;;  %v13216_v0 = vpop.f32.mrb[5].mxu1  ;;  %v13304_v7 = vpop.f32.mrb[6].mxu0  ;;  %15225 = vmatpush1.bf16.msra.mxu0 %v20803_v14  ;;  %v20841_v14 = vld [vmem:[#allocation27 + $0x2a8] ss:$12 sps:$4 sm:$0xff]   ;;  %v20847_v62 = vld [vmem:[#allocation27 + $0x200] ss:$12 sps:$4 sm:$0xff]  }
0x2ae1   : > { %v18704_v3 = vadd.f32 %v13216_v0, %v11566_v58  ;;  %v18709_v6 = vadd.f32 %v13304_v7, %v11570_v24  ;;  %v13218_v42 = vpop.f32.mrb[6].mxu1  ;;  %v13306_v46 = vpop.f32.mrb[7].mxu0  ;;  %18127 = vmatpush3.bf16.msra.mxu1 %v20807_v51  ;;  %15226 = vmatprep.subr.bf16.mxu0 %v20810_v4  ;;  %v13571_v38 = vmax.f32 %v18707_v16, 0.0  ;;  %v20836_v24 = vld [vmem:[#allocation27 + $0x290] ss:$12 sps:$4 sm:$0xff]  }
0x2ae2   : > { %v18705_v17 = vadd.f32 %v13218_v42, %v11562_v41  ;;  %v18710_v49 = vadd.f32 %v13306_v46, %v11574_v47  ;;  %v13220_v21 = vpop.f32.mrb[7].mxu1  ;;  %18128 = vmatprep.subr.bf16.mxu1 %v20811_v53  ;;  %v13569_v32 = vmax.f32 %v18703_v54, 0.0  ;;  %v13572_v44 = vmax.f32 %v18708_v56, 0.0  ;;  %v20833_v41 = vld [vmem:[#allocation27 + $0x348] ss:$12 sps:$4 sm:$0xff]  }
0x2ae3   : > { %v13583_v18 = vmax.f32 %v18709_v6, 0.0  ;;  %v18706_v25 = vadd.f32 %v13220_v21, %v11566_v58  ;;  %v13570_v60 = vmax.f32 %v18704_v3, 0.0  ;;  %v20840_v47 = vld [vmem:[#allocation27 + $0x364] ss:$12 sps:$4 sm:$0xff]   ;;  %v20838_v58 = vld [vmem:[#allocation27 + $0x360] ss:$12 sps:$4 sm:$0xff]  }
0x2ae4   : > { %v13581_v27 = vmax.f32 %v18705_v17, 0.0  ;;  %v13584_v19 = vmax.f32 %v18710_v49, 0.0  ;;  %15227 = vmatpush1.bf16.msra.mxu0 %v20808_v8  ;;  %v20845_v51 = vld [vmem:[#allocation27 + $0x37c] ss:$12 sps:$4 sm:$0xff]   ;;  %v20843_v53 = vld [vmem:[#allocation27 + $0x378] ss:$12 sps:$4 sm:$0xff]  }
0x2ae5   : > { %v24717_v55 = vpack.c.bf16 %v13583_v18, %v13571_v38  ;;  %v13582_v31 = vmax.f32 %v18706_v25, 0.0  ;;  %18129 = vmatpush3.bf16.msra.mxu1 %v20812_v61  ;;  %15228 = vmatprep.subr.bf16.mxu0 %v20815_v37  ;;  %v20842_v4 = vld [vmem:[#allocation27 + $0x1e8] ss:$12 sps:$4 sm:$0xff]   ;;  %v20851_v63 = vld [vmem:[#allocation27 + $0x2d8] ss:$12 sps:$4 sm:$0xff]  }
0x2ae6   : > { %v24719_v40 = vpack.c.bf16 %v13581_v27, %v13569_v32  ;;  %v24721_v10 = vpack.c.bf16 %v13584_v19, %v13572_v44  ;;  %18130 = vmatprep.subr.bf16.mxu1 %v20816_v34  ;;  %v20850_v16 = vld [vmem:[#allocation27 + $0x394] ss:$12 sps:$4 sm:$0xff]   ;;  %v20848_v54 = vld [vmem:[#allocation27 + $0x390] ss:$12 sps:$4 sm:$0xff]   ;;  %v20855_v56 = vld [vmem:[#allocation27 + $0x3ac] ss:$12 sps:$4 sm:$0xff]  }
0x2ae7   : > { %v13594_v28 = vpack.c.bf16 %v13582_v31, %v13570_v60  ;;  %v20852_v0 = vld [vmem:[#allocation27 + $0x218] ss:$12 sps:$4 sm:$0xff]   ;;  %v20856_v7 = vld [vmem:[#allocation27 + $0x2f0] ss:$12 sps:$4 sm:$0xff]   ;;  %v20853_v8 = vld [vmem:[#allocation27 + $0x3a8] ss:$12 sps:$4 sm:$0xff]  }
0x2ae8   : > { %15229 = vmatpush1.bf16.msra.mxu0 %v20813_v36  ;;  %v20860_v3 = vld [vmem:[#allocation27 + $0x3c4] ss:$12 sps:$4 sm:$0xff]   ;;  %v20861_v42 = vld [vmem:[#allocation27 + $0x3c8] ss:$12 sps:$4 sm:$0xff]   ;;  %v20858_v46 = vld [vmem:[#allocation27 + $0x3c0] ss:$12 sps:$4 sm:$0xff]  }
0x2ae9   : > { %15230 = vmatprep.mubr.bf16.mxu0 %v13594_v28  ;;  %18131 = vmatpush3.bf16.msra.mxu1 %v20817_v12  ;;  %v20857_v6 = vld [vmem:[#allocation27 + $0x230] ss:$12 sps:$4 sm:$0xff]   ;;  %v20862_v37 = vld [vmem:[#allocation27 + $0x308] ss:$12 sps:$4 sm:$0xff]   ;;  %v20866_v17 = vld [vmem:[#allocation27 + $0x3e0] ss:$12 sps:$4 sm:$0xff]  }
0x2aea   : > { %15241 = vmatprep.subr.bf16.mxu0 %v20820_v48  ;;  %18138 = vmatprep.subr.bf16.mxu1 %v20821_v1  ;;  %v20865_v61 = vld [vmem:[#allocation27 + $0x3dc] ss:$12 sps:$4 sm:$0xff]   ;;  %v20863_v49 = vld [vmem:[#allocation27 + $0x3d8] ss:$12 sps:$4 sm:$0xff]   ;;  %v20870_v21 = vld [vmem:[#allocation27 + $0x3f4] ss:$12 sps:$4 sm:$0xff]  }
0x2aeb   : > { %15231 = vmatmul.mubr.bf16.vlgmr.msra.gmra.mrb[12].mxu0 %v24719_v40  ;;  %v20867_v34 = vld [vmem:[#allocation27 + $0x320] ss:$12 sps:$4 sm:$0xff]   ;;  %v20871_v38 = vld [vmem:[#allocation27 + $0x3f8] ss:$12 sps:$4 sm:$0xff]   ;;  %v20868_v18 = vld [vmem:[#allocation27 + $0x3f0] ss:$12 sps:$4 sm:$0xff]  }
0x2aec   : > { %15242 = vmatpush1.bf16.msra.mxu0 %v20818_v13  ;;  %15273 = vmatprep.mubr.bf16.mxu0 %v24721_v10  ;;  %v20875_v25 = vld [vmem:[#allocation27 + $0x40c] ss:$12 sps:$4 sm:$0xff]   ;;  %v20876_v44 = vld [vmem:[#allocation27 + $0x410] ss:$12 sps:$4 sm:$0xff]   ;;  %v20873_v27 = vld [vmem:[#allocation27 + $0x408] ss:$12 sps:$4 sm:$0xff]  }
0x2aed   : > { %15446 = vmatmul.mubr.bf16.vlgmr.msra.gmra.mrb[16].mxu1 %v24697_v11  ;;  %15243 = vmatprep.subr.bf16.mxu0 %v20825_v35  ;;  %v20837_v11 = vld [vmem:[#allocation27 + $0x1d0] ss:$12 sps:$4 sm:$0xff]   ;;  %v20872_v32 = vld [vmem:[#allocation27 + $0x338] ss:$12 sps:$4 sm:$0xff]   ;;  %v20881_v60 = vld [vmem:[#allocation27 + $0x428] ss:$12 sps:$4 sm:$0xff]  }
0x2aee   : > { %18139 = vmatpush3.bf16.msra.mxu1 %v20822_v59  ;;  %15486 = vmatprep.mubr.bf16.mxu1 %v13594_v28  ;;  %v20880_v19 = vld [vmem:[#allocation27 + $0x424] ss:$12 sps:$4 sm:$0xff]   ;;  %v20878_v31 = vld [vmem:[#allocation27 + $0x420] ss:$12 sps:$4 sm:$0xff]   ;;  %v20885_v12 = vld [vmem:[#allocation27 + $0x43c] ss:$12 sps:$4 sm:$0xff]  }
0x2aef   : > { %18140 = vmatprep.subr.bf16.mxu1 %v20826_v30  ;;  %v20877_v36 = vld [vmem:[#allocation27 + $0x350] ss:$12 sps:$4 sm:$0xff]   ;;  %v20883_v48 = vld [vmem:[#allocation27 + $0x438] ss:$12 sps:$4 sm:$0xff]   ;;  %v20890_v1 = vld [vmem:[#allocation27 + $0x454] ss:$12 sps:$4 sm:$0xff]  }
0x2af0   : > { %15244 = vmatpush1.bf16.msra.mxu0 %v20823_v2  ;;  %v20887_v28 = vld [vmem:[#allocation27 + $0x380] ss:$12 sps:$4 sm:$0xff]   ;;  %v20891_v13 = vld [vmem:[#allocation27 + $0x458] ss:$12 sps:$4 sm:$0xff]   ;;  %v20888_v35 = vld [vmem:[#allocation27 + $0x450] ss:$12 sps:$4 sm:$0xff]  }
0x2af1   : > { %15245 = vmatprep.subr.bf16.mxu0 %v20830_v5  ;;  %v20895_v59 = vld [vmem:[#allocation27 + $0x46c] ss:$12 sps:$4 sm:$0xff]   ;;  %v20896_v2 = vld [vmem:[#allocation27 + $0x470] ss:$12 sps:$4 sm:$0xff]   ;;  %v20893_v5 = vld [vmem:[#allocation27 + $0x468] ss:$12 sps:$4 sm:$0xff]  }
0x2af2   : > { %18141 = vmatpush3.bf16.msra.mxu1 %v20827_v33  ;;  %v20892_v30 = vld [vmem:[#allocation27 + $0x398] ss:$12 sps:$4 sm:$0xff]  }
0x2af3   : > { %18142 = vmatprep.subr.bf16.mxu1 %v20831_v29  ;;  %v20900_v33 = vld [vmem:[#allocation27 + $0x484] ss:$12 sps:$4 sm:$0xff]  }
0x2af4   : > { %15246 = vmatpush1.bf16.msra.mxu0 %v20828_v43  ;;  %v20897_v29 = vld [vmem:[#allocation27 + $0x3b0] ss:$12 sps:$4 sm:$0xff]   ;;  %v20901_v43 = vld [vmem:[#allocation27 + $0x548] ss:$12 sps:$4 sm:$0xff]  }
0x2af5   : > { %15247 = vmatprep.subr.bf16.mxu0 %v20835_v52  ;;  %v20898_v52 = vld [vmem:[#allocation27 + $0x480] ss:$12 sps:$4 sm:$0xff]  }
0x2af6   : > { %18143 = vmatpush3.bf16.msra.mxu1 %v20832_v26  ;;  %v20905_v26 = vld [vmem:[#allocation27 + $0x49c] ss:$12 sps:$4 sm:$0xff]  }
0x2af7   : > { %18144 = vmatprep.subr.bf16.mxu1 %v20836_v24  ;;  %v20902_v24 = vld [vmem:[#allocation27 + $0x488] ss:$12 sps:$4 sm:$0xff]  }
0x2af8   : > { %15248 = vmatpush1.bf16.msra.mxu0 %v20833_v41  ;;  %v20906_v41 = vld [vmem:[#allocation27 + $0x560] ss:$12 sps:$4 sm:$0xff]  }
0x2af9   : > { %15249 = vmatprep.subr.bf16.mxu0 %v20840_v47  ;;  %v20903_v47 = vld [vmem:[#allocation27 + $0x498] ss:$12 sps:$4 sm:$0xff]  }
0x2afa   : > { %18145 = vmatpush3.bf16.msra.mxu1 %v20837_v11  ;;  %v20910_v11 = vld [vmem:[#allocation27 + $0x4b4] ss:$12 sps:$4 sm:$0xff]  }
0x2afb   : > { %18146 = vmatprep.subr.bf16.mxu1 %v20841_v14  ;;  %v20907_v14 = vld [vmem:[#allocation27 + $0x4a0] ss:$12 sps:$4 sm:$0xff]  }
0x2afc   : > { %15250 = vmatpush1.bf16.msra.mxu0 %v20838_v58  ;;  %v20911_v58 = vld [vmem:[#allocation27 + $0x578] ss:$12 sps:$4 sm:$0xff]  }
0x2afd   : > { %15251 = vmatprep.subr.bf16.mxu0 %v20845_v51  ;;  %v20908_v51 = vld [vmem:[#allocation27 + $0x4b0] ss:$12 sps:$4 sm:$0xff]  }
0x2afe   : > { %18147 = vmatpush3.bf16.msra.mxu1 %v20842_v4  ;;  %v20915_v4 = vld [vmem:[#allocation27 + $0x4cc] ss:$12 sps:$4 sm:$0xff]  }
0x2aff   : > { %18148 = vmatprep.subr.bf16.mxu1 %v20846_v45  ;;  %v20912_v45 = vld [vmem:[#allocation27 + $0x4b8] ss:$12 sps:$4 sm:$0xff]  }
0x2b00   : > { %15252 = vmatpush1.bf16.msra.mxu0 %v20843_v53  ;;  %v20916_v53 = vld [vmem:[#allocation27 + $0x590] ss:$12 sps:$4 sm:$0xff]  }
0x2b01   : > { %15253 = vmatprep.subr.bf16.mxu0 %v20850_v16  ;;  %v20913_v16 = vld [vmem:[#allocation27 + $0x4c8] ss:$12 sps:$4 sm:$0xff]  }
0x2b02   : > { %18149 = vmatpush3.bf16.msra.mxu1 %v20847_v62  ;;  %v20920_v62 = vld [vmem:[#allocation27 + $0x4e4] ss:$12 sps:$4 sm:$0xff]  }
0x2b03   : > { %18150 = vmatprep.subr.bf16.mxu1 %v20851_v63  ;;  %v20921_v63 = vld [vmem:[#allocation27 + $0x5a8] ss:$12 sps:$4 sm:$0xff]  }
0x2b04   : > { %15254 = vmatpush1.bf16.msra.mxu0 %v20848_v54  ;;  %v20918_v54 = vld [vmem:[#allocation27 + $0x4e0] ss:$12 sps:$4 sm:$0xff]  }
0x2b05   : > { %15255 = vmatprep.subr.bf16.mxu0 %v20855_v56  ;;  %v24730_v56 = vld [vmem:[#allocation26 + $0x8] sm:$0xf] }
0x2b06   : > { %18151 = vmatpush3.bf16.msra.mxu1 %v20852_v0  ;;  %v20925_v0 = vld [vmem:[#allocation27 + $0x4fc] ss:$12 sps:$4 sm:$0xff]  }
0x2b07   : > { %18152 = vmatprep.subr.bf16.mxu1 %v20856_v7  ;;  %v20922_v7 = vld [vmem:[#allocation27 + $0x4e8] ss:$12 sps:$4 sm:$0xff]  }
0x2b08   : > { %15256 = vmatpush1.bf16.msra.mxu0 %v20853_v8  ;;  %v11586_v8 = vrot.slane %v24730_v56, %v25079_v39 }
0x2b09   : > { %15257 = vmatprep.subr.bf16.mxu0 %v20860_v3  ;;  %v20926_v3 = vld [vmem:[#allocation27 + $0x5c0] ss:$12 sps:$4 sm:$0xff]  }
0x2b0a   : > { %18153 = vmatpush3.bf16.msra.mxu1 %v20857_v6  ;;  %v11578_v6 = vrot.slane %v24691_v20, %v6685_v57 }
0x2b0b   : > { %18160 = vmatprep.subr.bf16.mxu1 %v20861_v42  ;;  %v11590_v42 = vrot.slane %v24730_v56, %v25077_v23 }
0x2b0c   : > { %15258 = vmatpush1.bf16.msra.mxu0 %v20858_v46  ;;  %v20923_v46 = vld [vmem:[#allocation27 + $0x4f8] ss:$12 sps:$4 sm:$0xff]  }
0x2b0d   : > { %15487 = vmatmul.mubr.bf16.vlgmr.msra.gmra.mrb[20].mxu1 %v24719_v40  ;;  %15259 = vmatprep.subr.bf16.mxu0 %v20865_v61  ;;  %v20882_v40 = vld [vmem:[#allocation27 + $0x368] ss:$12 sps:$4 sm:$0xff]   ;;  %v11582_v61 = vrot.slane %v24691_v20, %v6689_v22  ;;  %v20935_v22 = vld [vmem:[#allocation27 + $0x52c] ss:$12 sps:$4 sm:$0xff]  }
0x2b0e   : > { %18161 = vmatpush3.bf16.msra.mxu1 %v20862_v37  ;;  %15527 = vmatprep.mubr.bf16.mxu1 %v24721_v10  ;;  %v20886_v10 = vld [vmem:[#allocation27 + $0x440] ss:$12 sps:$4 sm:$0xff]  }
0x2b0f   : > { %18162 = vmatprep.subr.bf16.mxu1 %v20866_v17  ;;  %v20930_v37 = vld [vmem:[#allocation27 + $0x514] ss:$12 sps:$4 sm:$0xff]  }
0x2b10   : > { %15260 = vmatpush1.bf16.msra.mxu0 %v20863_v49  ;;  %v20927_v49 = vld [vmem:[#allocation27 + $0x500] ss:$12 sps:$4 sm:$0xff]  }
0x2b11   : > { %15261 = vmatprep.subr.bf16.mxu0 %v20870_v21 }
0x2b12   : > { %18163 = vmatpush3.bf16.msra.mxu1 %v20867_v34 }
0x2b13   : > { %18164 = vmatprep.subr.bf16.mxu1 %v20871_v38 }
0x2b14   : > { %15262 = vmatpush1.bf16.msra.mxu0 %v20868_v18  ;;  %v20931_v18 = vld [vmem:[#allocation27 + $0x5d8] ss:$12 sps:$4 sm:$0xff]  }
0x2b15   : > { %15263 = vmatprep.subr.bf16.mxu0 %v20875_v25 }
0x2b16   : > { %18165 = vmatpush3.bf16.msra.mxu1 %v20872_v32 }
0x2b17   : > { %18166 = vmatprep.subr.bf16.mxu1 %v20876_v44 }
0x2b18   : > { %15264 = vmatpush1.bf16.msra.mxu0 %v20873_v27  ;;  %v20928_v27 = vld [vmem:[#allocation27 + $0x510] ss:$12 sps:$4 sm:$0xff]  }
0x2b19   : > { %15265 = vmatprep.subr.bf16.mxu0 %v20880_v19 }
0x2b1a   : > { %18167 = vmatpush3.bf16.msra.mxu1 %v20877_v36 }
0x2b1b   : > { %18168 = vmatprep.subr.bf16.mxu1 %v20881_v60 }
0x2b1c   : > { %15266 = vmatpush1.bf16.msra.mxu0 %v20878_v31 }
0x2b1d   : > { %15267 = vmatprep.subr.bf16.mxu0 %v20885_v12 }
0x2b1e   : > { %18169 = vmatpush3.bf16.msra.mxu1 %v20882_v40  ;;  %v20932_v40 = vld [vmem:[#allocation27 + $0x518] ss:$12 sps:$4 sm:$0xff]  }
0x2b1f   : > { %18170 = vmatprep.subr.bf16.mxu1 %v20886_v10 }
0x2b20   : > { %15268 = vmatpush1.bf16.msra.mxu0 %v20883_v48 }
0x2b21   : > { %15269 = vmatprep.subr.bf16.mxu0 %v20890_v1 }
0x2b22   : > { %18171 = vmatpush3.bf16.msra.mxu1 %v20887_v28  ;;  %v20936_v28 = vld [vmem:[#allocation27 + $0x5f0] ss:$12 sps:$4 sm:$0xff]  }
0x2b23   : > { %18172 = vmatprep.subr.bf16.mxu1 %v20891_v13 }
0x2b24   : > { %15270 = vmatpush1.bf16.msra.mxu0 %v20888_v35 }
0x2b25   : > { %15271 = vmatprep.subr.bf16.mxu0 %v20895_v59 }
0x2b26   : > { %18173 = vmatpush3.bf16.msra.mxu1 %v20892_v30 }
0x2b27   : > { %18174 = vmatprep.subr.bf16.mxu1 %v20896_v2  ;;  %v20933_v2 = vld [vmem:[#allocation27 + $0x528] ss:$12 sps:$4 sm:$0xff]  }
0x2b28   : > { %15272 = vmatpush1.bf16.msra.mxu0 %v20893_v5 }
0x2b29   : > { %15284 = vmatprep.subr.bf16.mxu0 %v20900_v33 }
0x2b2a   : > { %18175 = vmatpush3.bf16.msra.mxu1 %v20897_v29 }
0x2b2b   : > { %15274 = vmatmul.mubr.bf16.vlgmr.msra.gmra.mrb[12].mxu0 %v24717_v55  ;;  %18182 = vmatprep.subr.bf16.mxu1 %v20901_v43 }
0x2b2c   : > { %15285 = vmatpush1.bf16.msra.mxu0 %v20898_v52 }
0x2b2d   : > { %15528 = vmatmul.mubr.bf16.vlgmr.msra.gmra.mrb[24].mxu1 %v24717_v55  ;;  %15286 = vmatprep.subr.bf16.mxu0 %v20905_v26  ;;  %v20917_v55 = vld [vmem:[#allocation27 + $0x4d0] ss:$12 sps:$4 sm:$0xff]  }
0x2b2e   : > { %18183 = vmatpush3.bf16.msra.mxu1 %v20902_v24  ;;  %v20937_v26 = vld [vmem:[#allocation27 + $0x530] ss:$12 sps:$4 sm:$0xff]  }
0x2b2f   : > { %18184 = vmatprep.subr.bf16.mxu1 %v20906_v41  ;;  %v20940_v24 = vld [vmem:[#allocation27 + $0x544] ss:$12 sps:$4 sm:$0xff]  }
0x2b30   : > { %15287 = vmatpush1.bf16.msra.mxu0 %v20903_v47  ;;  %v20941_v47 = vld [vmem:[#allocation27 + $0x6c8] ss:$12 sps:$4 sm:$0xff]  }
0x2b31   : > { %15288 = vmatprep.subr.bf16.mxu0 %v20910_v11  ;;  %v20938_v11 = vld [vmem:[#allocation27 + $0x540] ss:$12 sps:$4 sm:$0xff]  }
0x2b32   : > { %18185 = vmatpush3.bf16.msra.mxu1 %v20907_v14  ;;  %v20945_v14 = vld [vmem:[#allocation27 + $0x55c] ss:$12 sps:$4 sm:$0xff]  }
0x2b33   : > { %18186 = vmatprep.subr.bf16.mxu1 %v20911_v58  ;;  %v20942_v58 = vld [vmem:[#allocation27 + $0x608] ss:$12 sps:$4 sm:$0xff]  }
0x2b34   : > { %15289 = vmatpush1.bf16.msra.mxu0 %v20908_v51  ;;  %v20946_v51 = vld [vmem:[#allocation27 + $0x6e0] ss:$12 sps:$4 sm:$0xff]  }
0x2b35   : > { %15290 = vmatprep.subr.bf16.mxu0 %v20915_v4  ;;  %v20943_v4 = vld [vmem:[#allocation27 + $0x558] ss:$12 sps:$4 sm:$0xff]  }
0x2b36   : > { %18187 = vmatpush3.bf16.msra.mxu1 %v20912_v45  ;;  %v20950_v45 = vld [vmem:[#allocation27 + $0x574] ss:$12 sps:$4 sm:$0xff]  }
0x2b37   : > { %18188 = vmatprep.subr.bf16.mxu1 %v20916_v53  ;;  %v20947_v53 = vld [vmem:[#allocation27 + $0x620] ss:$12 sps:$4 sm:$0xff]  }
0x2b38   : > { %15291 = vmatpush1.bf16.msra.mxu0 %v20913_v16  ;;  %v20951_v16 = vld [vmem:[#allocation27 + $0x6f8] ss:$12 sps:$4 sm:$0xff]  }
0x2b39   : > { %15292 = vmatprep.subr.bf16.mxu0 %v20920_v62  ;;  %v20948_v62 = vld [vmem:[#allocation27 + $0x570] ss:$12 sps:$4 sm:$0xff]  }
0x2b3a   : > { %18189 = vmatpush3.bf16.msra.mxu1 %v20917_v55  ;;  %v20955_v55 = vld [vmem:[#allocation27 + $0x58c] ss:$12 sps:$4 sm:$0xff]  }
0x2b3b   : > { %18190 = vmatprep.subr.bf16.mxu1 %v20921_v63  ;;  %v20952_v63 = vld [vmem:[#allocation27 + $0x638] ss:$12 sps:$4 sm:$0xff]  }
0x2b3c   : > { %15293 = vmatpush1.bf16.msra.mxu0 %v20918_v54  ;;  %v20956_v54 = vld [vmem:[#allocation27 + $0x710] ss:$12 sps:$4 sm:$0xff]  }
0x2b3d   : > { %15294 = vmatprep.subr.bf16.mxu0 %v20925_v0  ;;  %v20953_v0 = vld [vmem:[#allocation27 + $0x588] ss:$12 sps:$4 sm:$0xff]  }
0x2b3e   : > { %18191 = vmatpush3.bf16.msra.mxu1 %v20922_v7  ;;  %v13472_v17 = vpop.f32.mrb[8].mxu0  ;;  %v20960_v7 = vld [vmem:[#allocation27 + $0x5a4] ss:$12 sps:$4 sm:$0xff]  }
0x2b3f   : > { %v18715_v21 = vadd.f32 %v13472_v17, %v11586_v8  ;;  %v13386_v34 = vpop.f32.mrb[8].mxu1  ;;  %v13474_v38 = vpop.f32.mrb[9].mxu0  ;;  %18192 = vmatprep.subr.bf16.mxu1 %v20926_v3  ;;  %v20961_v3 = vld [vmem:[#allocation27 + $0x728] ss:$12 sps:$4 sm:$0xff]  }
0x2b40   : > { %v18711_v25 = vadd.f32 %v13386_v34, %v11578_v6  ;;  %v18716_v57 = vadd.f32 %v13474_v38, %v11590_v42  ;;  %v13388_v32 = vpop.f32.mrb[9].mxu1  ;;  %v13476_v44 = vpop.f32.mrb[10].mxu0  ;;  %15295 = vmatpush1.bf16.msra.mxu0 %v20923_v46  ;;  %v20962_v46 = vld [vmem:[#allocation27 + $0x668] ss:$12 sps:$4 sm:$0xff]   ;;  %v20968_v34 = vld [vmem:[#allocation27 + $0x5d0] ss:$12 sps:$4 sm:$0xff]  }
0x2b41   : > { %v18712_v19 = vadd.f32 %v13388_v32, %v11582_v61  ;;  %v18717_v36 = vadd.f32 %v13476_v44, %v11586_v8  ;;  %v13390_v15 = vpop.f32.mrb[10].mxu1  ;;  %v13478_v60 = vpop.f32.mrb[11].mxu0  ;;  %15296 = vmatprep.subr.bf16.mxu0 %v20930_v37  ;;  %v13575_v10 = vmax.f32 %v18715_v21, 0.0  ;;  %v20957_v8 = vld [vmem:[#allocation27 + $0x650] ss:$12 sps:$4 sm:$0xff]  }
0x2b42   : > { %v18713_v20 = vadd.f32 %v13390_v15, %v11578_v6  ;;  %v18718_v31 = vadd.f32 %v13478_v60, %v11590_v42  ;;  %18193 = vmatpush3.bf16.msra.mxu1 %v20927_v49  ;;  %v13392_v12 = vpop.f32.mrb[11].mxu1  ;;  %v13573_v13 = vmax.f32 %v18711_v25, 0.0  ;;  %v13576_v35 = vmax.f32 %v18716_v57, 0.0  ;;  %v20958_v6 = vld [vmem:[#allocation27 + $0x5a0] ss:$12 sps:$4 sm:$0xff]  }
0x2b43   : > { %v13587_v48 = vmax.f32 %v18717_v36, 0.0  ;;  %v18714_v1 = vadd.f32 %v13392_v12, %v11582_v61  ;;  %18194 = vmatprep.subr.bf16.mxu1 %v20931_v18  ;;  %v13574_v5 = vmax.f32 %v18712_v19, 0.0  ;;  %v20965_v42 = vld [vmem:[#allocation27 + $0x5bc] ss:$12 sps:$4 sm:$0xff]   ;;  %v20966_v61 = vld [vmem:[#allocation27 + $0x740] ss:$12 sps:$4 sm:$0xff]  }
0x2b44   : > { %v13585_v59 = vmax.f32 %v18713_v20, 0.0  ;;  %v13588_v30 = vmax.f32 %v18718_v31, 0.0  ;;  %15297 = vmatpush1.bf16.msra.mxu0 %v20928_v27  ;;  %v20963_v37 = vld [vmem:[#allocation27 + $0x5b8] ss:$12 sps:$4 sm:$0xff]   ;;  %v20970_v17 = vld [vmem:[#allocation27 + $0x5d4] ss:$12 sps:$4 sm:$0xff]  }
0x2b45   : > { %v24742_v33 = vpack.c.bf16 %v13587_v48, %v13575_v10  ;;  %v13586_v29 = vmax.f32 %v18714_v1, 0.0  ;;  %15298 = vmatprep.subr.bf16.mxu0 %v20935_v22  ;;  %v20967_v49 = vld [vmem:[#allocation27 + $0x680] ss:$12 sps:$4 sm:$0xff]   ;;  %v20971_v21 = vld [vmem:[#allocation27 + $0x758] ss:$12 sps:$4 sm:$0xff]  }
0x2b46   : > { %v24744_v43 = vpack.c.bf16 %v13585_v59, %v13573_v13  ;;  %v24746_v52 = vpack.c.bf16 %v13588_v30, %v13576_v35  ;;  %18195 = vmatpush3.bf16.msra.mxu1 %v20932_v40  ;;  %v20975_v38 = vld [vmem:[#allocation27 + $0x5ec] ss:$12 sps:$4 sm:$0xff]   ;;  %v20976_v25 = vld [vmem:[#allocation27 + $0x770] ss:$12 sps:$4 sm:$0xff]   ;;  %v20973_v57 = vld [vmem:[#allocation27 + $0x5e8] ss:$12 sps:$4 sm:$0xff]  }
0x2b47   : > { %v13598_v41 = vpack.c.bf16 %v13586_v29, %v13574_v5  ;;  %18196 = vmatprep.subr.bf16.mxu1 %v20936_v28  ;;  %v20972_v18 = vld [vmem:[#allocation27 + $0x698] ss:$12 sps:$4 sm:$0xff]   ;;  %v20977_v44 = vld [vmem:[#allocation27 + $0x6b0] ss:$12 sps:$4 sm:$0xff]   ;;  %v21002_v27 = vld [vmem:[#allocation27 + $0x848] ss:$12 sps:$4 sm:$0xff]  }
0x2b48   : > { %15299 = vmatpush1.bf16.msra.mxu0 %v20933_v2  ;;  %v20980_v32 = vld [vmem:[#allocation27 + $0x604] ss:$12 sps:$4 sm:$0xff]   ;;  %v20978_v19 = vld [vmem:[#allocation27 + $0x600] ss:$12 sps:$4 sm:$0xff]   ;;  %v20983_v36 = vld [vmem:[#allocation27 + $0x61c] ss:$12 sps:$4 sm:$0xff]  }
0x2b49   : > { %15316 = vmatprep.mubr.bf16.mxu0 %v13598_v41  ;;  %15568 = vmatprep.mubr.bf16.mxu1 %v13598_v41  ;;  %v21006_v15 = vld [vmem:[#allocation27 + $0x788] ss:$12 sps:$4 sm:$0xff]   ;;  %v21007_v60 = vld [vmem:[#allocation27 + $0x860] ss:$12 sps:$4 sm:$0xff]   ;;  %v20981_v22 = vld [vmem:[#allocation27 + $0x618] ss:$12 sps:$4 sm:$0xff]  }
0x2b4a   : > { %18197 = vmatpush3.bf16.msra.mxu1 %v20937_v26  ;;  %15300 = vmatprep.subr.bf16.mxu0 %v20940_v24  ;;  %v20986_v20 = vld [vmem:[#allocation27 + $0x634] ss:$12 sps:$4 sm:$0xff]   ;;  %v21012_v12 = vld [vmem:[#allocation27 + $0x878] ss:$12 sps:$4 sm:$0xff]   ;;  %v20984_v40 = vld [vmem:[#allocation27 + $0x630] ss:$12 sps:$4 sm:$0xff]  }
0x2b4b   : > { %18204 = vmatprep.subr.bf16.mxu1 %v20941_v47  ;;  %v21011_v31 = vld [vmem:[#allocation27 + $0x7a0] ss:$12 sps:$4 sm:$0xff]   ;;  %v21016_v48 = vld [vmem:[#allocation27 + $0x7b8] ss:$12 sps:$4 sm:$0xff]   ;;  %v21017_v1 = vld [vmem:[#allocation27 + $0x890] ss:$12 sps:$4 sm:$0xff]  }
0x2b4c   : > { %15301 = vmatpush1.bf16.msra.mxu0 %v20938_v11  ;;  %v20989_v10 = vld [vmem:[#allocation27 + $0x64c] ss:$12 sps:$4 sm:$0xff]   ;;  %v20987_v28 = vld [vmem:[#allocation27 + $0x648] ss:$12 sps:$4 sm:$0xff]   ;;  %v20992_v13 = vld [vmem:[#allocation27 + $0x664] ss:$12 sps:$4 sm:$0xff]  }
0x2b4d   : > { %15569 = vmatmul.mubr.bf16.vlgmr.msra.gmra.mrb[28].mxu1 %v24744_v43  ;;  %15302 = vmatprep.subr.bf16.mxu0 %v20945_v14  ;;  %v21021_v35 = vld [vmem:[#allocation27 + $0x7d0] ss:$12 sps:$4 sm:$0xff]   ;;  %v21022_v59 = vld [vmem:[#allocation27 + $0x8a8] ss:$12 sps:$4 sm:$0xff]   ;;  %v20990_v30 = vld [vmem:[#allocation27 + $0x660] ss:$12 sps:$4 sm:$0xff]  }
0x2b4e   : > { %18205 = vmatpush3.bf16.msra.mxu1 %v20942_v58  ;;  %15609 = vmatprep.mubr.bf16.mxu1 %v24746_v52  ;;  %v20995_v2 = vld [vmem:[#allocation27 + $0x67c] ss:$12 sps:$4 sm:$0xff]   ;;  %v21027_v29 = vld [vmem:[#allocation27 + $0x8c0] ss:$12 sps:$4 sm:$0xff]   ;;  %v21032_v24 = vld [vmem:[#allocation27 + $0x8d8] ss:$12 sps:$4 sm:$0xff]  }
0x2b4f   : > { %18206 = vmatprep.subr.bf16.mxu1 %v20946_v51  ;;  %v21026_v5 = vld [vmem:[#allocation27 + $0x7e8] ss:$12 sps:$4 sm:$0xff]   ;;  %v21031_v26 = vld [vmem:[#allocation27 + $0x800] ss:$12 sps:$4 sm:$0xff]   ;;  %v20996_v41 = vld [vmem:[#allocation27 + $0x690] ss:$12 sps:$4 sm:$0xff]  }
0x2b50   : > { %15303 = vmatpush1.bf16.msra.mxu0 %v20943_v4  ;;  %v21001_v47 = vld [vmem:[#allocation27 + $0x6ac] ss:$12 sps:$4 sm:$0xff]   ;;  %v21037_v14 = vld [vmem:[#allocation27 + $0x8f0] ss:$12 sps:$4 sm:$0xff]   ;;  %v20999_v58 = vld [vmem:[#allocation27 + $0x6a8] ss:$12 sps:$4 sm:$0xff]  }
0x2b51   : > { %15304 = vmatprep.subr.bf16.mxu0 %v20950_v45  ;;  %v21036_v11 = vld [vmem:[#allocation27 + $0x818] ss:$12 sps:$4 sm:$0xff]   ;;  %v21041_v4 = vld [vmem:[#allocation27 + $0x830] ss:$12 sps:$4 sm:$0xff]   ;;  %v21003_v45 = vld [vmem:[#allocation27 + $0x6c0] ss:$12 sps:$4 sm:$0xff]  }
0x2b52   : > { %18207 = vmatpush3.bf16.msra.mxu1 %v20947_v53  ;;  %v21005_v51 = vld [vmem:[#allocation27 + $0x6c4] ss:$12 sps:$4 sm:$0xff]   ;;  %v21010_v53 = vld [vmem:[#allocation27 + $0x6dc] ss:$12 sps:$4 sm:$0xff]  }
0x2b53   : > { %18208 = vmatprep.subr.bf16.mxu1 %v20951_v16  ;;  %v21008_v16 = vld [vmem:[#allocation27 + $0x6d8] ss:$12 sps:$4 sm:$0xff]  }
0x2b54   : > { %15305 = vmatpush1.bf16.msra.mxu0 %v20948_v62  ;;  %v21015_v62 = vld [vmem:[#allocation27 + $0x6f4] ss:$12 sps:$4 sm:$0xff]  }
0x2b55   : > { %15306 = vmatprep.subr.bf16.mxu0 %v20955_v55  ;;  %v21013_v55 = vld [vmem:[#allocation27 + $0x6f0] ss:$12 sps:$4 sm:$0xff]  }
0x2b56   : > { %18209 = vmatpush3.bf16.msra.mxu1 %v20952_v63  ;;  %v21020_v63 = vld [vmem:[#allocation27 + $0x70c] ss:$12 sps:$4 sm:$0xff]  }
0x2b57   : > { %18210 = vmatprep.subr.bf16.mxu1 %v20956_v54  ;;  %v21018_v54 = vld [vmem:[#allocation27 + $0x708] ss:$12 sps:$4 sm:$0xff]  }
0x2b58   : > { %15307 = vmatpush1.bf16.msra.mxu0 %v20953_v0  ;;  %v21025_v0 = vld [vmem:[#allocation27 + $0x724] ss:$12 sps:$4 sm:$0xff]  }
0x2b59   : > { %15308 = vmatprep.subr.bf16.mxu0 %v20960_v7  ;;  %v21023_v7 = vld [vmem:[#allocation27 + $0x720] ss:$12 sps:$4 sm:$0xff]  }
0x2b5a   : > { %18211 = vmatpush3.bf16.msra.mxu1 %v20957_v8  ;;  %v21030_v8 = vld [vmem:[#allocation27 + $0x73c] ss:$12 sps:$4 sm:$0xff]  }
0x2b5b   : > { %18212 = vmatprep.subr.bf16.mxu1 %v20961_v3  ;;  %v11594_v3 = vrot.slane %v24730_v56, %v25078_v9 }
0x2b5c   : > { %15309 = vmatpush1.bf16.msra.mxu0 %v20958_v6  ;;  %v21028_v6 = vld [vmem:[#allocation27 + $0x738] ss:$12 sps:$4 sm:$0xff]  }
0x2b5d   : > { %15310 = vmatprep.subr.bf16.mxu0 %v20965_v42  ;;  %v11598_v42 = vrot.slane %v24730_v56, %v24235_v50  ;;  %v21044_v50 = vld [vmem:[#allocation27 + $0x784] ss:$12 sps:$4 sm:$0xff]  }
0x2b5e   : > { %18213 = vmatpush3.bf16.msra.mxu1 %v20962_v46  ;;  %v21035_v46 = vld [vmem:[#allocation27 + $0x754] ss:$12 sps:$4 sm:$0xff]  }
0x2b5f   : > { %18214 = vmatprep.subr.bf16.mxu1 %v20966_v61 }
0x2b60   : > { %15311 = vmatpush1.bf16.msra.mxu0 %v20963_v37 }
0x2b61   : > { %15312 = vmatprep.subr.bf16.mxu0 %v20970_v17 }
0x2b62   : > { %18215 = vmatpush3.bf16.msra.mxu1 %v20967_v49  ;;  %v21033_v49 = vld [vmem:[#allocation27 + $0x750] ss:$12 sps:$4 sm:$0xff]  }
0x2b63   : > { %18216 = vmatprep.subr.bf16.mxu1 %v20971_v21 }
0x2b64   : > { %15313 = vmatpush1.bf16.msra.mxu0 %v20968_v34 }
0x2b65   : > { %15314 = vmatprep.subr.bf16.mxu0 %v20975_v38  ;;  %v21040_v38 = vld [vmem:[#allocation27 + $0x76c] ss:$12 sps:$4 sm:$0xff]  }
0x2b66   : > { %18217 = vmatpush3.bf16.msra.mxu1 %v20972_v18 }
0x2b67   : > { %18218 = vmatprep.subr.bf16.mxu1 %v20976_v25 }
0x2b68   : > { %15315 = vmatpush1.bf16.msra.mxu0 %v20973_v57 }
0x2b69   : > { %15327 = vmatprep.subr.bf16.mxu0 %v20980_v32 }
0x2b6a   : > { %18219 = vmatpush3.bf16.msra.mxu1 %v20977_v44 }
0x2b6b   : > { %15317 = vmatmul.mubr.bf16.vlgmr.msra.gmra.mrb[12].mxu0 %v24744_v43  ;;  %18226 = vmatprep.subr.bf16.mxu1 %v21002_v27  ;;  %v20993_v43 = vld [vmem:[#allocation27 + $0x678] ss:$12 sps:$4 sm:$0xff]   ;;  %v21038_v27 = vld [vmem:[#allocation27 + $0x768] ss:$12 sps:$4 sm:$0xff]  }
0x2b6c   : > { %15328 = vmatpush1.bf16.msra.mxu0 %v20978_v19  ;;  %15359 = vmatprep.mubr.bf16.mxu0 %v24746_v52  ;;  %v20998_v52 = vld [vmem:[#allocation27 + $0x694] ss:$12 sps:$4 sm:$0xff]  }
0x2b6d   : > { %15610 = vmatmul.mubr.bf16.vlgmr.msra.gmra.mrb[32].mxu1 %v24742_v33  ;;  %15329 = vmatprep.subr.bf16.mxu0 %v20983_v36 }
0x2b6e   : > { %18227 = vmatpush3.bf16.msra.mxu1 %v21006_v15 }
0x2b6f   : > { %18228 = vmatprep.subr.bf16.mxu1 %v21007_v60  ;;  %v21042_v60 = vld [vmem:[#allocation27 + $0x780] ss:$12 sps:$4 sm:$0xff]  }
0x2b70   : > { %15330 = vmatpush1.bf16.msra.mxu0 %v20981_v22  ;;  %v21047_v22 = vld [vmem:[#allocation27 + $0x79c] ss:$12 sps:$4 sm:$0xff]  }
0x2b71   : > { %15331 = vmatprep.subr.bf16.mxu0 %v20986_v20  ;;  %v21045_v20 = vld [vmem:[#allocation27 + $0x798] ss:$12 sps:$4 sm:$0xff]  }
0x2b72   : > { %18229 = vmatpush3.bf16.msra.mxu1 %v21011_v31  ;;  %v21050_v31 = vld [vmem:[#allocation27 + $0x7b4] ss:$12 sps:$4 sm:$0xff]  }
0x2b73   : > { %18230 = vmatprep.subr.bf16.mxu1 %v21012_v12  ;;  %v21048_v12 = vld [vmem:[#allocation27 + $0x7b0] ss:$12 sps:$4 sm:$0xff]  }
0x2b74   : > { %15332 = vmatpush1.bf16.msra.mxu0 %v20984_v40  ;;  %v21053_v40 = vld [vmem:[#allocation27 + $0x7cc] ss:$12 sps:$4 sm:$0xff]  }
0x2b75   : > { %15333 = vmatprep.subr.bf16.mxu0 %v20989_v10  ;;  %v21051_v10 = vld [vmem:[#allocation27 + $0x7c8] ss:$12 sps:$4 sm:$0xff]  }
0x2b76   : > { %18231 = vmatpush3.bf16.msra.mxu1 %v21016_v48  ;;  %v21056_v48 = vld [vmem:[#allocation27 + $0x7e4] ss:$12 sps:$4 sm:$0xff]  }
0x2b77   : > { %18232 = vmatprep.subr.bf16.mxu1 %v21017_v1  ;;  %v21054_v1 = vld [vmem:[#allocation27 + $0x7e0] ss:$12 sps:$4 sm:$0xff]  }
0x2b78   : > { %15334 = vmatpush1.bf16.msra.mxu0 %v20987_v28  ;;  %v21059_v28 = vld [vmem:[#allocation27 + $0x7fc] ss:$12 sps:$4 sm:$0xff]  }
0x2b79   : > { %15335 = vmatprep.subr.bf16.mxu0 %v20992_v13  ;;  %v21057_v13 = vld [vmem:[#allocation27 + $0x7f8] ss:$12 sps:$4 sm:$0xff]  }
0x2b7a   : > { %18233 = vmatpush3.bf16.msra.mxu1 %v21021_v35 }
0x2b7b   : > { %18234 = vmatprep.subr.bf16.mxu1 %v21022_v59  ;;  %v21060_v59 = vld [vmem:[#allocation27 + $0x810] ss:$12 sps:$4 sm:$0xff]  }
0x2b7c   : > { %15336 = vmatpush1.bf16.msra.mxu0 %v20990_v30 }
0x2b7d   : > { %15337 = vmatprep.subr.bf16.mxu0 %v20995_v2  ;;  %v21065_v2 = vld [vmem:[#allocation27 + $0x82c] ss:$12 sps:$4 sm:$0xff]  }
0x2b7e   : > { %18235 = vmatpush3.bf16.msra.mxu1 %v21026_v5 }
0x2b7f   : > { %18236 = vmatprep.subr.bf16.mxu1 %v21027_v29 }
0x2b80   : > { %15338 = vmatpush1.bf16.msra.mxu0 %v20993_v43 }
0x2b81   : > { %15339 = vmatprep.subr.bf16.mxu0 %v20998_v52 }
0x2b82   : > { %18237 = vmatpush3.bf16.msra.mxu1 %v21031_v26  ;;  %v21063_v26 = vld [vmem:[#allocation27 + $0x828] ss:$12 sps:$4 sm:$0xff]  }
0x2b83   : > { %18238 = vmatprep.subr.bf16.mxu1 %v21032_v24  ;;  %v21068_v24 = vld [vmem:[#allocation27 + $0x844] ss:$12 sps:$4 sm:$0xff]  }
0x2b84   : > { %15340 = vmatpush1.bf16.msra.mxu0 %v20996_v41  ;;  %v21066_v41 = vld [vmem:[#allocation27 + $0x840] ss:$12 sps:$4 sm:$0xff]  }
0x2b85   : > { %15341 = vmatprep.subr.bf16.mxu0 %v21001_v47  ;;  %v21071_v47 = vld [vmem:[#allocation27 + $0x85c] ss:$12 sps:$4 sm:$0xff]  }
0x2b86   : > { %18239 = vmatpush3.bf16.msra.mxu1 %v21036_v11  ;;  %v21069_v11 = vld [vmem:[#allocation27 + $0x858] ss:$12 sps:$4 sm:$0xff]  }
0x2b87   : > { %18240 = vmatprep.subr.bf16.mxu1 %v21037_v14  ;;  %v21074_v14 = vld [vmem:[#allocation27 + $0x874] ss:$12 sps:$4 sm:$0xff]  }
0x2b88   : > { %15342 = vmatpush1.bf16.msra.mxu0 %v20999_v58  ;;  %v21072_v58 = vld [vmem:[#allocation27 + $0x870] ss:$12 sps:$4 sm:$0xff]  }
0x2b89   : > { %15343 = vmatprep.subr.bf16.mxu0 %v21005_v51  ;;  %v21077_v51 = vld [vmem:[#allocation27 + $0x88c] ss:$12 sps:$4 sm:$0xff]  }
0x2b8a   : > { %18241 = vmatpush3.bf16.msra.mxu1 %v21041_v4  ;;  %v21075_v4 = vld [vmem:[#allocation27 + $0x888] ss:$12 sps:$4 sm:$0xff]  }
0x2b8c   : > { %15344 = vmatpush1.bf16.msra.mxu0 %v21003_v45  ;;  %v21080_v45 = vld [vmem:[#allocation27 + $0x8a4] ss:$12 sps:$4 sm:$0xff]  }
0x2b8d   : > { %15345 = vmatprep.subr.bf16.mxu0 %v21010_v53  ;;  %v21078_v53 = vld [vmem:[#allocation27 + $0x8a0] ss:$12 sps:$4 sm:$0xff]  }
0x2b90   : > { %15346 = vmatpush1.bf16.msra.mxu0 %v21008_v16  ;;  %v21083_v16 = vld [vmem:[#allocation27 + $0x8bc] ss:$12 sps:$4 sm:$0xff]  }
0x2b91   : > { %15347 = vmatprep.subr.bf16.mxu0 %v21015_v62  ;;  %v24761_v62 = vld [vmem:[#allocation29] sm:$0x7] }
0x2b94   : > { %15348 = vmatpush1.bf16.msra.mxu0 %v21013_v55  ;;  %v21081_v55 = vld [vmem:[#allocation27 + $0x8b8] ss:$12 sps:$4 sm:$0xff]  }
0x2b95   : > { %15349 = vmatprep.subr.bf16.mxu0 %v21020_v63  ;;  %v21086_v63 = vld [vmem:[#allocation27 + $0x8d4] ss:$12 sps:$4 sm:$0xff]  }
0x2b98   : > { %15350 = vmatpush1.bf16.msra.mxu0 %v21018_v54  ;;  %v13615_v54 = vrot.slane %v24761_v62, %v25078_v9 }
0x2b99   : > { %15351 = vmatprep.subr.bf16.mxu0 %v21025_v0 }
0x2b9c   : > { %15352 = vmatpush1.bf16.msra.mxu0 %v21023_v7  ;;  %v21084_v7 = vld [vmem:[#allocation27 + $0x8d0] ss:$12 sps:$4 sm:$0xff]  }
0x2b9d   : > { %15353 = vmatprep.subr.bf16.mxu0 %v21030_v8 }
0x2b9f   : > { %v13558_v61 = vpop.f32.mrb[12].mxu1 }
0x2ba0   : > { %v18719_v37 = vadd.f32 %v13558_v61, %v11594_v3  ;;  %v13560_v17 = vpop.f32.mrb[13].mxu1  ;;  %15354 = vmatpush1.bf16.msra.mxu0 %v21028_v6 }
0x2ba1   : > { %v18720_v21 = vadd.f32 %v13560_v17, %v11598_v42  ;;  %v13562_v34 = vpop.f32.mrb[14].mxu1  ;;  %15355 = vmatprep.subr.bf16.mxu0 %v21035_v46 }
0x2ba2   : > { %v18721_v18 = vadd.f32 %v13562_v34, %v11594_v3  ;;  %v13564_v25 = vpop.f32.mrb[15].mxu1  ;;  %v13577_v32 = vmax.f32 %v18719_v37, 0.0  ;;  %v21089_v3 = vld [vmem:[#allocation27 + $0x8ec] ss:$12 sps:$4 sm:$0xff]  }
0x2ba3   : > { %v18722_v57 = vadd.f32 %v13564_v25, %v11598_v42  ;;  %v13578_v19 = vmax.f32 %v18720_v21, 0.0  ;;  %v21087_v21 = vld [vmem:[#allocation27 + $0x8e8] ss:$12 sps:$4 sm:$0xff]  }
0x2ba4   : > { %v13589_v44 = vmax.f32 %v18721_v18, 0.0  ;;  %15356 = vmatpush1.bf16.msra.mxu0 %v21033_v49 }
0x2ba5   : > { %v13590_v36 = vmax.f32 %v18722_v57, 0.0  ;;  %15357 = vmatprep.subr.bf16.mxu0 %v21040_v38 }
0x2ba6   : > { %v24757_v56 = vpack.c.bf16 %v13589_v44, %v13577_v32 }
0x2ba7   : > { %v13602_v15 = vpack.c.bf16 %v13590_v36, %v13578_v19  ;;  %v21091_v19 = vld [vmem:[#allocation30] sm:$0xff]   ;;  %v21092_v36 = vld [vmem:[#allocation30 + $0x48] sm:$0xff]  }
0x2ba8   : > { %15358 = vmatpush1.bf16.msra.mxu0 %v21038_v27  ;;  %v21090_v27 = vld [vmem:[#allocation30 + $0x40] sm:$0xff]  }
0x2ba9   : > { %15650 = vmatprep.mubr.bf16.mxu1 %v13602_v15  ;;  %15370 = vmatprep.subr.bf16.mxu0 %v21044_v50 }
0x2baa   : > { %15651 = vmatmul.mubr.bf16.vlgmr.msra.gmra.mrb[36].mxu1 %v24757_v56  ;;  %18248 = vmatprep.subr.bf16.mxu1 %v21090_v27 }
0x2bab   : > { %15360 = vmatmul.mubr.bf16.vlgmr.msra.gmra.mrb[12].mxu0 %v24742_v33  ;;  %v21062_v33 = vld [vmem:[#allocation27 + $0x814] ss:$12 sps:$4 sm:$0xff]   ;;  %18249 = vmatpush3.bf16.msra.mxu1 %v21091_v19 }
0x2bac   : > { %15371 = vmatpush1.bf16.msra.mxu0 %v21042_v60  ;;  %15402 = vmatprep.mubr.bf16.mxu0 %v13602_v15  ;;  %v21093_v15 = vld [vmem:[#allocation30 + $0x8] sm:$0xff]   ;;  %v21094_v60 = vld [vmem:[#allocation30 + $0x50] sm:$0xff]  }
0x2bad   : > { %15372 = vmatprep.subr.bf16.mxu0 %v21047_v22  ;;  %18250 = vmatprep.subr.bf16.mxu1 %v21092_v36  ;;  %v21095_v22 = vld [vmem:[#allocation30 + $0x10] sm:$0xff]  }
0x2baf   : > { %18251 = vmatpush3.bf16.msra.mxu1 %v21093_v15 }
0x2bb0   : > { %15373 = vmatpush1.bf16.msra.mxu0 %v21045_v20  ;;  %18252 = vmatprep.subr.bf16.mxu1 %v21094_v60  ;;  %v21097_v20 = vld [vmem:[#allocation30 + $0x18] sm:$0xff]   ;;  %v17816_v60 = vld [vmem:[#allocation32] ss:$0 sm:$0xff] }
0x2bb1   : > { %15374 = vmatprep.subr.bf16.mxu0 %v21050_v31  ;;  %v21098_v31 = vld [vmem:[#allocation30 + $0x60] sm:$0xff]  }
0x2bb3   : > { %18253 = vmatpush3.bf16.msra.mxu1 %v21095_v22 }
0x2bb4   : > { %15375 = vmatpush1.bf16.msra.mxu0 %v21048_v12  ;;  %v21099_v12 = vld [vmem:[#allocation30 + $0x20] sm:$0xff]  }
0x2bb5   : > { %15376 = vmatprep.subr.bf16.mxu0 %v21053_v40  ;;  %v21100_v40 = vld [vmem:[#allocation30 + $0x68] sm:$0xff]  }
0x2bb8   : > { %15377 = vmatpush1.bf16.msra.mxu0 %v21051_v10  ;;  %v21101_v10 = vld [vmem:[#allocation30 + $0x28] sm:$0xff]  }
0x2bb9   : > { %15378 = vmatprep.subr.bf16.mxu0 %v21056_v48 }
0x2bbc   : > { %15379 = vmatpush1.bf16.msra.mxu0 %v21054_v1 }
0x2bbd   : > { %15380 = vmatprep.subr.bf16.mxu0 %v21059_v28 }
0x2bc0   : > { %v18132_v35 = vpop.f32.mrb[16].mxu1  ;;  %15381 = vmatpush1.bf16.msra.mxu0 %v21057_v13 }
0x2bc1   : > { %v18133_v30 = vpop.f32.mrb[17].mxu1  ;;  %15382 = vmatprep.subr.bf16.mxu0 %v21062_v33 }
0x2bc2   : > { %v18134_v5 = vadd.f32 %v18133_v30, %v18132_v35  ;;  %v18135_v29 = vpop.f32.mrb[18].mxu1 }
0x2bc3   : > { %v18136_v43 = vpop.f32.mrb[19].mxu1 }
0x2bc4   : > { %v18137_v52 = vadd.f32 %v18136_v43, %v18135_v29  ;;  %15383 = vmatpush1.bf16.msra.mxu0 %v21060_v59  ;;  %v15448_v6 = vadd.f32 %v18134_v5, %v13615_v54  ;;  %v21103_v5 = vld [vmem:[#allocation30 + $0x30] sm:$0xff]  }
0x2bc5   : > { %15384 = vmatprep.subr.bf16.mxu0 %v21065_v2  ;;  %v21102_v2 = vld [vmem:[#allocation30 + $0x70] sm:$0xff]  }
0x2bc6   : > { %v15451_v37 = vadd.f32 %v18137_v52, %v13615_v54  ;;  %v21104_v52 = vld [vmem:[#allocation30 + $0x78] sm:$0xff]  }
0x2bc8   : > { %15385 = vmatpush1.bf16.msra.mxu0 %v21063_v26 }
0x2bc9   : > { %15386 = vmatprep.subr.bf16.mxu0 %v21068_v24 }
0x2bcc   : > { %15387 = vmatpush1.bf16.msra.mxu0 %v21066_v41  ;;  %v21105_v41 = vld [vmem:[#allocation30 + $0x38] sm:$0xff]  }
0x2bcd   : > { %15388 = vmatprep.subr.bf16.mxu0 %v21071_v47 }
0x2bd0   : > { %15389 = vmatpush1.bf16.msra.mxu0 %v21069_v11 }
0x2bd1   : > { %15390 = vmatprep.subr.bf16.mxu0 %v21074_v14 }
0x2bd4   : > { %15391 = vmatpush1.bf16.msra.mxu0 %v21072_v58 }
0x2bd5   : > { %15392 = vmatprep.subr.bf16.mxu0 %v21077_v51  ;;  %v21806_v51 = vmov 0.0  }
0x2bd8   : > { %15393 = vmatpush1.bf16.msra.mxu0 %v21075_v4 }
0x2bd9   : > { %15394 = vmatprep.subr.bf16.mxu0 %v21080_v45 }
0x2bdc   : > { %15395 = vmatpush1.bf16.msra.mxu0 %v21078_v53 }
0x2bdd   : > { %15396 = vmatprep.subr.bf16.mxu0 %v21083_v16 }
0x2be0   : > { %v18154_v0 = vpop.f32.mrb[20].mxu1  ;;  %15397 = vmatpush1.bf16.msra.mxu0 %v21081_v55 }
0x2be1   : > { %v18155_v8 = vpop.f32.mrb[21].mxu1  ;;  %15398 = vmatprep.subr.bf16.mxu0 %v21086_v63 }
0x2be2   : > { %v18156_v42 = vadd.f32 %v18155_v8, %v18154_v0  ;;  %v18157_v46 = vpop.f32.mrb[22].mxu1  ;;  %v13607_v8 = vrot.slane %v24761_v62, %v25079_v39  ;;  %v21108_v39 = vld [vmem:[#allocation30 + $0x90] sm:$0xff]  }
0x2be3   : > { %v18158_v61 = vpop.f32.mrb[23].mxu1 }
0x2be4   : > { %v15489_v17 = vadd.f32 %v18156_v42, %v15448_v6  ;;  %v18159_v49 = vadd.f32 %v18158_v61, %v18157_v46  ;;  %15399 = vmatpush1.bf16.msra.mxu0 %v21084_v7  ;;  %v13611_v6 = vrot.slane %v24761_v62, %v25077_v23  ;;  %v21109_v23 = vld [vmem:[#allocation30 + $0x98] sm:$0xff]   ;;  %v21110_v62 = vld [vmem:[#allocation30 + $0xa0] sm:$0xff]  }
0x2be5   : > { %15400 = vmatprep.subr.bf16.mxu0 %v21089_v3 }
0x2be6   : > { %v15492_v34 = vadd.f32 %v18159_v49, %v15451_v37 }
0x2be8   : > { %15401 = vmatpush1.bf16.msra.mxu0 %v21087_v21 }
0x2beb   : > { %15403 = vmatmul.mubr.bf16.vlgmr.msra.gmra.mrb[12].mxu0 %v24757_v56  ;;  %v21096_v56 = vld [vmem:[#allocation30 + $0x58] sm:$0xff]  }
0x2bec   : > { %18254 = vmatprep.subr.bf16.mxu1 %v21096_v56 }
0x2bed   : > { %18255 = vmatpush3.bf16.msra.mxu1 %v21097_v20 }
0x2bee   : > { %18256 = vmatprep.subr.bf16.mxu1 %v21098_v31 }
0x2bf1   : > { %18257 = vmatpush3.bf16.msra.mxu1 %v21099_v12 }
0x2bf2   : > { %18258 = vmatprep.subr.bf16.mxu1 %v21100_v40 }
0x2bf5   : > { %18259 = vmatpush3.bf16.msra.mxu1 %v21101_v10 }
0x2bf6   : > { %18260 = vmatprep.subr.bf16.mxu1 %v21102_v2 }
0x2bf9   : > { %18261 = vmatpush3.bf16.msra.mxu1 %v21103_v5 }
0x2bfa   : > { %18262 = vmatprep.subr.bf16.mxu1 %v21104_v52 }
0x2bfd   : > { %18263 = vmatpush3.bf16.msra.mxu1 %v21105_v41 }
0x2bfe   : > { %18587 = vmatprep.subr.bf16.mxu1 %v21806_v51 }
0x2c00   : > { %v18176_v9 = vpop.f32.mrb[24].mxu1 }
0x2c01   : > { %v18177_v38 = vpop.f32.mrb[25].mxu1 }
0x2c02   : > { %v18178_v18 = vadd.f32 %v18177_v38, %v18176_v9  ;;  %v18179_v25 = vpop.f32.mrb[26].mxu1  ;;  %v21106_v38 = vld [vmem:[#allocation30 + $0x80] sm:$0xff]  }
0x2c03   : > { %v18180_v57 = vpop.f32.mrb[27].mxu1 }
0x2c04   : > { %v15530_v32 = vadd.f32 %v18178_v18, %v15489_v17  ;;  %v18181_v44 = vadd.f32 %v18180_v57, %v18179_v25  ;;  %v21107_v18 = vld [vmem:[#allocation30 + $0x88] sm:$0xff]   ;;  %v21112_v57 = vld [vmem:[#allocation30 + $0xb0] sm:$0xff]  }
0x2c05   : > { %v21111_v25 = vld [vmem:[#allocation30 + $0xa8] sm:$0xff]  }
0x2c06   : > { %v15533_v50 = vadd.f32 %v18181_v44, %v15492_v34 }
0x2c20   : > { %v18198_v48 = vpop.f32.mrb[28].mxu1 }
0x2c21   : > { %v18199_v1 = vpop.f32.mrb[29].mxu1 }
0x2c22   : > { %v18200_v28 = vadd.f32 %v18199_v1, %v18198_v48  ;;  %v18201_v13 = vpop.f32.mrb[30].mxu1 }
0x2c23   : > { %v18202_v33 = vpop.f32.mrb[31].mxu1 }
0x2c24   : > { %v15571_v35 = vadd.f32 %v18200_v28, %v15530_v32  ;;  %v18203_v59 = vadd.f32 %v18202_v33, %v18201_v13  ;;  %v21113_v32 = vld [vmem:[#allocation30 + $0xb8] sm:$0xff]  }
0x2c26   : > { %v15574_v30 = vadd.f32 %v18203_v59, %v15533_v50 }
0x2c40   : > { %v18220_v29 = vpop.f32.mrb[32].mxu1 }
0x2c41   : > { %v18221_v43 = vpop.f32.mrb[33].mxu1 }
0x2c42   : > { %v18222_v26 = vadd.f32 %v18221_v43, %v18220_v29  ;;  %v18223_v24 = vpop.f32.mrb[34].mxu1 }
0x2c43   : > { %v18224_v47 = vpop.f32.mrb[35].mxu1 }
0x2c44   : > { %v15612_v11 = vadd.f32 %v18222_v26, %v15571_v35  ;;  %v18225_v14 = vadd.f32 %v18224_v47, %v18223_v24 }
0x2c46   : > { %v15615_v58 = vadd.f32 %v18225_v14, %v15574_v30 }
0x2c7d   : > { %v18242_v4 = vpop.f32.mrb[36].mxu1 }
0x2c7e   : > { %v18243_v45 = vpop.f32.mrb[37].mxu1 }
0x2c7f   : > { %v18244_v53 = vadd.f32 %v18243_v45, %v18242_v4  ;;  %v18245_v16 = vpop.f32.mrb[38].mxu1 }
0x2c80   : > { %v18246_v55 = vpop.f32.mrb[39].mxu1 }
0x2c81   : > { %v15653_v63 = vadd.f32 %v18244_v53, %v15612_v11  ;;  %v18247_v54 = vadd.f32 %v18246_v55, %v18245_v16 }
0x2c83   : > { %v15656_v0 = vadd.f32 %v18247_v54, %v15615_v58 }
0x2c85   : > { %v15709_v7 = vpack.c.bf16 %v15656_v0, %v15653_v63 }
0x2cbe   : > { %v15404_v3 = vpop.f32.mrb[12].mxu0 }
0x2cbf   : > { %v15406_v42 = vpop.f32.mrb[13].mxu0  ;;  %v18723_v61 = vadd.f32 %v15404_v3, %v13607_v8 }
0x2cc0   : > { %v15408_v46 = vpop.f32.mrb[14].mxu0  ;;  %v18724_v49 = vadd.f32 %v15406_v42, %v13611_v6 }
0x2cc1   : > { %v18725_v37 = vadd.f32 %v15408_v46, %v13607_v8  ;;  %v15410_v17 = vpop.f32.mrb[15].mxu0 }
0x2cc2   : > { %v18726_v21 = vadd.f32 %v15410_v17, %v13611_v6 }
0x2cc3   : > { %v15707_v34 = vpack.c.bf16 %v18725_v37, %v18723_v61 }
0x2cc4   : > { %v15708_v9 = vpack.c.bf16 %v18726_v21, %v18724_v49 }
0x2cc6   : > { %15893 = vmatprep.mubr.bf16.mxu1 %v15708_v9 }
0x2cc7   : > { %15894 = vmatmul.mubr.bf16.vlgmr.msra.gmra.mrb[40].mxu1 %v15707_v34 }
0x2cc8   : > { %18588 = vmatpush3.bf16.msra.mxu1 %v21106_v38  ;;  %18603 = vmatprep.mubr.msk.bf16.mxu1 %vm21807_vm5, %v21806_v51 }
0x2cc9   : > { %18589 = vmatprep.subr.bf16.mxu1 %v21806_v51 }
0x2ccc   : > { %18590 = vmatpush3.bf16.msra.mxu1 %v21107_v18 }
0x2ccd   : > { %18591 = vmatprep.subr.bf16.mxu1 %v21806_v51 }
0x2cd0   : > { %18592 = vmatpush3.bf16.msra.mxu1 %v21108_v39 }
0x2cd1   : > { %18593 = vmatprep.subr.bf16.mxu1 %v21806_v51 }
0x2cd4   : > { %18594 = vmatpush3.bf16.msra.mxu1 %v21109_v23 }
0x2cd5   : > { %18595 = vmatprep.subr.bf16.mxu1 %v21806_v51 }
0x2cd8   : > { %18596 = vmatpush3.bf16.msra.mxu1 %v21110_v62 }
0x2cd9   : > { %18597 = vmatprep.subr.bf16.mxu1 %v21806_v51 }
0x2cdc   : > { %18598 = vmatpush3.bf16.msra.mxu1 %v21111_v25 }
0x2cdd   : > { %18599 = vmatprep.subr.bf16.mxu1 %v21806_v51 }
0x2ce0   : > { %18600 = vmatpush3.bf16.msra.mxu1 %v21112_v57 }
0x2ce1   : > { %18601 = vmatprep.subr.bf16.mxu1 %v21806_v51 }
0x2ce4   : > { %18602 = vmatpush3.bf16.msra.mxu1 %v21113_v32 }
0x2ce7   : > { %18604 = vmatmul.mubr.bf16.vlgmr.msra.gmra.mrb[44].mxu1 %v15709_v7 }
0x2d9a   : > { %v18264_v44 = vpop.f32.mrb[40].mxu1 }
0x2d9b   : > { %v18265_v27 = vpop.f32.mrb[41].mxu1 }
0x2d9c   : > { %v18266_v19 = vadd.f32 %v18265_v27, %v18264_v44  ;;  %v18267_v36 = vpop.f32.mrb[42].mxu1 }
0x2d9d   : > { %v18268_v50 = vpop.f32.mrb[43].mxu1 }
0x2d9e   : > { %v18269_v15 = vadd.f32 %v18268_v50, %v18267_v36  ;;  %v15896_v22 = vadd.f32 %v18266_v19, %v17816_v60 }
0x2da0   : > { %v15899_v12 = vadd.f32 %v18269_v15, %v17816_v60 }
0x2dba   : > { %v15936_v56 = vpop.f32.mrb[44].mxu1 }
0x2dbb   : > { %v15937_v20 = vadd.f32 %v15936_v56, %v15896_v22  ;;  %v18605_v31 = vpop.f32.mrb[45].mxu1 }
0x2dbc   : > { %v15939_v40 = vpop.f32.mrb[46].mxu1 }
0x2dbd   : > { %15943 = vst [vmem:[#allocation33] sm:$0xff] %v15937_v20  ;;  %v15940_v10 = vadd.f32 %v15939_v40, %v15899_v12  ;;  %v18606_v48 = vpop.f32.mrb[47].mxu1 }
0x2dbf   : > { %15944 = vst [vmem:[#allocation33 + $0x8] sm:$0xff] %v15940_v10 }
0x2dc0 PF: > { %s25081_s18 = sld [smem:[#allocation47_spill]]  ;;  %s21808_s28 = smov [#allocation33]  }
0x2dc1   : > { %s15951_s2 = sshll.u32 %s21808_s28, 4  ;;  %s15952_s2 = int_to_ptr.vmem [resolvable:$true] %s15951_s2 }
0x2dc2   : > { %s21672_s4 = scalar_lea.vmem %s15952_s2, 256  ;;  %p21679_p11 = scmp.lt.s32.totalorder %s15952_s2, %s15952_s2 }
0x2dc3   : > { %p21673_p9 = scmp.ne.s32.totalorder %s15952_s2, %s21672_s4  ;;  %p21680_p1 = scmp.lt.s32.totalorder %s21672_s4, %s21672_s4 }
0x2dc5   : > { %p21681_p10 = por %p21680_p1, %p21679_p11 }
0x2dc6   : > { %p18928_p6 = scmp.eq.s32.totalorder %s25081_s18, 5 }
0x2dc8   : > { %p21674_p5 = pnand %p21673_p9, %p18928_p6 }
0x2dca   : > { %p21675_p0 = pneg %p21674_p5 }
0x2dcc   : > { %p21682_p7 = pnand %p21681_p10, %p21675_p0 }
0x2dce   : > { %21685 = shalt.err (!%p21682_p7)
}
0x2dcf   : > { %s25082_s0 = sld [smem:[#allocation102_spill]] }
0x2dd5   : > { %s21686_s22 = scalar_lea.hbm %s25082_s0, 256 }
0x2dd6   : > { %p21687_p4 = scmp.ne.s32.totalorder %s25082_s0, %s21686_s22  ;;  %p21692_p3 = scmp.lt.u32.totalorder %s21686_s22, %s25082_s0 }
0x2dd8   : > { %p21688_p8 = pnand %p21687_p4, %p18928_p6 }
0x2dda   : > { %p21689_p12 = pneg %p21688_p8 }
0x2ddc   : > { %p21694_p2 = pnand %p21692_p3, %p21689_p12 }
0x2dde   : > { %21697 = shalt.err (!%p21694_p2)
}
0x2ddf   : > { %s21809_s20 = smov 128   ;;  %s21810_s26 = smov 8  }
0x2de0   : > { %18849 = dma.vmem_to_hbm [thread:$0]  (%p18928_p6), %s15952_s2, 256, %s25082_s0, [#allocation5], %s21809_s20, %s21809_s20, %s21810_s26  }
0x2de1   : > { %21755 = dma.done.wait (%p18928_p6), [#allocation5], 256  }
0x2de2   : > { %21757 = vsyncadd (%p18928_p6), [#allocation5], 4294967040 }
0x2de3 PF: > { %s25083_s24 = sld [smem:[#allocation49_spill]]  ;;  %s25084_s1 = sld [smem:[#allocation45_spill]] }
0x2de4   : > { %s25085_s22 = sld [smem:[#allocation46_spill]]  ;;  %s25086_s23 = sld [smem:[#allocation50_spill]] }
0x2de9   : > { %p50_p13 = scmp.ge.s32.totalorder %s25083_s24, 8  }
0x2deb   :  { %52 = sbr.rel (!%p50_p13) target bundleno = 35 (0x23), region = 297 }
0x2df2   :  { %15967 = vsyncpa [#allocation4], 1 }
0x2df3   :  { %15969 = vsyncpa [#allocation4 + $0x1], 1 }
0x2df4   :  { %15970 = vsyncpa [#allocation7], 1 }
0x2df5   :  { %15972 = vsyncpa [#allocation7 + $0x1], 1 }
0x2df6   :  { %15973 = vsyncpa [#allocation10], 1 }
0x2df7   :  { %15975 = vsyncpa [#allocation10 + $0x1], 1 }
0x2df8   :  { %15976 = vsyncpa [#allocation13], 1 }
0x2df9   :  { %15978 = vsyncpa [#allocation13 + $0x1], 1 }
0x2dfa   :  { %15979 = vsyncpa [#allocation16], 1 }
0x2dfb   :  { %15981 = vsyncpa [#allocation16 + $0x1], 1 }
0x2dfc   :  { %15982 = vsyncpa [#allocation19], 1 }
0x2dfd   :  { %15984 = vsyncpa [#allocation19 + $0x1], 1 }
0x2dfe   :  { %15985 = vsyncpa [#allocation22], 1 }
0x2dff   :  { %15986 = vsyncpa [#allocation25], 1 }
0x2e00   :  { %15987 = vsyncpa [#allocation28], 1 }
0x2e01   :  { %15988 = vsyncpa [#allocation31], 1 }
0x2e02   :  { %15989 = vsyncpa [#allocation5], 1 }
0x2e03   :  { %15991 = vsyncpa [#allocation5 + $0x1], 1 }

</bundles_post_ra>
